<compile_context>
chip_gen: v5e
topology: v5e:2x2
jax: 0.10.0
libtpu: 0.0.40
codegen_flags: <defaults>
</compile_context>

<pallas_src>
import functools

import jax
import jax.numpy as jnp
from jax.experimental import pallas as pl
from jax.experimental.pallas import tpu as pltpu

DIM_G = 64
WAVE_LEN = 1000.0


def _graphneck_kernel(dim_g, wave_len,
                      geo_c_ref,   # VMEM (N, 8): [cx, cy, 1/w, 1/h, log w, log h, 0, 0]
                      geo_r_ref,   # VMEM (8, N): same quantities, lane-dense rows
                      amp_ref,     # SMEM (dim_g//2,): folded amplitude per (k, g)
                      phs_ref,     # SMEM (dim_g//2,): folded phase per (k, g)
                      wgb_ref,     # SMEM (1,): WG bias
                      x_ref, w1_ref, b1_ref, w2_ref, b2_ref,
                      out_ref):
    f32 = jnp.float32
    bf16 = jnp.bfloat16
    G = dim_g // 8

    geo_c = geo_c_ref[...]          # (N, 8)
    geo_r = geo_r_ref[...]          # (8, N)

    cx_c, cy_c = geo_c[:, 0:1], geo_c[:, 1:2]
    iw_c, ih_c = geo_c[:, 2:3], geo_c[:, 3:4]
    lw_c, lh_c = geo_c[:, 4:5], geo_c[:, 5:6]
    cx_r, cy_r = geo_r[0:1, :], geo_r[1:2, :]
    lw_r, lh_r = geo_r[4:5, :], geo_r[5:6, :]

    # fc[i, j] = WG(embedding[i, j, :]) without materialising the (N, N, dim_g)
    # embedding: per-channel delta computed on demand, sin/cos pair folded to a
    # single A*sin(arg + phi) term, 4 independent partial accumulators.
    fc_parts = []
    for k in range(4):
        if k == 0:
            delta = jnp.log(jnp.maximum(jnp.abs((cx_c - cx_r) * iw_c), 0.001))
        elif k == 1:
            delta = jnp.log(jnp.maximum(jnp.abs((cy_c - cy_r) * ih_c), 0.001))
        elif k == 2:
            delta = lw_c - lw_r
        else:
            delta = lh_c - lh_r
        base = 100.0 * delta
        acc = None
        for g in range(G):
            freq = 1.0 / (wave_len ** (float(g) / float(G)))
            idx = k * G + g
            term = amp_ref[idx] * jnp.sin(base * freq + phs_ref[idx])
            acc = term if acc is None else acc + term
        fc_parts.append(acc)
    fc = (fc_parts[0] + fc_parts[1]) + (fc_parts[2] + fc_parts[3]) + wgb_ref[0]

    # softmax(log(clamp(fc, 1e-6)), axis=1) == clamp(fc, 1e-6) / rowsum(clamp(...))
    adj_un = jnp.maximum(fc, 1e-6)                                   # (N, N) unnormalized
    inv_row = pl.reciprocal(jnp.sum(adj_un, axis=1, keepdims=True),  # (N, 1)
                            approx=True)
    adj_bf = adj_un.astype(bf16)

    # GCN layer 1: relu(adj @ (x @ W1) + b1)   (row-normalization folded in post-matmul)
    support1 = jnp.dot(x_ref[...].astype(bf16), w1_ref[...].astype(bf16),
                       preferred_element_type=f32)
    h1 = jnp.maximum(
        jnp.dot(adj_bf, support1.astype(bf16), preferred_element_type=f32) * inv_row
        + b1_ref[...], 0.0)

    # GCN layer 2: relu(adj @ (h1 @ W2) + b2)
    support2 = jnp.dot(h1.astype(bf16), w2_ref[...].astype(bf16),
                       preferred_element_type=f32)
    out = jnp.maximum(
        jnp.dot(adj_bf, support2.astype(bf16), preferred_element_type=f32) * inv_row
        + b2_ref[...], 0.0)

    out_ref[...] = out.astype(out_ref.dtype)


def graph_neck_forward(in_feature, rois, params, dim_g=DIM_G, wave_len=WAVE_LEN):
    """Glue: flatten features, pack per-roi geometry, fold WG weights, call the kernel."""
    N = in_feature.shape[0]
    x = in_feature.reshape(N, -1).astype(jnp.float32)

    f_g = rois[:, 1:5].astype(jnp.float32)
    x_min, y_min, x_max, y_max = f_g[:, 0], f_g[:, 1], f_g[:, 2], f_g[:, 3]
    cx = (x_min + x_max) * 0.5
    cy = (y_min + y_max) * 0.5
    w = x_max - x_min + 1.0
    h = y_max - y_min + 1.0
    zeros = jnp.zeros_like(cx)
    geo_r = jnp.stack([cx, cy, 1.0 / w, 1.0 / h,
                       jnp.log(w), jnp.log(h), zeros, zeros], axis=0)   # (8, N) lane-dense
    geo_c = geo_r.T                                                     # (N, 8)

    # Fold each sin/cos weight pair: w_s*sin(a) + w_c*cos(a) = A*sin(a + phi).
    wg_w = params["wg_w"].astype(jnp.float32)
    w_sin = wg_w[: dim_g // 2]
    w_cos = wg_w[dim_g // 2:]
    amp = jnp.sqrt(w_sin * w_sin + w_cos * w_cos)
    phs = jnp.arctan2(w_cos, w_sin)

    w1, b1 = params["w1"], params["b1"]
    w2, b2 = params["w2"], params["b2"]
    dim_in, laten_dim = w1.shape
    dim_out = w2.shape[1]

    kernel = functools.partial(_graphneck_kernel, dim_g, wave_len)
    vmem = pl.BlockSpec(memory_space=pltpu.MemorySpace.VMEM)
    smem = pl.BlockSpec(memory_space=pltpu.MemorySpace.SMEM)

    flops = 2 * N * (dim_in * laten_dim + N * laten_dim + laten_dim * dim_out + N * dim_out)
    transcendentals = N * N * (dim_g // 2 + 2) + 2 * N + N   # sins + 2 logs/elem-col + recips
    bytes_accessed = 4 * (x.size + w1.size + b1.size + w2.size + b2.size
                          + geo_r.size + geo_c.size + dim_g + 1 + N * dim_out)

    out = pl.pallas_call(
        kernel,
        out_shape=jax.ShapeDtypeStruct((N, dim_out), jnp.float32),
        in_specs=[vmem, vmem, smem, smem, smem] + [vmem] * 5,
        out_specs=vmem,
        cost_estimate=pl.CostEstimate(flops=int(flops),
                                      transcendentals=int(transcendentals),
                                      bytes_accessed=int(bytes_accessed)),
    )(geo_c, geo_r, amp, phs, params["wg_b"].astype(jnp.float32),
      x, w1, b1, w2, b2)
    return out


def init_params(key, dim_in, laten_dim, dim_out, dim_g):
    """Deterministic parameter init mirroring the PyTorch module's shapes/scales."""
    ks = jax.random.split(key, 6)
    std_wg = 1.0 / (dim_g ** 0.5)
    std1 = 1.0 / (laten_dim ** 0.5)
    std2 = 1.0 / (dim_out ** 0.5)
    return dict(
        wg_w=jax.random.uniform(ks[0], (dim_g,), jnp.float32, -std_wg, std_wg),
        wg_b=jax.random.uniform(ks[1], (1,), jnp.float32, -std_wg, std_wg),
        w1=jax.random.uniform(ks[2], (dim_in, laten_dim), jnp.float32, -std1, std1),
        b1=jax.random.uniform(ks[3], (1, laten_dim), jnp.float32, -std1, std1),
        w2=jax.random.uniform(ks[4], (laten_dim, dim_out), jnp.float32, -std2, std2),
        b2=jax.random.uniform(ks[5], (1, dim_out), jnp.float32, -std2, std2),
    )


def reference_forward(in_feature, rois, params, dim_g=DIM_G, wave_len=WAVE_LEN):
    """Pure-JAX reference reproducing the PyTorch forward semantics (f32)."""
    N = in_feature.shape[0]
    x = in_feature.reshape(N, -1).astype(jnp.float32)
    f_g = rois[:, 1:5].astype(jnp.float32)
    x_min, y_min, x_max, y_max = (f_g[:, 0:1], f_g[:, 1:2], f_g[:, 2:3], f_g[:, 3:4])
    cx = (x_min + x_max) * 0.5
    cy = (y_min + y_max) * 0.5
    w = x_max - x_min + 1.0
    h = y_max - y_min + 1.0
    delta_x = jnp.log(jnp.maximum(jnp.abs((cx - cx.reshape(1, -1)) / w), 0.001))
    delta_y = jnp.log(jnp.maximum(jnp.abs((cy - cy.reshape(1, -1)) / h), 0.001))
    delta_w = jnp.log(w / w.reshape(1, -1))
    delta_h = jnp.log(h / h.reshape(1, -1))
    position_mat = jnp.stack([delta_x, delta_y, delta_w, delta_h], axis=-1)   # (N,N,4)
    G = dim_g // 8
    dim_mat = 1.0 / (wave_len ** (jnp.arange(G, dtype=jnp.float32) / G))
    mul_mat = (100.0 * position_mat)[..., None] * dim_mat.reshape(1, 1, 1, G)
    mul_mat = mul_mat.reshape(N, N, -1)
    emb = jnp.concatenate([jnp.sin(mul_mat), jnp.cos(mul_mat)], axis=-1)      # (N,N,dim_g)
    fc = emb @ params["wg_w"] + params["wg_b"][0]
    adj = jax.nn.softmax(jnp.log(jnp.maximum(fc, 1e-6)), axis=1)
    h1 = jnp.maximum(adj @ (x @ params["w1"]) + params["b1"], 0.0)
    out = jnp.maximum(adj @ (h1 @ params["w2"]) + params["b2"], 0.0)
    return out


if __name__ == "__main__":
    N, dim_in, laten_dim, dim_out, dim_g = 8, 32, 32, 32, DIM_G

    key = jax.random.PRNGKey(0)
    k_feat, k_box, k_params = jax.random.split(key, 3)

    # ROI-pooled feature (N, C, H, W) — flattened to (N, dim_in) in forward.
    in_feature = jax.random.normal(k_feat, (N, 2, 4, 4), jnp.float32)

    kb1, kb2, kb3, kb4 = jax.random.split(k_box, 4)
    x_min = jax.random.uniform(kb1, (N,), jnp.float32, 0.0, 50.0)
    y_min = jax.random.uniform(kb2, (N,), jnp.float32, 0.0, 50.0)
    bw = jax.random.uniform(kb3, (N,), jnp.float32, 5.0, 40.0)
    bh = jax.random.uniform(kb4, (N,), jnp.float32, 5.0, 40.0)
    rois = jnp.stack([jnp.zeros((N,), jnp.float32),
                      x_min, y_min, x_min + bw, y_min + bh], axis=1)  # (N, 5)

    params = init_params(k_params, dim_in, laten_dim, dim_out, dim_g)

    out = graph_neck_forward(in_feature, rois, params)
    out = jax.block_until_ready(out)

    ref = reference_forward(in_feature, rois, params)
    assert out.shape == (N, dim_out)
    assert bool(jnp.all(jnp.isfinite(out)))
    max_err = float(jnp.max(jnp.abs(out - ref)))
    assert max_err < 1e-2, f"max abs err {max_err}"
    print("KERNEL_OK")
</pallas_src>

<mosaic_0001>
module attributes {stable_mosaic.version = 11 : i64} {
  func.func @_graphneck_kernel(%arg0: memref<8x8xf32, #tpu.memory_space<vmem>>, %arg1: memref<8x8xf32, #tpu.memory_space<vmem>>, %arg2: memref<32xf32, #tpu.memory_space<smem>>, %arg3: memref<32xf32, #tpu.memory_space<smem>>, %arg4: memref<1xf32, #tpu.memory_space<smem>>, %arg5: memref<8x32xf32, #tpu.memory_space<vmem>>, %arg6: memref<32x32xf32, #tpu.memory_space<vmem>>, %arg7: memref<1x32xf32, #tpu.memory_space<vmem>>, %arg8: memref<32x32xf32, #tpu.memory_space<vmem>>, %arg9: memref<1x32xf32, #tpu.memory_space<vmem>>, %arg10: memref<8x32xf32, #tpu.memory_space<vmem>>) attributes {dimension_semantics = [], scalar_prefetch = 0 : i64, scratch_operands = 0 : i64, tpu.core_type = #tpu.core_type<tc>} {
    %c0 = arith.constant 0 : index
    %c0_0 = arith.constant 0 : index
    %0 = vector.load %arg0[%c0, %c0_0] : memref<8x8xf32, #tpu.memory_space<vmem>>, vector<8x8xf32>
    %c0_1 = arith.constant 0 : index
    %c0_2 = arith.constant 0 : index
    %1 = vector.load %arg1[%c0_1, %c0_2] : memref<8x8xf32, #tpu.memory_space<vmem>>, vector<8x8xf32>
    %2 = vector.extract_strided_slice %0 {offsets = [0, 0], sizes = [8, 1], strides = [1, 1]} : vector<8x8xf32> to vector<8x1xf32>
    %3 = vector.extract_strided_slice %0 {offsets = [0, 1], sizes = [8, 1], strides = [1, 1]} : vector<8x8xf32> to vector<8x1xf32>
    %4 = vector.extract_strided_slice %0 {offsets = [0, 2], sizes = [8, 1], strides = [1, 1]} : vector<8x8xf32> to vector<8x1xf32>
    %5 = vector.extract_strided_slice %0 {offsets = [0, 3], sizes = [8, 1], strides = [1, 1]} : vector<8x8xf32> to vector<8x1xf32>
    %6 = vector.extract_strided_slice %0 {offsets = [0, 4], sizes = [8, 1], strides = [1, 1]} : vector<8x8xf32> to vector<8x1xf32>
    %7 = vector.extract_strided_slice %0 {offsets = [0, 5], sizes = [8, 1], strides = [1, 1]} : vector<8x8xf32> to vector<8x1xf32>
    %8 = vector.extract_strided_slice %1 {offsets = [0, 0], sizes = [1, 8], strides = [1, 1]} : vector<8x8xf32> to vector<1x8xf32>
    %9 = vector.extract_strided_slice %1 {offsets = [1, 0], sizes = [1, 8], strides = [1, 1]} : vector<8x8xf32> to vector<1x8xf32>
    %10 = vector.extract_strided_slice %1 {offsets = [4, 0], sizes = [1, 8], strides = [1, 1]} : vector<8x8xf32> to vector<1x8xf32>
    %11 = vector.extract_strided_slice %1 {offsets = [5, 0], sizes = [1, 8], strides = [1, 1]} : vector<8x8xf32> to vector<1x8xf32>
    %12 = vector.broadcast %2 : vector<8x1xf32> to vector<8x8xf32>
    %13 = vector.broadcast %8 : vector<1x8xf32> to vector<8x8xf32>
    %14 = arith.subf %12, %13 : vector<8x8xf32>
    %15 = vector.broadcast %4 : vector<8x1xf32> to vector<8x8xf32>
    %16 = arith.mulf %14, %15 : vector<8x8xf32>
    %17 = math.absf %16 : vector<8x8xf32>
    %cst = arith.constant 1.000000e-03 : f32
    %18 = vector.broadcast %cst : f32 to vector<8x8xf32>
    %19 = arith.maximumf %17, %18 : vector<8x8xf32>
    %20 = math.log %19 : vector<8x8xf32>
    %cst_3 = arith.constant 1.000000e+02 : f32
    %21 = vector.broadcast %cst_3 : f32 to vector<8x8xf32>
    %22 = arith.mulf %21, %20 : vector<8x8xf32>
    %c0_4 = arith.constant 0 : index
    %23 = memref.load %arg2[%c0_4] : memref<32xf32, #tpu.memory_space<smem>>
    %cst_5 = arith.constant 1.000000e+00 : f32
    %24 = vector.broadcast %cst_5 : f32 to vector<8x8xf32>
    %25 = arith.mulf %22, %24 : vector<8x8xf32>
    %c0_6 = arith.constant 0 : index
    %26 = memref.load %arg3[%c0_6] : memref<32xf32, #tpu.memory_space<smem>>
    %27 = vector.broadcast %26 : f32 to vector<8x8xf32>
    %28 = arith.addf %25, %27 : vector<8x8xf32>
    %29 = math.sin %28 : vector<8x8xf32>
    %30 = vector.broadcast %23 : f32 to vector<8x8xf32>
    %31 = arith.mulf %30, %29 : vector<8x8xf32>
    %c1 = arith.constant 1 : index
    %32 = memref.load %arg2[%c1] : memref<32xf32, #tpu.memory_space<smem>>
    %cst_7 = arith.constant 0.421696514 : f32
    %33 = vector.broadcast %cst_7 : f32 to vector<8x8xf32>
    %34 = arith.mulf %22, %33 : vector<8x8xf32>
    %c1_8 = arith.constant 1 : index
    %35 = memref.load %arg3[%c1_8] : memref<32xf32, #tpu.memory_space<smem>>
    %36 = vector.broadcast %35 : f32 to vector<8x8xf32>
    %37 = arith.addf %34, %36 : vector<8x8xf32>
    %38 = math.sin %37 : vector<8x8xf32>
    %39 = vector.broadcast %32 : f32 to vector<8x8xf32>
    %40 = arith.mulf %39, %38 : vector<8x8xf32>
    %41 = arith.addf %31, %40 : vector<8x8xf32>
    %c2 = arith.constant 2 : index
    %42 = memref.load %arg2[%c2] : memref<32xf32, #tpu.memory_space<smem>>
    %cst_9 = arith.constant 0.177827939 : f32
    %43 = vector.broadcast %cst_9 : f32 to vector<8x8xf32>
    %44 = arith.mulf %22, %43 : vector<8x8xf32>
    %c2_10 = arith.constant 2 : index
    %45 = memref.load %arg3[%c2_10] : memref<32xf32, #tpu.memory_space<smem>>
    %46 = vector.broadcast %45 : f32 to vector<8x8xf32>
    %47 = arith.addf %44, %46 : vector<8x8xf32>
    %48 = math.sin %47 : vector<8x8xf32>
    %49 = vector.broadcast %42 : f32 to vector<8x8xf32>
    %50 = arith.mulf %49, %48 : vector<8x8xf32>
    %51 = arith.addf %41, %50 : vector<8x8xf32>
    %c3 = arith.constant 3 : index
    %52 = memref.load %arg2[%c3] : memref<32xf32, #tpu.memory_space<smem>>
    %cst_11 = arith.constant 0.0749894232 : f32
    %53 = vector.broadcast %cst_11 : f32 to vector<8x8xf32>
    %54 = arith.mulf %22, %53 : vector<8x8xf32>
    %c3_12 = arith.constant 3 : index
    %55 = memref.load %arg3[%c3_12] : memref<32xf32, #tpu.memory_space<smem>>
    %56 = vector.broadcast %55 : f32 to vector<8x8xf32>
    %57 = arith.addf %54, %56 : vector<8x8xf32>
    %58 = math.sin %57 : vector<8x8xf32>
    %59 = vector.broadcast %52 : f32 to vector<8x8xf32>
    %60 = arith.mulf %59, %58 : vector<8x8xf32>
    %61 = arith.addf %51, %60 : vector<8x8xf32>
    %c4 = arith.constant 4 : index
    %62 = memref.load %arg2[%c4] : memref<32xf32, #tpu.memory_space<smem>>
    %cst_13 = arith.constant 0.0316227749 : f32
    %63 = vector.broadcast %cst_13 : f32 to vector<8x8xf32>
    %64 = arith.mulf %22, %63 : vector<8x8xf32>
    %c4_14 = arith.constant 4 : index
    %65 = memref.load %arg3[%c4_14] : memref<32xf32, #tpu.memory_space<smem>>
    %66 = vector.broadcast %65 : f32 to vector<8x8xf32>
    %67 = arith.addf %64, %66 : vector<8x8xf32>
    %68 = math.sin %67 : vector<8x8xf32>
    %69 = vector.broadcast %62 : f32 to vector<8x8xf32>
    %70 = arith.mulf %69, %68 : vector<8x8xf32>
    %71 = arith.addf %61, %70 : vector<8x8xf32>
    %c5 = arith.constant 5 : index
    %72 = memref.load %arg2[%c5] : memref<32xf32, #tpu.memory_space<smem>>
    %cst_15 = arith.constant 0.013335214 : f32
    %73 = vector.broadcast %cst_15 : f32 to vector<8x8xf32>
    %74 = arith.mulf %22, %73 : vector<8x8xf32>
    %c5_16 = arith.constant 5 : index
    %75 = memref.load %arg3[%c5_16] : memref<32xf32, #tpu.memory_space<smem>>
    %76 = vector.broadcast %75 : f32 to vector<8x8xf32>
    %77 = arith.addf %74, %76 : vector<8x8xf32>
    %78 = math.sin %77 : vector<8x8xf32>
    %79 = vector.broadcast %72 : f32 to vector<8x8xf32>
    %80 = arith.mulf %79, %78 : vector<8x8xf32>
    %81 = arith.addf %71, %80 : vector<8x8xf32>
    %c6 = arith.constant 6 : index
    %82 = memref.load %arg2[%c6] : memref<32xf32, #tpu.memory_space<smem>>
    %cst_17 = arith.constant 0.00562341325 : f32
    %83 = vector.broadcast %cst_17 : f32 to vector<8x8xf32>
    %84 = arith.mulf %22, %83 : vector<8x8xf32>
    %c6_18 = arith.constant 6 : index
    %85 = memref.load %arg3[%c6_18] : memref<32xf32, #tpu.memory_space<smem>>
    %86 = vector.broadcast %85 : f32 to vector<8x8xf32>
    %87 = arith.addf %84, %86 : vector<8x8xf32>
    %88 = math.sin %87 : vector<8x8xf32>
    %89 = vector.broadcast %82 : f32 to vector<8x8xf32>
    %90 = arith.mulf %89, %88 : vector<8x8xf32>
    %91 = arith.addf %81, %90 : vector<8x8xf32>
    %c7 = arith.constant 7 : index
    %92 = memref.load %arg2[%c7] : memref<32xf32, #tpu.memory_space<smem>>
    %cst_19 = arith.constant 0.00237137382 : f32
    %93 = vector.broadcast %cst_19 : f32 to vector<8x8xf32>
    %94 = arith.mulf %22, %93 : vector<8x8xf32>
    %c7_20 = arith.constant 7 : index
    %95 = memref.load %arg3[%c7_20] : memref<32xf32, #tpu.memory_space<smem>>
    %96 = vector.broadcast %95 : f32 to vector<8x8xf32>
    %97 = arith.addf %94, %96 : vector<8x8xf32>
    %98 = math.sin %97 : vector<8x8xf32>
    %99 = vector.broadcast %92 : f32 to vector<8x8xf32>
    %100 = arith.mulf %99, %98 : vector<8x8xf32>
    %101 = arith.addf %91, %100 : vector<8x8xf32>
    %102 = vector.broadcast %3 : vector<8x1xf32> to vector<8x8xf32>
    %103 = vector.broadcast %9 : vector<1x8xf32> to vector<8x8xf32>
    %104 = arith.subf %102, %103 : vector<8x8xf32>
    %105 = vector.broadcast %5 : vector<8x1xf32> to vector<8x8xf32>
    %106 = arith.mulf %104, %105 : vector<8x8xf32>
    %107 = math.absf %106 : vector<8x8xf32>
    %cst_21 = arith.constant 1.000000e-03 : f32
    %108 = vector.broadcast %cst_21 : f32 to vector<8x8xf32>
    %109 = arith.maximumf %107, %108 : vector<8x8xf32>
    %110 = math.log %109 : vector<8x8xf32>
    %cst_22 = arith.constant 1.000000e+02 : f32
    %111 = vector.broadcast %cst_22 : f32 to vector<8x8xf32>
    %112 = arith.mulf %111, %110 : vector<8x8xf32>
    %c8 = arith.constant 8 : index
    %113 = memref.load %arg2[%c8] : memref<32xf32, #tpu.memory_space<smem>>
    %cst_23 = arith.constant 1.000000e+00 : f32
    %114 = vector.broadcast %cst_23 : f32 to vector<8x8xf32>
    %115 = arith.mulf %112, %114 : vector<8x8xf32>
    %c8_24 = arith.constant 8 : index
    %116 = memref.load %arg3[%c8_24] : memref<32xf32, #tpu.memory_space<smem>>
    %117 = vector.broadcast %116 : f32 to vector<8x8xf32>
    %118 = arith.addf %115, %117 : vector<8x8xf32>
    %119 = math.sin %118 : vector<8x8xf32>
    %120 = vector.broadcast %113 : f32 to vector<8x8xf32>
    %121 = arith.mulf %120, %119 : vector<8x8xf32>
    %c9 = arith.constant 9 : index
    %122 = memref.load %arg2[%c9] : memref<32xf32, #tpu.memory_space<smem>>
    %cst_25 = arith.constant 0.421696514 : f32
    %123 = vector.broadcast %cst_25 : f32 to vector<8x8xf32>
    %124 = arith.mulf %112, %123 : vector<8x8xf32>
    %c9_26 = arith.constant 9 : index
    %125 = memref.load %arg3[%c9_26] : memref<32xf32, #tpu.memory_space<smem>>
    %126 = vector.broadcast %125 : f32 to vector<8x8xf32>
    %127 = arith.addf %124, %126 : vector<8x8xf32>
    %128 = math.sin %127 : vector<8x8xf32>
    %129 = vector.broadcast %122 : f32 to vector<8x8xf32>
    %130 = arith.mulf %129, %128 : vector<8x8xf32>
    %131 = arith.addf %121, %130 : vector<8x8xf32>
    %c10 = arith.constant 10 : index
    %132 = memref.load %arg2[%c10] : memref<32xf32, #tpu.memory_space<smem>>
    %cst_27 = arith.constant 0.177827939 : f32
    %133 = vector.broadcast %cst_27 : f32 to vector<8x8xf32>
    %134 = arith.mulf %112, %133 : vector<8x8xf32>
    %c10_28 = arith.constant 10 : index
    %135 = memref.load %arg3[%c10_28] : memref<32xf32, #tpu.memory_space<smem>>
    %136 = vector.broadcast %135 : f32 to vector<8x8xf32>
    %137 = arith.addf %134, %136 : vector<8x8xf32>
    %138 = math.sin %137 : vector<8x8xf32>
    %139 = vector.broadcast %132 : f32 to vector<8x8xf32>
    %140 = arith.mulf %139, %138 : vector<8x8xf32>
    %141 = arith.addf %131, %140 : vector<8x8xf32>
    %c11 = arith.constant 11 : index
    %142 = memref.load %arg2[%c11] : memref<32xf32, #tpu.memory_space<smem>>
    %cst_29 = arith.constant 0.0749894232 : f32
    %143 = vector.broadcast %cst_29 : f32 to vector<8x8xf32>
    %144 = arith.mulf %112, %143 : vector<8x8xf32>
    %c11_30 = arith.constant 11 : index
    %145 = memref.load %arg3[%c11_30] : memref<32xf32, #tpu.memory_space<smem>>
    %146 = vector.broadcast %145 : f32 to vector<8x8xf32>
    %147 = arith.addf %144, %146 : vector<8x8xf32>
    %148 = math.sin %147 : vector<8x8xf32>
    %149 = vector.broadcast %142 : f32 to vector<8x8xf32>
    %150 = arith.mulf %149, %148 : vector<8x8xf32>
    %151 = arith.addf %141, %150 : vector<8x8xf32>
    %c12 = arith.constant 12 : index
    %152 = memref.load %arg2[%c12] : memref<32xf32, #tpu.memory_space<smem>>
    %cst_31 = arith.constant 0.0316227749 : f32
    %153 = vector.broadcast %cst_31 : f32 to vector<8x8xf32>
    %154 = arith.mulf %112, %153 : vector<8x8xf32>
    %c12_32 = arith.constant 12 : index
    %155 = memref.load %arg3[%c12_32] : memref<32xf32, #tpu.memory_space<smem>>
    %156 = vector.broadcast %155 : f32 to vector<8x8xf32>
    %157 = arith.addf %154, %156 : vector<8x8xf32>
    %158 = math.sin %157 : vector<8x8xf32>
    %159 = vector.broadcast %152 : f32 to vector<8x8xf32>
    %160 = arith.mulf %159, %158 : vector<8x8xf32>
    %161 = arith.addf %151, %160 : vector<8x8xf32>
    %c13 = arith.constant 13 : index
    %162 = memref.load %arg2[%c13] : memref<32xf32, #tpu.memory_space<smem>>
    %cst_33 = arith.constant 0.013335214 : f32
    %163 = vector.broadcast %cst_33 : f32 to vector<8x8xf32>
    %164 = arith.mulf %112, %163 : vector<8x8xf32>
    %c13_34 = arith.constant 13 : index
    %165 = memref.load %arg3[%c13_34] : memref<32xf32, #tpu.memory_space<smem>>
    %166 = vector.broadcast %165 : f32 to vector<8x8xf32>
    %167 = arith.addf %164, %166 : vector<8x8xf32>
    %168 = math.sin %167 : vector<8x8xf32>
    %169 = vector.broadcast %162 : f32 to vector<8x8xf32>
    %170 = arith.mulf %169, %168 : vector<8x8xf32>
    %171 = arith.addf %161, %170 : vector<8x8xf32>
    %c14 = arith.constant 14 : index
    %172 = memref.load %arg2[%c14] : memref<32xf32, #tpu.memory_space<smem>>
    %cst_35 = arith.constant 0.00562341325 : f32
    %173 = vector.broadcast %cst_35 : f32 to vector<8x8xf32>
    %174 = arith.mulf %112, %173 : vector<8x8xf32>
    %c14_36 = arith.constant 14 : index
    %175 = memref.load %arg3[%c14_36] : memref<32xf32, #tpu.memory_space<smem>>
    %176 = vector.broadcast %175 : f32 to vector<8x8xf32>
    %177 = arith.addf %174, %176 : vector<8x8xf32>
    %178 = math.sin %177 : vector<8x8xf32>
    %179 = vector.broadcast %172 : f32 to vector<8x8xf32>
    %180 = arith.mulf %179, %178 : vector<8x8xf32>
    %181 = arith.addf %171, %180 : vector<8x8xf32>
    %c15 = arith.constant 15 : index
    %182 = memref.load %arg2[%c15] : memref<32xf32, #tpu.memory_space<smem>>
    %cst_37 = arith.constant 0.00237137382 : f32
    %183 = vector.broadcast %cst_37 : f32 to vector<8x8xf32>
    %184 = arith.mulf %112, %183 : vector<8x8xf32>
    %c15_38 = arith.constant 15 : index
    %185 = memref.load %arg3[%c15_38] : memref<32xf32, #tpu.memory_space<smem>>
    %186 = vector.broadcast %185 : f32 to vector<8x8xf32>
    %187 = arith.addf %184, %186 : vector<8x8xf32>
    %188 = math.sin %187 : vector<8x8xf32>
    %189 = vector.broadcast %182 : f32 to vector<8x8xf32>
    %190 = arith.mulf %189, %188 : vector<8x8xf32>
    %191 = arith.addf %181, %190 : vector<8x8xf32>
    %192 = vector.broadcast %6 : vector<8x1xf32> to vector<8x8xf32>
    %193 = vector.broadcast %10 : vector<1x8xf32> to vector<8x8xf32>
    %194 = arith.subf %192, %193 : vector<8x8xf32>
    %cst_39 = arith.constant 1.000000e+02 : f32
    %195 = vector.broadcast %cst_39 : f32 to vector<8x8xf32>
    %196 = arith.mulf %195, %194 : vector<8x8xf32>
    %c16 = arith.constant 16 : index
    %197 = memref.load %arg2[%c16] : memref<32xf32, #tpu.memory_space<smem>>
    %cst_40 = arith.constant 1.000000e+00 : f32
    %198 = vector.broadcast %cst_40 : f32 to vector<8x8xf32>
    %199 = arith.mulf %196, %198 : vector<8x8xf32>
    %c16_41 = arith.constant 16 : index
    %200 = memref.load %arg3[%c16_41] : memref<32xf32, #tpu.memory_space<smem>>
    %201 = vector.broadcast %200 : f32 to vector<8x8xf32>
    %202 = arith.addf %199, %201 : vector<8x8xf32>
    %203 = math.sin %202 : vector<8x8xf32>
    %204 = vector.broadcast %197 : f32 to vector<8x8xf32>
    %205 = arith.mulf %204, %203 : vector<8x8xf32>
    %c17 = arith.constant 17 : index
    %206 = memref.load %arg2[%c17] : memref<32xf32, #tpu.memory_space<smem>>
    %cst_42 = arith.constant 0.421696514 : f32
    %207 = vector.broadcast %cst_42 : f32 to vector<8x8xf32>
    %208 = arith.mulf %196, %207 : vector<8x8xf32>
    %c17_43 = arith.constant 17 : index
    %209 = memref.load %arg3[%c17_43] : memref<32xf32, #tpu.memory_space<smem>>
    %210 = vector.broadcast %209 : f32 to vector<8x8xf32>
    %211 = arith.addf %208, %210 : vector<8x8xf32>
    %212 = math.sin %211 : vector<8x8xf32>
    %213 = vector.broadcast %206 : f32 to vector<8x8xf32>
    %214 = arith.mulf %213, %212 : vector<8x8xf32>
    %215 = arith.addf %205, %214 : vector<8x8xf32>
    %c18 = arith.constant 18 : index
    %216 = memref.load %arg2[%c18] : memref<32xf32, #tpu.memory_space<smem>>
    %cst_44 = arith.constant 0.177827939 : f32
    %217 = vector.broadcast %cst_44 : f32 to vector<8x8xf32>
    %218 = arith.mulf %196, %217 : vector<8x8xf32>
    %c18_45 = arith.constant 18 : index
    %219 = memref.load %arg3[%c18_45] : memref<32xf32, #tpu.memory_space<smem>>
    %220 = vector.broadcast %219 : f32 to vector<8x8xf32>
    %221 = arith.addf %218, %220 : vector<8x8xf32>
    %222 = math.sin %221 : vector<8x8xf32>
    %223 = vector.broadcast %216 : f32 to vector<8x8xf32>
    %224 = arith.mulf %223, %222 : vector<8x8xf32>
    %225 = arith.addf %215, %224 : vector<8x8xf32>
    %c19 = arith.constant 19 : index
    %226 = memref.load %arg2[%c19] : memref<32xf32, #tpu.memory_space<smem>>
    %cst_46 = arith.constant 0.0749894232 : f32
    %227 = vector.broadcast %cst_46 : f32 to vector<8x8xf32>
    %228 = arith.mulf %196, %227 : vector<8x8xf32>
    %c19_47 = arith.constant 19 : index
    %229 = memref.load %arg3[%c19_47] : memref<32xf32, #tpu.memory_space<smem>>
    %230 = vector.broadcast %229 : f32 to vector<8x8xf32>
    %231 = arith.addf %228, %230 : vector<8x8xf32>
    %232 = math.sin %231 : vector<8x8xf32>
    %233 = vector.broadcast %226 : f32 to vector<8x8xf32>
    %234 = arith.mulf %233, %232 : vector<8x8xf32>
    %235 = arith.addf %225, %234 : vector<8x8xf32>
    %c20 = arith.constant 20 : index
    %236 = memref.load %arg2[%c20] : memref<32xf32, #tpu.memory_space<smem>>
    %cst_48 = arith.constant 0.0316227749 : f32
    %237 = vector.broadcast %cst_48 : f32 to vector<8x8xf32>
    %238 = arith.mulf %196, %237 : vector<8x8xf32>
    %c20_49 = arith.constant 20 : index
    %239 = memref.load %arg3[%c20_49] : memref<32xf32, #tpu.memory_space<smem>>
    %240 = vector.broadcast %239 : f32 to vector<8x8xf32>
    %241 = arith.addf %238, %240 : vector<8x8xf32>
    %242 = math.sin %241 : vector<8x8xf32>
    %243 = vector.broadcast %236 : f32 to vector<8x8xf32>
    %244 = arith.mulf %243, %242 : vector<8x8xf32>
    %245 = arith.addf %235, %244 : vector<8x8xf32>
    %c21 = arith.constant 21 : index
    %246 = memref.load %arg2[%c21] : memref<32xf32, #tpu.memory_space<smem>>
    %cst_50 = arith.constant 0.013335214 : f32
    %247 = vector.broadcast %cst_50 : f32 to vector<8x8xf32>
    %248 = arith.mulf %196, %247 : vector<8x8xf32>
    %c21_51 = arith.constant 21 : index
    %249 = memref.load %arg3[%c21_51] : memref<32xf32, #tpu.memory_space<smem>>
    %250 = vector.broadcast %249 : f32 to vector<8x8xf32>
    %251 = arith.addf %248, %250 : vector<8x8xf32>
    %252 = math.sin %251 : vector<8x8xf32>
    %253 = vector.broadcast %246 : f32 to vector<8x8xf32>
    %254 = arith.mulf %253, %252 : vector<8x8xf32>
    %255 = arith.addf %245, %254 : vector<8x8xf32>
    %c22 = arith.constant 22 : index
    %256 = memref.load %arg2[%c22] : memref<32xf32, #tpu.memory_space<smem>>
    %cst_52 = arith.constant 0.00562341325 : f32
    %257 = vector.broadcast %cst_52 : f32 to vector<8x8xf32>
    %258 = arith.mulf %196, %257 : vector<8x8xf32>
    %c22_53 = arith.constant 22 : index
    %259 = memref.load %arg3[%c22_53] : memref<32xf32, #tpu.memory_space<smem>>
    %260 = vector.broadcast %259 : f32 to vector<8x8xf32>
    %261 = arith.addf %258, %260 : vector<8x8xf32>
    %262 = math.sin %261 : vector<8x8xf32>
    %263 = vector.broadcast %256 : f32 to vector<8x8xf32>
    %264 = arith.mulf %263, %262 : vector<8x8xf32>
    %265 = arith.addf %255, %264 : vector<8x8xf32>
    %c23 = arith.constant 23 : index
    %266 = memref.load %arg2[%c23] : memref<32xf32, #tpu.memory_space<smem>>
    %cst_54 = arith.constant 0.00237137382 : f32
    %267 = vector.broadcast %cst_54 : f32 to vector<8x8xf32>
    %268 = arith.mulf %196, %267 : vector<8x8xf32>
    %c23_55 = arith.constant 23 : index
    %269 = memref.load %arg3[%c23_55] : memref<32xf32, #tpu.memory_space<smem>>
    %270 = vector.broadcast %269 : f32 to vector<8x8xf32>
    %271 = arith.addf %268, %270 : vector<8x8xf32>
    %272 = math.sin %271 : vector<8x8xf32>
    %273 = vector.broadcast %266 : f32 to vector<8x8xf32>
    %274 = arith.mulf %273, %272 : vector<8x8xf32>
    %275 = arith.addf %265, %274 : vector<8x8xf32>
    %276 = vector.broadcast %7 : vector<8x1xf32> to vector<8x8xf32>
    %277 = vector.broadcast %11 : vector<1x8xf32> to vector<8x8xf32>
    %278 = arith.subf %276, %277 : vector<8x8xf32>
    %cst_56 = arith.constant 1.000000e+02 : f32
    %279 = vector.broadcast %cst_56 : f32 to vector<8x8xf32>
    %280 = arith.mulf %279, %278 : vector<8x8xf32>
    %c24 = arith.constant 24 : index
    %281 = memref.load %arg2[%c24] : memref<32xf32, #tpu.memory_space<smem>>
    %cst_57 = arith.constant 1.000000e+00 : f32
    %282 = vector.broadcast %cst_57 : f32 to vector<8x8xf32>
    %283 = arith.mulf %280, %282 : vector<8x8xf32>
    %c24_58 = arith.constant 24 : index
    %284 = memref.load %arg3[%c24_58] : memref<32xf32, #tpu.memory_space<smem>>
    %285 = vector.broadcast %284 : f32 to vector<8x8xf32>
    %286 = arith.addf %283, %285 : vector<8x8xf32>
    %287 = math.sin %286 : vector<8x8xf32>
    %288 = vector.broadcast %281 : f32 to vector<8x8xf32>
    %289 = arith.mulf %288, %287 : vector<8x8xf32>
    %c25 = arith.constant 25 : index
    %290 = memref.load %arg2[%c25] : memref<32xf32, #tpu.memory_space<smem>>
    %cst_59 = arith.constant 0.421696514 : f32
    %291 = vector.broadcast %cst_59 : f32 to vector<8x8xf32>
    %292 = arith.mulf %280, %291 : vector<8x8xf32>
    %c25_60 = arith.constant 25 : index
    %293 = memref.load %arg3[%c25_60] : memref<32xf32, #tpu.memory_space<smem>>
    %294 = vector.broadcast %293 : f32 to vector<8x8xf32>
    %295 = arith.addf %292, %294 : vector<8x8xf32>
    %296 = math.sin %295 : vector<8x8xf32>
    %297 = vector.broadcast %290 : f32 to vector<8x8xf32>
    %298 = arith.mulf %297, %296 : vector<8x8xf32>
    %299 = arith.addf %289, %298 : vector<8x8xf32>
    %c26 = arith.constant 26 : index
    %300 = memref.load %arg2[%c26] : memref<32xf32, #tpu.memory_space<smem>>
    %cst_61 = arith.constant 0.177827939 : f32
    %301 = vector.broadcast %cst_61 : f32 to vector<8x8xf32>
    %302 = arith.mulf %280, %301 : vector<8x8xf32>
    %c26_62 = arith.constant 26 : index
    %303 = memref.load %arg3[%c26_62] : memref<32xf32, #tpu.memory_space<smem>>
    %304 = vector.broadcast %303 : f32 to vector<8x8xf32>
    %305 = arith.addf %302, %304 : vector<8x8xf32>
    %306 = math.sin %305 : vector<8x8xf32>
    %307 = vector.broadcast %300 : f32 to vector<8x8xf32>
    %308 = arith.mulf %307, %306 : vector<8x8xf32>
    %309 = arith.addf %299, %308 : vector<8x8xf32>
    %c27 = arith.constant 27 : index
    %310 = memref.load %arg2[%c27] : memref<32xf32, #tpu.memory_space<smem>>
    %cst_63 = arith.constant 0.0749894232 : f32
    %311 = vector.broadcast %cst_63 : f32 to vector<8x8xf32>
    %312 = arith.mulf %280, %311 : vector<8x8xf32>
    %c27_64 = arith.constant 27 : index
    %313 = memref.load %arg3[%c27_64] : memref<32xf32, #tpu.memory_space<smem>>
    %314 = vector.broadcast %313 : f32 to vector<8x8xf32>
    %315 = arith.addf %312, %314 : vector<8x8xf32>
    %316 = math.sin %315 : vector<8x8xf32>
    %317 = vector.broadcast %310 : f32 to vector<8x8xf32>
    %318 = arith.mulf %317, %316 : vector<8x8xf32>
    %319 = arith.addf %309, %318 : vector<8x8xf32>
    %c28 = arith.constant 28 : index
    %320 = memref.load %arg2[%c28] : memref<32xf32, #tpu.memory_space<smem>>
    %cst_65 = arith.constant 0.0316227749 : f32
    %321 = vector.broadcast %cst_65 : f32 to vector<8x8xf32>
    %322 = arith.mulf %280, %321 : vector<8x8xf32>
    %c28_66 = arith.constant 28 : index
    %323 = memref.load %arg3[%c28_66] : memref<32xf32, #tpu.memory_space<smem>>
    %324 = vector.broadcast %323 : f32 to vector<8x8xf32>
    %325 = arith.addf %322, %324 : vector<8x8xf32>
    %326 = math.sin %325 : vector<8x8xf32>
    %327 = vector.broadcast %320 : f32 to vector<8x8xf32>
    %328 = arith.mulf %327, %326 : vector<8x8xf32>
    %329 = arith.addf %319, %328 : vector<8x8xf32>
    %c29 = arith.constant 29 : index
    %330 = memref.load %arg2[%c29] : memref<32xf32, #tpu.memory_space<smem>>
    %cst_67 = arith.constant 0.013335214 : f32
    %331 = vector.broadcast %cst_67 : f32 to vector<8x8xf32>
    %332 = arith.mulf %280, %331 : vector<8x8xf32>
    %c29_68 = arith.constant 29 : index
    %333 = memref.load %arg3[%c29_68] : memref<32xf32, #tpu.memory_space<smem>>
    %334 = vector.broadcast %333 : f32 to vector<8x8xf32>
    %335 = arith.addf %332, %334 : vector<8x8xf32>
    %336 = math.sin %335 : vector<8x8xf32>
    %337 = vector.broadcast %330 : f32 to vector<8x8xf32>
    %338 = arith.mulf %337, %336 : vector<8x8xf32>
    %339 = arith.addf %329, %338 : vector<8x8xf32>
    %c30 = arith.constant 30 : index
    %340 = memref.load %arg2[%c30] : memref<32xf32, #tpu.memory_space<smem>>
    %cst_69 = arith.constant 0.00562341325 : f32
    %341 = vector.broadcast %cst_69 : f32 to vector<8x8xf32>
    %342 = arith.mulf %280, %341 : vector<8x8xf32>
    %c30_70 = arith.constant 30 : index
    %343 = memref.load %arg3[%c30_70] : memref<32xf32, #tpu.memory_space<smem>>
    %344 = vector.broadcast %343 : f32 to vector<8x8xf32>
    %345 = arith.addf %342, %344 : vector<8x8xf32>
    %346 = math.sin %345 : vector<8x8xf32>
    %347 = vector.broadcast %340 : f32 to vector<8x8xf32>
    %348 = arith.mulf %347, %346 : vector<8x8xf32>
    %349 = arith.addf %339, %348 : vector<8x8xf32>
    %c31 = arith.constant 31 : index
    %350 = memref.load %arg2[%c31] : memref<32xf32, #tpu.memory_space<smem>>
    %cst_71 = arith.constant 0.00237137382 : f32
    %351 = vector.broadcast %cst_71 : f32 to vector<8x8xf32>
    %352 = arith.mulf %280, %351 : vector<8x8xf32>
    %c31_72 = arith.constant 31 : index
    %353 = memref.load %arg3[%c31_72] : memref<32xf32, #tpu.memory_space<smem>>
    %354 = vector.broadcast %353 : f32 to vector<8x8xf32>
    %355 = arith.addf %352, %354 : vector<8x8xf32>
    %356 = math.sin %355 : vector<8x8xf32>
    %357 = vector.broadcast %350 : f32 to vector<8x8xf32>
    %358 = arith.mulf %357, %356 : vector<8x8xf32>
    %359 = arith.addf %349, %358 : vector<8x8xf32>
    %360 = arith.addf %101, %191 : vector<8x8xf32>
    %361 = arith.addf %275, %359 : vector<8x8xf32>
    %362 = arith.addf %360, %361 : vector<8x8xf32>
    %c0_73 = arith.constant 0 : index
    %363 = memref.load %arg4[%c0_73] : memref<1xf32, #tpu.memory_space<smem>>
    %364 = vector.broadcast %363 : f32 to vector<8x8xf32>
    %365 = arith.addf %362, %364 : vector<8x8xf32>
    %cst_74 = arith.constant 9.99999997E-7 : f32
    %366 = vector.broadcast %cst_74 : f32 to vector<8x8xf32>
    %367 = arith.maximumf %365, %366 : vector<8x8xf32>
    %cst_75 = arith.constant dense<0.000000e+00> : vector<8xf32>
    %368 = vector.multi_reduction <add>, %367, %cst_75 [1] : vector<8x8xf32> to vector<8xf32>
    %369 = vector.shape_cast %368 : vector<8xf32> to vector<8x1xf32>
    %370 = tpu.reciprocal %369 {approx = true} : vector<8x1xf32> -> vector<8x1xf32>
    %371 = arith.truncf %367 : vector<8x8xf32> to vector<8x8xbf16>
    %c0_76 = arith.constant 0 : index
    %c0_77 = arith.constant 0 : index
    %372 = vector.load %arg5[%c0_76, %c0_77] : memref<8x32xf32, #tpu.memory_space<vmem>>, vector<8x32xf32>
    %373 = arith.truncf %372 : vector<8x32xf32> to vector<8x32xbf16>
    %c0_78 = arith.constant 0 : index
    %c0_79 = arith.constant 0 : index
    %374 = vector.load %arg6[%c0_78, %c0_79] : memref<32x32xf32, #tpu.memory_space<vmem>>, vector<32x32xf32>
    %375 = arith.truncf %374 : vector<32x32xf32> to vector<32x32xbf16>
    %cst_80 = arith.constant dense<0.000000e+00> : vector<8x32xf32>
    %376 = tpu.matmul %373, %375, %cst_80 {dimension_numbers = #tpu.dot_dimension_numbers<[1], [0], [0], [1], [0, 0, 1, 1], [], []>} : vector<8x32xbf16>, vector<32x32xbf16>, vector<8x32xf32> -> vector<8x32xf32>
    %377 = arith.truncf %376 : vector<8x32xf32> to vector<8x32xbf16>
    %cst_81 = arith.constant dense<0.000000e+00> : vector<8x32xf32>
    %378 = tpu.matmul %371, %377, %cst_81 {dimension_numbers = #tpu.dot_dimension_numbers<[1], [0], [0], [1], [0, 0, 1, 1], [], []>} : vector<8x8xbf16>, vector<8x32xbf16>, vector<8x32xf32> -> vector<8x32xf32>
    %379 = vector.broadcast %370 : vector<8x1xf32> to vector<8x32xf32>
    %380 = arith.mulf %378, %379 : vector<8x32xf32>
    %c0_82 = arith.constant 0 : index
    %c0_83 = arith.constant 0 : index
    %381 = vector.load %arg7[%c0_82, %c0_83] : memref<1x32xf32, #tpu.memory_space<vmem>>, vector<1x32xf32>
    %382 = vector.broadcast %381 : vector<1x32xf32> to vector<8x32xf32>
    %383 = arith.addf %380, %382 : vector<8x32xf32>
    %cst_84 = arith.constant 0.000000e+00 : f32
    %384 = vector.broadcast %cst_84 : f32 to vector<8x32xf32>
    %385 = arith.maximumf %383, %384 : vector<8x32xf32>
    %386 = arith.truncf %385 : vector<8x32xf32> to vector<8x32xbf16>
    %c0_85 = arith.constant 0 : index
    %c0_86 = arith.constant 0 : index
    %387 = vector.load %arg8[%c0_85, %c0_86] : memref<32x32xf32, #tpu.memory_space<vmem>>, vector<32x32xf32>
    %388 = arith.truncf %387 : vector<32x32xf32> to vector<32x32xbf16>
    %cst_87 = arith.constant dense<0.000000e+00> : vector<8x32xf32>
    %389 = tpu.matmul %386, %388, %cst_87 {dimension_numbers = #tpu.dot_dimension_numbers<[1], [0], [0], [1], [0, 0, 1, 1], [], []>} : vector<8x32xbf16>, vector<32x32xbf16>, vector<8x32xf32> -> vector<8x32xf32>
    %390 = arith.truncf %389 : vector<8x32xf32> to vector<8x32xbf16>
    %cst_88 = arith.constant dense<0.000000e+00> : vector<8x32xf32>
    %391 = tpu.matmul %371, %390, %cst_88 {dimension_numbers = #tpu.dot_dimension_numbers<[1], [0], [0], [1], [0, 0, 1, 1], [], []>} : vector<8x8xbf16>, vector<8x32xbf16>, vector<8x32xf32> -> vector<8x32xf32>
    %392 = vector.broadcast %370 : vector<8x1xf32> to vector<8x32xf32>
    %393 = arith.mulf %391, %392 : vector<8x32xf32>
    %c0_89 = arith.constant 0 : index
    %c0_90 = arith.constant 0 : index
    %394 = vector.load %arg9[%c0_89, %c0_90] : memref<1x32xf32, #tpu.memory_space<vmem>>, vector<1x32xf32>
    %395 = vector.broadcast %394 : vector<1x32xf32> to vector<8x32xf32>
    %396 = arith.addf %393, %395 : vector<8x32xf32>
    %cst_91 = arith.constant 0.000000e+00 : f32
    %397 = vector.broadcast %cst_91 : f32 to vector<8x32xf32>
    %398 = arith.maximumf %396, %397 : vector<8x32xf32>
    %c0_92 = arith.constant 0 : index
    %c0_93 = arith.constant 0 : index
    %399 = vector.load %arg10[%c0_92, %c0_93] : memref<8x32xf32, #tpu.memory_space<vmem>>, vector<8x32xf32>
    tpu.vector_store %arg10[%c0_92, %c0_93], %398 {strides = array<i32>} : memref<8x32xf32, #tpu.memory_space<vmem>>, vector<8x32xf32>,
    return
  }
}

</mosaic_0001>

<bundles_post_ra>
// kernel: tpu_custom_call.1
= control target key start
LH: loop header
LB: loop body
LE: loop exit
PB: predicated region body
PF: predicated region fallthrough
CT: control target
= control target key end

     0   :  { %16 = vsyncpa [#allocation4], 0  ;;  %s12386_s0 = inlined_call_operand.hbm [shape: f32[8,8], index: 0, kind: input, shape index: {}]   ;;  %s12387_s1 = inlined_call_operand.hbm [shape: f32[8,8], index: 1, kind: input, shape index: {}]   ;;  %s12388_s2 = inlined_call_operand.vmem [shape: f32[32], index: 2, kind: input, shape index: {}]   ;;  %s12389_s3 = inlined_call_operand.vmem [shape: f32[32], index: 3, kind: input, shape index: {}]   ;;  %s12390_s4 = inlined_call_operand.<no memory space> [shape: f32[1], index: 4, kind: input, shape index: {}]   ;;  %s12391_s5 = inlined_call_operand.hbm [shape: f32[8,32], index: 5, kind: input, shape index: {}]   ;;  %s12392_s6 = inlined_call_operand.hbm [shape: f32[32,32], index: 6, kind: input, shape index: {}]   ;;  %s12393_s7 = inlined_call_operand.vmem [shape: f32[1,32], index: 7, kind: input, shape index: {}]   ;;  %s12394_s8 = inlined_call_operand.hbm [shape: f32[32,32], index: 8, kind: input, shape index: {}]   ;;  %s12395_s9 = inlined_call_operand.vmem [shape: f32[1,32], index: 9, kind: input, shape index: {}]   ;;  %s12396_s10 = inlined_call_operand.hbm [shape: f32[8,32], index: 10, kind: output, shape index: {}]  }
   0x1   :  { %17 = vsyncpa [#allocation8], 0 }
   0x2   :  { %18 = vsyncpa [#allocation6], 0 }
   0x3   :  { %19 = vsyncpa [#allocation11], 0 }
   0x4   :  { %20 = vsyncpa [#allocation14], 0  ;;  %s38_s15 = sshll.u32 %s12387_s1, 4  ;;  %s39_s15 = int_to_ptr.hbm [resolvable:$true] %s38_s15 }
   0x5   :  { %21 = vsyncpa [#allocation5], 0  ;;  %s5910_s16 = smov [#allocation7]   ;;  %s79_s20 = sshll.u32 %s12392_s6, 4  ;;  %s80_s20 = int_to_ptr.hbm [resolvable:$true] %s79_s20 }
   0x6   :  { %s40_s17 = sshll.u32 %s5910_s16, 4  ;;  %s5911_s21 = smov [#allocation13]   ;;  %s41_s17 = int_to_ptr.vmem [resolvable:$true] %s40_s17 }
   0x7   :  { %43 = dma.hbm_to_vmem [thread:$0]  %s39_s15, 128, %s41_s17, [#allocation8]  }
   0x8   :  { %s81_s22 = sshll.u32 %s5911_s21, 4  ;;  %s5912_s23 = smov 128   ;;  %s82_s22 = int_to_ptr.vmem [resolvable:$true] %s81_s22 }
   0x9   :  { %s5913_s24 = smov 8   ;;  %s27_s26 = sshll.u32 %s12386_s0, 4  ;;  %s28_s26 = int_to_ptr.hbm [resolvable:$true] %s27_s26 }
   0xa   :  { %87 = dma.hbm_to_vmem [thread:$0]  %s80_s20, 512, %s82_s22, [#allocation14], %s5912_s23, %s5912_s23, %s5913_s24  }
   0xb   :  { %s5914_s27 = smov [#allocation3]   ;;  %s49_s30 = sshll.u32 %s12388_s2, 4  ;;  %s50_s30 = int_to_ptr.vmem [resolvable:$true] %s49_s30 }
   0xc   :  { %s29_s28 = sshll.u32 %s5914_s27, 4  ;;  %s5915_s11 = smov [#allocation9]   ;;  %s30_s28 = int_to_ptr.vmem [resolvable:$true] %s29_s28 }
   0xd   :  { %32 = dma.hbm_to_vmem [thread:$0]  %s28_s26, 128, %s30_s28, [#allocation4]  }
   0xe   :  { %52 = dma.vmem_to_smem %s50_s30, 16, %s5915_s11, [#allocation6]  }
   0xf   :  { %s58_s14 = sshll.u32 %s12389_s3, 4  ;;  %s69_s0 = sshll.u32 %s12391_s5, 4  ;;  %s59_s14 = int_to_ptr.vmem [resolvable:$true] %s58_s14  ;;  %s70_s0 = int_to_ptr.hbm [resolvable:$true] %s69_s0 }
  0x10   :  { %s5916_s17 = smov [#allocation10]   ;;  %s5917_s18 = smov [#allocation12]  }
  0x11   :  { %61 = dma.vmem_to_smem %s59_s14, 16, %s5916_s17, [#allocation11]  }
  0x12   :  { %s71_s19 = sshll.u32 %s5917_s18, 4  ;;  %s94_s21 = sshll.u32 %s12394_s8, 4  ;;  %s72_s19 = int_to_ptr.vmem [resolvable:$true] %s71_s19  ;;  %s95_s21 = int_to_ptr.hbm [resolvable:$true] %s94_s21 }
  0x13   :  { %74 = dma.hbm_to_vmem [thread:$0]  %s70_s0, 128, %s72_s19, [#allocation8]  }
  0x14   :  { %s5918_s22 = smov [#allocation15]  }
  0x15   :  { %s96_s1 = sshll.u32 %s5918_s22, 4  ;;  %s97_s1 = int_to_ptr.vmem [resolvable:$true] %s96_s1 }
  0x16   :  { %102 = dma.hbm_to_vmem [thread:$0]  %s95_s21, 512, %s97_s1, [#allocation14], %s5912_s23, %s5912_s23, %s5913_s24  }
  0x17   :  { %5896 = dma.done.wait [#allocation4], 128  }
  0x18   :  { %5897 = vsyncadd [#allocation4], 4294967168 }
  0x19   :  { %5898 = dma.done.wait [#allocation8], 128  }
  0x1a   :  { %5899 = vsyncadd [#allocation8], 4294967168 }
  0x1b   :  { %5900 = dma.done.wait [#allocation6], 16  }
  0x1c   :  { %5901 = vsyncadd [#allocation6], 4294967280 }
  0x1d   :  { %5902 = dma.done.wait [#allocation11], 16  }
  0x1e   :  { %5903 = vsyncadd [#allocation11], 4294967280 }
  0x1f   :  { %5904 = dma.done.wait [#allocation8], 128  }
  0x20   :  { %5905 = vsyncadd [#allocation8], 4294967168 }
  0x21   :  { %5906 = dma.done.wait [#allocation14], 1024  }
  0x22   :  { %5907 = vsyncadd [#allocation14], 4294966272 }
  0x23   :  { %133 = sfence }
  0x24   :  { %v135_v0 = vld [vmem:[#allocation3] sm:$0xff]  ;;  %v5919_v1 = vmov 4   ;;  %v12413_v2 = vmov 0   ;;  %v5921_v3 = vmov 2   ;;  %v5922_v4 = vmov 5   ;;  %v136_v7 = vld [vmem:[#allocation7] sm:$0xff] }
  0x25   :  { %5715 = vset.pattern.permute.xlu2 %v5919_v1  ;;  %5711 = vset.pattern.permute.xlu0 %v12413_v2  ;;  %v5923_v5 = vmov 1   ;;  %v5924_v6 = vmov 3   ;;  %v142_v8 = vperm.slane %v136_v7, 0  ;;  %s155_s3 = sld [smem:[#allocation10]]  ;;  %v12408_v30 = vmov 920167782  }
  0x26   :  { %2775 = vperm.xlu2 %5715, %v135_v0   ;;  %139 = vperm.xlu0 %5711, %v135_v0   ;;  %s5531_s5 = sld [smem:[#allocation10 + $0x1]]  ;;  %v12406_v32 = vmov 1326507024   ;;  %v12404_v36 = vmov 2102212464  }
  0x27   :  { %5713 = vset.pattern.permute.xlu1 %v5921_v3  ;;  %v12402_v39 = vmov 2475754826   ;;  %v12400_v41 = vmov 2131351028   ;;  %v12418_v46 = vmov 683565275  }
  0x28   :  { %145 = vperm.xlu1 %5713, %v135_v0   ;;  %s6104_s8 = sld [smem:[#allocation10 + $0x2]] }
  0x29   :  { %s5541_s23 = sld [smem:[#allocation10 + $0x3]] }
  0x2a   :  { %s5546_s24 = sld [smem:[#allocation10 + $0x4]] }
  0x2b   :  { %v156_v18 = vstv %s155_s3  ;;  %s6513_s25 = sld [smem:[#allocation10 + $0x5]] }
  0x2c   :  { %v318_v27 = vstv %s5531_s5  ;;  %s6572_s26 = sld [smem:[#allocation10 + $0x6]] }
  0x2d   :  { %s6657_s27 = sld [smem:[#allocation9]] }
  0x2e   :  { %5716 = vset.pattern.permute.xlu2 %v5922_v4  ;;  %5712 = vset.pattern.permute.xlu0 %v5923_v5  ;;  %s6896_s28 = sld [smem:[#allocation10 + $0x7]] }
  0x2f   :  { %4084 = vperm.xlu2 %5716, %v135_v0   ;;  %1457 = vperm.xlu0 %5712, %v135_v0   ;;  %s7053_s6 = sld [smem:[#allocation9 + $0x1]] }
  0x30   :  { %5714 = vset.pattern.permute.xlu1 %v5924_v6  ;;  %s7156_s29 = sld [smem:[#allocation10 + $0x10]] }
  0x31   :  { %1463 = vperm.xlu1 %5714, %v135_v0   ;;  %s7167_s30 = sld [smem:[#allocation9 + $0x2]] }
  0x32   :  { %s7279_s11 = sld [smem:[#allocation10 + $0x11]] }
  0x33   :  { %s7296_s12 = sld [smem:[#allocation9 + $0x3]] }
  0x34   :  { %s7343_s13 = sld [smem:[#allocation9 + $0x4]] }
  0x35   :  { %s7389_s14 = sld [smem:[#allocation9 + $0x5]] }
  0x36   :  { %s7397_s15 = sld [smem:[#allocation10 + $0x8]] }
  0x37   :  { %5717 = vset.pattern.permute.xlu0 %v5922_v4  ;;  %s7401_s16 = sld [smem:[#allocation10 + $0x9]] }
  0x38   :  { %s7408_s0 = sld [smem:[#allocation10 + $0xa]] }
  0x39   :  { %s7421_s17 = sld [smem:[#allocation10 + $0xb]] }
  0x3a   :  { %s7430_s18 = sld [smem:[#allocation10 + $0xc]] }
  0x3b   :  { %s7438_s19 = sld [smem:[#allocation10 + $0x12]] }
  0x3c   :  { %s7573_s20 = sld [smem:[#allocation10 + $0xd]] }
  0x3d   :  { %s7650_s2 = sld [smem:[#allocation10 + $0x13]] }
  0x3e   :  { %s7741_s21 = sld [smem:[#allocation10 + $0xe]] }
  0x3f   :  { %s7752_s22 = sld [smem:[#allocation10 + $0xf]] }
  0x40   :  { %s7855_s1 = sld [smem:[#allocation10 + $0x14]] }
  0x41   :  { %s7984_s3 = sld [smem:[#allocation9 + $0x6]] }
  0x42   :  { %s8099_s5 = sld [smem:[#allocation10 + $0x15]] }
  0x98   :  { %v140_v9 = vpop.permute.xlu0 %139 }
  0x99   :  { %v143_v10 = vsub.f32 %v140_v9, %v142_v8 }
  0x9a   :  { %v146_v11 = vpop.permute.xlu1 %145 }
  0x9b   :  { %v148_v12 = vmul.f32 %v146_v11, %v143_v10 }
  0x9d   :  { %v149_v13 = vand.u32 2147483647, %v148_v12 }
  0x9f   :  { %v150_v14 = vmax.f32 %v149_v13, 0.001 }
  0xa1   :  { %5720 = vlog2.f32 %v150_v14 }
  0xa7   :  { %v5721_v15 = vpop.eup %5720 }
  0xa8   :  { %v152_v16 = vmul.f32 0.6931472, %v5721_v15 }
  0xaa   :  { %v6015_v17 = vmul.f32 100.0, %v152_v16 }
  0xac   :  { %v6018_v19 = vadd.f32 %v156_v18, %v6015_v17  ;;  %v316_v26 = vmul.f32 0.4216965, %v6015_v17 }
  0xae   :  { %v161_v20 = vand.u32 2139095040, %v6018_v19  ;;  %v6024_v29 = vadd.f32 %v318_v27, %v316_v26  ;;  %v158_v34 = vand.u32 2147483647, %v6018_v19 }
  0xb0   :  { %v162_v21 = vshrl.u32 %v161_v20, 23  ;;  %12576 = vst [vmem:[#allocation24_spill] sm:$0xff] %v6024_v29  ;;  %v323_v38 = vand.u32 2139095040, %v6024_v29  ;;  %v165_v51 = vand.u32 8388607, %v158_v34 }
  0xb2   :  { %v5527_v22 = vadd.s32 4294967169, %v162_v21  ;;  %v324_v52 = vshrl.u32 %v323_v38, 23  ;;  %v166_v58 = vor.u32 8388608, %v165_v51 }
  0xb4   :  { %v168_v23 = vadd.s32 1, %v5527_v22  ;;  %v5532_v61 = vadd.s32 4294967169, %v324_v52  ;;  %v6078_v3 = vshll.u32 %v166_v58, 8 }
  0xb6   :  { %vm169_vm0 = vcmp.gt.s32.totalorder %v168_v23, 0  ;;  %v330_v4 = vadd.s32 1, %v5532_v61  ;;  %v207_v7 = vand.u32 65535, %v6078_v3  ;;  %v208_v13 = vshrl.u32 %v6078_v3, 16 }
  0xb7   :  { %v170_v24 = vsel %vm169_vm0, %v168_v23, 0 }
  0xb8   :  { %v172_v25 = vand.u32 31, %v170_v24  ;;  %v6031_v35 = vshrl.u32 %v170_v24, 5  ;;  %vm331_vm5 = vcmp.gt.s32.totalorder %v330_v4, 0 }
  0xb9   :  { %v332_v10 = vsel %vm331_vm5, %v330_v4, 0 }
  0xba   :  { %v6022_v28 = vsub.s32 32, %v172_v25  ;;  %v184_v37 = vshll.u32 %v12404_v36, %v172_v25  ;;  %v187_v44 = vshll.u32 %v12408_v30, %v172_v25  ;;  %v175_v47 = vshll.u32 %v12418_v46, %v172_v25 }
  0xbb   :  { %v178_v48 = vshll.u32 %v12402_v39, %v172_v25  ;;  %v181_v49 = vshll.u32 %v12400_v41, %v172_v25  ;;  %vm193_vm1 = vcmp.lt.s32.totalorder %v6031_v35, 4  ;;  %vm190_vm2 = vcmp.lt.s32.totalorder %v6031_v35, 1 }
  0xbc   :  { %v185_v31 = vshrl.u32 %v12408_v30, %v6022_v28  ;;  %v188_v33 = vshrl.u32 %v12406_v32, %v6022_v28  ;;  %v176_v40 = vshrl.u32 %v12402_v39, %v6022_v28  ;;  %v179_v42 = vshrl.u32 %v12400_v41, %v6022_v28 }
  0xbd   :  { %v182_v43 = vshrl.u32 %v12404_v36, %v6022_v28  ;;  %vm192_vm3 = vcmp.lt.s32.totalorder %v6031_v35, 3  ;;  %vm191_vm4 = vcmp.lt.s32.totalorder %v6031_v35, 2  ;;  %v334_v15 = vand.u32 31, %v332_v10 }
  0xbe   :  { %v186_v45 = vor.u32 %v185_v31, %v184_v37  ;;  %v189_v50 = vor.u32 %v188_v33, %v187_v44  ;;  %v6047_v53 = vor.u32 %v176_v40, %v175_v47  ;;  %v6049_v54 = vor.u32 %v179_v42, %v178_v48 }
  0xbf   :  { %v6051_v55 = vor.u32 %v182_v43, %v181_v49  ;;  %v6088_v24 = vsub.s32 32, %v334_v15  ;;  %v12410_v33 = vand.u32 2147483647, %v6024_v29  ;;  %v6100_v43 = vshrl.u32 %v332_v10, 5 }
  0xc0   :  { %v199_v56 = vsel %vm193_vm1, %v186_v45, 920167782  ;;  %v203_v57 = vsel %vm193_vm1, %v189_v50, 1326507024  ;;  %v198_v59 = vsel %vm190_vm2, %v6047_v53, %v6049_v54  ;;  %v346_v49 = vshll.u32 %v12404_v36, %v334_v15 }
  0xc1   :  { %v200_v60 = vsel %vm192_vm3, %v6051_v55, %v199_v56  ;;  %v202_v62 = vsel %vm190_vm2, %v6049_v54, %v6051_v55  ;;  %v204_v63 = vsel %vm192_vm3, %v186_v45, %v203_v57  ;;  %v347_v40 = vshrl.u32 %v12408_v30, %v6088_v24 }
  0xc2   :  { %v201_v0 = vsel %vm191_vm4, %v198_v59, %v200_v60  ;;  %v205_v1 = vsel %vm191_vm4, %v202_v62, %v204_v63  ;;  %v350_v44 = vshrl.u32 %v12406_v32, %v6088_v24  ;;  %v338_v47 = vshrl.u32 %v12402_v39, %v6088_v24 }
  0xc3   :  { %v232_v5 = vshrl.u32 %v201_v0, 16  ;;  %v210_v6 = vshrl.u32 %v205_v1, 16  ;;  %v231_v11 = vand.u32 65535, %v201_v0  ;;  %v209_v12 = vand.u32 65535, %v205_v1 }
  0xc4   :  { %v341_v48 = vshrl.u32 %v12400_v41, %v6088_v24  ;;  %v344_v52 = vshrl.u32 %v12404_v36, %v6088_v24  ;;  %v349_v56 = vshll.u32 %v12408_v30, %v334_v15  ;;  %v337_v58 = vshll.u32 %v12418_v46, %v334_v15 }
  0xc5   :  { %v234_v8 = vmul.u32 %v232_v5, %v207_v7  ;;  %v212_v9 = vmul.u32 %v210_v6, %v207_v7  ;;  %v233_v18 = vmul.u32 %v231_v11, %v207_v7  ;;  %v6082_v20 = vmul.u32 %v231_v11, %v208_v13 }
  0xc6   :  { %v211_v21 = vmul.u32 %v209_v12, %v207_v7  ;;  %v6084_v22 = vmul.u32 %v209_v12, %v208_v13  ;;  %v236_v38 = vmul.u32 %v232_v5, %v208_v13  ;;  %v214_v42 = vmul.u32 %v210_v6, %v208_v13 }
  0xc7   :  { %v237_v14 = vshll.u32 %v234_v8, 16  ;;  %v215_v16 = vshll.u32 %v212_v9, 16  ;;  %v239_v26 = vshll.u32 %v6082_v20, 16  ;;  %v348_v59 = vor.u32 %v347_v40, %v346_v49 }
  0xc8   :  { %v217_v27 = vshll.u32 %v6084_v22, 16  ;;  %v340_v60 = vshll.u32 %v12402_v39, %v334_v15  ;;  %v343_v61 = vshll.u32 %v12400_v41, %v334_v15  ;;  %v351_v62 = vor.u32 %v350_v44, %v349_v56 }
  0xc9   :  { %vm241_vm6 = vc.u32 %v233_v18, %v237_v14  ;;  %v6086_v23 = vadd.s32 %v237_v14, %v233_v18  ;;  %vm219_vm7 = vc.u32 %v211_v21, %v215_v16  ;;  %v221_v25 = vadd.s32 %v215_v16, %v211_v21 }
  0xca   :  { %v242_v31 = vsel %vm241_vm6, 1, %v12413_v2  ;;  %v220_v37 = vsel %vm219_vm7, 1, %v12413_v2  ;;  %v327_v0 = vand.u32 8388607, %v12410_v33  ;;  %v6121_v1 = vor.u32 %v338_v47, %v337_v58 }
  0xcb   :  { %vm245_vm8 = vc.u32 %v6086_v23, %v239_v26  ;;  %vm223_vm9 = vc.u32 %v221_v25, %v217_v27  ;;  %v244_v45 = vadd.s32 %v242_v31, %v236_v38  ;;  %v222_v50 = vadd.s32 %v220_v37, %v214_v42 }
  0xcc   :  { %v246_v51 = vsel %vm245_vm8, 1, %v12413_v2  ;;  %v224_v57 = vsel %vm223_vm9, 1, %v12413_v2  ;;  %v6123_v5 = vor.u32 %v341_v48, %v340_v60  ;;  %v6125_v6 = vor.u32 %v344_v52, %v343_v61 }
  0xcd   :  { %v248_v63 = vadd.s32 %v246_v51, %v244_v45  ;;  %v226_v4 = vadd.s32 %v224_v57, %v222_v50  ;;  %vm355_vm10 = vcmp.lt.s32.totalorder %v6100_v43, 4  ;;  %v238_v7 = vshrl.u32 %v234_v8, 16 }
  0xce   :  { %v361_v10 = vsel %vm355_vm10, %v348_v59, 920167782  ;;  %v216_v11 = vshrl.u32 %v212_v9, 16  ;;  %v365_v12 = vsel %vm355_vm10, %v351_v62, 1326507024  ;;  %v481_v13 = vstv %s6104_s8  ;;  %s8153_s8 = sld [smem:[#allocation9 + $0x7]] }
  0xcf   :  { %v249_v14 = vadd.s32 %v248_v63, %v238_v7  ;;  %vm352_vm11 = vcmp.lt.s32.totalorder %v6100_v43, 1  ;;  %vm354_vm12 = vcmp.lt.s32.totalorder %v6100_v43, 3  ;;  %v479_v15 = vmul.f32 0.17782794, %v6015_v17 }
  0xd0   :  { %v227_v16 = vadd.s32 %v226_v4, %v216_v11  ;;  %v328_v18 = vor.u32 8388608, %v327_v0  ;;  %v360_v8 = vsel %vm352_vm11, %v6121_v1, %v6123_v5  ;;  %v362_v9 = vsel %vm354_vm12, %v6125_v6, %v361_v10 }
  0xd1   :  { %v240_v21 = vshrl.u32 %v6082_v20, 16  ;;  %v364_v25 = vsel %vm352_vm11, %v6123_v5, %v6125_v6  ;;  %v366_v27 = vsel %vm354_vm12, %v348_v59, %v365_v12  ;;  %v218_v31 = vshrl.u32 %v6084_v22, 16 }
  0xd2   :  { %vm353_vm13 = vcmp.lt.s32.totalorder %v6100_v43, 2  ;;  %v195_v37 = vsel %vm193_vm1, %v6051_v55, 2102212464  ;;  %v6157_v42 = vadd.f32 %v481_v13, %v479_v15  ;;  %v174_v44 = vshrl.u32 %v12418_v46, %v6022_v28 }
  0xd3   :  { %v250_v38 = vadd.s32 %v249_v14, %v240_v21  ;;  %v363_v40 = vsel %vm353_vm13, %v360_v8, %v362_v9  ;;  %v6161_v45 = vadd.s32 %v227_v16, %v218_v31  ;;  %v367_v22 = vsel %vm353_vm13, %v364_v25, %v366_v27 }
  0xd4   :  { %v6165_v47 = vshll.u32 %v328_v18, 8  ;;  %v194_v55 = vsel %vm190_vm2, %v174_v44, %v6047_v53  ;;  %v196_v48 = vsel %vm192_vm3, %v6049_v54, %v195_v37  ;;  %v6176_v49 = vadd.s32 %v6086_v23, %v239_v26 }
  0xd5   :  { %v394_v28 = vshrl.u32 %v363_v40, 16  ;;  %v254_v50 = vadd.s32 1, %v250_v38  ;;  %v372_v51 = vshrl.u32 %v367_v22, 16  ;;  %v486_v52 = vand.u32 2139095040, %v6157_v42 }
  0xd6   :  { %vm253_vm14 = vc.u32 %v6161_v45, %v6176_v49  ;;  %v369_v56 = vand.u32 65535, %v6165_v47  ;;  %v197_v53 = vsel %vm191_vm4, %v194_v55, %v196_v48  ;;  %v393_v26 = vand.u32 65535, %v363_v40 }
  0xd7   :  { %v255_v54 = vsel %vm253_vm14, %v254_v50, %v250_v38  ;;  %v487_v20 = vshrl.u32 %v486_v52, 23  ;;  %v251_v23 = vmul.u32 %v6078_v3, %v197_v53  ;;  %v371_v59 = vand.u32 65535, %v367_v22 }
  0xd8   :  { %v396_v57 = vmul.u32 %v394_v28, %v369_v56  ;;  %v374_v58 = vmul.u32 %v372_v51, %v369_v56  ;;  %v370_v61 = vshrl.u32 %v6165_v47, 16  ;;  %v395_v4 = vmul.u32 %v393_v26, %v369_v56 }
  0xd9   :  { %v256_v60 = vadd.s32 %v255_v54, %v251_v23  ;;  %v5537_v0 = vadd.s32 4294967169, %v487_v20  ;;  %v373_v10 = vmul.u32 %v371_v59, %v369_v56  ;;  %v336_v54 = vshrl.u32 %v12418_v46, %v6088_v24 }
  0xda   :  { %v399_v62 = vshll.u32 %v396_v57, 16  ;;  %v377_v63 = vshll.u32 %v374_v58, 16  ;;  %v397_v7 = vmul.u32 %v393_v26, %v370_v61  ;;  %v375_v11 = vmul.u32 %v371_v59, %v370_v61 }
  0xdb   :  { %v257_v35 = vadd.s32 536870912, %v256_v60  ;;  %v493_v14 = vadd.s32 1, %v5537_v0  ;;  %v398_v9 = vmul.u32 %v394_v28, %v370_v61  ;;  %v376_v21 = vmul.u32 %v372_v51, %v370_v61 }
  0xdc   :  { %vm403_vm15 = vc.u32 %v395_v4, %v399_v62  ;;  %v405_v12 = vadd.s32 %v399_v62, %v395_v4  ;;  %vm381_vm0 = vc.u32 %v373_v10, %v377_v63  ;;  %v383_v13 = vadd.s32 %v377_v63, %v373_v10 }
  0xdd   :  { %v401_v15 = vshll.u32 %v397_v7, 16  ;;  %v379_v3 = vshll.u32 %v375_v11, 16  ;;  %v404_v16 = vsel %vm403_vm15, 1, %v12413_v2  ;;  %v6187_v18 = vshrl.u32 %v257_v35, 30 }
  0xde   :  { %v382_v8 = vsel %vm381_vm0, 1, %v12413_v2  ;;  %vm494_vm3 = vcmp.gt.s32.totalorder %v493_v14, 0  ;;  %v406_v25 = vadd.s32 %v404_v16, %v398_v9  ;;  %v400_v28 = vshrl.u32 %v396_v57, 16 }
  0xdf   :  { %vm407_vm1 = vc.u32 %v405_v12, %v401_v15  ;;  %vm385_vm2 = vc.u32 %v383_v13, %v379_v3  ;;  %v384_v27 = vadd.s32 %v382_v8, %v376_v21  ;;  %v259_v37 = vshll.u32 %v6187_v18, 30 }
  0xe0   :  { %v408_v31 = vsel %vm407_vm1, 1, %v12413_v2  ;;  %v386_v38 = vsel %vm385_vm2, 1, %v12413_v2  ;;  %v495_v40 = vsel %vm494_vm3, %v493_v14, 0  ;;  %v378_v50 = vshrl.u32 %v374_v58, 16 }
  0xe1   :  { %v410_v44 = vadd.s32 %v408_v31, %v406_v25  ;;  %v388_v22 = vadd.s32 %v386_v38, %v384_v27  ;;  %v497_v55 = vand.u32 31, %v495_v40  ;;  %v6193_v48 = vsub.s32 %v256_v60, %v259_v37 }
  0xe2   :  { %v402_v20 = vshrl.u32 %v397_v7, 16  ;;  %v642_v23 = vmul.f32 0.07498942, %v6015_v17  ;;  %v357_v26 = vsel %vm355_vm10, %v6125_v6, 2102212464  ;;  %v380_v57 = vshrl.u32 %v375_v11, 16 }
  0xe3   :  { %v411_v51 = vadd.s32 %v410_v44, %v400_v28  ;;  %v389_v52 = vadd.s32 %v388_v22, %v378_v50  ;;  %v6195_v56 = vsub.s32 32, %v497_v55  ;;  %v262_v53 = vsub.s32 0, %v6193_v48 }
  0xe4   :  { %vm261_vm4 = vcmp.lt.s32.totalorder %v6193_v48, 0  ;;  %v644_v58 = vstv %s5541_s23  ;;  %v12397_v60 = vand.u32 2147483647, %v6157_v42  ;;  %v356_v61 = vsel %vm352_vm11, %v336_v54, %v6121_v1  ;;  %s8164_s23 = sld [smem:[#allocation9 + $0x8]] }
  0xe5   :  { %v412_v59 = vadd.s32 %v411_v51, %v402_v20  ;;  %v6209_v62 = vadd.s32 %v389_v52, %v380_v57  ;;  %v510_v24 = vshrl.u32 %v12408_v30, %v6195_v56  ;;  %v513_v63 = vshrl.u32 %v12406_v32, %v6195_v56 }
  0xe6   :  { %v263_v0 = vsel %vm261_vm4, %v262_v53, %v6193_v48  ;;  %v358_v6 = vsel %vm354_vm12, %v6123_v5, %v357_v26  ;;  %v6219_v4 = vshrl.u32 %v495_v40, 5  ;;  %v6221_v7 = vadd.f32 %v644_v58, %v642_v23 }
  0xe7   :  { %v6223_v10 = vadd.s32 %v405_v12, %v401_v15  ;;  %v501_v1 = vshrl.u32 %v12402_v39, %v6195_v56  ;;  %v509_v11 = vshll.u32 %v12404_v36, %v497_v55  ;;  %v512_v35 = vshll.u32 %v12408_v30, %v497_v55 }
  0xe8   :  { %v416_v13 = vadd.s32 1, %v412_v59  ;;  %v500_v14 = vshll.u32 %v12418_v46, %v497_v55  ;;  %v504_v3 = vshrl.u32 %v12400_v41, %v6195_v56  ;;  %v507_v5 = vshrl.u32 %v12404_v36, %v6195_v56 }
  0xe9   :  { %v264_v16 = vclz %v263_v0  ;;  %vm415_vm5 = vc.u32 %v6209_v62, %v6223_v10  ;;  %v511_v12 = vor.u32 %v510_v24, %v509_v11  ;;  %v514_v15 = vor.u32 %v513_v63, %v512_v35 }
  0xea   :  { %v359_v8 = vsel %vm353_vm13, %v356_v61, %v358_v6  ;;  %v503_v9 = vshll.u32 %v12402_v39, %v497_v55  ;;  %v506_v21 = vshll.u32 %v12400_v41, %v497_v55  ;;  %v649_v25 = vand.u32 2139095040, %v6221_v7 }
  0xeb   :  { %v490_v27 = vand.u32 8388607, %v12397_v60  ;;  %v6243_v31 = vor.u32 %v501_v1, %v500_v14  ;;  %v417_v37 = vsel %vm415_vm5, %v416_v13, %v412_v59  ;;  %vm518_vm6 = vcmp.lt.s32.totalorder %v6219_v4, 4 }
  0xec   :  { %v6245_v38 = vor.u32 %v504_v3, %v503_v9  ;;  %v6247_v40 = vor.u32 %v507_v5, %v506_v21  ;;  %v5528_v43 = vadd.s32 4294967294, %v264_v16  ;;  %v413_v44 = vmul.u32 %v6165_v47, %v359_v8 }
  0xed   :  { %v524_v22 = vsel %vm518_vm6, %v511_v12, 920167782  ;;  %v528_v55 = vsel %vm518_vm6, %v514_v15, 1326507024  ;;  %v650_v28 = vshrl.u32 %v649_v25, 23  ;;  %v491_v51 = vor.u32 8388608, %v490_v27 }
  0xee   :  { %v418_v50 = vadd.s32 %v417_v37, %v413_v44  ;;  %vm515_vm7 = vcmp.lt.s32.totalorder %v6219_v4, 1  ;;  %vm517_vm8 = vcmp.lt.s32.totalorder %v6219_v4, 3  ;;  %vm5529_vm9 = vcmp.lt.s32.totalorder %v5528_v43, 0 }
  0xef   :  { %v523_v52 = vsel %vm515_vm7, %v6243_v31, %v6245_v38  ;;  %v525_v47 = vsel %vm517_vm8, %v6247_v40, %v524_v22  ;;  %v527_v53 = vsel %vm515_vm7, %v6245_v38, %v6247_v40  ;;  %v529_v54 = vsel %vm517_vm8, %v511_v12, %v528_v55 }
  0xf0   :  { %vm516_vm10 = vcmp.lt.s32.totalorder %v6219_v4, 2  ;;  %v5542_v20 = vadd.s32 4294967169, %v650_v28  ;;  %v419_v23 = vadd.s32 536870912, %v418_v50  ;;  %v805_v58 = vmul.f32 0.031622775, %v6015_v17 }
  0xf1   :  { %v526_v26 = vsel %vm516_vm10, %v523_v52, %v525_v47  ;;  %v530_v57 = vsel %vm516_vm10, %v527_v53, %v529_v54  ;;  %v267_v59 = vsel %vm5529_vm9, 0, %v5528_v43  ;;  %v6276_v61 = vshll.u32 %v491_v51, 8 }
  0xf2   :  { %v807_v24 = vstv %s5546_s24  ;;  %v535_v63 = vshrl.u32 %v530_v57, 16  ;;  %v557_v0 = vshrl.u32 %v526_v26, 16  ;;  %v656_v6 = vadd.s32 1, %v5542_v20  ;;  %s8179_s24 = sld [smem:[#allocation9 + $0x9]] }
  0xf3   :  { %v272_v1 = vsub.s32 4294967266, %v267_v59  ;;  %v6278_v11 = vshrl.u32 %v419_v23, 30  ;;  %v6280_v35 = vadd.f32 %v807_v24, %v805_v58  ;;  %v532_v13 = vand.u32 65535, %v6276_v61 }
  0xf4   :  { %v268_v14 = vsub.s32 32, %v267_v59  ;;  %vm657_vm11 = vcmp.gt.s32.totalorder %v656_v6, 0  ;;  %v534_v15 = vand.u32 65535, %v530_v57  ;;  %v252_v9 = vadd.s32 %v6176_v49, %v6161_v45 }
  0xf5   :  { %12577 = vst [vmem:[#allocation25_spill] sm:$0xff] %v6280_v35  ;;  %v6283_v3 = vmul.u32 %v535_v63, %v532_v13  ;;  %v6285_v5 = vmul.u32 %v557_v0, %v532_v13  ;;  %v273_v16 = vadd.s32 127, %v272_v1  ;;  %v421_v12 = vshll.u32 %v6278_v11, 30 }
  0xf6   :  { %v812_v8 = vand.u32 2139095040, %v6280_v35  ;;  %v556_v21 = vand.u32 65535, %v526_v26  ;;  %v269_v25 = vshll.u32 %v6193_v48, %v267_v59  ;;  %v658_v27 = vsel %vm657_vm11, %v656_v6, 0 }
  0xf7   :  { %v270_v37 = vshrl.u32 %v252_v9, %v268_v14  ;;  %v533_v43 = vshrl.u32 %v6276_v61, 16  ;;  %v540_v44 = vshll.u32 %v6283_v3, 16  ;;  %v562_v22 = vshll.u32 %v6285_v5, 16 }
  0xf8   :  { %v274_v55 = vshll.u32 %v273_v16, 23  ;;  %v6295_v28 = vsub.s32 %v418_v50, %v421_v12  ;;  %v536_v51 = vmul.u32 %v534_v15, %v532_v13  ;;  %v813_v52 = vshrl.u32 %v812_v8, 23 }
  0xf9   :  { %v6297_v47 = vmul.u32 %v534_v15, %v533_v43  ;;  %v558_v53 = vmul.u32 %v556_v21, %v532_v13  ;;  %v6299_v45 = vmul.u32 %v556_v21, %v533_v43  ;;  %v660_v49 = vand.u32 31, %v658_v27 }
  0xfa   :  { %v271_v48 = vor.u32 %v270_v37, %v269_v25  ;;  %v546_v54 = vadd.s32 %v540_v44, %v536_v51  ;;  %v275_v23 = vor.u32 4788187, %v274_v55  ;;  %vm544_vm12 = vc.u32 %v536_v51, %v540_v44 }
  0xfb   :  { %v6301_v20 = vadd.s32 %v562_v22, %v558_v53  ;;  %vm566_vm13 = vc.u32 %v558_v53, %v562_v22  ;;  %v5547_v26 = vadd.s32 4294967169, %v813_v52  ;;  %v424_v57 = vsub.s32 0, %v6295_v28 }
  0xfc   :  { %v542_v50 = vshll.u32 %v6297_v47, 16  ;;  %v564_v58 = vshll.u32 %v6299_v45, 16  ;;  %v6306_v59 = vsub.s32 32, %v660_v49  ;;  %vm423_vm14 = vcmp.lt.s32.totalorder %v6295_v28, 0 }
  0xfd   :  { %v520_v24 = vsel %vm518_vm6, %v6247_v40, 2102212464  ;;  %v545_v6 = vsel %vm544_vm12, 1, %v12413_v2  ;;  %v567_v1 = vsel %vm566_vm13, 1, %v12413_v2  ;;  %v278_v13 = vcvt.s32.f32 %v271_v48 }
  0xfe   :  { %vm548_vm15 = vc.u32 %v546_v54, %v542_v50  ;;  %vm570_vm0 = vc.u32 %v6301_v20, %v564_v58  ;;  %v539_v14 = vmul.u32 %v535_v63, %v533_v43  ;;  %v561_v16 = vmul.u32 %v557_v0, %v533_v43 }
  0xff   :  { %v819_v12 = vadd.s32 1, %v5547_v26  ;;  %v276_v15 = vand.u32 2147483647, %v275_v23  ;;  %v425_v8 = vsel %vm423_vm14, %v424_v57, %v6295_v28  ;;  %v673_v9 = vshrl.u32 %v12408_v30, %v6306_v59 }
 0x100   :  { %v676_v40 = vshrl.u32 %v12406_v32, %v6306_v59  ;;  %v547_v21 = vadd.s32 %v545_v6, %v539_v14  ;;  %v549_v25 = vsel %vm548_vm15, 1, %v12413_v2  ;;  %v569_v37 = vadd.s32 %v567_v1, %v561_v16 }
 0x101   :  { %v571_v44 = vsel %vm570_vm0, 1, %v12413_v2  ;;  %v12399_v22 = vand.u32 2147483647, %v6221_v7  ;;  %v6325_v63 = vshrl.u32 %v658_v27, 5  ;;  %v672_v0 = vshll.u32 %v12404_v36, %v660_v49 }
 0x102   :  { %v675_v43 = vshll.u32 %v12408_v30, %v660_v49  ;;  %v664_v55 = vshrl.u32 %v12402_v39, %v6306_v59  ;;  %v667_v51 = vshrl.u32 %v12400_v41, %v6306_v59  ;;  %v670_v52 = vshrl.u32 %v12404_v36, %v6306_v59 }
 0x103   :  { %vm820_vm1 = vcmp.gt.s32.totalorder %v819_v12, 0  ;;  %v279_v53 = vmul.f32 %v278_v13, %v276_v15  ;;  %v426_v48 = vclz %v425_v8  ;;  %v674_v54 = vor.u32 %v673_v9, %v672_v0 }
 0x104   :  { %v677_v23 = vor.u32 %v676_v40, %v675_v43  ;;  %v551_v27 = vadd.s32 %v549_v25, %v547_v21  ;;  %v663_v26 = vshll.u32 %v12418_v46, %v660_v49  ;;  %v666_v57 = vshll.u32 %v12402_v39, %v660_v49 }
 0x105   :  { %v669_v50 = vshll.u32 %v12400_v41, %v660_v49  ;;  %v541_v6 = vshrl.u32 %v6283_v3, 16  ;;  %v573_v1 = vadd.s32 %v571_v44, %v569_v37  ;;  %v653_v14 = vand.u32 8388607, %v12399_v22 }
 0x106   :  { %v821_v16 = vsel %vm820_vm1, %v819_v12, 0  ;;  %v6341_v60 = vor.u32 %v664_v55, %v663_v26  ;;  %v6343_v13 = vor.u32 %v667_v51, %v666_v57  ;;  %vm681_vm2 = vcmp.lt.s32.totalorder %v6325_v63, 4 }
 0x107   :  { %v6345_v15 = vor.u32 %v670_v52, %v669_v50  ;;  %v499_v8 = vshrl.u32 %v12418_v46, %v6195_v56  ;;  %v563_v49 = vshrl.u32 %v6285_v5, 16  ;;  %v687_v3 = vsel %vm681_vm2, %v674_v54, 920167782 }
 0x108   :  { %v691_v9 = vsel %vm681_vm2, %v677_v23, 1326507024  ;;  %v280_v12 = vxor.u32 2147483648, %v279_v53  ;;  %v5533_v40 = vadd.s32 4294967294, %v426_v48  ;;  %v552_v21 = vadd.s32 %v551_v27, %v541_v6 }
 0x109   :  { %v823_v25 = vand.u32 31, %v821_v16  ;;  %v574_v37 = vadd.s32 %v573_v1, %v563_v49  ;;  %v654_v44 = vor.u32 8388608, %v653_v14  ;;  %vm678_vm3 = vcmp.lt.s32.totalorder %v6325_v63, 1 }
 0x10a   :  { %vm680_vm4 = vcmp.lt.s32.totalorder %v6325_v63, 3  ;;  %v686_v56 = vsel %vm678_vm3, %v6341_v60, %v6343_v13  ;;  %v690_v0 = vsel %vm678_vm3, %v6343_v13, %v6345_v15  ;;  %v519_v55 = vsel %vm515_vm7, %v499_v8, %v6243_v31 }
 0x10b   :  { %v688_v5 = vsel %vm680_vm4, %v6345_v15, %v687_v3  ;;  %v692_v43 = vsel %vm680_vm4, %v674_v54, %v691_v9  ;;  %v543_v51 = vshrl.u32 %v6297_v47, 16  ;;  %v521_v52 = vsel %vm517_vm8, %v6245_v38, %v520_v24 }
 0x10c   :  { %v565_v48 = vshrl.u32 %v6299_v45, 16  ;;  %vm679_vm5 = vcmp.lt.s32.totalorder %v6325_v63, 2  ;;  %v6379_v23 = vsub.s32 32, %v823_v25  ;;  %vm160_vm6 = vcmp.lt.s32.totalorder %v6018_v19, 0 }
 0x10d   :  { %v6382_v27 = vadd.s32 %v552_v21, %v543_v51  ;;  %v6386_v54 = vsel %vm679_vm5, %v686_v56, %v688_v5  ;;  %v6390_v31 = vsel %vm679_vm5, %v690_v0, %v692_v43  ;;  %v281_v38 = vsel %vm160_vm6, %v280_v12, %v279_v53 }
 0x10e   :  { %vm5534_vm7 = vcmp.lt.s32.totalorder %v5533_v40, 0  ;;  %v575_v47 = vadd.s32 %v574_v37, %v565_v48  ;;  %v6394_v24 = vshll.u32 %v654_v44, 8  ;;  %vm6398_vm8 = vcmp.le.f32.partialorder %v158_v34, 0.7853982 }
 0x10f   :  { %v6404_v57 = vadd.s32 %v6223_v10, %v6209_v62  ;;  %v522_v50 = vsel %vm516_vm10, %v519_v55, %v521_v52  ;;  %v6411_v53 = vadd.s32 %v6301_v20, %v564_v58  ;;  %v698_v6 = vshrl.u32 %v6390_v31, 16 }
 0x110   :  { %v720_v1 = vshrl.u32 %v6386_v54, 16  ;;  %v12398_v34 = vand.u32 2147483647, %v6280_v35  ;;  %v836_v14 = vshrl.u32 %v12408_v30, %v6379_v23  ;;  %v6421_v62 = vsel %vm6398_vm8, %v6018_v19, %v281_v38 }
 0x111   :  { %v6423_v4 = vsel %vm5534_vm7, 0, %v5533_v40  ;;  %vm578_vm9 = vc.u32 %v6382_v27, %v6411_v53  ;;  %v839_v10 = vshrl.u32 %v12406_v32, %v6379_v23  ;;  %v579_v45 = vadd.s32 1, %v575_v47 }
 0x112   :  { %v695_v20 = vand.u32 65535, %v6394_v24  ;;  %v6430_v58 = vshrl.u32 %v821_v16, 5  ;;  %v835_v8 = vshll.u32 %v12404_v36, %v823_v25  ;;  %v827_v49 = vshrl.u32 %v12402_v39, %v6379_v23 }
 0x113   :  { %v830_v3 = vshrl.u32 %v12400_v41, %v6379_v23  ;;  %v833_v9 = vshrl.u32 %v12404_v36, %v6379_v23  ;;  %v838_v12 = vshll.u32 %v12408_v30, %v823_v25  ;;  %v816_v21 = vand.u32 8388607, %v12398_v34 }
 0x114   :  { %v6442_v40 = vmul.u32 %v698_v6, %v695_v20  ;;  %v6446_v16 = vmul.u32 %v720_v1, %v695_v20  ;;  %v837_v37 = vor.u32 %v836_v14, %v835_v8  ;;  %v826_v44 = vshll.u32 %v12418_v46, %v823_v25 }
 0x115   :  { %v829_v56 = vshll.u32 %v12402_v39, %v823_v25  ;;  %v832_v5 = vshll.u32 %v12400_v41, %v823_v25  ;;  %v840_v0 = vor.u32 %v839_v10, %v838_v12  ;;  %v576_v43 = vmul.u32 %v6276_v61, %v522_v50 }
 0x116   :  { %v580_v55 = vsel %vm578_vm9, %v579_v45, %v575_v47  ;;  %v697_v51 = vand.u32 65535, %v6390_v31  ;;  %v719_v52 = vand.u32 65535, %v6386_v54  ;;  %v6459_v48 = vor.u32 %v827_v49, %v826_v44 }
 0x117   :  { %v6461_v38 = vor.u32 %v830_v3, %v829_v56  ;;  %v6463_v14 = vor.u32 %v833_v9, %v832_v5  ;;  %vm844_vm10 = vcmp.lt.s32.totalorder %v6430_v58, 4  ;;  %v434_v25 = vsub.s32 4294967266, %v6423_v4 }
 0x118   :  { %v696_v61 = vshrl.u32 %v6394_v24, 16  ;;  %v725_v50 = vshll.u32 %v6446_v16, 16  ;;  %v850_v47 = vsel %vm844_vm10, %v837_v37, 920167782  ;;  %v6471_v10 = vadd.s32 %v580_v55, %v576_v43 }
 0x119   :  { %v703_v45 = vshll.u32 %v6442_v40, 16  ;;  %v817_v8 = vor.u32 8388608, %v816_v21  ;;  %v854_v49 = vsel %vm844_vm10, %v840_v0, 1326507024  ;;  %v721_v3 = vmul.u32 %v719_v52, %v695_v20 }
 0x11a   :  { %v6476_v9 = vmul.u32 %v719_v52, %v696_v61  ;;  %vm841_vm11 = vcmp.lt.s32.totalorder %v6430_v58, 1  ;;  %vm843_vm12 = vcmp.lt.s32.totalorder %v6430_v58, 3  ;;  %v699_v12 = vmul.u32 %v697_v51, %v695_v20 }
 0x11b   :  { %v6480_v44 = vmul.u32 %v697_v51, %v696_v61  ;;  %v849_v56 = vsel %vm841_vm11, %v6459_v48, %v6461_v38  ;;  %v851_v21 = vsel %vm843_vm12, %v6463_v14, %v850_v47  ;;  %vm729_vm13 = vc.u32 %v721_v3, %v725_v50 }
 0x11c   :  { %v6489_v5 = vadd.s32 %v725_v50, %v721_v3  ;;  %v853_v0 = vsel %vm841_vm11, %v6461_v38, %v6463_v14  ;;  %v855_v20 = vsel %vm843_vm12, %v837_v37, %v854_v49  ;;  %v430_v43 = vsub.s32 32, %v6423_v4 }
 0x11d   :  { %vm707_vm14 = vc.u32 %v699_v12, %v703_v45  ;;  %v709_v55 = vadd.s32 %v703_v45, %v699_v12  ;;  %vm842_vm15 = vcmp.lt.s32.totalorder %v6430_v58, 2  ;;  %v435_v51 = vadd.s32 127, %v434_v25 }
 0x11e   :  { %v582_v52 = vadd.s32 536870912, %v6471_v10  ;;  %v12411_v50 = vshll.u32 %v6476_v9, 16  ;;  %v6503_v47 = vsel %vm842_vm15, %v849_v56, %v851_v21  ;;  %v705_v3 = vshll.u32 %v6480_v44, 16 }
 0x11f   :  { %v730_v34 = vsel %vm729_vm13, 1, %v12413_v2  ;;  %v6509_v37 = vsel %vm842_vm15, %v853_v0, %v855_v20  ;;  %v6511_v45 = vshll.u32 %v817_v8, 8  ;;  %v6517_v25 = vmul.f32 %v6421_v62, %v6421_v62 }
 0x120   :  { %v708_v49 = vsel %vm707_vm14, 1, %v12413_v2  ;;  %v724_v12 = vmul.u32 %v720_v1, %v696_v61  ;;  %vm733_vm0 = vc.u32 %v6489_v5, %v12411_v50  ;;  %v432_v56 = vshrl.u32 %v6404_v57, %v430_v43 }
 0x121   :  { %v702_v8 = vmul.u32 %v698_v6, %v696_v61  ;;  %vm711_vm1 = vc.u32 %v709_v55, %v705_v3  ;;  %v883_v21 = vshrl.u32 %v6503_v47, 16  ;;  %v431_v0 = vshll.u32 %v6295_v28, %v6423_v4 }
 0x122   :  { %v436_v20 = vshll.u32 %v435_v51, 23  ;;  %v732_v22 = vadd.s32 %v730_v34, %v724_v12  ;;  %v861_v54 = vshrl.u32 %v6509_v37, 16  ;;  %v6532_v1 = vshrl.u32 %v582_v52, 30 }
 0x123   :  { %v710_v41 = vadd.s32 %v708_v49, %v702_v8  ;;  %v734_v39 = vsel %vm733_vm0, 1, %v12413_v2  ;;  %v858_v57 = vand.u32 65535, %v6511_v45  ;;  %v294_v31 = vmul.f32 -0.00019511016, %v6517_v25 }
 0x124   :  { %v712_v6 = vsel %vm711_vm1, 1, %v12413_v2  ;;  %v6539_v43 = vor.u32 %v432_v56, %v431_v0  ;;  %v6543_v34 = vor.u32 4788187, %v436_v20  ;;  %v736_v4 = vadd.s32 %v734_v39, %v732_v22 }
 0x125   :  { %v6541_v28 = vmul.u32 %v883_v21, %v858_v57  ;;  %v6545_v55 = vmul.u32 %v861_v54, %v858_v57  ;;  %v968_v51 = vmul.f32 0.013335214, %v6015_v17  ;;  %v584_v52 = vshll.u32 %v6532_v1, 30 }
 0x126   :  { %v714_v3 = vadd.s32 %v712_v6, %v710_v41  ;;  %v882_v49 = vand.u32 65535, %v6503_v47  ;;  %v970_v12 = vstv %s6513_s25  ;;  %v287_v8 = vmul.f32 -0.001358992, %v6517_v25  ;;  %s8197_s25 = sld [smem:[#allocation9 + $0xa]] }
 0x127   :  { %v295_v36 = vadd.f32 0.008332121, %v294_v31  ;;  %v726_v56 = vshrl.u32 %v6446_v16, 16  ;;  %v860_v0 = vand.u32 65535, %v6509_v37  ;;  %v440_v20 = vcvt.s32.f32 %v6539_v43 }
 0x128   :  { %v704_v39 = vshrl.u32 %v6442_v40, 16  ;;  %v859_v22 = vshrl.u32 %v6511_v45, 16  ;;  %v888_v32 = vshll.u32 %v6541_v28, 16  ;;  %v438_v41 = vand.u32 2147483647, %v6543_v34 }
 0x129   :  { %v737_v6 = vadd.s32 %v736_v4, %v726_v56  ;;  %v866_v47 = vshll.u32 %v6545_v55, 16  ;;  %v6560_v30 = vadd.f32 %v970_v12, %v968_v51  ;;  %v6563_v31 = vsub.s32 %v6471_v10, %v584_v52 }
 0x12a   :  { %v715_v16 = vadd.s32 %v714_v3, %v704_v39  ;;  %v884_v37 = vmul.u32 %v882_v49, %v858_v57  ;;  %v6565_v33 = vmul.u32 %v882_v49, %v859_v22  ;;  %v662_v40 = vshrl.u32 %v12418_v46, %v6306_v59 }
 0x12b   :  { %12580 = vst [vmem:[#allocation26_spill] sm:$0xff] %v6560_v30  ;;  %v728_v43 = vshrl.u32 %v6476_v9, 16  ;;  %v862_v61 = vmul.u32 %v860_v0, %v858_v57  ;;  %v6570_v50 = vmul.u32 %v860_v0, %v859_v22  ;;  %v683_v34 = vsel %vm681_vm2, %v6345_v15, 2102212464 }
 0x12c   :  { %v706_v10 = vshrl.u32 %v6480_v44, 16  ;;  %vm892_vm7 = vc.u32 %v884_v37, %v888_v32  ;;  %v6578_v4 = vadd.s32 %v888_v32, %v884_v37  ;;  %v975_v59 = vand.u32 2139095040, %v6560_v30 }
 0x12d   :  { %v738_v51 = vadd.s32 %v737_v6, %v728_v43  ;;  %vm870_vm9 = vc.u32 %v862_v61, %v866_v47  ;;  %v872_v52 = vadd.s32 %v866_v47, %v862_v61  ;;  %vm586_vm13 = vcmp.lt.s32.totalorder %v6563_v31, 0 }
 0x12e   :  { %v587_v57 = vsub.s32 0, %v6563_v31  ;;  %v6583_v3 = vadd.s32 %v715_v16, %v706_v10  ;;  %v890_v49 = vshll.u32 %v6565_v33, 16  ;;  %v682_v15 = vsel %vm678_vm3, %v662_v40, %v6341_v60 }
 0x12f   :  { %v684_v32 = vsel %vm680_vm4, %v6343_v13, %v683_v34  ;;  %v868_v44 = vshll.u32 %v6570_v50, 16  ;;  %v893_v61 = vsel %vm892_vm7, 1, %v12413_v2  ;;  %v12581_v12 = vshll.u32 %v6476_v9, 16 }
 0x130   :  { %v871_v0 = vsel %vm870_vm9, 1, %v12413_v2  ;;  %v887_v39 = vmul.u32 %v883_v21, %v859_v22  ;;  %vm896_vm2 = vc.u32 %v6578_v4, %v890_v49  ;;  %v742_v60 = vadd.s32 1, %v738_v51 }
 0x131   :  { %v6597_v56 = vadd.s32 %v6489_v5, %v12581_v12  ;;  %v865_v6 = vmul.u32 %v861_v54, %v859_v22  ;;  %vm874_vm3 = vc.u32 %v872_v52, %v868_v44  ;;  %v976_v13 = vshrl.u32 %v975_v59, 23 }
 0x132   :  { %v588_v47 = vsel %vm586_vm13, %v587_v57, %v6563_v31  ;;  %v895_v9 = vadd.s32 %v893_v61, %v887_v39  ;;  %v1131_v5 = vmul.f32 0.0056234132, %v6015_v17  ;;  %v685_v21 = vsel %vm679_vm5, %v682_v15, %v684_v32 }
 0x133   :  { %vm741_vm4 = vc.u32 %v6583_v3, %v6597_v56  ;;  %v873_v16 = vadd.s32 %v871_v0, %v865_v6  ;;  %v897_v37 = vsel %vm896_vm2, 1, %v12413_v2  ;;  %v1133_v40 = vstv %s6572_s26  ;;  %s8205_s26 = sld [smem:[#allocation9 + $0xb]] }
 0x134   :  { %v288_v54 = vadd.f32 0.041655596, %v287_v8  ;;  %v441_v22 = vmul.f32 %v440_v20, %v438_v41  ;;  %v875_v43 = vsel %vm874_vm3, 1, %v12413_v2  ;;  %v296_v34 = vmul.f32 %v295_v36, %v6517_v25 }
 0x135   :  { %v589_v10 = vclz %v588_v47  ;;  %v743_v52 = vsel %vm741_vm4, %v742_v60, %v738_v51  ;;  %v5552_v59 = vadd.s32 4294967169, %v976_v13  ;;  %v739_v57 = vmul.u32 %v6394_v24, %v685_v21 }
 0x136   :  { %v899_v44 = vadd.s32 %v897_v37, %v895_v9  ;;  %v6616_v61 = vadd.f32 %v1133_v40, %v1131_v5  ;;  %v12583_v63 = vsub.s32 4, %v6187_v18  ;;  %v877_v8 = vadd.s32 %v875_v43, %v873_v16 }
 0x137   :  { %v289_v20 = vmul.f32 %v288_v54, %v6517_v25  ;;  %v442_v41 = vxor.u32 2147483648, %v441_v22  ;;  %v744_v32 = vadd.s32 %v743_v52, %v739_v57  ;;  %v889_v36 = vshrl.u32 %v6541_v28, 16 }
 0x138   :  { %12582 = vst [vmem:[#allocation27_spill] sm:$0xff] %v6616_v61  ;;  %v283_v15 = vsel %vm160_vm6, %v12583_v63, %v6187_v18  ;;  %v297_v51 = vadd.f32 -0.16666654, %v296_v34  ;;  %v5538_v12 = vadd.s32 4294967294, %v589_v10  ;;  %v867_v24 = vshrl.u32 %v6545_v55, 16 }
 0x139   :  { %v982_v0 = vadd.s32 1, %v5552_v59  ;;  %vm322_vm5 = vcmp.lt.s32.totalorder %v6024_v29, 0  ;;  %v900_v39 = vadd.s32 %v899_v44, %v889_v36  ;;  %v1138_v60 = vand.u32 2139095040, %v6616_v61 }
 0x13a   :  { %v285_v18 = vsel %vm6398_vm8, 0, %v283_v15  ;;  %v12584_v6 = vand.u32 2147483647, %v6024_v29  ;;  %v444_v28 = vsub.s32 4, %v6278_v11  ;;  %v878_v47 = vadd.s32 %v877_v8, %v867_v24 }
 0x13b   :  { %v290_v9 = vadd.f32 -0.4999988, %v289_v20  ;;  %v443_v55 = vsel %vm322_vm5, %v442_v41, %v441_v22  ;;  %v745_v5 = vadd.s32 536870912, %v744_v32  ;;  %v891_v21 = vshrl.u32 %v6565_v33, 16 }
 0x13c   :  { %vm6632_vm6 = vcmp.le.f32.partialorder %v12584_v6, 0.7853982  ;;  %v298_v16 = vmul.f32 %v297_v51, %v6517_v25  ;;  %vm5539_vm14 = vcmp.lt.s32.totalorder %v5538_v12, 0  ;;  %v869_v26 = vshrl.u32 %v6570_v50, 16 }
 0x13d   :  { %vm983_vm8 = vcmp.gt.s32.totalorder %v982_v0, 0  ;;  %v302_v37 = vadd.s32 3, %v285_v18  ;;  %v846_v40 = vsel %vm844_vm10, %v6463_v14, 2102212464  ;;  %v901_v54 = vadd.s32 %v900_v39, %v891_v21 }
 0x13e   :  { %v1139_v43 = vshrl.u32 %v1138_v60, 23  ;;  %v445_v22 = vsel %vm322_vm5, %v444_v28, %v6278_v11  ;;  %v6651_v34 = vsel %vm6632_vm6, %v6024_v29, %v443_v55  ;;  %v825_v50 = vshrl.u32 %v12418_v46, %v6379_v23 }
 0x13f   :  { %v6655_v10 = vadd.s32 %v878_v47, %v869_v26  ;;  %v291_v14 = vmul.f32 %v290_v9, %v6517_v25  ;;  %v592_v52 = vsel %vm5539_vm14, 0, %v5538_v12  ;;  %v6660_v59 = vshrl.u32 %v745_v5, 30 }
 0x140   :  { %v984_v57 = vsel %vm983_vm8, %v982_v0, 0  ;;  %v299_v44 = vadd.f32 1.0, %v298_v16  ;;  %v845_v11 = vsel %vm841_vm11, %v825_v50, %v6459_v48  ;;  %v847_v63 = vsel %vm843_vm12, %v6461_v38, %v846_v40 }
 0x141   :  { %12587 = vst [vmem:[#allocation28_spill] sm:$0xff] %v6660_v59  ;;  %v6671_v23 = vadd.s32 %v6578_v4, %v890_v49  ;;  %v447_v25 = vsel %vm6632_vm6, 0, %v445_v22  ;;  %v6677_v15 = vmul.f32 %v6651_v34, %v6651_v34  ;;  %v905_v8 = vadd.s32 1, %v901_v54 }
 0x142   :  { %v5557_v20 = vadd.s32 4294967169, %v1139_v43  ;;  %v597_v41 = vsub.s32 4294967266, %v592_v52  ;;  %v986_v48 = vand.u32 31, %v984_v57  ;;  %v6681_v38 = vand.u32 3, %v302_v37 }
 0x143   :  { %vm904_vm10 = vc.u32 %v6655_v10, %v6671_v23  ;;  %v747_v33 = vshll.u32 %v6660_v59, 30  ;;  %v848_v4 = vsel %vm842_vm15, %v845_v11, %v847_v63  ;;  %v6686_v49 = vadd.f32 1.0, %v291_v14 }
 0x144   :  { %v6689_v36 = vmul.f32 %v299_v44, %v6421_v62  ;;  %v464_v51 = vadd.s32 3, %v447_v25  ;;  %v449_v12 = vmul.f32 -0.001358992, %v6677_v15  ;;  %v456_v24 = vmul.f32 -0.00019511016, %v6677_v15 }
 0x145   :  { %v906_v0 = vsel %vm904_vm10, %v905_v8, %v901_v54  ;;  %v1145_v39 = vadd.s32 1, %v5557_v20  ;;  %v593_v60 = vsub.s32 32, %v592_v52  ;;  %v598_v18 = vadd.s32 127, %v597_v41 }
 0x146   :  { %v902_v6 = vmul.u32 %v6511_v45, %v848_v4  ;;  %v6694_v13 = vsub.s32 32, %v986_v48  ;;  %vm308_vm11 = vcmp.eq.s32.totalorder %v6681_v38, 2  ;;  %v6698_v28 = vsub.s32 %v744_v32, %v747_v33 }
 0x147   :  { %v309_v62 = vxor.u32 2147483648, %v6686_v49  ;;  %v6701_v47 = vand.u32 3, %v464_v51  ;;  %v577_v9 = vadd.s32 %v6411_v53, %v6382_v27  ;;  %v306_v5 = vxor.u32 2147483648, %v6689_v36 }
 0x148   :  { %v6705_v55 = vadd.s32 %v906_v0, %v902_v6  ;;  %v450_v21 = vadd.f32 0.041655596, %v449_v12  ;;  %v457_v45 = vadd.f32 0.008332121, %v456_v24  ;;  %vm1146_vm12 = vcmp.gt.s32.totalorder %v1145_v39, 0 }
 0x149   :  { %v595_v16 = vshrl.u32 %v577_v9, %v593_v60  ;;  %v599_v26 = vshll.u32 %v598_v18, 23  ;;  %v12588_v37 = vmov 920167782   ;;  %v12589_v40 = vmov 1326507024  }
 0x14a   :  { %v999_v32 = vshrl.u32 %v12588_v37, %v6694_v13  ;;  %v1002_v54 = vshrl.u32 %v12589_v40, %v6694_v13  ;;  %v594_v43 = vshll.u32 %v6563_v31, %v592_v52  ;;  %vm749_vm15 = vcmp.lt.s32.totalorder %v6698_v28, 0 }
 0x14b   :  { %v750_v27 = vsub.s32 0, %v6698_v28  ;;  %v12412_v53 = vand.u32 2147483647, %v6560_v30  ;;  %v908_v22 = vadd.s32 536870912, %v6705_v55  ;;  %v12590_v50 = vmov 2102212464  }
 0x14c   :  { %v998_v14 = vshll.u32 %v12590_v50, %v986_v48  ;;  %v1001_v44 = vshll.u32 %v12588_v37, %v986_v48  ;;  %v1147_v11 = vsel %vm1146_vm12, %v1145_v39, 0  ;;  %vm305_vm0 = vcmp.eq.s32.totalorder %v6681_v38, 0 }
 0x14d   :  { %v6720_v63 = vshrl.u32 %v984_v57, 5  ;;  %v12591_v25 = vmov 2475754826   ;;  %v12592_v52 = vmov 2131351028   ;;  %v996_v20 = vshrl.u32 %v12590_v50, %v6694_v13 }
 0x14e   :  { %v990_v31 = vshrl.u32 %v12591_v25, %v6694_v13  ;;  %v993_v8 = vshrl.u32 %v12592_v52, %v6694_v13  ;;  %v596_v41 = vor.u32 %v595_v16, %v594_v43  ;;  %v600_v33 = vor.u32 4788187, %v599_v26 }
 0x14f   :  { %v1000_v4 = vor.u32 %v999_v32, %v998_v14  ;;  %v1003_v51 = vor.u32 %v1002_v54, %v1001_v44  ;;  %v989_v12 = vshll.u32 %v12418_v46, %v986_v48  ;;  %v992_v24 = vshll.u32 %v12591_v25, %v986_v48 }
 0x150   :  { %v995_v57 = vshll.u32 %v12592_v52, %v986_v48  ;;  %v1149_v0 = vand.u32 31, %v1147_v11  ;;  %v6734_v39 = vsel %vm308_vm11, %v309_v62, %v6689_v36  ;;  %v751_v60 = vsel %vm749_vm15, %v750_v27, %v6698_v28 }
 0x151   :  { %v6739_v18 = vshrl.u32 %v908_v22, 30  ;;  %v979_v6 = vand.u32 8388607, %v12412_v53  ;;  %v6743_v9 = vor.u32 %v990_v31, %v989_v12  ;;  %v6745_v16 = vor.u32 %v993_v8, %v992_v24 }
 0x152   :  { %v6747_v48 = vor.u32 %v996_v20, %v995_v57  ;;  %vm1007_vm1 = vcmp.lt.s32.totalorder %v6720_v63, 4  ;;  %v451_v36 = vmul.f32 %v450_v21, %v6677_v15  ;;  %v458_v62 = vmul.f32 %v457_v45, %v6677_v15 }
 0x153   :  { %12593 = vst [vmem:[#allocation29_spill] sm:$0xff] %v6739_v18  ;;  %v1013_v26 = vsel %vm1007_vm1, %v1000_v4, 920167782  ;;  %v1017_v32 = vsel %vm1007_vm1, %v1003_v51, 1326507024  ;;  %v603_v43 = vcvt.s32.f32 %v596_v41  ;;  %v752_v27 = vclz %v751_v60 }
 0x154   :  { %v601_v54 = vand.u32 2147483647, %v600_v33  ;;  %v6756_v22 = vsub.s32 32, %v1149_v0  ;;  %v910_v14 = vshll.u32 %v6739_v18, 30  ;;  %v980_v44 = vor.u32 8388608, %v979_v6 }
 0x155   :  { %vm1004_vm7 = vcmp.lt.s32.totalorder %v6720_v63, 1  ;;  %vm1006_vm9 = vcmp.lt.s32.totalorder %v6720_v63, 3  ;;  %v6777_v20 = vsel %vm305_vm0, %v6686_v49, %v306_v5  ;;  %v6779_v41 = vadd.f32 -0.4999988, %v451_v36 }
 0x156   :  { %v1012_v21 = vsel %vm1004_vm7, %v6743_v9, %v6745_v16  ;;  %v1014_v45 = vsel %vm1006_vm9, %v6747_v48, %v1013_v26  ;;  %v1016_v31 = vsel %vm1004_vm7, %v6745_v16, %v6747_v48  ;;  %v1018_v8 = vsel %vm1006_vm9, %v1000_v4, %v1017_v32 }
 0x157   :  { %v459_v33 = vadd.f32 -0.16666654, %v458_v62  ;;  %vm485_vm13 = vcmp.lt.s32.totalorder %v6157_v42, 0  ;;  %v604_v12 = vmul.f32 %v603_v43, %v601_v54  ;;  %v5543_v24 = vadd.s32 4294967294, %v752_v27 }
 0x158   :  { %vm1005_vm2 = vcmp.lt.s32.totalorder %v6720_v63, 2  ;;  %v1162_v57 = vshrl.u32 %v12588_v37, %v6756_v22  ;;  %v12417_v5 = vand.u32 2147483647, %v6616_v61  ;;  %v1165_v60 = vshrl.u32 %v12589_v40, %v6756_v22 }
 0x159   :  { %v6788_v4 = vsel %vm1005_vm2, %v1012_v21, %v1014_v45  ;;  %v6792_v49 = vsel %vm1005_vm2, %v1016_v31, %v1018_v8  ;;  %v6798_v6 = vsub.s32 %v6705_v55, %v910_v14  ;;  %v6800_v36 = vshll.u32 %v980_v44, 8 }
 0x15a   :  { %v6802_v62 = vshrl.u32 %v1147_v11, 5  ;;  %v1161_v26 = vshll.u32 %v12590_v50, %v1149_v0  ;;  %v1153_v32 = vshrl.u32 %v12591_v25, %v6756_v22  ;;  %v1156_v54 = vshrl.u32 %v12592_v52, %v6756_v22 }
 0x15b   :  { %v1159_v43 = vshrl.u32 %v12590_v50, %v6756_v22  ;;  %v1164_v27 = vshll.u32 %v12588_v37, %v1149_v0  ;;  %v12594_v55 = vand.u32 2147483647, %v6157_v42  ;;  %v12595_v14 = vmov 0 }
 0x15c   :  { %v605_v11 = vxor.u32 2147483648, %v604_v12  ;;  %v12420_v21 = vshrl.u32 %v6788_v4, 16  ;;  %v1163_v45 = vor.u32 %v1162_v57, %v1161_v26  ;;  %v1152_v31 = vshll.u32 %v12418_v46, %v1149_v0 }
 0x15d   :  { %vm6814_vm3 = vcmp.le.f32.partialorder %v12594_v55, 0.7853982  ;;  %v1155_v8 = vshll.u32 %v12591_v25, %v1149_v0  ;;  %v1158_v53 = vshll.u32 %v12592_v52, %v1149_v0  ;;  %v1166_v58 = vor.u32 %v1165_v60, %v1164_v27 }
 0x15e   :  { %v12596_v14 = vsel %vm6814_vm3, 4294967295, %v12595_v14  ;;  %vm5544_vm4 = vcmp.lt.s32.totalorder %v5543_v24, 0  ;;  %v913_v51 = vsub.s32 0, %v6798_v6  ;;  %v1021_v55 = vand.u32 65535, %v6800_v36 }
 0x15f   :  { %12597 = vst [vmem:[#allocation30_spill] sm:$0xff] %v12596_v14  ;;  %v1142_v2 = vand.u32 8388607, %v12417_v5  ;;  %v6827_v30 = vor.u32 %v1153_v32, %v1152_v31  ;;  %v6829_v44 = vor.u32 %v1156_v54, %v1155_v8  ;;  %v6831_v57 = vor.u32 %v1159_v43, %v1158_v53 }
 0x160   :  { %vm1170_vm5 = vcmp.lt.s32.totalorder %v6802_v62, 4  ;;  %v6835_v26 = vmul.f32 %v459_v33, %v6677_v15  ;;  %vm912_vm6 = vcmp.lt.s32.totalorder %v6798_v6, 0  ;;  %v6840_v0 = vmul.u32 %v12420_v21, %v1021_v55 }
 0x161   :  { %12598 = vst [vmem:[#allocation31_spill] sm:$0xff] %v6827_v30  ;;  %v1176_v60 = vsel %vm1170_vm5, %v1163_v45, 920167782  ;;  %v606_v32 = vsel %vm485_vm13, %v605_v11, %v604_v12  ;;  %v6846_v54 = vsel %vm5544_vm4, 0, %v5543_v24  ;;  %v12600_v53 = vshrl.u32 %v6792_v49, 16 }
 0x162   :  { %12599 = vst [vmem:[#allocation32_spill] sm:$0xff] %v6829_v44  ;;  %v1180_v33 = vsel %vm1170_vm5, %v1166_v58, 1326507024  ;;  %v1045_v27 = vand.u32 65535, %v6788_v4  ;;  %v1143_v31 = vor.u32 8388608, %v1142_v2  ;;  %vm1167_vm14 = vcmp.lt.s32.totalorder %v6802_v62, 1 }
 0x163   :  { %v6850_v43 = vmul.u32 %v12600_v53, %v1021_v55  ;;  %vm1169_vm8 = vcmp.lt.s32.totalorder %v6802_v62, 3  ;;  %v914_v8 = vsel %vm912_vm6, %v913_v51, %v6798_v6  ;;  %v1023_v12 = vand.u32 65535, %v6792_v49 }
 0x164   :  { %v1175_v24 = vsel %vm1167_vm14, %v6827_v30, %v6829_v44  ;;  %v1177_v58 = vsel %vm1169_vm8, %v6831_v57, %v1176_v60  ;;  %v1022_v11 = vshrl.u32 %v6800_v36, 16  ;;  %v1051_v2 = vshll.u32 %v6840_v0, 16 }
 0x165   :  { %v1179_v51 = vsel %vm1167_vm14, %v6829_v44, %v6831_v57  ;;  %v1181_v53 = vsel %vm1169_vm8, %v1163_v45, %v1180_v33  ;;  %v6877_v5 = vsel %vm6814_vm3, %v6157_v42, %v606_v32  ;;  %v760_v46 = vsub.s32 4294967266, %v6846_v54 }
 0x166   :  { %12601 = vst [vmem:[#allocation33_spill] sm:$0xff] %v6877_v5  ;;  %v1029_v60 = vshll.u32 %v6850_v43, 16  ;;  %vm1168_vm10 = vcmp.lt.s32.totalorder %v6802_v62, 2  ;;  %v915_v21 = vclz %v914_v8  ;;  %v1047_v61 = vmul.u32 %v1045_v27, %v1021_v55 }
 0x167   :  { %v6882_v18 = vmul.u32 %v1045_v27, %v1022_v11  ;;  %v6886_v52 = vsel %vm1168_vm10, %v1175_v24, %v1177_v58  ;;  %v1025_v45 = vmul.u32 %v1023_v12, %v1021_v55  ;;  %v6888_v33 = vmul.u32 %v1023_v12, %v1022_v11 }
 0x168   :  { %v6892_v32 = vsel %vm1168_vm10, %v1179_v51, %v1181_v53  ;;  %v6894_v25 = vshll.u32 %v1143_v31, 8  ;;  %v6900_v8 = vmul.f32 %v6877_v5, %v6877_v5  ;;  %v756_v27 = vsub.s32 32, %v6846_v54 }
 0x169   :  { %vm1055_vm11 = vc.u32 %v1047_v61, %v1051_v2  ;;  %v6903_v24 = vadd.s32 %v1051_v2, %v1047_v61  ;;  %v761_v55 = vadd.s32 127, %v760_v46  ;;  %vm1033_vm12 = vc.u32 %v1025_v45, %v1029_v60 }
 0x16a   :  { %12602 = vst [vmem:[#allocation34_spill] sm:$0xff] %v6894_v25  ;;  %v1035_v12 = vadd.s32 %v1029_v60, %v1025_v45  ;;  %v12433_v58 = vshrl.u32 %v6886_v52, 16  ;;  %v740_v31 = vadd.s32 %v6597_v56, %v6583_v3  ;;  %v5548_v51 = vadd.s32 4294967294, %v915_v21 }
 0x16b   :  { %v12432_v53 = vshll.u32 %v6882_v18, 16  ;;  %v757_v40 = vshll.u32 %v6698_v28, %v6846_v54  ;;  %v1031_v37 = vshll.u32 %v6888_v33, 16  ;;  %v12603_v61 = vmov 0  }
 0x16c   :  { %v1056_v2 = vsel %vm1055_vm11, 1, %v12603_v61  ;;  %v1184_v46 = vand.u32 65535, %v6894_v25  ;;  %v758_v60 = vshrl.u32 %v740_v31, %v756_v27  ;;  %v1034_v45 = vsel %vm1033_vm12, 1, %v12603_v61 }
 0x16d   :  { %v12604_v3 = vshrl.u32 %v6788_v4, 16  ;;  %vm1059_vm15 = vc.u32 %v6903_v24, %v12432_v53  ;;  %v762_v21 = vshll.u32 %v761_v55, 23  ;;  %v12605_v28 = vshrl.u32 %v6792_v49, 16 }
 0x16e   :  { %vm1037_vm0 = vc.u32 %v1035_v12, %v1031_v37  ;;  %v6925_v50 = vmul.u32 %v12433_v58, %v1184_v46  ;;  %vm5549_vm4 = vcmp.lt.s32.totalorder %v5548_v51, 0  ;;  %v12606_v31 = vshrl.u32 %v6892_v32, 16 }
 0x16f   :  { %v1050_v56 = vmul.u32 %v12604_v3, %v1022_v11  ;;  %v1028_v54 = vmul.u32 %v12605_v28, %v1022_v11  ;;  %v1294_v4 = vmul.f32 0.0023713738, %v6015_v17  ;;  %v1060_v53 = vsel %vm1059_vm15, 1, %v12603_v61 }
 0x170   :  { %v6929_v59 = vmul.u32 %v12606_v31, %v1184_v46  ;;  %v1208_v55 = vand.u32 65535, %v6886_v52  ;;  %v1296_v49 = vstv %s6896_s28  ;;  %v6936_v37 = vadd.f32 1.0, %v6835_v26  ;;  %s8233_s28 = sld [smem:[#allocation9 + $0xd]] }
 0x171   :  { %v1058_v27 = vadd.s32 %v1056_v2, %v1050_v56  ;;  %v1036_v3 = vadd.s32 %v1034_v45, %v1028_v54  ;;  %v612_v11 = vmul.f32 -0.001358992, %v6900_v8  ;;  %v1038_v12 = vsel %vm1037_vm0, 1, %v12603_v61  ;;  %v12622_v62 = vld [vmem:[#allocation34_spill] sm:$0xff] }
 0x172   :  { %v1186_v2 = vand.u32 65535, %v6892_v32  ;;  %v759_v56 = vor.u32 %v758_v60, %v757_v40  ;;  %v6941_v28 = vsel %vm5549_vm4, 0, %v5548_v51  ;;  %v1185_v17 = vshrl.u32 %v6894_v25, 16 }
 0x173   :  { %v1214_v45 = vshll.u32 %v6925_v50, 16  ;;  %v619_v54 = vmul.f32 -0.00019511016, %v6900_v8  ;;  %v1062_v31 = vadd.s32 %v1060_v53, %v1058_v27  ;;  %v1192_v58 = vshll.u32 %v6929_v59, 16 }
 0x174   :  { %v6947_v26 = vadd.f32 %v1296_v49, %v1294_v4  ;;  %v763_v35 = vor.u32 4788187, %v762_v21  ;;  %v1040_v5 = vadd.s32 %v1038_v12, %v1036_v3  ;;  %v1210_v14 = vmul.u32 %v1208_v55, %v1184_v46 }
 0x175   :  { %v6949_v44 = vmul.u32 %v1208_v55, %v1185_v17  ;;  %v923_v40 = vsub.s32 4294967266, %v6941_v28  ;;  %v1052_v51 = vshrl.u32 %v6840_v0, 16  ;;  %v1188_v60 = vmul.u32 %v1186_v2, %v1184_v46 }
 0x176   :  { %12607 = vst [vmem:[#allocation35_spill] sm:$0xff] %v6947_v26  ;;  %v6953_v25 = vmul.u32 %v1186_v2, %v1185_v17  ;;  %v766_v30 = vcvt.s32.f32 %v759_v56  ;;  %v1030_v29 = vshrl.u32 %v6850_v43, 16  ;;  %vm1218_vm6 = vc.u32 %v1210_v14, %v1214_v45 }
 0x177   :  { %v6956_v53 = vadd.s32 %v1214_v45, %v1210_v14  ;;  %v1063_v27 = vadd.s32 %v1062_v31, %v1052_v51  ;;  %vm1196_vm11 = vc.u32 %v1188_v60, %v1192_v58  ;;  %v1198_v21 = vadd.s32 %v1192_v58, %v1188_v60 }
 0x178   :  { %v1301_v4 = vand.u32 2139095040, %v6947_v26  ;;  %v764_v3 = vand.u32 2147483647, %v763_v35  ;;  %v1009_v55 = vsel %vm1007_vm1, %v6747_v48, 2102212464  ;;  %v1041_v0 = vadd.s32 %v1040_v5, %v1030_v29 }
 0x179   :  { %v12445_v46 = vshll.u32 %v6949_v44, 16  ;;  %v924_v49 = vadd.s32 127, %v923_v40  ;;  %v1054_v12 = vshrl.u32 %v6882_v18, 16  ;;  %v1194_v43 = vshll.u32 %v6953_v25, 16 }
 0x17a   :  { %v1219_v14 = vsel %vm1218_vm6, 1, %v12603_v61  ;;  %v1032_v2 = vshrl.u32 %v6888_v33, 16  ;;  %v1197_v58 = vsel %vm1196_vm11, 1, %v12603_v61  ;;  %v12608_v35 = vshrl.u32 %v6886_v52, 16 }
 0x17b   :  { %vm1222_vm1 = vc.u32 %v6956_v53, %v12445_v46  ;;  %vm648_vm12 = vcmp.lt.s32.totalorder %v6221_v7, 0  ;;  %v1064_v29 = vadd.s32 %v1063_v27, %v1054_v12  ;;  %v12609_v48 = vshrl.u32 %v6892_v32, 16 }
 0x17c   :  { %v1213_v56 = vmul.u32 %v12608_v35, %v1185_v17  ;;  %vm1200_vm15 = vc.u32 %v1198_v21, %v1194_v43  ;;  %v1302_v45 = vshrl.u32 %v1301_v4, 23  ;;  %v767_v31 = vmul.f32 %v766_v30, %v764_v3 }
 0x17d   :  { %v1191_v5 = vmul.u32 %v12609_v48, %v1185_v17  ;;  %v12610_v33 = vmov 683565275   ;;  %v6978_v51 = vadd.s32 %v1041_v0, %v1032_v2  ;;  %v620_v60 = vadd.f32 0.008332121, %v619_v54 }
 0x17e   :  { %v988_v40 = vshrl.u32 %v12610_v33, %v6694_v13  ;;  %v1221_v52 = vadd.s32 %v1219_v14, %v1213_v56  ;;  %v919_v35 = vsub.s32 32, %v6941_v28  ;;  %v1223_v46 = vsel %vm1222_vm1, 1, %v12603_v61 }
 0x17f   :  { %v1199_v26 = vadd.s32 %v1197_v58, %v1191_v5  ;;  %v1010_v30 = vsel %vm1006_vm9, %v6745_v16, %v1009_v55  ;;  %v12611_v17 = vshll.u32 %v6882_v18, 16  ;;  %v1201_v54 = vsel %vm1200_vm15, 1, %v12603_v61 }
 0x180   :  { %v1008_v32 = vsel %vm1004_vm7, %v988_v40, %v6743_v9  ;;  %v903_v27 = vadd.s32 %v6671_v23, %v6655_v10  ;;  %v925_v21 = vshll.u32 %v924_v49, 23  ;;  %v1068_v4 = vadd.s32 1, %v1064_v29 }
 0x181   :  { %v6991_v13 = vadd.s32 %v6903_v24, %v12611_v17  ;;  %v5562_v3 = vadd.s32 4294967169, %v1302_v45  ;;  %v613_v0 = vadd.f32 0.041655596, %v612_v11  ;;  %v768_v12 = vxor.u32 2147483648, %v767_v31 }
 0x182   :  { %v1225_v9 = vadd.s32 %v1223_v46, %v1221_v52  ;;  %vm304_vm9 = vcmp.lt.s32.totalorder %v6681_v38, 2  ;;  %v621_v18 = vmul.f32 %v620_v60, %v6900_v8  ;;  %v921_v16 = vshrl.u32 %v903_v27, %v919_v35  ;;  %v12616_v27 = vld [vmem:[#allocation24_spill] sm:$0xff] }
 0x183   :  { %vm1067_vm7 = vc.u32 %v6978_v51, %v6991_v13  ;;  %v1011_v24 = vsel %vm1005_vm2, %v1008_v32, %v1010_v30  ;;  %v1203_v55 = vadd.s32 %v1201_v54, %v1199_v26  ;;  %v453_v10 = vmul.f32 %v6779_v41, %v6677_v15 }
 0x184   :  { %v462_v23 = vmul.f32 %v6936_v37, %v6651_v34  ;;  %v920_v11 = vshll.u32 %v6798_v6, %v6941_v28  ;;  %v1215_v46 = vshrl.u32 %v6925_v50, 16  ;;  %v926_v49 = vor.u32 4788187, %v925_v21 }
 0x185   :  { %v1069_v43 = vsel %vm1067_vm7, %v1068_v4, %v1064_v29  ;;  %v1193_v14 = vshrl.u32 %v6929_v59, 16  ;;  %v1308_v2 = vadd.s32 1, %v5562_v3  ;;  %vm467_vm0 = vcmp.eq.s32.totalorder %v6701_v47, 0  ;;  %v12618_v3 = vld [vmem:[#allocation32_spill] sm:$0xff] }
 0x186   :  { %v614_v63 = vmul.f32 %v613_v0, %v6900_v8  ;;  %v769_v15 = vsel %vm648_vm12, %v768_v12, %v767_v31  ;;  %v1065_v41 = vmul.u32 %v6800_v36, %v1011_v24  ;;  %v1226_v34 = vadd.s32 %v1225_v9, %v1215_v46 }
 0x187   :  { %v622_v37 = vadd.f32 -0.16666654, %v621_v18  ;;  %v12612_v6 = vand.u32 2147483647, %v6221_v7  ;;  %v922_v28 = vor.u32 %v921_v16, %v920_v11  ;;  %v1204_v59 = vadd.s32 %v1203_v55, %v1193_v14 }
 0x188   :  { %vm301_vm4 = vweird.f32 %v6018_v19  ;;  %v454_v26 = vadd.f32 1.0, %v453_v10  ;;  %v12615_v58 = vsub.s32 4, %v6532_v1  ;;  %v7027_v36 = vadd.s32 %v1069_v43, %v1065_v41  ;;  %v12621_v41 = vld [vmem:[#allocation33_spill] sm:$0xff] }
 0x189   :  { %vm7017_vm2 = vcmp.le.f32.partialorder %v12612_v6, 0.7853982  ;;  %v1217_v29 = vshrl.u32 %v6949_v44, 16  ;;  %v927_v5 = vand.u32 2147483647, %v926_v49  ;;  %v1195_v45 = vshrl.u32 %v6953_v25, 16 }
 0x18a   :  { %v608_v56 = vsel %vm485_vm13, %v12615_v58, %v6532_v1  ;;  %v7033_v48 = vsel %vm7017_vm2, %v6221_v7, %v769_v15  ;;  %vm1309_vm6 = vcmp.gt.s32.totalorder %v1308_v2, 0  ;;  %v468_v31 = vxor.u32 2147483648, %v462_v23 }
 0x18b   :  { %v615_v40 = vadd.f32 -0.4999988, %v614_v63  ;;  %v1172_v52 = vsel %vm1170_vm5, %v6831_v57, 2102212464  ;;  %v1227_v1 = vadd.s32 %v1226_v34, %v1217_v29  ;;  %v623_v60 = vmul.f32 %v622_v37, %v6900_v8 }
 0x18c   :  { %v929_v35 = vcvt.s32.f32 %v922_v28  ;;  %v1151_v32 = vshrl.u32 %v12610_v33, %v6756_v22  ;;  %v7042_v30 = vadd.s32 %v1204_v59, %v1195_v45  ;;  %v311_v25 = vsel %vm304_vm9, %v6777_v20, %v6734_v39  ;;  %v12617_v22 = vld [vmem:[#allocation31_spill] sm:$0xff]  ;;  %v12623_v59 = vld [vmem:[#allocation25_spill] sm:$0xff] }
 0x18d   :  { %v7050_v17 = vmul.f32 %v7033_v48, %v7033_v48  ;;  %v1071_v57 = vadd.s32 536870912, %v7027_v36  ;;  %v1310_v54 = vsel %vm1309_vm6, %v1308_v2, 0  ;;  %vm463_vm13 = vweird.f32 %v12616_v27 }
 0x18e   :  { %v930_v21 = vmul.f32 %v929_v35, %v927_v5  ;;  %v1171_v4 = vsel %vm1167_vm14, %v1151_v32, %v12617_v22  ;;  %v1173_v38 = vsel %vm1169_vm8, %v12618_v3, %v1172_v52  ;;  %v12619_v39 = vshll.u32 %v6949_v44, 16 }
 0x18f   :  { %v471_v0 = vxor.u32 2147483648, %v454_v26  ;;  %v610_v9 = vsel %vm6814_vm3, 0, %v608_v56  ;;  %v616_v18 = vmul.f32 %v615_v40, %v6900_v8  ;;  %v1231_v16 = vadd.s32 1, %v1227_v1 }
 0x190   :  { %v7065_v20 = vadd.s32 %v6956_v53, %v12619_v39  ;;  %v469_v24 = vsel %vm467_vm0, %v454_v26, %v468_v31  ;;  %v624_v55 = vadd.f32 1.0, %v623_v60  ;;  %v1312_v10 = vand.u32 31, %v1310_v54  ;;  %v12628_v60 = vld [vmem:[#allocation28_spill] sm:$0xff]  ;;  %v12631_v39 = vld [vmem:[#allocation35_spill] sm:$0xff] }
 0x191   :  { %v775_v44 = vmul.f32 -0.001358992, %v7050_v17  ;;  %v782_v53 = vmul.f32 -0.00019511016, %v7050_v17  ;;  %v7076_v11 = vshrl.u32 %v1071_v57, 30  ;;  %v1174_v46 = vsel %vm1168_vm10, %v1171_v4, %v1173_v38 }
 0x192   :  { %vm1230_vm5 = vc.u32 %v7042_v30, %v7065_v20  ;;  %v312_v8 = vsel %vm301_vm4, nan, %v311_v25  ;;  %vm466_vm3 = vcmp.lt.s32.totalorder %v6701_v47, 2  ;;  %vm470_vm14 = vcmp.eq.s32.totalorder %v6701_v47, 2 }
 0x193   :  { %v931_v49 = vxor.u32 2147483648, %v930_v21  ;;  %v472_v43 = vsel %vm470_vm14, %v471_v0, %v462_v23  ;;  %v7084_v14 = vadd.f32 1.0, %v616_v18  ;;  %v627_v2 = vadd.s32 3, %v610_v9 }
 0x194   :  { %v1232_v63 = vsel %vm1230_vm5, %v1231_v16, %v1227_v1  ;;  %v473_v15 = vsel %vm466_vm3, %v469_v24, %v472_v43  ;;  %v7087_v34 = vmul.f32 %v624_v55, %v12621_v41  ;;  %v1228_v37 = vmul.u32 %v12622_v62, %v1174_v46  ;;  %v7149_v43 = vld [vmem:[#allocation7] sm:$0xff] }
 0x195   :  { %v7090_v19 = vsub.s32 32, %v1312_v10  ;;  %v776_v6 = vadd.f32 0.041655596, %v775_v44  ;;  %v783_v28 = vadd.f32 0.008332121, %v782_v53  ;;  %vm811_vm8 = vcmp.lt.s32.totalorder %v12623_v59, 0 }
 0x196   :  { %v1073_v47 = vshll.u32 %v7076_v11, 30  ;;  %v12624_v26 = vstv %s6657_s27  ;;  %v475_v58 = vstv %s7053_s6  ;;  %v932_v56 = vsel %vm811_vm8, %v931_v49, %v930_v21  ;;  %12635 = vst [vmem:[#allocation24_spill] sm:$0xff] %v7149_v43  ;;  %s8215_s27 = sld [smem:[#allocation9 + $0xc]] }
 0x197   :  { %v7096_v23 = vmul.f32 %v12624_v26, %v312_v8  ;;  %v7101_v29 = vadd.s32 %v1232_v63, %v1228_v37  ;;  %v7105_v5 = vsel %vm463_vm13, nan, %v473_v15  ;;  %v7107_v45 = vand.u32 3, %v627_v2  ;;  %v2776_v2 = vpop.permute.xlu2 %2775  ;;  %s8239_s6 = sld [smem:[#allocation9 + $0xe]] }
 0x198   :  { %v634_v31 = vxor.u32 2147483648, %v7084_v14  ;;  %v12625_v40 = vand.u32 2147483647, %v12623_v59  ;;  %v631_v1 = vxor.u32 2147483648, %v7087_v34  ;;  %v770_v35 = vsub.s32 4, %v12628_v60 }
 0x199   :  { %v12629_v32 = vmov 920167782   ;;  %v12630_v57 = vmov 1326507024   ;;  %v777_v21 = vmul.f32 %v776_v6, %v7050_v17  ;;  %v784_v22 = vmul.f32 %v783_v28, %v7050_v17 }
 0x19a   :  { %vm7112_vm10 = vcmp.le.f32.partialorder %v12625_v40, 0.7853982  ;;  %v1325_v25 = vshrl.u32 %v12629_v32, %v7090_v19  ;;  %v1328_v27 = vshrl.u32 %v12630_v57, %v7090_v19  ;;  %v7130_v3 = vsub.s32 %v7027_v36, %v1073_v47 }
 0x19b   :  { %v7127_v4 = vsel %vm7112_vm10, %v12623_v59, %v932_v56  ;;  %v1234_v38 = vadd.s32 536870912, %v7101_v29  ;;  %v12446_v0 = vand.u32 2147483647, %v12631_v39  ;;  %v12632_v12 = vmov 2102212464  }
 0x19c   :  { %v1324_v9 = vshll.u32 %v12632_v12, %v1312_v10  ;;  %v1327_v18 = vshll.u32 %v12629_v32, %v1312_v10  ;;  %vm630_vm11 = vcmp.eq.s32.totalorder %v7107_v45, 0  ;;  %v7137_v16 = vshrl.u32 %v1310_v54, 5 }
 0x19d   :  { %v12633_v24 = vmov 2475754826   ;;  %v12634_v44 = vmov 2131351028   ;;  %v1322_v36 = vshrl.u32 %v12632_v12, %v7090_v19  ;;  %v7147_v46 = vmul.f32 %v7127_v4, %v7127_v4 }
 0x19e   :  { %v1316_v55 = vshrl.u32 %v12633_v24, %v7090_v19  ;;  %v1319_v53 = vshrl.u32 %v12634_v44, %v7090_v19  ;;  %v1326_v8 = vor.u32 %v1325_v25, %v1324_v9  ;;  %v1329_v49 = vor.u32 %v1328_v27, %v1327_v18 }
 0x19f   :  { %v2778_v54 = vperm.slane %v7149_v43, 4  ;;  %v1076_v63 = vsub.s32 0, %v7130_v3  ;;  %v1315_v15 = vshll.u32 %v12610_v33, %v1312_v10  ;;  %v1318_v41 = vshll.u32 %v12633_v24, %v1312_v10 }
 0x1a0   :  { %v1321_v62 = vshll.u32 %v12634_v44, %v1312_v10  ;;  %vm633_vm1 = vcmp.eq.s32.totalorder %v7107_v45, 2  ;;  %v771_v37 = vsel %vm648_vm12, %v770_v35, %v12628_v60  ;;  %vm1075_vm15 = vcmp.lt.s32.totalorder %v7130_v3, 0 }
 0x1a1   :  { %v7163_v6 = vshrl.u32 %v1234_v38, 30  ;;  %v1305_v28 = vand.u32 8388607, %v12446_v0  ;;  %vm629_vm7 = vcmp.lt.s32.totalorder %v7107_v45, 2  ;;  %v7170_v10 = vor.u32 %v1316_v55, %v1315_v15  ;;  %v12636_v15 = vld [vmem:[#allocation29_spill] sm:$0xff] }
 0x1a2   :  { %v7172_v47 = vor.u32 %v1319_v53, %v1318_v41  ;;  %v7174_v26 = vor.u32 %v1322_v36, %v1321_v62  ;;  %vm1333_vm9 = vcmp.lt.s32.totalorder %v7137_v16, 4  ;;  %v785_v56 = vadd.f32 -0.16666654, %v784_v22 }
 0x1a3   :  { %v1339_v40 = vsel %vm1333_vm9, %v1326_v8, 920167782  ;;  %v1343_v60 = vsel %vm1333_vm9, %v1329_v49, 1326507024  ;;  %v2779_v35 = vsub.f32 %v2776_v2, %v2778_v54  ;;  %v773_v25 = vsel %vm7017_vm2, 0, %v771_v37 }
 0x1a4   :  { %v778_v27 = vadd.f32 -0.4999988, %v777_v21  ;;  %v945_v38 = vmul.f32 -0.00019511016, %v7147_v46  ;;  %v1077_v9 = vsel %vm1075_vm15, %v1076_v63, %v7130_v3  ;;  %vm626_vm12 = vweird.f32 %v6157_v42 }
 0x1a5   :  { %v1236_v22 = vshll.u32 %v7163_v6, 30  ;;  %v1306_v18 = vor.u32 8388608, %v1305_v28  ;;  %vm1330_vm0 = vcmp.lt.s32.totalorder %v7137_v16, 1  ;;  %vm1332_vm4 = vcmp.lt.s32.totalorder %v7137_v16, 3 }
 0x1a6   :  { %v1338_v50 = vsel %vm1330_vm0, %v7170_v10, %v7172_v47  ;;  %v1340_v21 = vsel %vm1332_vm4, %v7174_v26, %v1339_v40  ;;  %v1342_v55 = vsel %vm1330_vm0, %v7172_v47, %v7174_v26  ;;  %v1344_v53 = vsel %vm1332_vm4, %v1326_v8, %v1343_v60 }
 0x1a7   :  { %v632_v36 = vsel %vm630_vm11, %v7084_v14, %v631_v1  ;;  %v786_v49 = vmul.f32 %v785_v56, %v7050_v17  ;;  %v1078_v54 = vclz %v1077_v9  ;;  %v7208_v2 = vmul.f32 100.0, %v2779_v35 }
 0x1a8   :  { %v790_v63 = vadd.s32 3, %v773_v25  ;;  %v933_v41 = vsub.s32 4, %v12636_v15  ;;  %vm1331_vm2 = vcmp.lt.s32.totalorder %v7137_v16, 2  ;;  %v2783_v62 = vstv %s7156_s29  ;;  %s8261_s29 = sld [smem:[#allocation9 + $0xf]] }
 0x1a9   :  { %v938_v37 = vmul.f32 -0.001358992, %v7147_v46  ;;  %v946_v8 = vadd.f32 0.008332121, %v945_v38  ;;  %v7216_v28 = vsel %vm1331_vm2, %v1338_v50, %v1340_v21  ;;  %v7220_v1 = vsel %vm1331_vm2, %v1342_v55, %v1344_v53 }
 0x1aa   :  { %v635_v56 = vsel %vm633_vm1, %v634_v31, %v7087_v34  ;;  %v779_v40 = vmul.f32 %v778_v27, %v7050_v17  ;;  %v7229_v60 = vsub.s32 %v7101_v29, %v1236_v22  ;;  %v7231_v35 = vshll.u32 %v1306_v18, 8 }
 0x1ab   :  { %v636_v25 = vsel %vm629_vm7, %v632_v36, %v635_v56  ;;  %v787_v38 = vadd.f32 1.0, %v786_v49  ;;  %v5553_v9 = vadd.s32 4294967294, %v1078_v54  ;;  %v7236_v50 = vadd.f32 %v2783_v62, %v7208_v2 }
 0x1ac   :  { %v476_v14 = vmul.f32 %v475_v58, %v7105_v5  ;;  %v638_v21 = vstv %s7167_s30  ;;  %v12448_v34 = vshrl.u32 %v7220_v1, 16  ;;  %v12447_v17 = vshrl.u32 %v7216_v28, 16  ;;  %s8346_s30 = sld [smem:[#allocation10 + $0x16]] }
 0x1ad   :  { %12637 = vst [vmem:[#allocation31_spill] sm:$0xff] %v7236_v50  ;;  %v7244_v29 = vand.u32 3, %v790_v63  ;;  %v934_v45 = vsel %vm811_vm8, %v933_v41, %v12636_v15  ;;  %v939_v31 = vadd.f32 0.041655596, %v938_v37  ;;  %v947_v27 = vmul.f32 %v946_v8, %v7147_v46 }
 0x1ae   :  { %v637_v22 = vsel %vm626_vm12, nan, %v636_v25  ;;  %v780_v18 = vadd.f32 1.0, %v779_v40  ;;  %v1239_v58 = vsub.s32 0, %v7229_v60  ;;  %v1347_v5 = vand.u32 65535, %v7231_v35 }
 0x1af   :  { %v788_v55 = vmul.f32 %v787_v38, %v7033_v48  ;;  %vm5554_vm6 = vcmp.lt.s32.totalorder %v5553_v9, 0  ;;  %vm1238_vm13 = vcmp.lt.s32.totalorder %v7229_v60, 0  ;;  %v2788_v53 = vand.u32 2139095040, %v7236_v50 }
 0x1b0   :  { %v7258_v36 = vadd.f32 %v476_v14, %v7096_v23  ;;  %v936_v49 = vsel %vm7112_vm10, 0, %v934_v45  ;;  %v7264_v42 = vmul.u32 %v12448_v34, %v1347_v5  ;;  %v7268_v54 = vmul.u32 %v12447_v17, %v1347_v5 }
 0x1b1   :  { %v7270_v48 = vmul.f32 %v638_v21, %v637_v22  ;;  %vm793_vm5 = vcmp.eq.s32.totalorder %v7244_v29, 0  ;;  %v940_v63 = vmul.f32 %v939_v31, %v7147_v46  ;;  %v948_v15 = vadd.f32 -0.16666654, %v947_v27 }
 0x1b2   :  { %v7274_v23 = vsel %vm5554_vm6, 0, %v5553_v9  ;;  %v1240_v52 = vsel %vm1238_vm13, %v1239_v58, %v7229_v60  ;;  %v1349_v41 = vand.u32 65535, %v7220_v1  ;;  %v1371_v62 = vand.u32 65535, %v7216_v28 }
 0x1b3   :  { %v794_v37 = vxor.u32 2147483648, %v788_v55  ;;  %v797_v8 = vxor.u32 2147483648, %v780_v18  ;;  %v953_v56 = vadd.s32 3, %v936_v49  ;;  %v2789_v40 = vshrl.u32 %v2788_v53, 23 }
 0x1b4   :  { %vm792_vm3 = vcmp.lt.s32.totalorder %v7244_v29, 2  ;;  %vm796_vm14 = vcmp.eq.s32.totalorder %v7244_v29, 2  ;;  %v1348_v25 = vshrl.u32 %v7231_v35, 16  ;;  %v1355_v38 = vshll.u32 %v7264_v42, 16 }
 0x1b5   :  { %v1377_v9 = vshll.u32 %v7268_v54, 16  ;;  %v941_v14 = vadd.f32 -0.4999988, %v940_v63  ;;  %v949_v21 = vmul.f32 %v948_v15, %v7147_v46  ;;  %v1086_v45 = vsub.s32 4294967266, %v7274_v23 }
 0x1b6   :  { %v1241_v31 = vclz %v1240_v52  ;;  %v1351_v27 = vmul.u32 %v1349_v41, %v1347_v5  ;;  %v7288_v22 = vmul.u32 %v1349_v41, %v1348_v25  ;;  %v1373_v58 = vmul.u32 %v1371_v62, %v1347_v5 }
 0x1b7   :  { %v7290_v53 = vmul.u32 %v1371_v62, %v1348_v25  ;;  %v795_v49 = vsel %vm793_vm5, %v780_v18, %v794_v37  ;;  %v798_v0 = vsel %vm796_vm14, %v797_v8, %v788_v55  ;;  %v7294_v17 = vand.u32 3, %v953_v56 }
 0x1b8   :  { %v5607_v34 = vadd.s32 4294967169, %v2789_v40  ;;  %vm789_vm8 = vweird.f32 %v6221_v7  ;;  %vm1359_vm10 = vc.u32 %v1351_v27, %v1355_v38  ;;  %v1361_v63 = vadd.s32 %v1355_v38, %v1351_v27 }
 0x1b9   :  { %vm1381_vm11 = vc.u32 %v1373_v58, %v1377_v9  ;;  %v7299_v15 = vadd.s32 %v1377_v9, %v1373_v58  ;;  %v942_v5 = vmul.f32 %v941_v14, %v7147_v46  ;;  %v950_v52 = vadd.f32 1.0, %v949_v21 }
 0x1ba   :  { %v1082_v41 = vsub.s32 32, %v7274_v23  ;;  %v1087_v18 = vadd.s32 127, %v1086_v45  ;;  %v5558_v55 = vadd.s32 4294967294, %v1241_v31  ;;  %v1357_v62 = vshll.u32 %v7288_v22, 16 }
 0x1bb   :  { %v1379_v37 = vshll.u32 %v7290_v53, 16  ;;  %v2943_v8 = vmul.f32 0.4216965, %v7208_v2  ;;  %v1360_v56 = vsel %vm1359_vm10, 1, %v12603_v61  ;;  %v1382_v40 = vsel %vm1381_vm11, 1, %v12603_v61 }
 0x1bc   :  { %v2795_v38 = vadd.s32 1, %v5607_v34  ;;  %v2945_v9 = vstv %s7279_s11  ;;  %v12638_v27 = vshrl.u32 %v7220_v1, 16  ;;  %vm1363_vm1 = vc.u32 %v1361_v63, %v1357_v62  ;;  %s8510_s11 = sld [smem:[#allocation9 + $0x10]] }
 0x1bd   :  { %v12639_v14 = vshrl.u32 %v7216_v28, 16  ;;  %vm1385_vm15 = vc.u32 %v7299_v15, %v1379_v37  ;;  %v799_v45 = vsel %vm792_vm3, %v795_v49, %v798_v0  ;;  %v943_v31 = vadd.f32 1.0, %v942_v5  ;;  %v12641_v49 = vld [vmem:[#allocation26_spill] sm:$0xff] }
 0x1be   :  { %v1354_v46 = vmul.u32 %v12638_v27, %v1348_v25  ;;  %v951_v58 = vmul.f32 %v950_v52, %v7127_v4  ;;  %v1066_v34 = vadd.s32 %v6991_v13, %v6978_v51  ;;  %vm5559_vm7 = vcmp.lt.s32.totalorder %v5558_v55, 0 }
 0x1bf   :  { %v1376_v21 = vmul.u32 %v12639_v14, %v1348_v25  ;;  %v7321_v62 = vadd.f32 %v2945_v9, %v2943_v8  ;;  %v1364_v25 = vsel %vm1363_vm1, 1, %v12603_v61  ;;  %v1386_v27 = vsel %vm1385_vm15, 1, %v12603_v61 }
 0x1c0   :  { %v1362_v1 = vadd.s32 %v1360_v56, %v1354_v46  ;;  %v1084_v28 = vshrl.u32 %v1066_v34, %v1082_v41  ;;  %vm2796_vm12 = vcmp.gt.s32.totalorder %v2795_v38, 0  ;;  %v640_v0 = vadd.f32 %v7270_v48, %v7258_v36 }
 0x1c1   :  { %v1384_v63 = vadd.s32 %v1382_v40, %v1376_v21  ;;  %12640 = vst [vmem:[#allocation32_spill] sm:$0xff] %v7321_v62  ;;  %v801_v29 = vstv %s7296_s12  ;;  %vm974_vm6 = vcmp.lt.s32.totalorder %v12641_v49, 0  ;;  %v1088_v4 = vshll.u32 %v1087_v18, 23  ;;  %s8589_s12 = sld [smem:[#allocation10 + $0x17]] }
 0x1c2   :  { %v800_v51 = vsel %vm789_vm8, nan, %v799_v45  ;;  %v960_v13 = vxor.u32 2147483648, %v943_v31  ;;  %v1083_v5 = vshll.u32 %v7130_v3, %v7274_v23  ;;  %v7333_v52 = vsel %vm5559_vm7, 0, %v5558_v55 }
 0x1c3   :  { %vm955_vm13 = vcmp.lt.s32.totalorder %v7294_v17, 2  ;;  %v12642_v41 = vand.u32 2147483647, %v12641_v49  ;;  %v1366_v36 = vadd.s32 %v1364_v25, %v1362_v1  ;;  %v1388_v48 = vadd.s32 %v1386_v27, %v1384_v63 }
 0x1c4   :  { %v2797_v18 = vsel %vm2796_vm12, %v2795_v38, 0  ;;  %v2950_v7 = vand.u32 2139095040, %v7321_v62  ;;  %vm956_vm3 = vcmp.eq.s32.totalorder %v7294_v17, 0  ;;  %v957_v3 = vxor.u32 2147483648, %v951_v58 }
 0x1c5   :  { %vm7338_vm5 = vcmp.le.f32.partialorder %v12642_v41, 0.7853982  ;;  %v1085_v23 = vor.u32 %v1084_v28, %v1083_v5  ;;  %v1096_v55 = vsub.s32 4, %v7076_v11  ;;  %vm959_vm14 = vcmp.eq.s32.totalorder %v7294_v17, 2 }
 0x1c6   :  { %v1089_v56 = vor.u32 4788187, %v1088_v4  ;;  %v1356_v40 = vshrl.u32 %v7264_v42, 16  ;;  %v1378_v9 = vshrl.u32 %v7268_v54, 16  ;;  %v802_v46 = vmul.f32 %v801_v29, %v800_v51 }
 0x1c7   :  { %v961_v14 = vsel %vm959_vm14, %v960_v13, %v951_v58  ;;  %v1249_v38 = vsub.s32 4294967266, %v7333_v52  ;;  %v2799_v21 = vand.u32 31, %v2797_v18  ;;  %v1335_v45 = vsel %vm1333_vm9, %v7174_v26, 2102212464 }
 0x1c8   :  { %v1367_v34 = vadd.s32 %v1366_v36, %v1356_v40  ;;  %v1389_v1 = vadd.s32 %v1388_v48, %v1378_v9  ;;  %v2951_v63 = vshrl.u32 %v2950_v7, 23  ;;  %v958_v28 = vsel %vm956_vm3, %v943_v31, %v957_v3 }
 0x1c9   :  { %v1092_v25 = vcvt.s32.f32 %v1085_v23  ;;  %v1097_v42 = vsel %vm974_vm6, %v1096_v55, %v7076_v11  ;;  %v1314_v54 = vshrl.u32 %v12610_v33, %v7090_v19  ;;  %vm952_vm8 = vweird.f32 %v12623_v59 }
 0x1ca   :  { %v1090_v58 = vand.u32 2147483647, %v1089_v56  ;;  %v1245_v26 = vsub.s32 32, %v7333_v52  ;;  %v1358_v27 = vshrl.u32 %v7288_v22, 16  ;;  %v1380_v29 = vshrl.u32 %v7290_v53, 16 }
 0x1cb   :  { %v1250_v4 = vadd.s32 127, %v1249_v38  ;;  %v1334_v31 = vsel %vm1330_vm0, %v1314_v54, %v7170_v10  ;;  %v1336_v11 = vsel %vm1332_vm4, %v7172_v47, %v1335_v45  ;;  %v7371_v19 = vsub.s32 32, %v2799_v21 }
 0x1cc   :  { %v1229_v51 = vadd.s32 %v7065_v20, %v7042_v30  ;;  %v7375_v13 = vadd.s32 %v1367_v34, %v1358_v27  ;;  %v1390_v5 = vadd.s32 %v1389_v1, %v1380_v29  ;;  %v5612_v22 = vadd.s32 4294967169, %v2951_v63 }
 0x1cd   :  { %v803_v41 = vadd.f32 %v802_v46, %v640_v0  ;;  %v962_v36 = vsel %vm955_vm13, %v958_v28, %v961_v14  ;;  %v964_v48 = vstv %s7343_s13  ;;  %v1099_v10 = vsel %vm7338_vm5, 0, %v1097_v42  ;;  %s8672_s13 = sld [smem:[#allocation9 + $0x11]] }
 0x1ce   :  { %v1093_v7 = vmul.f32 %v1092_v25, %v1090_v58  ;;  %v1247_v3 = vshrl.u32 %v1229_v51, %v1245_v26  ;;  %v1337_v47 = vsel %vm1331_vm2, %v1334_v31, %v1336_v11  ;;  %v7387_v30 = vadd.s32 %v7299_v15, %v1379_v37 }
 0x1cf   :  { %v1251_v20 = vshll.u32 %v1250_v4, 23  ;;  %v12449_v17 = vand.u32 2147483647, %v7236_v50  ;;  %v2811_v0 = vshll.u32 %v12632_v12, %v2799_v21  ;;  %v2812_v23 = vshrl.u32 %v12629_v32, %v7371_v19 }
 0x1d0   :  { %vm1393_vm9 = vc.u32 %v7375_v13, %v7387_v30  ;;  %v1394_v16 = vadd.s32 1, %v1390_v5  ;;  %v7399_v53 = vshrl.u32 %v2797_v18, 5  ;;  %v2957_v15 = vadd.s32 1, %v5612_v22 }
 0x1d1   :  { %v2802_v37 = vshll.u32 %v12610_v33, %v2799_v21  ;;  %v2803_v55 = vshrl.u32 %v12633_v24, %v7371_v19  ;;  %v2805_v56 = vshll.u32 %v12633_v24, %v2799_v21  ;;  %v2808_v40 = vshll.u32 %v12634_v44, %v2799_v21 }
 0x1d2   :  { %v2806_v9 = vshrl.u32 %v12634_v44, %v7371_v19  ;;  %v2809_v18 = vshrl.u32 %v12632_v12, %v7371_v19  ;;  %v2814_v46 = vshll.u32 %v12629_v32, %v2799_v21  ;;  %v2815_v14 = vshrl.u32 %v12630_v57, %v7371_v19 }
 0x1d3   :  { %v963_v38 = vsel %vm952_vm8, nan, %v962_v36  ;;  %v1116_v45 = vadd.s32 3, %v1099_v10  ;;  %v1246_v34 = vshll.u32 %v7229_v60, %v7333_v52  ;;  %v2813_v1 = vor.u32 %v2812_v23, %v2811_v0 }
 0x1d4   :  { %v1252_v63 = vor.u32 4788187, %v1251_v20  ;;  %v2792_v28 = vand.u32 8388607, %v12449_v17  ;;  %vm2820_vm0 = vcmp.lt.s32.totalorder %v7399_v53, 4  ;;  %vm2958_vm4 = vcmp.gt.s32.totalorder %v2957_v15, 0 }
 0x1d5   :  { %v1094_v21 = vxor.u32 2147483648, %v1093_v7  ;;  %v1248_v25 = vor.u32 %v1247_v3, %v1246_v34  ;;  %v1391_v42 = vmul.u32 %v7231_v35, %v1337_v47  ;;  %v1395_v59 = vsel %vm1393_vm9, %v1394_v16, %v1390_v5  ;;  %v12646_v16 = vld [vmem:[#allocation27_spill] sm:$0xff] }
 0x1d6   :  { %v7432_v60 = vor.u32 %v2803_v55, %v2802_v37  ;;  %v7434_v52 = vor.u32 %v2806_v9, %v2805_v56  ;;  %v7436_v54 = vor.u32 %v2809_v18, %v2808_v40  ;;  %v2816_v58 = vor.u32 %v2815_v14, %v2814_v46 }
 0x1d7   :  { %vm2817_vm2 = vcmp.lt.s32.totalorder %v7399_v53, 1  ;;  %vm2819_vm10 = vcmp.lt.s32.totalorder %v7399_v53, 3  ;;  %v2826_v35 = vsel %vm2820_vm0, %v2813_v1, 920167782  ;;  %v2959_v26 = vsel %vm2958_vm4, %v2957_v15, 0 }
 0x1d8   :  { %v965_v27 = vmul.f32 %v964_v48, %v963_v38  ;;  %v1253_v29 = vand.u32 2147483647, %v1252_v63  ;;  %v2793_v4 = vor.u32 8388608, %v2792_v28  ;;  %v1095_v31 = vsel %vm974_vm6, %v1094_v21, %v1093_v7 }
 0x1d9   :  { %v1255_v11 = vcvt.s32.f32 %v1248_v25  ;;  %v7446_v51 = vadd.s32 %v1395_v59, %v1391_v42  ;;  %vm2818_vm11 = vcmp.lt.s32.totalorder %v7399_v53, 2  ;;  %v2825_v5 = vsel %vm2817_vm2, %v7432_v60, %v7434_v52 }
 0x1da   :  { %v2827_v22 = vsel %vm2819_vm10, %v7436_v54, %v2826_v35  ;;  %v2830_v36 = vsel %vm2820_vm0, %v2816_v58, 1326507024  ;;  %v2961_v48 = vand.u32 31, %v2959_v26  ;;  %v7458_v10 = vadd.f32 %v965_v27, %v803_v41 }
 0x1db   :  { %v7460_v7 = vand.u32 3, %v1116_v45  ;;  %v7466_v47 = vsel %vm7338_vm5, %v12641_v49, %v1095_v31  ;;  %v1256_v20 = vmul.f32 %v1255_v11, %v1253_v29  ;;  %v7469_v23 = vshll.u32 %v2793_v4, 8 }
 0x1dc   :  { %12645 = vst [vmem:[#allocation30_spill] sm:$0xff] %v7458_v10  ;;  %vm1137_vm1 = vcmp.lt.s32.totalorder %v12646_v16, 0  ;;  %v7474_v41 = vsel %vm2818_vm11, %v2825_v5, %v2827_v22  ;;  %v2829_v8 = vsel %vm2817_vm2, %v7434_v52, %v7436_v54  ;;  %v2831_v15 = vsel %vm2819_vm10, %v2813_v1, %v2830_v36 }
 0x1dd   :  { %v3106_v37 = vmul.f32 0.17782794, %v7208_v2  ;;  %v1397_v55 = vadd.s32 536870912, %v7446_v51  ;;  %v7485_v40 = vsub.s32 32, %v2961_v48  ;;  %v3108_v9 = vstv %s7438_s19  ;;  %s8793_s19 = sld [smem:[#allocation10 + $0x18]] }
 0x1de   :  { %v7494_v45 = vmul.f32 %v7466_v47, %v7466_v47  ;;  %v7498_v34 = vsel %vm2818_vm11, %v2829_v8, %v2831_v15  ;;  %v2834_v1 = vand.u32 65535, %v7469_v23  ;;  %v2859_v63 = vshrl.u32 %v7474_v41, 16 }
 0x1df   :  { %v1257_v28 = vxor.u32 2147483648, %v1256_v20  ;;  %v7503_v21 = vshrl.u32 %v7469_v23, 16  ;;  %v12450_v25 = vand.u32 2147483647, %v7321_v62  ;;  %v7506_v42 = vadd.f32 %v3108_v9, %v3106_v37 }
 0x1e0   :  { %v7508_v59 = vshrl.u32 %v1397_v55, 30  ;;  %v2858_v58 = vand.u32 65535, %v7474_v41  ;;  %v2973_v35 = vshll.u32 %v12632_v12, %v2961_v48  ;;  %v2974_v27 = vshrl.u32 %v12629_v32, %v7485_v40 }
 0x1e1   :  { %12647 = vst [vmem:[#allocation33_spill] sm:$0xff] %v7506_v42  ;;  %v12451_v29 = vshrl.u32 %v7498_v34, 16  ;;  %v7515_v4 = vshrl.u32 %v2959_v26, 5  ;;  %v2976_v31 = vshll.u32 %v12629_v32, %v2961_v48  ;;  %v2977_v11 = vshrl.u32 %v12630_v57, %v7485_v40 }
 0x1e2   :  { %12648 = vst [vmem:[#allocation34_spill] sm:$0xff] %v7508_v59  ;;  %v7520_v5 = vmul.u32 %v2859_v63, %v2834_v1  ;;  %v2964_v22 = vshll.u32 %v12610_v33, %v2961_v48  ;;  %v2967_v36 = vshll.u32 %v12633_v24, %v2961_v48  ;;  %v2970_v41 = vshll.u32 %v12634_v44, %v2961_v48 }
 0x1e3   :  { %v2965_v8 = vshrl.u32 %v12633_v24, %v7485_v40  ;;  %v2968_v26 = vshrl.u32 %v12634_v44, %v7485_v40  ;;  %v2971_v15 = vshrl.u32 %v12632_v12, %v7485_v40  ;;  %v3113_v37 = vand.u32 2139095040, %v7506_v42 }
 0x1e4   :  { %v1108_v55 = vmul.f32 -0.00019511016, %v7494_v45  ;;  %v1258_v9 = vsel %vm1137_vm1, %v1257_v28, %v1256_v20  ;;  %v2836_v38 = vand.u32 65535, %v7498_v34  ;;  %v2975_v14 = vor.u32 %v2974_v27, %v2973_v35 }
 0x1e5   :  { %v7538_v48 = vmul.u32 %v12451_v29, %v2834_v1  ;;  %v2954_v46 = vand.u32 8388607, %v12450_v25  ;;  %v2978_v18 = vor.u32 %v2977_v11, %v2976_v31  ;;  %vm2982_vm15 = vcmp.lt.s32.totalorder %v7515_v4, 4 }
 0x1e6   :  { %v12649_v56 = vand.u32 2147483647, %v12646_v16  ;;  %v1399_v20 = vshll.u32 %v7508_v59, 30  ;;  %v2860_v28 = vmul.u32 %v2858_v58, %v2834_v1  ;;  %v7551_v35 = vmul.u32 %v2858_v58, %v7503_v21 }
 0x1e7   :  { %v2864_v27 = vshll.u32 %v7520_v5, 16  ;;  %v7554_v17 = vor.u32 %v2965_v8, %v2964_v22  ;;  %v7556_v25 = vor.u32 %v2968_v26, %v2967_v36  ;;  %v7558_v31 = vor.u32 %v2971_v15, %v2970_v41 }
 0x1e8   :  { %vm7545_vm7 = vcmp.le.f32.partialorder %v12649_v56, 0.7853982  ;;  %v3114_v11 = vshrl.u32 %v3113_v37, 23  ;;  %v7561_v56 = vmul.u32 %v2836_v38, %v7503_v21  ;;  %vm2979_vm12 = vcmp.lt.s32.totalorder %v7515_v4, 1 }
 0x1e9   :  { %vm2981_vm6 = vcmp.lt.s32.totalorder %v7515_v4, 3  ;;  %v2988_v58 = vsel %vm2982_vm15, %v2975_v14, 920167782  ;;  %v2838_v3 = vmul.u32 %v2836_v38, %v2834_v1  ;;  %v2842_v29 = vshll.u32 %v7538_v48, 16 }
 0x1ea   :  { %v2955_v22 = vor.u32 8388608, %v2954_v46  ;;  %v2992_v36 = vsel %vm2982_vm15, %v2978_v18, 1326507024  ;;  %v7571_v41 = vsub.s32 %v7446_v51, %v1399_v20  ;;  %v12452_v8 = vshll.u32 %v7551_v35, 16 }
 0x1eb   :  { %vm2868_vm13 = vc.u32 %v2860_v28, %v2864_v27  ;;  %v7576_v26 = vadd.s32 %v2864_v27, %v2860_v28  ;;  %vm2980_vm5 = vcmp.lt.s32.totalorder %v7515_v4, 2  ;;  %v2987_v46 = vsel %vm2979_vm12, %v7554_v17, %v7556_v25 }
 0x1ec   :  { %v2989_v18 = vsel %vm2981_vm6, %v7558_v31, %v2988_v58  ;;  %v5617_v51 = vadd.s32 4294967169, %v3114_v11  ;;  %v2844_v38 = vshll.u32 %v7561_v56, 16  ;;  %v2863_v1 = vmul.u32 %v2859_v63, %v7503_v21 }
 0x1ed   :  { %v2991_v15 = vsel %vm2979_vm12, %v7556_v25, %v7558_v31  ;;  %v2993_v37 = vsel %vm2981_vm6, %v2975_v14, %v2992_v36  ;;  %vm2846_vm3 = vc.u32 %v2838_v3, %v2842_v29  ;;  %v2848_v20 = vadd.s32 %v2842_v29, %v2838_v3 }
 0x1ee   :  { %v2869_v28 = vsel %vm2868_vm13, 1, %v12603_v61  ;;  %v7595_v27 = vshll.u32 %v2955_v22, 8  ;;  %v1101_v11 = vmul.f32 -0.001358992, %v7494_v45  ;;  %v1109_v58 = vadd.f32 0.008332121, %v1108_v55 }
 0x1ef   :  { %vm2872_vm14 = vc.u32 %v7576_v26, %v12452_v8  ;;  %v7603_v63 = vsel %vm2980_vm5, %v2987_v46, %v2989_v18  ;;  %v7608_v3 = vsel %vm7545_vm7, %v12646_v16, %v1258_v9  ;;  %v1402_v14 = vsub.s32 0, %v7571_v41 }
 0x1f0   :  { %12652 = vst [vmem:[#allocation25_spill] sm:$0xff] %v7608_v3  ;;  %v7613_v29 = vsel %vm2980_vm5, %v2991_v15, %v2993_v37  ;;  %v3120_v55 = vadd.s32 1, %v5617_v51  ;;  %vm1401_vm8 = vcmp.lt.s32.totalorder %v7571_v41, 0  ;;  %v12653_v22 = vshrl.u32 %v7498_v34, 16 }
 0x1f1   :  { %v2847_v46 = vsel %vm2846_vm3, 1, %v12603_v61  ;;  %v2871_v18 = vadd.s32 %v2869_v28, %v2863_v1  ;;  %vm2850_vm9 = vc.u32 %v2848_v20, %v2844_v38  ;;  %v2873_v9 = vsel %vm2872_vm14, 1, %v12603_v61 }
 0x1f2   :  { %v2841_v36 = vmul.u32 %v12653_v22, %v7503_v21  ;;  %v2996_v8 = vand.u32 65535, %v7595_v27  ;;  %v3021_v43 = vshrl.u32 %v7603_v63, 16  ;;  %v1102_v62 = vadd.f32 0.041655596, %v1101_v11 }
 0x1f3   :  { %v1110_v15 = vmul.f32 %v1109_v58, %v7494_v45  ;;  %v2999_v37 = vshrl.u32 %v7613_v29, 16  ;;  %v1259_v50 = vsub.s32 4, %v7163_v6  ;;  %v7629_v34 = vmul.f32 %v7608_v3, %v7608_v3 }
 0x1f4   :  { %v1403_v21 = vsel %vm1401_vm8, %v1402_v14, %v7571_v41  ;;  %vm3121_vm4 = vcmp.gt.s32.totalorder %v3120_v55, 0  ;;  %v2849_v38 = vadd.s32 %v2847_v46, %v2841_v36  ;;  %v2851_v1 = vsel %vm2850_vm9, 1, %v12603_v61 }
 0x1f5   :  { %v2865_v20 = vshrl.u32 %v7520_v5, 16  ;;  %v2875_v28 = vadd.s32 %v2873_v9, %v2871_v18  ;;  %v2997_v11 = vshrl.u32 %v7595_v27, 16  ;;  %v2998_v58 = vand.u32 65535, %v7613_v29 }
 0x1f6   :  { %v3020_v22 = vand.u32 65535, %v7603_v63  ;;  %v7637_v51 = vmul.u32 %v3021_v43, %v2996_v8  ;;  %v1103_v10 = vmul.f32 %v1102_v62, %v7494_v45  ;;  %v1111_v59 = vadd.f32 -0.16666654, %v1110_v15 }
 0x1f7   :  { %v7640_v39 = vmul.u32 %v2999_v37, %v2996_v8  ;;  %v3122_v14 = vsel %vm3121_vm4, %v3120_v55, 0  ;;  %v1271_v36 = vmul.f32 -0.00019511016, %v7629_v34  ;;  %v1404_v46 = vclz %v1403_v21 }
 0x1f8   :  { %v2801_v5 = vshrl.u32 %v12610_v33, %v7371_v19  ;;  %v2822_v29 = vsel %vm2820_vm0, %v7436_v54, 2102212464  ;;  %v2843_v63 = vshrl.u32 %v7538_v48, 16  ;;  %v2853_v18 = vadd.s32 %v2851_v1, %v2849_v38 }
 0x1f9   :  { %v2867_v9 = vshrl.u32 %v7551_v35, 16  ;;  %v2876_v62 = vadd.s32 %v2875_v28, %v2865_v20  ;;  %v7652_v15 = vmul.u32 %v2998_v58, %v2997_v11  ;;  %v3022_v55 = vmul.u32 %v3020_v22, %v2996_v8 }
 0x1fa   :  { %v3026_v21 = vshll.u32 %v7637_v51, 16  ;;  %v3124_v49 = vand.u32 31, %v3122_v14  ;;  %v7658_v19 = vsel %vm1137_vm1, %v1259_v50, %v7163_v6  ;;  %v3000_v54 = vmul.u32 %v2998_v58, %v2996_v8 }
 0x1fb   :  { %v3004_v48 = vshll.u32 %v7640_v39, 16  ;;  %v7661_v38 = vmul.u32 %v3020_v22, %v2997_v11  ;;  %v7663_v1 = vadd.f32 -0.4999988, %v1103_v10  ;;  %v7666_v20 = vmul.f32 %v1111_v59, %v7494_v45 }
 0x1fc   :  { %v7668_v28 = vadd.f32 0.008332121, %v1271_v36  ;;  %v2821_v3 = vsel %vm2817_vm2, %v2801_v5, %v7432_v60  ;;  %v2823_v6 = vsel %vm2819_vm10, %v7434_v52, %v2822_v29  ;;  %v2845_v50 = vshrl.u32 %v7561_v56, 16 }
 0x1fd   :  { %v2854_v8 = vadd.s32 %v2853_v18, %v2843_v63  ;;  %v2877_v58 = vadd.s32 %v2876_v62, %v2867_v9  ;;  %v7677_v10 = vadd.s32 4294967294, %v1404_v46  ;;  %v3006_v59 = vshll.u32 %v7652_v15, 16 }
 0x1fe   :  { %vm3030_vm0 = vc.u32 %v3022_v55, %v3026_v21  ;;  %v7680_v22 = vsub.s32 32, %v3124_v49  ;;  %vm3008_vm1 = vc.u32 %v3000_v54, %v3004_v48  ;;  %v3010_v36 = vadd.s32 %v3004_v48, %v3000_v54 }
 0x1ff   :  { %v12463_v60 = vshll.u32 %v7661_v38, 16  ;;  %v7683_v5 = vadd.s32 %v3026_v21, %v3022_v55  ;;  %v7687_v52 = vsel %vm2818_vm11, %v2821_v3, %v2823_v6  ;;  %v12654_v56 = vshll.u32 %v7551_v35, 16 }
 0x200   :  { %v3025_v29 = vmul.u32 %v3021_v43, %v2997_v11  ;;  %v3269_v63 = vmul.f32 0.07498942, %v7208_v2  ;;  %v7695_v18 = vadd.s32 %v2854_v8, %v2845_v50  ;;  %v2881_v9 = vadd.s32 1, %v2877_v58 }
 0x201   :  { %v7692_v46 = vadd.s32 %v7576_v26, %v12654_v56  ;;  %v3031_v62 = vsel %vm3030_vm0, 1, %v12603_v61  ;;  %v3271_v54 = vstv %s7650_s2  ;;  %v3003_v55 = vmul.u32 %v2999_v37, %v2997_v11  ;;  %s8884_s2 = sld [smem:[#allocation10 + $0x19]] }
 0x202   :  { %v3009_v21 = vsel %vm3008_vm1, 1, %v12603_v61  ;;  %v3139_v53 = vshll.u32 %v12629_v32, %v3124_v49  ;;  %v3140_v35 = vshrl.u32 %v12630_v57, %v7680_v22  ;;  %vm3012_vm2 = vc.u32 %v3010_v36, %v3006_v59 }
 0x203   :  { %12655 = vst [vmem:[#allocation28_spill] sm:$0xff] %v7692_v46  ;;  %vm3034_vm10 = vc.u32 %v7683_v5, %v12463_v60  ;;  %v12466_v43 = vand.u32 2147483647, %v7506_v42  ;;  %v7707_v26 = vshrl.u32 %v3122_v14, 5  ;;  %v3033_v3 = vadd.s32 %v3031_v62, %v3025_v29 }
 0x204   :  { %v3136_v48 = vshll.u32 %v12632_v12, %v3124_v49  ;;  %v3137_v37 = vshrl.u32 %v12629_v32, %v7680_v22  ;;  %v7712_v11 = vadd.f32 %v3271_v54, %v3269_v63  ;;  %v3130_v6 = vshll.u32 %v12633_v24, %v3124_v49 }
 0x205   :  { %v3131_v50 = vshrl.u32 %v12634_v44, %v7680_v22  ;;  %v3133_v8 = vshll.u32 %v12634_v44, %v3124_v49  ;;  %v3134_v59 = vshrl.u32 %v12632_v12, %v7680_v22  ;;  %v3011_v14 = vadd.s32 %v3009_v21, %v3003_v55 }
 0x206   :  { %12656 = vst [vmem:[#allocation29_spill] sm:$0xff] %v7712_v11  ;;  %v3013_v36 = vsel %vm3012_vm2, 1, %v12603_v61  ;;  %v3035_v56 = vsel %vm3034_vm10, 1, %v12603_v61  ;;  %v3141_v29 = vor.u32 %v3140_v35, %v3139_v53  ;;  %v3117_v63 = vand.u32 8388607, %v12466_v43 }
 0x207   :  { %v3127_v62 = vshll.u32 %v12610_v33, %v3124_v49  ;;  %v3128_v54 = vshrl.u32 %v12633_v24, %v7680_v22  ;;  %vm3145_vm11 = vcmp.lt.s32.totalorder %v7707_v26, 4  ;;  %vm2880_vm13 = vc.u32 %v7695_v18, %v7692_v46 }
 0x208   :  { %v3005_v55 = vshrl.u32 %v7640_v39, 16  ;;  %v3138_v21 = vor.u32 %v3137_v37, %v3136_v48  ;;  %v3276_v60 = vand.u32 2139095040, %v7712_v11  ;;  %v3027_v53 = vshrl.u32 %v7637_v51, 16 }
 0x209   :  { %v3037_v35 = vadd.s32 %v3035_v56, %v3033_v3  ;;  %v7733_v42 = vor.u32 %v3131_v50, %v3130_v6  ;;  %v7735_v43 = vor.u32 %v3134_v59, %v3133_v8  ;;  %v3015_v49 = vadd.s32 %v3013_v36, %v3011_v14 }
 0x20a   :  { %vm3142_vm3 = vcmp.lt.s32.totalorder %v7707_v26, 1  ;;  %vm3144_vm14 = vcmp.lt.s32.totalorder %v7707_v26, 3  ;;  %v3155_v46 = vsel %vm3145_vm11, %v3141_v29, 1326507024  ;;  %v2878_v39 = vmul.u32 %v7469_v23, %v7687_v52 }
 0x20b   :  { %v2882_v48 = vsel %vm2880_vm13, %v2881_v9, %v2877_v58  ;;  %v3118_v51 = vor.u32 8388608, %v3117_v63  ;;  %v7745_v3 = vor.u32 %v3128_v54, %v3127_v62  ;;  %v2963_v37 = vshrl.u32 %v12610_v33, %v7485_v40 }
 0x20c   :  { %v3029_v6 = vshrl.u32 %v7661_v38, 16  ;;  %v3151_v50 = vsel %vm3145_vm11, %v3138_v21, 920167782  ;;  %v3277_v8 = vshrl.u32 %v3276_v60, 23  ;;  %v3038_v59 = vadd.s32 %v3037_v35, %v3027_v53 }
 0x20d   :  { %vm3143_vm8 = vcmp.lt.s32.totalorder %v7707_v26, 2  ;;  %v3154_v23 = vsel %vm3142_vm3, %v7733_v42, %v7735_v43  ;;  %v3156_v58 = vsel %vm3144_vm14, %v3138_v21, %v3155_v46  ;;  %v1105_v40 = vmul.f32 %v7663_v1, %v7494_v45 }
 0x20e   :  { %v1113_v52 = vadd.f32 1.0, %v7666_v20  ;;  %v3007_v60 = vshrl.u32 %v7652_v15, 16  ;;  %v3016_v9 = vadd.s32 %v3015_v49, %v3005_v55  ;;  %v2984_v14 = vsel %vm2982_vm15, %v7558_v31, 2102212464 }
 0x20f   :  { %v3150_v36 = vsel %vm3142_vm3, %v7745_v3, %v7733_v42  ;;  %v3152_v46 = vsel %vm3144_vm14, %v7735_v43, %v3151_v50  ;;  %v7775_v45 = vshll.u32 %v3118_v51, 8  ;;  %v1264_v1 = vmul.f32 -0.001358992, %v7629_v34 }
 0x210   :  { %v7778_v15 = vadd.s32 %v2882_v48, %v2878_v39  ;;  %v7782_v20 = vsel %vm3143_vm8, %v3154_v23, %v3156_v58  ;;  %v5622_v31 = vadd.s32 4294967169, %v3277_v8  ;;  %v1273_v56 = vmul.f32 %v7668_v28, %v7629_v34 }
 0x211   :  { %vm5564_vm15 = vcmp.lt.s32.totalorder %v7677_v10, 0  ;;  %v2983_v29 = vsel %vm2979_vm12, %v2963_v37, %v7554_v17  ;;  %v3039_v63 = vadd.s32 %v3038_v59, %v3029_v6  ;;  %v2985_v62 = vsel %vm2981_vm6, %v7556_v25, %v2984_v14 }
 0x212   :  { %v7793_v54 = vadd.s32 %v3016_v9, %v3007_v60  ;;  %v12657_v55 = vshll.u32 %v7661_v38, 16  ;;  %v7802_v28 = vsel %vm3143_vm8, %v3150_v36, %v3152_v46  ;;  %vm1119_vm9 = vcmp.eq.s32.totalorder %v7460_v7, 0 }
 0x213   :  { %v1262_v17 = vsel %vm7545_vm7, 0, %v7658_v19  ;;  %v3159_v25 = vand.u32 65535, %v7775_v45  ;;  %v3162_v35 = vshrl.u32 %v7782_v20, 16  ;;  %v1114_v38 = vmul.f32 %v1113_v52, %v7466_v47 }
 0x214   :  { %v7798_v21 = vadd.s32 %v7683_v5, %v12657_v55  ;;  %v7813_v5 = vsel %vm5564_vm15, 0, %v7677_v10  ;;  %v2884_v49 = vadd.s32 536870912, %v7778_v15  ;;  %v3283_v39 = vadd.s32 1, %v5622_v31 }
 0x215   :  { %vm1122_vm12 = vcmp.eq.s32.totalorder %v7460_v7, 2  ;;  %v2986_v0 = vsel %vm2980_vm5, %v2983_v29, %v2985_v62  ;;  %v3043_v19 = vadd.s32 1, %v3039_v63  ;;  %v3184_v51 = vshrl.u32 %v7802_v28, 16 }
 0x216   :  { %v1106_v37 = vadd.f32 1.0, %v1105_v40  ;;  %v1265_v6 = vadd.f32 0.041655596, %v1264_v1  ;;  %v1274_v50 = vadd.f32 -0.16666654, %v1273_v56  ;;  %vm3042_vm7 = vc.u32 %v7793_v54, %v7798_v21 }
 0x217   :  { %vm1118_vm6 = vcmp.lt.s32.totalorder %v7460_v7, 2  ;;  %v1279_v47 = vadd.s32 3, %v1262_v17  ;;  %v1412_v10 = vsub.s32 4294967266, %v7813_v5  ;;  %v3161_v8 = vand.u32 65535, %v7782_v20 }
 0x218   :  { %v7826_v59 = vmul.u32 %v3162_v35, %v3159_v25  ;;  %v1120_v4 = vxor.u32 2147483648, %v1114_v38  ;;  %v7828_v23 = vshrl.u32 %v2884_v49, 30  ;;  %v3040_v58 = vmul.u32 %v7595_v27, %v2986_v0 }
 0x219   :  { %vm3284_vm5 = vcmp.gt.s32.totalorder %v3283_v39, 0  ;;  %v3044_v40 = vsel %vm3042_vm7, %v3043_v19, %v3039_v63  ;;  %v3160_v52 = vshrl.u32 %v7775_v45, 16  ;;  %v3183_v60 = vand.u32 65535, %v7802_v28 }
 0x21a   :  { %v7833_v9 = vmul.u32 %v3184_v51, %v3159_v25  ;;  %v1123_v14 = vxor.u32 2147483648, %v1106_v37  ;;  %v1266_v36 = vmul.f32 %v1265_v6, %v7629_v34  ;;  %v1275_v46 = vmul.f32 %v1274_v50, %v7629_v34 }
 0x21b   :  { %v1408_v1 = vsub.s32 32, %v7813_v5  ;;  %v1413_v20 = vadd.s32 127, %v1412_v10  ;;  %v3163_v31 = vmul.u32 %v3161_v8, %v3159_v25  ;;  %v3167_v56 = vshll.u32 %v7826_v59, 16 }
 0x21c   :  { %v3285_v27 = vsel %vm3284_vm5, %v3283_v39, 0  ;;  %v1121_v29 = vsel %vm1119_vm9, %v1106_v37, %v1120_v4  ;;  %v1392_v63 = vadd.s32 %v7387_v30, %v7375_v13  ;;  %v2886_v62 = vshll.u32 %v7828_v23, 30 }
 0x21d   :  { %v7844_v55 = vadd.s32 %v3044_v40, %v3040_v58  ;;  %v7846_v28 = vmul.u32 %v3161_v8, %v3160_v52  ;;  %v3185_v17 = vmul.u32 %v3183_v60, %v3159_v25  ;;  %v7848_v49 = vmul.u32 %v3183_v60, %v3160_v52 }
 0x21e   :  { %v3189_v0 = vshll.u32 %v7833_v9, 16  ;;  %v1124_v39 = vsel %vm1122_vm12, %v1123_v14, %v1114_v38  ;;  %v1267_v19 = vadd.f32 -0.4999988, %v1266_v36  ;;  %v7853_v6 = vand.u32 3, %v1279_v47 }
 0x21f   :  { %v3287_v37 = vand.u32 31, %v3285_v27  ;;  %v1276_v50 = vadd.f32 1.0, %v1275_v46  ;;  %v1410_v13 = vshrl.u32 %v1392_v63, %v1408_v1  ;;  %v1414_v30 = vshll.u32 %v1413_v20, 23 }
 0x220   :  { %vm3171_vm4 = vc.u32 %v3163_v31, %v3167_v56  ;;  %v7859_v25 = vsel %vm1118_vm6, %v1121_v29, %v1124_v39  ;;  %v1409_v10 = vshll.u32 %v7571_v41, %v7813_v5  ;;  %v7864_v8 = vsub.s32 %v7778_v15, %v2886_v62  ;;  %v12658_v15 = vld [vmem:[#allocation25_spill] sm:$0xff] }
 0x221   :  { %v3046_v38 = vadd.s32 536870912, %v7844_v55  ;;  %v3166_v47 = vmul.u32 %v3162_v35, %v3160_v52  ;;  %v3169_v4 = vshll.u32 %v7846_v28, 16  ;;  %v3191_v58 = vshll.u32 %v7848_v49, 16 }
 0x222   :  { %v7869_v40 = vadd.s32 %v3189_v0, %v3185_v17  ;;  %v3172_v60 = vsel %vm3171_vm4, 1, %v12603_v61  ;;  %v3173_v7 = vadd.s32 %v3167_v56, %v3163_v31  ;;  %vm3193_vm0 = vc.u32 %v3185_v17, %v3189_v0 }
 0x223   :  { %v7872_v14 = vsub.s32 32, %v3287_v37  ;;  %v7875_v41 = vmul.f32 %v1267_v19, %v7629_v34  ;;  %v7878_v5 = vmul.f32 %v1276_v50, %v12658_v15  ;;  %v7880_v36 = vor.u32 %v1410_v13, %v1409_v10 }
 0x224   :  { %v7882_v35 = vor.u32 4788187, %v1414_v30  ;;  %vm2888_vm1 = vcmp.lt.s32.totalorder %v7864_v8, 0  ;;  %v2889_v46 = vsub.s32 0, %v7864_v8  ;;  %v3188_v1 = vmul.u32 %v3184_v51, %v3160_v52 }
 0x225   :  { %v12468_v20 = vand.u32 2147483647, %v7712_v11  ;;  %v7887_v31 = vshrl.u32 %v3046_v38, 30  ;;  %v3174_v56 = vadd.s32 %v3172_v60, %v3166_v47  ;;  %v3194_v34 = vsel %vm3193_vm0, 1, %v12603_v61 }
 0x226   :  { %vm3197_vm2 = vc.u32 %v7869_v40, %v3191_v58  ;;  %vm7893_vm10 = vc.u32 %v3173_v7, %v3169_v4  ;;  %v3299_v63 = vshll.u32 %v12632_v12, %v3287_v37  ;;  %v3300_v51 = vshrl.u32 %v12629_v32, %v7872_v14 }
 0x227   :  { %v3432_v52 = vmul.f32 0.031622775, %v7208_v2  ;;  %v7901_v62 = vshrl.u32 %v3285_v27, 5  ;;  %v3302_v17 = vshll.u32 %v12629_v32, %v3287_v37  ;;  %v3303_v0 = vshrl.u32 %v12630_v57, %v7872_v14 }
 0x228   :  { %v3434_v39 = vstv %s7855_s1  ;;  %v3196_v19 = vadd.s32 %v3194_v34, %v3188_v1  ;;  %v3198_v50 = vsel %vm3197_vm2, 1, %v12603_v61  ;;  %v3290_v13 = vshll.u32 %v12610_v33, %v3287_v37  ;;  %s8890_s1 = sld [smem:[#allocation9 + $0x13]] }
 0x229   :  { %v3293_v30 = vshll.u32 %v12633_v24, %v3287_v37  ;;  %v3291_v10 = vshrl.u32 %v12633_v24, %v7872_v14  ;;  %v3294_v27 = vshrl.u32 %v12634_v44, %v7872_v14  ;;  %v3296_v38 = vshll.u32 %v12634_v44, %v3287_v37 }
 0x22a   :  { %v3297_v47 = vshrl.u32 %v12632_v12, %v7872_v14  ;;  %v1416_v4 = vand.u32 2147483647, %v7882_v35  ;;  %v3176_v60 = vsel %vm7893_vm10, 1, %v12603_v61  ;;  %v3301_v7 = vor.u32 %v3300_v51, %v3299_v63 }
 0x22b   :  { %v7921_v15 = vadd.f32 %v3434_v39, %v3432_v52  ;;  %v2890_v1 = vsel %vm2888_vm1, %v2889_v46, %v7864_v8  ;;  %v3280_v34 = vand.u32 8388607, %v12468_v20  ;;  %v3304_v37 = vor.u32 %v3303_v0, %v3302_v17 }
 0x22c   :  { %vm3308_vm13 = vcmp.lt.s32.totalorder %v7901_v62, 4  ;;  %v3048_v48 = vshll.u32 %v7887_v31, 30  ;;  %v3168_v35 = vshrl.u32 %v7826_v59, 16  ;;  %v3190_v29 = vshrl.u32 %v7833_v9, 16  ;;  %v12662_v59 = vld [vmem:[#allocation26_spill] sm:$0xff] }
 0x22d   :  { %12661 = vst [vmem:[#allocation27_spill] sm:$0xff] %v7921_v15  ;;  %v3200_v53 = vadd.s32 %v3198_v50, %v3196_v19  ;;  %v3178_v63 = vadd.s32 %v3176_v60, %v3174_v56  ;;  %v7932_v51 = vor.u32 %v3291_v10, %v3290_v13  ;;  %v7934_v52 = vor.u32 %v3294_v27, %v3293_v30 }
 0x22e   :  { %v7936_v39 = vor.u32 %v3297_v47, %v3296_v38  ;;  %vm3305_vm15 = vcmp.lt.s32.totalorder %v7901_v62, 1  ;;  %vm3307_vm9 = vcmp.lt.s32.totalorder %v7901_v62, 3  ;;  %v3314_v46 = vsel %vm3308_vm13, %v3301_v7, 920167782 }
 0x22f   :  { %v3439_v17 = vand.u32 2139095040, %v7921_v15  ;;  %vm1115_vm12 = vweird.f32 %v12662_v59  ;;  %v2891_v9 = vclz %v2890_v1  ;;  %v3126_v56 = vshrl.u32 %v12610_v33, %v7680_v22 }
 0x230   :  { %v3281_v0 = vor.u32 8388608, %v3280_v34  ;;  %v3318_v19 = vsel %vm3308_vm13, %v3304_v37, 1326507024  ;;  %vm1282_vm7 = vcmp.eq.s32.totalorder %v7853_v6, 0  ;;  %v7950_v50 = vsub.s32 %v7844_v55, %v3048_v48  ;;  %v12663_v37 = vld [vmem:[#allocation35_spill] sm:$0xff] }
 0x231   :  { %v3170_v13 = vshrl.u32 %v7846_v28, 16  ;;  %v3192_v30 = vshrl.u32 %v7848_v49, 16  ;;  %v3201_v10 = vadd.s32 %v3200_v53, %v3190_v29  ;;  %v3179_v27 = vadd.s32 %v3178_v63, %v3168_v35 }
 0x232   :  { %vm3306_vm6 = vcmp.lt.s32.totalorder %v7901_v62, 2  ;;  %v3313_v22 = vsel %vm3305_vm15, %v7932_v51, %v7934_v52  ;;  %v3315_v38 = vsel %vm3307_vm9, %v7936_v39, %v3314_v46  ;;  %v3147_v48 = vsel %vm3145_vm11, %v7735_v43, 2102212464 }
 0x233   :  { %v3317_v53 = vsel %vm3305_vm15, %v7934_v52, %v7936_v39  ;;  %v3319_v55 = vsel %vm3307_vm9, %v3301_v7, %v3318_v19  ;;  %v3440_v28 = vshrl.u32 %v3439_v17, 23  ;;  %v1269_v47 = vadd.f32 1.0, %v7875_v41 }
 0x234   :  { %v1283_v60 = vxor.u32 2147483648, %v7878_v5  ;;  %v5608_v1 = vadd.s32 4294967294, %v2891_v9  ;;  %v7973_v34 = vshll.u32 %v3281_v0, 8  ;;  %vm1300_vm5 = vcmp.lt.s32.totalorder %v12663_v37, 0 }
 0x235   :  { %v1418_v43 = vcvt.s32.f32 %v7880_v36  ;;  %v3146_v35 = vsel %vm3142_vm3, %v3126_v56, %v7745_v3  ;;  %v3202_v29 = vadd.s32 %v3201_v10, %v3192_v30  ;;  %v7982_v7 = vsel %vm3306_vm6, %v3313_v22, %v3315_v38 }
 0x236   :  { %vm1281_vm11 = vcmp.lt.s32.totalorder %v7853_v6, 2  ;;  %v3148_v41 = vsel %vm3144_vm14, %v7733_v42, %v3147_v48  ;;  %v7990_v63 = vadd.s32 %v3179_v27, %v3170_v13  ;;  %v7995_v36 = vadd.s32 %v7869_v40, %v3191_v58 }
 0x237   :  { %v7999_v3 = vsel %vm3306_vm6, %v3317_v53, %v3319_v55  ;;  %vm1285_vm3 = vcmp.eq.s32.totalorder %v7853_v6, 2  ;;  %v1419_v46 = vmul.f32 %v1418_v43, %v1416_v4  ;;  %v3051_v17 = vsub.s32 0, %v7950_v50 }
 0x238   :  { %v5627_v9 = vadd.s32 4294967169, %v3440_v28  ;;  %vm5609_vm4 = vcmp.lt.s32.totalorder %v5608_v1, 0  ;;  %vm3050_vm14 = vcmp.lt.s32.totalorder %v7950_v50, 0  ;;  %v3322_v42 = vand.u32 65535, %v7973_v34 }
 0x239   :  { %v3347_v49 = vshrl.u32 %v7982_v7, 16  ;;  %v1126_v58 = vsel %vm1115_vm12, nan, %v7859_v25  ;;  %vm1278_vm0 = vweird.f32 %v12646_v16  ;;  %v12664_v40 = vand.u32 2147483647, %v12663_v37  ;;  %v12667_v25 = vld [vmem:[#allocation34_spill] sm:$0xff] }
 0x23a   :  { %v3149_v56 = vsel %vm3143_vm8, %v3146_v35, %v3148_v41  ;;  %v3206_v0 = vadd.s32 1, %v3202_v29  ;;  %v3325_v19 = vshrl.u32 %v7999_v3, 16  ;;  %v1284_v13 = vsel %vm1282_vm7, %v1269_v47, %v1283_v60 }
 0x23b   :  { %vm8012_vm1 = vcmp.le.f32.partialorder %v12664_v40, 0.7853982  ;;  %v1286_v59 = vxor.u32 2147483648, %v1269_v47  ;;  %v1422_v30 = vsub.s32 4, %v12667_v25  ;;  %vm3205_vm2 = vc.u32 %v7990_v63, %v7995_v36 }
 0x23c   :  { %v1420_v10 = vxor.u32 2147483648, %v1419_v46  ;;  %v8024_v27 = vsel %vm5609_vm4, 0, %v5608_v1  ;;  %v3052_v26 = vsel %vm3050_vm14, %v3051_v17, %v7950_v50  ;;  %v3446_v22 = vadd.s32 1, %v5627_v9 }
 0x23d   :  { %v3203_v38 = vmul.u32 %v7775_v45, %v3149_v56  ;;  %v3323_v48 = vshrl.u32 %v7973_v34, 16  ;;  %v3346_v53 = vand.u32 65535, %v7982_v7  ;;  %v8030_v55 = vmul.u32 %v3347_v49, %v3322_v42  ;;  %v12669_v56 = vld [vmem:[#allocation30_spill] sm:$0xff] }
 0x23e   :  { %v12668_v28 = vstv %s7389_s14  ;;  %v3207_v60 = vsel %vm3205_vm2, %v3206_v0, %v3202_v29  ;;  %v3324_v43 = vand.u32 65535, %v7999_v3  ;;  %v8035_v35 = vmul.u32 %v3325_v19, %v3322_v42  ;;  %s8704_s14 = sld [smem:[#allocation9 + $0x12]] }
 0x23f   :  { %v1128_v47 = vmul.f32 %v12668_v28, %v1126_v58  ;;  %v1287_v1 = vsel %vm1285_vm3, %v1286_v59, %v7878_v5  ;;  %v1290_v41 = vstv %s7984_s3  ;;  %v1423_v45 = vsel %vm1300_vm5, %v1422_v30, %v12667_v25  ;;  %s9058_s3 = sld [smem:[#allocation10 + $0x1a]] }
 0x240   :  { %v3053_v17 = vclz %v3052_v26  ;;  %v1288_v7 = vsel %vm1281_vm11, %v1284_v13, %v1287_v1  ;;  %v1421_v29 = vsel %vm1300_vm5, %v1420_v10, %v1419_v46  ;;  %v2899_v3 = vsub.s32 4294967266, %v8024_v27 }
 0x241   :  { %vm3447_vm8 = vcmp.gt.s32.totalorder %v3446_v22, 0  ;;  %v8049_v9 = vadd.s32 %v3207_v60, %v3203_v38  ;;  %v3348_v58 = vmul.u32 %v3346_v53, %v3322_v42  ;;  %v8051_v40 = vmul.u32 %v3346_v53, %v3323_v48  ;;  %v12670_v38 = vld [vmem:[#allocation28_spill] sm:$0xff] }
 0x242   :  { %v3352_v5 = vshll.u32 %v8030_v55, 16  ;;  %v1129_v0 = vadd.f32 %v1128_v47, %v12669_v56  ;;  %v3326_v59 = vmul.u32 %v3324_v43, %v3322_v42  ;;  %v8055_v25 = vmul.u32 %v3324_v43, %v3323_v48 }
 0x243   :  { %v3330_v6 = vshll.u32 %v8035_v35, 16  ;;  %v1289_v46 = vsel %vm1278_vm0, nan, %v1288_v7  ;;  %v1425_v13 = vsel %vm8012_vm1, 0, %v1423_v45  ;;  %v5613_v30 = vadd.s32 4294967294, %v3053_v17 }
 0x244   :  { %v3448_v10 = vsel %vm3447_vm8, %v3446_v22, 0  ;;  %v8065_v26 = vsel %vm8012_vm1, %v12663_v37, %v1421_v29  ;;  %v2879_v42 = vadd.s32 %v12670_v38, %v7695_v18  ;;  %v2895_v53 = vsub.s32 32, %v8024_v27 }
 0x245   :  { %v2900_v28 = vadd.s32 127, %v2899_v3  ;;  %v3209_v47 = vadd.s32 536870912, %v8049_v9  ;;  %v12469_v16 = vshll.u32 %v8051_v40, 16  ;;  %vm3356_vm10 = vc.u32 %v3348_v58, %v3352_v5 }
 0x246   :  { %v8072_v60 = vadd.s32 %v3352_v5, %v3348_v58  ;;  %v3332_v22 = vshll.u32 %v8055_v25, 16  ;;  %vm3334_vm12 = vc.u32 %v3326_v59, %v3330_v6  ;;  %v3336_v43 = vadd.s32 %v3330_v6, %v3326_v59 }
 0x247   :  { %v3450_v4 = vand.u32 31, %v3448_v10  ;;  %v8077_v1 = vmul.f32 %v8065_v26, %v8065_v26  ;;  %v1442_v18 = vadd.s32 3, %v1425_v13  ;;  %vm5614_vm7 = vcmp.lt.s32.totalorder %v5613_v30, 0 }
 0x248   :  { %v3351_v45 = vmul.u32 %v3347_v49, %v3323_v48  ;;  %v1291_v17 = vmul.f32 %v1290_v41, %v1289_v46  ;;  %v2897_v7 = vshrl.u32 %v2879_v42, %v2895_v53  ;;  %v3329_v29 = vmul.u32 %v3325_v19, %v3323_v48 }
 0x249   :  { %v3357_v3 = vsel %vm3356_vm10, 1, %v12603_v61  ;;  %v2901_v56 = vshll.u32 %v2900_v28, 23  ;;  %v8080_v58 = vshrl.u32 %v3209_v47, 30  ;;  %v3335_v5 = vsel %vm3334_vm12, 1, %v12603_v61 }
 0x24a   :  { %vm3360_vm5 = vc.u32 %v8072_v60, %v12469_v16  ;;  %v2896_v59 = vshll.u32 %v7864_v8, %v8024_v27  ;;  %v8088_v6 = vsel %vm5614_vm7, 0, %v5613_v30  ;;  %vm3338_vm11 = vc.u32 %v3336_v43, %v3332_v22 }
 0x24b   :  { %12671 = vst [vmem:[#allocation25_spill] sm:$0xff] %v8080_v58  ;;  %v8090_v49 = vsub.s32 32, %v3450_v4  ;;  %v8092_v19 = vadd.f32 %v1291_v17, %v1129_v0  ;;  %v8095_v48 = vmul.f32 -0.001358992, %v8077_v1  ;;  %v8097_v41 = vand.u32 3, %v1442_v18 }
 0x24c   :  { %v3359_v46 = vadd.s32 %v3357_v3, %v3351_v45  ;;  %v8102_v13 = vmul.f32 -0.00019511016, %v8077_v1  ;;  %v8104_v38 = vor.u32 %v2897_v7, %v2896_v59  ;;  %v3337_v8 = vadd.s32 %v3335_v5, %v3329_v29 }
 0x24d   :  { %12672 = vst [vmem:[#allocation26_spill] sm:$0xff] %v8092_v19  ;;  %v3361_v27 = vsel %vm3360_vm5, 1, %v12603_v61  ;;  %v8107_v30 = vor.u32 4788187, %v2901_v56  ;;  %v3061_v0 = vsub.s32 4294967266, %v8088_v6  ;;  %v3211_v42 = vshll.u32 %v8080_v58, 30 }
 0x24e   :  { %12673 = vst [vmem:[#allocation34_spill] sm:$0xff] %v8097_v41  ;;  %v3339_v53 = vsel %vm3338_vm11, 1, %v12603_v61  ;;  %v3353_v28 = vshrl.u32 %v8030_v55, 16  ;;  %v12475_v47 = vand.u32 2147483647, %v7921_v15  ;;  %v3462_v22 = vshll.u32 %v12632_v12, %v3450_v4 }
 0x24f   :  { %v3463_v43 = vshrl.u32 %v12629_v32, %v8090_v49  ;;  %v3363_v18 = vadd.s32 %v3361_v27, %v3359_v46  ;;  %v8117_v45 = vshrl.u32 %v3448_v10, 5  ;;  %v3465_v17 = vshll.u32 %v12629_v32, %v3450_v4 }
 0x250   :  { %v3466_v7 = vshrl.u32 %v12630_v57, %v8090_v49  ;;  %v3331_v29 = vshrl.u32 %v8035_v35, 16  ;;  %v3341_v3 = vadd.s32 %v3339_v53, %v3337_v8  ;;  %v3453_v55 = vshll.u32 %v12610_v33, %v3450_v4 }
 0x251   :  { %v3456_v56 = vshll.u32 %v12633_v24, %v3450_v4  ;;  %v3454_v5 = vshrl.u32 %v12633_v24, %v8090_v49  ;;  %v3457_v10 = vshrl.u32 %v12634_v44, %v8090_v49  ;;  %v3459_v59 = vshll.u32 %v12634_v44, %v3450_v4 }
 0x252   :  { %v3460_v46 = vshrl.u32 %v12632_v12, %v8090_v49  ;;  %v3355_v27 = vshrl.u32 %v8051_v40, 16  ;;  %v3443_v35 = vand.u32 8388607, %v12475_v47  ;;  %v3464_v8 = vor.u32 %v3463_v43, %v3462_v22 }
 0x253   :  { %v3595_v53 = vmul.f32 0.013335214, %v7208_v2  ;;  %v3364_v20 = vadd.s32 %v3363_v18, %v3353_v28  ;;  %v3467_v16 = vor.u32 %v3466_v7, %v3465_v17  ;;  %vm3471_vm3 = vcmp.lt.s32.totalorder %v8117_v45, 4 }
 0x254   :  { %v3597_v19 = vstv %s8099_s5  ;;  %v3289_v37 = vshrl.u32 %v12610_v33, %v7872_v14  ;;  %v3310_v4 = vsel %vm3308_vm13, %v7936_v39, 2102212464  ;;  %v3333_v11 = vshrl.u32 %v8055_v25, 16  ;;  %s9318_s5 = sld [smem:[#allocation10 + $0x1b]] }
 0x255   :  { %v3342_v58 = vadd.s32 %v3341_v3, %v3331_v29  ;;  %v8145_v47 = vsub.s32 %v8049_v9, %v3211_v42  ;;  %v8147_v22 = vor.u32 %v3454_v5, %v3453_v55  ;;  %v8149_v28 = vor.u32 %v3457_v10, %v3456_v56 }
 0x256   :  { %v8151_v43 = vor.u32 %v3460_v46, %v3459_v59  ;;  %vm3468_vm4 = vcmp.lt.s32.totalorder %v8117_v45, 1  ;;  %vm3470_vm14 = vcmp.lt.s32.totalorder %v8117_v45, 3  ;;  %v3477_v14 = vsel %vm3471_vm3, %v3464_v8, 920167782  ;;  %v12676_v59 = vld [vmem:[#allocation31_spill] sm:$0xff] }
 0x257   :  { %v8159_v39 = vadd.f32 %v3597_v19, %v3595_v53  ;;  %v2903_v9 = vand.u32 2147483647, %v8107_v30  ;;  %v3365_v25 = vadd.s32 %v3364_v20, %v3355_v27  ;;  %v3444_v42 = vor.u32 8388608, %v3443_v35 }
 0x258   :  { %v3481_v18 = vsel %vm3471_vm3, %v3467_v16, 1326507024  ;;  %v3309_v17 = vsel %vm3305_vm15, %v3289_v37, %v7932_v51  ;;  %v3311_v7 = vsel %vm3307_vm9, %v7934_v52, %v3310_v4  ;;  %v8172_v29 = vadd.s32 %v3342_v58, %v3333_v11 }
 0x259   :  { %12674 = vst [vmem:[#allocation30_spill] sm:$0xff] %v8159_v39  ;;  %v12675_v19 = vshll.u32 %v8051_v40, 16  ;;  %v3062_v16 = vadd.s32 127, %v3061_v0  ;;  %vm3469_vm13 = vcmp.lt.s32.totalorder %v8117_v45, 2  ;;  %v3476_v51 = vsel %vm3468_vm4, %v8147_v22, %v8149_v28 }
 0x25a   :  { %v3478_v11 = vsel %vm3470_vm14, %v8151_v43, %v3477_v14  ;;  %v3214_v52 = vsub.s32 0, %v8145_v47  ;;  %v3480_v37 = vsel %vm3468_vm4, %v8149_v28, %v8151_v43  ;;  %v3482_v40 = vsel %vm3470_vm14, %v3464_v8, %v3481_v18 }
 0x25b   :  { %v8177_v20 = vadd.s32 %v8072_v60, %v12675_v19  ;;  %v3602_v60 = vand.u32 2139095040, %v8159_v39  ;;  %vm3213_vm15 = vcmp.lt.s32.totalorder %v8145_v47, 0  ;;  %v3312_v58 = vsel %vm3306_vm6, %v3309_v17, %v3311_v7 }
 0x25c   :  { %v3369_v30 = vadd.s32 1, %v3365_v25  ;;  %v8202_v0 = vshll.u32 %v3444_v42, 8  ;;  %v1428_v3 = vadd.f32 0.041655596, %v8095_v48  ;;  %v3057_v55 = vsub.s32 32, %v8088_v6 }
 0x25d   :  { %vm3368_vm9 = vc.u32 %v8172_v29, %v8177_v20  ;;  %v8212_v56 = vsel %vm3469_vm13, %v3476_v51, %v3478_v11  ;;  %v1435_v62 = vadd.f32 0.008332121, %v8102_v13  ;;  %v2905_v5 = vcvt.s32.f32 %v8104_v38 }
 0x25e   :  { %v3041_v48 = vadd.s32 %v7798_v21, %v7793_v54  ;;  %v8222_v10 = vsel %vm3469_vm13, %v3480_v37, %v3482_v40  ;;  %vm2787_vm6 = vcmp.lt.s32.totalorder %v12676_v59, 0  ;;  %v3063_v46 = vshll.u32 %v3062_v16, 23 }
 0x25f   :  { %v3215_v27 = vsel %vm3213_vm15, %v3214_v52, %v8145_v47  ;;  %v3366_v13 = vmul.u32 %v7973_v34, %v3312_v58  ;;  %v3603_v35 = vshrl.u32 %v3602_v60, 23  ;;  %v2906_v8 = vmul.f32 %v2905_v5, %v2903_v9 }
 0x260   :  { %v3370_v38 = vsel %vm3368_vm9, %v3369_v30, %v3365_v25  ;;  %v3485_v53 = vand.u32 65535, %v8202_v0  ;;  %v3510_v54 = vshrl.u32 %v8212_v56, 16  ;;  %v3059_v14 = vshrl.u32 %v3041_v48, %v3057_v55 }
 0x261   :  { %v3488_v42 = vshrl.u32 %v8222_v10, 16  ;;  %v1429_v18 = vmul.f32 %v1428_v3, %v8077_v1  ;;  %v1436_v17 = vmul.f32 %v1435_v62, %v8077_v1  ;;  %v12677_v9 = vand.u32 2147483647, %v12676_v59 }
 0x262   :  { %v3216_v7 = vclz %v3215_v27  ;;  %v3058_v19 = vshll.u32 %v7950_v50, %v8088_v6  ;;  %v3064_v16 = vor.u32 4788187, %v3063_v46  ;;  %v8249_v51 = vadd.s32 %v3370_v38, %v3366_v13 }
 0x263   :  { %vm8243_vm0 = vcmp.le.f32.partialorder %v12677_v9, 0.7853982  ;;  %v5632_v11 = vadd.s32 4294967169, %v3603_v35  ;;  %v2907_v52 = vxor.u32 2147483648, %v2906_v8  ;;  %v3486_v37 = vshrl.u32 %v8202_v0, 16 }
 0x264   :  { %v3509_v40 = vand.u32 65535, %v8212_v56  ;;  %v8253_v60 = vmul.u32 %v3510_v54, %v3485_v53  ;;  %v3060_v30 = vor.u32 %v3059_v14, %v3058_v19  ;;  %v3487_v3 = vand.u32 65535, %v8222_v10 }
 0x265   :  { %v8257_v55 = vmul.u32 %v3488_v42, %v3485_v53  ;;  %v1430_v62 = vadd.f32 -0.4999988, %v1429_v18  ;;  %v5618_v6 = vadd.s32 4294967294, %v3216_v7  ;;  %v1437_v48 = vadd.f32 -0.16666654, %v1436_v17 }
 0x266   :  { %v3065_v46 = vand.u32 2147483647, %v3064_v16  ;;  %v3372_v56 = vadd.s32 536870912, %v8249_v51  ;;  %v3609_v27 = vadd.s32 1, %v5632_v11  ;;  %v2908_v13 = vsel %vm2787_vm6, %v2907_v52, %v2906_v8 }
 0x267   :  { %v3511_v35 = vmul.u32 %v3509_v40, %v3485_v53  ;;  %v8266_v10 = vmul.u32 %v3509_v40, %v3486_v37  ;;  %v3515_v38 = vshll.u32 %v8253_v60, 16  ;;  %v3067_v14 = vcvt.s32.f32 %v3060_v30 }
 0x268   :  { %v3489_v18 = vmul.u32 %v3487_v3, %v3485_v53  ;;  %v8269_v9 = vmul.u32 %v3487_v3, %v3486_v37  ;;  %v3493_v19 = vshll.u32 %v8257_v55, 16  ;;  %v1431_v17 = vmul.f32 %v1430_v62, %v8077_v1 }
 0x269   :  { %vm5619_vm1 = vcmp.lt.s32.totalorder %v5618_v6, 0  ;;  %v8278_v8 = vsel %vm8243_vm0, %v12676_v59, %v2908_v13  ;;  %v3068_v11 = vmul.f32 %v3067_v14, %v3065_v46  ;;  %v8280_v52 = vshrl.u32 %v3372_v56, 30 }
 0x26a   :  { %vm3610_vm2 = vcmp.gt.s32.totalorder %v3609_v27, 0  ;;  %v1438_v53 = vmul.f32 %v1437_v48, %v8077_v1  ;;  %v12477_v40 = vshll.u32 %v8266_v10, 16  ;;  %vm3519_vm8 = vc.u32 %v3511_v35, %v3515_v38 }
 0x26b   :  { %12680 = vst [vmem:[#allocation28_spill] sm:$0xff] %v8280_v52  ;;  %v8284_v30 = vadd.s32 %v3515_v38, %v3511_v35  ;;  %v8286_v3 = vsel %vm5619_vm1, 0, %v5618_v6  ;;  %v3495_v62 = vshll.u32 %v8269_v9, 16  ;;  %vm3497_vm10 = vc.u32 %v3489_v18, %v3493_v19 }
 0x26c   :  { %v3499_v21 = vadd.s32 %v3493_v19, %v3489_v18  ;;  %v8292_v46 = vmul.f32 %v8278_v8, %v8278_v8  ;;  %v3514_v56 = vmul.u32 %v3510_v54, %v3486_v37  ;;  %v3611_v13 = vsel %vm3610_vm2, %v3609_v27, 0 }
 0x26d   :  { %v3069_v14 = vxor.u32 2147483648, %v3068_v11  ;;  %v3374_v1 = vshll.u32 %v8280_v52, 30  ;;  %v3492_v48 = vmul.u32 %v3488_v42, %v3486_v37  ;;  %v3520_v35 = vsel %vm3519_vm8, 1, %v12603_v61  ;;  %v12681_v42 = vld [vmem:[#allocation32_spill] sm:$0xff] }
 0x26e   :  { %v1439_v38 = vadd.f32 1.0, %v1438_v53  ;;  %v3224_v6 = vsub.s32 4294967266, %v8286_v3  ;;  %v3498_v7 = vsel %vm3497_vm10, 1, %v12603_v61  ;;  %vm3523_vm12 = vc.u32 %v8284_v30, %v12477_v40 }
 0x26f   :  { %v8301_v18 = vadd.f32 1.0, %v1431_v17  ;;  %v2909_v54 = vsub.s32 4, %v7828_v23  ;;  %vm3501_vm7 = vc.u32 %v3499_v21, %v3495_v62  ;;  %v3613_v27 = vand.u32 31, %v3611_v13 }
 0x270   :  { %v2914_v19 = vmul.f32 -0.001358992, %v8292_v46  ;;  %v12682_v37 = vand.u32 2147483647, %v12681_v42  ;;  %vm2949_vm11 = vcmp.lt.s32.totalorder %v12681_v42, 0  ;;  %v3522_v16 = vadd.s32 %v3520_v35, %v3514_v56 }
 0x271   :  { %v3070_v50 = vsel %vm2949_vm11, %v3069_v14, %v3068_v11  ;;  %v8315_v17 = vsub.s32 %v8249_v51, %v3374_v1  ;;  %v3500_v5 = vadd.s32 %v3498_v7, %v3492_v48  ;;  %v3524_v21 = vsel %vm3523_vm12, 1, %v12603_v61 }
 0x272   :  { %vm8307_vm5 = vcmp.le.f32.partialorder %v12682_v37, 0.7853982  ;;  %v8319_v62 = vmul.f32 %v1439_v38, %v8065_v26  ;;  %v8321_v58 = vadd.s32 127, %v3224_v6  ;;  %v3502_v37 = vsel %vm3501_vm7, 1, %v12603_v61 }
 0x273   :  { %v12476_v34 = vand.u32 2147483647, %v8159_v39  ;;  %v8329_v11 = vsel %vm2787_vm6, %v2909_v54, %v7828_v23  ;;  %v2921_v51 = vmul.f32 -0.00019511016, %v8292_v46  ;;  %v8332_v7 = vsub.s32 32, %v3613_v27 }
 0x274   :  { %v8334_v14 = vadd.f32 0.041655596, %v2914_v19  ;;  %v8339_v26 = vsel %vm8307_vm5, %v12681_v42, %v3070_v50  ;;  %v3516_v1 = vshrl.u32 %v8253_v60, 16  ;;  %v3526_v48 = vadd.s32 %v3524_v21, %v3522_v16 }
 0x275   :  { %v3204_v35 = vadd.s32 %v7995_v36, %v7990_v63  ;;  %v3377_v23 = vsub.s32 0, %v8315_v17  ;;  %v3494_v38 = vshrl.u32 %v8257_v55, 16  ;;  %v3504_v6 = vadd.s32 %v3502_v37, %v3500_v5 }
 0x276   :  { %v3220_v54 = vsub.s32 32, %v8286_v3  ;;  %v3226_v19 = vshll.u32 %v8321_v58, 23  ;;  %vm3376_vm15 = vcmp.lt.s32.totalorder %v8315_v17, 0  ;;  %v3606_v60 = vand.u32 8388607, %v12476_v34 }
 0x277   :  { %v3452_v50 = vshrl.u32 %v12610_v33, %v8090_v49  ;;  %v3518_v63 = vshrl.u32 %v8266_v10, 16  ;;  %v3628_v36 = vshll.u32 %v12629_v32, %v3613_v27  ;;  %v3629_v55 = vshrl.u32 %v12630_v57, %v8332_v7 }
 0x278   :  { %v3527_v5 = vadd.s32 %v3526_v48, %v3516_v1  ;;  %v8359_v16 = vshrl.u32 %v3611_v13, 5  ;;  %v3625_v58 = vshll.u32 %v12632_v12, %v3613_v27  ;;  %v3626_v21 = vshrl.u32 %v12629_v32, %v8332_v7 }
 0x279   :  { %v3378_v37 = vsel %vm3376_vm15, %v3377_v23, %v8315_v17  ;;  %v3473_v49 = vsel %vm3471_vm3, %v8151_v43, 2102212464  ;;  %v3496_v4 = vshrl.u32 %v8269_v9, 16  ;;  %v3505_v34 = vadd.s32 %v3504_v6, %v3494_v38 }
 0x27a   :  { %v3619_v56 = vshll.u32 %v12633_v24, %v3613_v27  ;;  %v3620_v13 = vshrl.u32 %v12634_v44, %v8332_v7  ;;  %v3622_v1 = vshll.u32 %v12634_v44, %v3613_v27  ;;  %v3623_v48 = vshrl.u32 %v12632_v12, %v8332_v7 }
 0x27b   :  { %v3472_v23 = vsel %vm3468_vm4, %v3452_v50, %v8147_v22  ;;  %v3616_v43 = vshll.u32 %v12610_v33, %v3613_v27  ;;  %v3617_v9 = vshrl.u32 %v12633_v24, %v8332_v7  ;;  %v3630_v38 = vor.u32 %v3629_v55, %v3628_v36 }
 0x27c   :  { %v3528_v6 = vadd.s32 %v3527_v5, %v3518_v63  ;;  %v3627_v40 = vor.u32 %v3626_v21, %v3625_v58  ;;  %vm3634_vm3 = vcmp.lt.s32.totalorder %v8359_v16, 4  ;;  %v3758_v39 = vmul.f32 0.0056234132, %v7208_v2 }
 0x27d   :  { %v3474_v15 = vsel %vm3470_vm14, %v8149_v28, %v3473_v49  ;;  %v8386_v52 = vadd.s32 %v3505_v34, %v3496_v4  ;;  %v12685_v22 = vshll.u32 %v8266_v10, 16  ;;  %v3760_v50 = vstv %s8346_s30  ;;  %s9430_s30 = sld [smem:[#allocation9 + $0x14]] }
 0x27e   :  { %vm1448_vm4 = vcmp.eq.s32.totalorder %v8097_v41, 2  ;;  %v3379_v63 = vclz %v3378_v37  ;;  %v3607_v36 = vor.u32 8388608, %v3606_v60  ;;  %v8395_v55 = vor.u32 %v3620_v13, %v3619_v56 }
 0x27f   :  { %v8391_v27 = vadd.s32 %v8284_v30, %v12685_v22  ;;  %v8397_v5 = vor.u32 %v3623_v48, %v3622_v1  ;;  %v8399_v58 = vor.u32 %v3617_v9, %v3616_v43  ;;  %vm3631_vm14 = vcmp.lt.s32.totalorder %v8359_v16, 1 }
 0x280   :  { %vm3633_vm9 = vcmp.lt.s32.totalorder %v8359_v16, 3  ;;  %v3644_v28 = vsel %vm3634_vm3, %v3630_v38, 1326507024  ;;  %vm1445_vm6 = vcmp.eq.s32.totalorder %v8097_v41, 0  ;;  %v3475_v4 = vsel %vm3469_vm13, %v3472_v23, %v3474_v15 }
 0x281   :  { %v3532_v34 = vadd.s32 1, %v3528_v6  ;;  %v3640_v10 = vsel %vm3634_vm3, %v3627_v40, 920167782  ;;  %v8410_v30 = vadd.f32 %v3760_v50, %v3758_v39  ;;  %v2922_v56 = vadd.f32 0.008332121, %v2921_v51 }
 0x282   :  { %v8414_v60 = vmul.f32 %v8339_v26, %v8339_v26  ;;  %v3222_v21 = vshrl.u32 %v3204_v35, %v3220_v54  ;;  %vm3531_vm1 = vc.u32 %v8386_v52, %v8391_v27  ;;  %v3221_v37 = vshll.u32 %v8145_v47, %v8286_v3 }
 0x283   :  { %vm3632_vm13 = vcmp.lt.s32.totalorder %v8359_v16, 2  ;;  %v3643_v15 = vsel %vm3631_vm14, %v8395_v55, %v8397_v5  ;;  %v3645_v45 = vsel %vm3633_vm9, %v3627_v40, %v3644_v28  ;;  %v3227_v39 = vor.u32 4788187, %v3226_v19 }
 0x284   :  { %v3529_v51 = vmul.u32 %v8202_v0, %v3475_v4  ;;  %v3639_v35 = vsel %vm3631_vm14, %v8399_v58, %v8395_v55  ;;  %v3641_v47 = vsel %vm3633_vm9, %v8397_v5, %v3640_v10  ;;  %v5623_v3 = vadd.s32 4294967294, %v3379_v63 }
 0x285   :  { %v3533_v54 = vsel %vm3531_vm1, %v3532_v34, %v3528_v6  ;;  %v8435_v49 = vshll.u32 %v3607_v36, 8  ;;  %v3765_v13 = vand.u32 2139095040, %v8410_v30  ;;  %v1446_v40 = vxor.u32 2147483648, %v8319_v62 }
 0x286   :  { %v2912_v0 = vsel %vm8243_vm0, 0, %v8329_v11  ;;  %v3223_v19 = vor.u32 %v3222_v21, %v3221_v37  ;;  %v8444_v1 = vsel %vm3632_vm13, %v3643_v15, %v3645_v45  ;;  %v2916_v48 = vmul.f32 %v8334_v14, %v8292_v46 }
 0x287   :  { %v2923_v23 = vmul.f32 %v2922_v56, %v8292_v46  ;;  %v3071_v43 = vsub.s32 4, %v7887_v31  ;;  %v8452_v9 = vsel %vm3632_vm13, %v3639_v35, %v3641_v47  ;;  %v12686_v25 = vxor.u32 2147483648, %v8301_v18 }
 0x288   :  { %v3083_v38 = vmul.f32 -0.00019511016, %v8414_v60  ;;  %v3228_v6 = vand.u32 2147483647, %v3227_v39  ;;  %v8462_v22 = vadd.s32 %v3533_v54, %v3529_v51  ;;  %vm5624_vm0 = vcmp.lt.s32.totalorder %v5623_v3, 0 }
 0x289   :  { %v8459_v11 = vsel %vm1448_vm4, %v12686_v25, %v8319_v62  ;;  %v3648_v14 = vand.u32 65535, %v8435_v49  ;;  %v3651_v50 = vshrl.u32 %v8444_v1, 16  ;;  %v3766_v63 = vshrl.u32 %v3765_v13, 23  ;;  %v12689_v13 = vld [vmem:[#allocation33_spill] sm:$0xff] }
 0x28a   :  { %12687 = vst [vmem:[#allocation31_spill] sm:$0xff] %v8459_v11  ;;  %v8469_v36 = vsel %vm1445_vm6, %v8301_v18, %v1446_v40  ;;  %v2929_v28 = vadd.s32 3, %v2912_v0  ;;  %v3230_v4 = vcvt.s32.f32 %v3223_v19  ;;  %v3673_v62 = vshrl.u32 %v8452_v9, 16 }
 0x28b   :  { %12688 = vst [vmem:[#allocation32_spill] sm:$0xff] %v8469_v36  ;;  %v2917_v34 = vadd.f32 -0.4999988, %v2916_v48  ;;  %v2924_v10 = vadd.f32 -0.16666654, %v2923_v23  ;;  %v3072_v56 = vsel %vm2949_vm11, %v3071_v43, %v7887_v31  ;;  %v8476_v45 = vsel %vm5624_vm0, 0, %v5623_v3 }
 0x28c   :  { %v3076_v21 = vmul.f32 -0.001358992, %v8414_v60  ;;  %v3084_v37 = vadd.f32 0.008332121, %v3083_v38  ;;  %v3231_v15 = vmul.f32 %v3230_v4, %v3228_v6  ;;  %v3535_v39 = vadd.s32 536870912, %v8462_v22 }
 0x28d   :  { %v3649_v18 = vshrl.u32 %v8435_v49, 16  ;;  %v3650_v51 = vand.u32 65535, %v8444_v1  ;;  %v8481_v35 = vmul.u32 %v3651_v50, %v3648_v14  ;;  %v5637_v47 = vadd.s32 4294967169, %v3766_v63 }
 0x28e   :  { %v8483_v54 = vand.u32 3, %v2929_v28  ;;  %vm3112_vm2 = vcmp.lt.s32.totalorder %v12689_v13, 0  ;;  %v3672_v31 = vand.u32 65535, %v8452_v9  ;;  %v8487_v40 = vmul.u32 %v3673_v62, %v3648_v14 }
 0x28f   :  { %v2918_v3 = vmul.f32 %v2917_v34, %v8292_v46  ;;  %v2925_v0 = vmul.f32 %v2924_v10, %v8292_v46  ;;  %v3074_v19 = vsel %vm8307_vm5, 0, %v3072_v56  ;;  %v3077_v48 = vadd.f32 0.041655596, %v3076_v21 }
 0x290   :  { %v3085_v1 = vmul.f32 %v3084_v37, %v8414_v60  ;;  %v3232_v23 = vxor.u32 2147483648, %v3231_v15  ;;  %v3387_v43 = vsub.s32 4294967266, %v8476_v45  ;;  %v8495_v25 = vshrl.u32 %v3535_v39, 30 }
 0x291   :  { %v3652_v38 = vmul.u32 %v3650_v51, %v3648_v14  ;;  %v8497_v6 = vmul.u32 %v3650_v51, %v3649_v18  ;;  %v3656_v9 = vshll.u32 %v8481_v35, 16  ;;  %v3772_v63 = vadd.s32 1, %v5637_v47 }
 0x292   :  { %12690 = vst [vmem:[#allocation33_spill] sm:$0xff] %v8495_v25  ;;  %v12691_v28 = vand.u32 2147483647, %v12689_v13  ;;  %v3674_v53 = vmul.u32 %v3672_v31, %v3648_v14  ;;  %v8506_v4 = vmul.u32 %v3672_v31, %v3649_v18  ;;  %v3678_v34 = vshll.u32 %v8487_v40, 16 }
 0x293   :  { %v2919_v10 = vadd.f32 1.0, %v2918_v3  ;;  %v2926_v56 = vadd.f32 1.0, %v2925_v0  ;;  %v3078_v21 = vmul.f32 %v3077_v48, %v8414_v60  ;;  %v3091_v37 = vadd.s32 3, %v3074_v19 }
 0x294   :  { %vm8502_vm8 = vcmp.le.f32.partialorder %v12691_v28, 0.7853982  ;;  %v3086_v39 = vadd.f32 -0.16666654, %v3085_v1  ;;  %v3233_v51 = vsel %vm3112_vm2, %v3232_v23, %v3231_v15  ;;  %v3383_v47 = vsub.s32 32, %v8476_v45 }
 0x295   :  { %v3388_v28 = vadd.s32 127, %v3387_v43  ;;  %vm2935_vm10 = vcmp.eq.s32.totalorder %v8483_v54, 2  ;;  %v3537_v14 = vshll.u32 %v8495_v25, 30  ;;  %v3658_v31 = vshll.u32 %v8497_v6, 16 }
 0x296   :  { %vm8518_vm12 = vc.u32 %v3652_v38, %v3656_v9  ;;  %vm3773_vm7 = vcmp.gt.s32.totalorder %v3772_v63, 0  ;;  %vm2932_vm5 = vcmp.eq.s32.totalorder %v8483_v54, 0  ;;  %v3662_v0 = vadd.s32 %v3656_v9, %v3652_v38 }
 0x297   :  { %v3680_v19 = vshll.u32 %v8506_v4, 16  ;;  %vm3682_vm11 = vc.u32 %v3674_v53, %v3678_v34  ;;  %v8524_v15 = vadd.s32 %v3678_v34, %v3674_v53  ;;  %v2927_v48 = vmul.f32 %v2926_v56, %v8278_v8 }
 0x298   :  { %v2936_v1 = vxor.u32 2147483648, %v2919_v10  ;;  %v3079_v23 = vadd.f32 -0.4999988, %v3078_v21  ;;  %v3367_v43 = vadd.s32 %v8177_v20, %v8172_v29  ;;  %v3087_v36 = vmul.f32 %v3086_v39, %v8414_v60 }
 0x299   :  { %v3655_v11 = vmul.u32 %v3651_v50, %v3649_v18  ;;  %v3677_v41 = vmul.u32 %v3673_v62, %v3649_v18  ;;  %v3774_v25 = vsel %vm3773_vm7, %v3772_v63, 0  ;;  %v8533_v38 = vsel %vm8502_vm8, %v12689_v13, %v3233_v51 }
 0x29a   :  { %v3385_v9 = vshrl.u32 %v3367_v43, %v3383_v47  ;;  %v3661_v8 = vsel %vm8518_vm12, 1, %v12603_v61  ;;  %v3683_v53 = vsel %vm3682_vm11, 1, %v12603_v61  ;;  %v3389_v34 = vshll.u32 %v3388_v28, 23 }
 0x29b   :  { %v8540_v29 = vsub.s32 %v8462_v22, %v3537_v14  ;;  %vm3664_vm15 = vc.u32 %v3662_v0, %v3658_v31  ;;  %vm3686_vm4 = vc.u32 %v8524_v15, %v3680_v19  ;;  %v2933_v20 = vxor.u32 2147483648, %v2927_v48 }
 0x29c   :  { %v3080_v50 = vmul.f32 %v3079_v23, %v8414_v60  ;;  %v3384_v62 = vshll.u32 %v8315_v17, %v8476_v45  ;;  %v3776_v18 = vand.u32 31, %v3774_v25  ;;  %v2940_v63 = vstv %s8510_s11  ;;  %s9536_s11 = sld [smem:[#allocation10 + $0x1c]] }
 0x29d   :  { %v3088_v56 = vadd.f32 1.0, %v3087_v36  ;;  %v3663_v21 = vadd.s32 %v3661_v8, %v3655_v11  ;;  %v3685_v39 = vadd.s32 %v3683_v53, %v3677_v41  ;;  %v8551_v22 = vmul.f32 %v8533_v38, %v8533_v38 }
 0x29e   :  { %v3386_v51 = vor.u32 %v3385_v9, %v3384_v62  ;;  %v3665_v47 = vsel %vm3664_vm15, 1, %v12603_v61  ;;  %v3687_v28 = vsel %vm3686_vm4, 1, %v12603_v61  ;;  %v8557_v60 = vsel %vm2935_vm10, %v2936_v1, %v2927_v48  ;;  %v12696_v1 = vld [vmem:[#allocation25_spill] sm:$0xff] }
 0x29f   :  { %v8559_v14 = vand.u32 3, %v3091_v37  ;;  %v3390_v17 = vor.u32 4788187, %v3389_v34  ;;  %v3540_v36 = vsub.s32 0, %v8540_v29  ;;  %v8564_v41 = vsel %vm2932_vm5, %v2919_v10, %v2933_v20 }
 0x2a0   :  { %v8566_v11 = vadd.f32 1.0, %v3080_v50  ;;  %vm3539_vm6 = vcmp.lt.s32.totalorder %v8540_v29, 0  ;;  %v8569_v45 = vsub.s32 32, %v3776_v18  ;;  %v3657_v31 = vshrl.u32 %v8481_v35, 16 }
 0x2a1   :  { %v3667_v3 = vadd.s32 %v3665_v47, %v3663_v21  ;;  %v3679_v0 = vshrl.u32 %v8487_v40, 16  ;;  %v3689_v37 = vadd.s32 %v3687_v28, %v3685_v39  ;;  %v8574_v48 = vmul.f32 %v3088_v56, %v8339_v26 }
 0x2a2   :  { %v3234_v23 = vsub.s32 4, %v12696_v1  ;;  %v3246_v10 = vmul.f32 -0.00019511016, %v8551_v22  ;;  %v3393_v43 = vcvt.s32.f32 %v3386_v51  ;;  %v3391_v9 = vand.u32 2147483647, %v3390_v17 }
 0x2a3   :  { %v3541_v8 = vsel %vm3539_vm6, %v3540_v36, %v8540_v29  ;;  %v3615_v53 = vshrl.u32 %v12610_v33, %v8332_v7  ;;  %v3636_v35 = vsel %vm3634_vm3, %v8397_v5, 2102212464  ;;  %v3659_v40 = vshrl.u32 %v8497_v6, 16 }
 0x2a4   :  { %v3681_v26 = vshrl.u32 %v8506_v4, 16  ;;  %v3788_v34 = vshll.u32 %v12632_v12, %v3776_v18  ;;  %v3789_v20 = vshrl.u32 %v12629_v32, %v8569_v45  ;;  %v3668_v50 = vadd.s32 %v3667_v3, %v3657_v31 }
 0x2a5   :  { %v3690_v62 = vadd.s32 %v3689_v37, %v3679_v0  ;;  %v12489_v56 = vand.u32 2147483647, %v8410_v30  ;;  %v8592_v7 = vshrl.u32 %v3774_v25, 5  ;;  %v3779_v21 = vshll.u32 %v12610_v33, %v3776_v18 }
 0x2a6   :  { %v3782_v5 = vshll.u32 %v12633_v24, %v3776_v18  ;;  %v3791_v6 = vshll.u32 %v12629_v32, %v3776_v18  ;;  %v3792_v39 = vshrl.u32 %v12630_v57, %v8569_v45  ;;  %v3780_v51 = vshrl.u32 %v12633_v24, %v8569_v45 }
 0x2a7   :  { %v3783_v47 = vshrl.u32 %v12634_v44, %v8569_v45  ;;  %v3785_v28 = vshll.u32 %v12634_v44, %v3776_v18  ;;  %v3786_v25 = vshrl.u32 %v12632_v12, %v8569_v45  ;;  %v3247_v17 = vadd.f32 0.008332121, %v3246_v10 }
 0x2a8   :  { %v3394_v36 = vmul.f32 %v3393_v43, %v3391_v9  ;;  %v3635_v31 = vsel %vm3631_vm14, %v3615_v53, %v8399_v58  ;;  %v3790_v3 = vor.u32 %v3789_v20, %v3788_v34  ;;  %vm2931_vm3 = vcmp.lt.s32.totalorder %v8483_v54, 2 }
 0x2a9   :  { %v3637_v0 = vsel %vm3633_vm9, %v8395_v55, %v3636_v35  ;;  %v3691_v37 = vadd.s32 %v3690_v62, %v3681_v26  ;;  %v3769_v18 = vand.u32 8388607, %v12489_v56  ;;  %vm3797_vm1 = vcmp.lt.s32.totalorder %v8592_v7, 4 }
 0x2aa   :  { %v3542_v10 = vclz %v3541_v8  ;;  %v8616_v43 = vadd.s32 %v3668_v50, %v3659_v40  ;;  %v8621_v58 = vadd.s32 %v8524_v15, %v3680_v19  ;;  %v3793_v9 = vor.u32 %v3792_v39, %v3791_v6 }
 0x2ab   :  { %v8623_v53 = vor.u32 %v3780_v51, %v3779_v21  ;;  %v8625_v34 = vor.u32 %v3783_v47, %v3782_v5  ;;  %v8627_v55 = vor.u32 %v3786_v25, %v3785_v28  ;;  %v3921_v35 = vmul.f32 0.0023713738, %v7208_v2 }
 0x2ac   :  { %vm3094_vm14 = vcmp.eq.s32.totalorder %v8559_v14, 0  ;;  %vm3794_vm9 = vcmp.lt.s32.totalorder %v8592_v7, 1  ;;  %vm3796_vm0 = vcmp.lt.s32.totalorder %v8592_v7, 3  ;;  %v3803_v4 = vsel %vm3797_vm1, %v3790_v3, 920167782 }
 0x2ad   :  { %v3923_v19 = vstv %s8589_s12  ;;  %vm2928_vm10 = vweird.f32 %v12676_v59  ;;  %v3235_v15 = vsel %vm3112_vm2, %v3234_v23, %v12696_v1  ;;  %v3638_v8 = vsel %vm3632_vm13, %v3635_v31, %v3637_v0  ;;  %v12698_v0 = vld [vmem:[#allocation29_spill] sm:$0xff]  ;;  %s9613_s12 = sld [smem:[#allocation9 + $0x15]] }
 0x2ae   :  { %v3695_v2 = vadd.s32 1, %v3691_v37  ;;  %v3770_v40 = vor.u32 8388608, %v3769_v18  ;;  %v3095_v26 = vxor.u32 2147483648, %v8574_v48  ;;  %v3239_v20 = vmul.f32 -0.001358992, %v8551_v22 }
 0x2af   :  { %vm3694_vm12 = vc.u32 %v8616_v43, %v8621_v58  ;;  %v3807_v50 = vsel %vm3797_vm1, %v3793_v9, 1326507024  ;;  %vm3795_vm7 = vcmp.lt.s32.totalorder %v8592_v7, 2  ;;  %v3802_v16 = vsel %vm3794_vm9, %v8623_v53, %v8625_v34 }
 0x2b0   :  { %v3804_v1 = vsel %vm3796_vm0, %v8627_v55, %v3803_v4  ;;  %v8656_v23 = vadd.f32 %v3923_v19, %v3921_v35  ;;  %v3248_v62 = vmul.f32 %v3247_v17, %v8551_v22  ;;  %v3395_v21 = vxor.u32 2147483648, %v3394_v36 }
 0x2b1   :  { %v5628_v5 = vadd.s32 4294967294, %v3542_v10  ;;  %v3692_v6 = vmul.u32 %v8435_v49, %v3638_v8  ;;  %v3696_v39 = vsel %vm3694_vm12, %v3695_v2, %v3691_v37  ;;  %v3806_v51 = vsel %vm3794_vm9, %v8625_v34, %v8627_v55 }
 0x2b2   :  { %12697 = vst [vmem:[#allocation25_spill] sm:$0xff] %v8656_v23  ;;  %v3808_v47 = vsel %vm3796_vm0, %v3790_v3, %v3807_v50  ;;  %v8666_v28 = vshll.u32 %v3770_v40, 8  ;;  %v2938_v25 = vsel %vm2931_vm3, %v8564_v41, %v8557_v60  ;;  %vm3090_vm13 = vweird.f32 %v12681_v42 }
 0x2b3   :  { %vm3097_vm2 = vcmp.eq.s32.totalorder %v8559_v14, 2  ;;  %v3098_v49 = vxor.u32 2147483648, %v8566_v11  ;;  %v8679_v17 = vsel %vm3795_vm7, %v3802_v16, %v3804_v1  ;;  %v3237_v31 = vsel %vm8502_vm8, 0, %v3235_v15 }
 0x2b4   :  { %v3240_v3 = vadd.f32 0.041655596, %v3239_v20  ;;  %vm3275_vm5 = vcmp.lt.s32.totalorder %v12698_v0, 0  ;;  %v3928_v54 = vand.u32 2139095040, %v8656_v23  ;;  %vm5629_vm11 = vcmp.lt.s32.totalorder %v5628_v5, 0 }
 0x2b5   :  { %v3396_v60 = vsel %vm3275_vm5, %v3395_v21, %v3394_v36  ;;  %v8687_v41 = vadd.s32 %v3696_v39, %v3692_v6  ;;  %v8691_v37 = vsel %vm3795_vm7, %v3806_v51, %v3808_v47  ;;  %v3096_v46 = vsel %vm3094_vm14, %v8566_v11, %v3095_v26 }
 0x2b6   :  { %v3249_v18 = vadd.f32 -0.16666654, %v3248_v62  ;;  %v3811_v10 = vand.u32 65535, %v8666_v28  ;;  %v3836_v9 = vshrl.u32 %v8679_v17, 16  ;;  %v2939_v35 = vsel %vm2928_vm10, nan, %v2938_v25 }
 0x2b7   :  { %vm3093_vm8 = vcmp.lt.s32.totalorder %v8559_v14, 2  ;;  %v3099_v36 = vsel %vm3097_vm2, %v3098_v49, %v8574_v48  ;;  %v12699_v11 = vand.u32 2147483647, %v12698_v0  ;;  %v8717_v19 = vsel %vm5629_vm11, 0, %v5628_v5 }
 0x2b8   :  { %v3814_v14 = vshrl.u32 %v8691_v37, 16  ;;  %v3929_v15 = vshrl.u32 %v3928_v54, 23  ;;  %v3100_v48 = vsel %vm3093_vm8, %v3096_v46, %v3099_v36  ;;  %v3241_v8 = vmul.f32 %v3240_v3, %v8551_v22 }
 0x2b9   :  { %vm8708_vm15 = vcmp.le.f32.partialorder %v12699_v11, 0.7853982  ;;  %v3254_v2 = vadd.s32 3, %v3237_v31  ;;  %v3698_v40 = vadd.s32 536870912, %v8687_v41  ;;  %v3250_v26 = vmul.f32 %v3249_v18, %v8551_v22 }
 0x2ba   :  { %v8715_v59 = vsel %vm8708_vm15, %v12698_v0, %v3396_v60  ;;  %v3812_v20 = vshrl.u32 %v8666_v28, 16  ;;  %v3835_v50 = vand.u32 65535, %v8679_v17  ;;  %v8725_v16 = vmul.u32 %v3836_v9, %v3811_v10 }
 0x2bb   :  { %v8729_v1 = vmul.f32 %v2940_v63, %v2939_v35  ;;  %v3102_v62 = vstv %s8672_s13  ;;  %v8734_v21 = vmul.f32 %v8715_v59, %v8715_v59  ;;  %v3550_v5 = vsub.s32 4294967266, %v8717_v19  ;;  %v12702_v63 = vld [vmem:[#allocation28_spill] sm:$0xff]  ;;  %s9731_s13 = sld [smem:[#allocation9 + $0x16]] }
 0x2bc   :  { %v3101_v6 = vsel %vm3090_vm13, nan, %v3100_v48  ;;  %v3813_v39 = vand.u32 65535, %v8691_v37  ;;  %v8740_v51 = vmul.u32 %v3814_v14, %v3811_v10  ;;  %v5642_v47 = vadd.s32 4294967169, %v3929_v15 }
 0x2bd   :  { %v3242_v25 = vadd.f32 -0.4999988, %v3241_v8  ;;  %v8742_v49 = vand.u32 3, %v3254_v2  ;;  %v3397_v17 = vsub.s32 4, %v12702_v63  ;;  %v8745_v31 = vshrl.u32 %v3698_v40, 30 }
 0x2be   :  { %v3251_v3 = vadd.f32 1.0, %v3250_v26  ;;  %v3837_v54 = vmul.u32 %v3835_v50, %v3811_v10  ;;  %v8747_v60 = vmul.u32 %v3835_v50, %v3812_v20  ;;  %v3841_v46 = vshll.u32 %v8725_v16, 16 }
 0x2bf   :  { %v8750_v42 = vmul.f32 %v3102_v62, %v3101_v6  ;;  %v3265_v18 = vstv %s8704_s14  ;;  %v3409_v37 = vmul.f32 -0.00019511016, %v8734_v21  ;;  %v3551_v35 = vadd.s32 127, %v3550_v5  ;;  %s9755_s14 = sld [smem:[#allocation10 + $0x1d]] }
 0x2c0   :  { %v3815_v36 = vmul.u32 %v3813_v39, %v3811_v10  ;;  %v8754_v11 = vmul.u32 %v3813_v39, %v3812_v20  ;;  %v3819_v15 = vshll.u32 %v8740_v51, 16  ;;  %v3935_v48 = vadd.s32 1, %v5642_v47 }
 0x2c1   :  { %v3243_v8 = vmul.f32 %v3242_v25, %v8551_v22  ;;  %v3398_v2 = vsel %vm3275_vm5, %v3397_v17, %v12702_v63  ;;  %v3546_v40 = vsub.s32 32, %v8717_v19  ;;  %v3700_v26 = vshll.u32 %v8745_v31, 30 }
 0x2c2   :  { %v3252_v50 = vmul.f32 %v3251_v3, %v8533_v38  ;;  %vm3257_vm4 = vcmp.eq.s32.totalorder %v8742_v49, 0  ;;  %v3843_v10 = vshll.u32 %v8747_v60, 16  ;;  %vm3845_vm6 = vc.u32 %v3837_v54, %v3841_v46 }
 0x2c3   :  { %v8766_v62 = vadd.s32 %v3841_v46, %v3837_v54  ;;  %v3410_v5 = vadd.f32 0.008332121, %v3409_v37  ;;  %v3530_v22 = vadd.s32 %v8391_v27, %v8386_v52  ;;  %v3552_v6 = vshll.u32 %v3551_v35, 23 }
 0x2c4   :  { %v3840_v39 = vmul.u32 %v3836_v9, %v3812_v20  ;;  %vm3260_vm3 = vcmp.eq.s32.totalorder %v8742_v49, 2  ;;  %v3821_v47 = vshll.u32 %v8754_v11, 16  ;;  %vm3823_vm14 = vc.u32 %v3815_v36, %v3819_v15 }
 0x2c5   :  { %v3825_v25 = vadd.s32 %v3819_v15, %v3815_v36  ;;  %vm3936_vm10 = vcmp.gt.s32.totalorder %v3935_v48, 0  ;;  %v3244_v38 = vadd.f32 1.0, %v3243_v8  ;;  %v3548_v63 = vshrl.u32 %v3530_v22, %v3546_v40 }
 0x2c6   :  { %v8773_v17 = vsub.s32 %v8687_v41, %v3700_v26  ;;  %v3846_v3 = vsel %vm3845_vm6, 1, %v12603_v61  ;;  %vm3256_vm12 = vcmp.lt.s32.totalorder %v8742_v49, 2  ;;  %v3258_v54 = vxor.u32 2147483648, %v3252_v50 }
 0x2c7   :  { %v3400_v52 = vsel %vm8708_vm15, 0, %v3398_v2  ;;  %v3818_v27 = vmul.u32 %v3814_v14, %v3812_v20  ;;  %vm3849_vm13 = vc.u32 %v8766_v62, %v3843_v10  ;;  %v3402_v9 = vmul.f32 -0.001358992, %v8734_v21 }
 0x2c8   :  { %v3547_v46 = vshll.u32 %v8540_v29, %v8717_v19  ;;  %v3824_v41 = vsel %vm3823_vm14, 1, %v12603_v61  ;;  %v3937_v37 = vsel %vm3936_vm10, %v3935_v48, 0  ;;  %v3411_v35 = vmul.f32 %v3410_v5, %v8734_v21  ;;  %v5727_v5 = vld [vmem:[#allocation7] sm:$0xff] }
 0x2c9   :  { %v3553_v36 = vor.u32 4788187, %v3552_v6  ;;  %vm3827_vm2 = vc.u32 %v3825_v25, %v3821_v47  ;;  %v3848_v15 = vadd.s32 %v3846_v3, %v3840_v39  ;;  %v3261_v4 = vxor.u32 2147483648, %v3244_v38  ;;  %v4085_v6 = vpop.permute.xlu2 %4084 }
 0x2ca   :  { %v3549_v8 = vor.u32 %v3548_v63, %v3547_v46  ;;  %v3703_v14 = vsub.s32 0, %v8773_v17  ;;  %v3850_v20 = vsel %vm3849_vm13, 1, %v12603_v61  ;;  %v3417_v2 = vadd.s32 3, %v3400_v52 }
 0x2cb   :  { %vm3702_vm5 = vcmp.lt.s32.totalorder %v8773_v17, 0  ;;  %v3826_v40 = vadd.s32 %v3824_v41, %v3818_v27  ;;  %v3939_v26 = vand.u32 31, %v3937_v37  ;;  %v3259_v29 = vsel %vm3257_vm4, %v3244_v38, %v3258_v54 }
 0x2cc   :  { %v3403_v19 = vadd.f32 0.041655596, %v3402_v9  ;;  %v3828_v48 = vsel %vm3827_vm2, 1, %v12603_v61  ;;  %v4087_v22 = vperm.slane %v5727_v5, 5  ;;  %v3412_v39 = vadd.f32 -0.16666654, %v3411_v35 }
 0x2cd   :  { %v3554_v47 = vand.u32 2147483647, %v3553_v36  ;;  %v3842_v25 = vshrl.u32 %v8725_v16, 16  ;;  %v3852_v63 = vadd.s32 %v3850_v20, %v3848_v15  ;;  %v3262_v3 = vsel %vm3260_vm3, %v3261_v4, %v3252_v50  ;;  %v12703_v20 = vld [vmem:[#allocation27_spill] sm:$0xff] }
 0x2ce   :  { %v3556_v52 = vcvt.s32.f32 %v3549_v8  ;;  %v3704_v38 = vsel %vm3702_vm5, %v3703_v14, %v8773_v17  ;;  %v3778_v54 = vshrl.u32 %v12610_v33, %v8569_v45  ;;  %v3799_v27 = vsel %vm3797_vm1, %v8627_v55, 2102212464 }
 0x2cf   :  { %v3820_v9 = vshrl.u32 %v8740_v51, 16  ;;  %v3830_v46 = vadd.s32 %v3828_v48, %v3826_v40  ;;  %v8807_v16 = vsub.s32 32, %v3939_v26  ;;  %v3263_v50 = vsel %vm3256_vm12, %v3259_v29, %v3262_v3 }
 0x2d0   :  { %v3404_v41 = vmul.f32 %v3403_v19, %v8734_v21  ;;  %v8812_v35 = vand.u32 3, %v3417_v2  ;;  %v4088_v36 = vsub.f32 %v4085_v6, %v4087_v22  ;;  %v3413_v15 = vmul.f32 %v3412_v39, %v8734_v21 }
 0x2d1   :  { %v3557_v45 = vmul.f32 %v3556_v52, %v3554_v47  ;;  %v3844_v4 = vshrl.u32 %v8747_v60, 16  ;;  %v3853_v8 = vadd.s32 %v3852_v63, %v3842_v25  ;;  %v3705_v55 = vclz %v3704_v38 }
 0x2d2   :  { %v3798_v51 = vsel %vm3794_vm9, %v3778_v54, %v8623_v53  ;;  %v3800_v49 = vsel %vm3796_vm0, %v8625_v34, %v3799_v27  ;;  %v12488_v14 = vand.u32 2147483647, %v8656_v23  ;;  %vm3438_vm1 = vcmp.lt.s32.totalorder %v12703_v20, 0 }
 0x2d3   :  { %v3822_v2 = vshrl.u32 %v8754_v11, 16  ;;  %v3831_v40 = vadd.s32 %v3830_v46, %v3820_v9  ;;  %v3951_v29 = vshll.u32 %v12632_v12, %v3939_v26  ;;  %v3952_v19 = vshrl.u32 %v12629_v32, %v8807_v16 }
 0x2d4   :  { %vm3253_vm11 = vweird.f32 %v12689_v13  ;;  %v8829_v53 = vshrl.u32 %v3937_v37, 5  ;;  %v3954_v48 = vshll.u32 %v12629_v32, %v3939_v26  ;;  %v3955_v34 = vshrl.u32 %v12630_v57, %v8807_v16 }
 0x2d5   :  { %v8834_v5 = vmul.f32 100.0, %v4088_v36  ;;  %v3854_v22 = vadd.s32 %v3853_v8, %v3844_v4  ;;  %v3942_v11 = vshll.u32 %v12610_v33, %v3939_v26  ;;  %v3945_v6 = vshll.u32 %v12633_v24, %v3939_v26 }
 0x2d6   :  { %v4092_v39 = vstv %s8793_s19  ;;  %v12704_v47 = vand.u32 2147483647, %v12703_v20  ;;  %v3943_v37 = vshrl.u32 %v12633_v24, %v8807_v16  ;;  %v3946_v63 = vshrl.u32 %v12634_v44, %v8807_v16  ;;  %s10031_s19 = sld [smem:[#allocation10 + $0x1e]] }
 0x2d7   :  { %v3948_v3 = vshll.u32 %v12634_v44, %v3939_v26  ;;  %v3949_v52 = vshrl.u32 %v12632_v12, %v8807_v16  ;;  %v3558_v38 = vxor.u32 2147483648, %v3557_v45  ;;  %v8852_v54 = vadd.s32 %v3831_v40, %v3822_v2 }
 0x2d8   :  { %vm8841_vm9 = vcmp.le.f32.partialorder %v12704_v47, 0.7853982  ;;  %v8857_v27 = vadd.s32 %v8766_v62, %v3843_v10  ;;  %v3953_v9 = vor.u32 %v3952_v19, %v3951_v29  ;;  %v3932_v46 = vand.u32 8388607, %v12488_v14  ;;  %v12711_v14 = vld [vmem:[#allocation30_spill] sm:$0xff] }
 0x2d9   :  { %v3956_v36 = vor.u32 %v3955_v34, %v3954_v48  ;;  %vm3960_vm0 = vcmp.lt.s32.totalorder %v8829_v53, 4  ;;  %v8863_v26 = vadd.f32 %v4092_v39, %v8834_v5  ;;  %v3405_v4 = vadd.f32 -0.4999988, %v3404_v41 }
 0x2da   :  { %v3414_v8 = vadd.f32 1.0, %v3413_v15  ;;  %v5633_v47 = vadd.s32 4294967294, %v3705_v55  ;;  %v3801_v2 = vsel %vm3795_vm7, %v3798_v51, %v3800_v49  ;;  %v3858_v60 = vadd.s32 1, %v3854_v22 }
 0x2db   :  { %12707 = vst [vmem:[#allocation29_spill] sm:$0xff] %v8863_v26  ;;  %v8867_v40 = vor.u32 %v3943_v37, %v3942_v11  ;;  %v8869_v10 = vor.u32 %v3946_v63, %v3945_v6  ;;  %v8871_v62 = vor.u32 %v3949_v52, %v3948_v3  ;;  %vm3857_vm8 = vc.u32 %v8852_v54, %v8857_v27 }
 0x2dc   :  { %vm3957_vm15 = vcmp.lt.s32.totalorder %v8829_v53, 1  ;;  %vm3959_vm4 = vcmp.lt.s32.totalorder %v8829_v53, 3  ;;  %v3966_v41 = vsel %vm3960_vm0, %v3953_v9, 920167782  ;;  %v3559_v7 = vsel %vm3438_vm1, %v3558_v38, %v3557_v45  ;;  %v12708_v38 = vld [vmem:[#allocation33_spill] sm:$0xff] }
 0x2dd   :  { %v3933_v15 = vor.u32 8388608, %v3932_v46  ;;  %v3970_v55 = vsel %vm3960_vm0, %v3956_v36, 1326507024  ;;  %v4097_v51 = vand.u32 2139095040, %v8863_v26  ;;  %v3264_v49 = vsel %vm3253_vm11, nan, %v3263_v50 }
 0x2de   :  { %v3406_v29 = vmul.f32 %v3405_v4, %v8734_v21  ;;  %vm5634_vm7 = vcmp.lt.s32.totalorder %v5633_v47, 0  ;;  %v3855_v19 = vmul.u32 %v8666_v28, %v3801_v2  ;;  %v3859_v48 = vsel %vm3857_vm8, %v3858_v60, %v3854_v22 }
 0x2df   :  { %vm3958_vm6 = vcmp.lt.s32.totalorder %v8829_v53, 2  ;;  %v3965_v45 = vsel %vm3957_vm15, %v8867_v40, %v8869_v10  ;;  %v3967_v13 = vsel %vm3959_vm4, %v8871_v62, %v3966_v41  ;;  %v3415_v21 = vmul.f32 %v3414_v8, %v8715_v59 }
 0x2e0   :  { %v8904_v28 = vsel %vm8841_vm9, %v12703_v20, %v3559_v7  ;;  %v3969_v50 = vsel %vm3957_vm15, %v8869_v10, %v8871_v62  ;;  %v3971_v34 = vsel %vm3959_vm4, %v3953_v9, %v3970_v55  ;;  %v3104_v22 = vadd.f32 %v8750_v42, %v8729_v1 }
 0x2e1   :  { %v8914_v11 = vsel %vm5634_vm7, 0, %v5633_v47  ;;  %v8916_v6 = vshll.u32 %v3933_v15, 8  ;;  %v4098_v59 = vshrl.u32 %v4097_v51, 23  ;;  %v3407_v39 = vadd.f32 1.0, %v3406_v29 }
 0x2e2   :  { %vm3419_vm3 = vcmp.lt.s32.totalorder %v8812_v35, 2  ;;  %v8919_v37 = vadd.s32 %v3859_v48, %v3855_v19  ;;  %v8923_v63 = vsel %vm3958_vm6, %v3965_v45, %v3967_v13  ;;  %v3266_v3 = vmul.f32 %v3265_v18, %v3264_v49 }
 0x2e3   :  { %vm3420_vm14 = vcmp.eq.s32.totalorder %v8812_v35, 0  ;;  %v8930_v1 = vmul.f32 %v8904_v28, %v8904_v28  ;;  %v8934_v42 = vsel %vm3958_vm6, %v3969_v50, %v3971_v34  ;;  %v3421_v52 = vxor.u32 2147483648, %v3415_v21 }
 0x2e4   :  { %v3560_v9 = vsub.s32 4, %v12708_v38  ;;  %v3713_v46 = vsub.s32 4294967266, %v8914_v11  ;;  %v4252_v36 = vmul.f32 0.4216965, %v8834_v5  ;;  %v3974_v18 = vand.u32 65535, %v8916_v6 }
 0x2e5   :  { %v3999_v4 = vshrl.u32 %v8923_v63, 16  ;;  %v5647_v8 = vadd.s32 4294967169, %v4098_v59  ;;  %v4254_v47 = vstv %s8884_s2  ;;  %vm3416_vm10 = vweird.f32 %v12698_v0  ;;  %s10125_s2 = sld [smem:[#allocation9 + $0x18]] }
 0x2e6   :  { %vm3423_vm12 = vcmp.eq.s32.totalorder %v8812_v35, 2  ;;  %v3424_v2 = vxor.u32 2147483648, %v3407_v39  ;;  %v3861_v60 = vadd.s32 536870912, %v8919_v37  ;;  %v3977_v41 = vshrl.u32 %v8934_v42, 16 }
 0x2e7   :  { %v8946_v7 = vadd.f32 %v3266_v3, %v3104_v22  ;;  %v3428_v15 = vstv %s8890_s1  ;;  %v3565_v55 = vmul.f32 -0.001358992, %v8930_v1  ;;  %v3572_v51 = vmul.f32 -0.00019511016, %v8930_v1  ;;  %s10206_s1 = sld [smem:[#allocation10 + $0x1f]] }
 0x2e8   :  { %v3422_v49 = vsel %vm3420_vm14, %v3407_v39, %v3421_v52  ;;  %v3561_v29 = vsel %vm3438_vm1, %v3560_v9, %v12708_v38  ;;  %v3714_v19 = vadd.s32 127, %v3713_v46  ;;  %v8956_v48 = vadd.f32 %v4254_v47, %v4252_v36 }
 0x2e9   :  { %v3975_v45 = vshrl.u32 %v8916_v6, 16  ;;  %v3998_v13 = vand.u32 65535, %v8923_v63  ;;  %v8960_v50 = vmul.u32 %v3999_v4, %v3974_v18  ;;  %v4104_v34 = vadd.s32 1, %v5647_v8 }
 0x2ea   :  { %12709 = vst [vmem:[#allocation28_spill] sm:$0xff] %v8956_v48  ;;  %v3425_v22 = vsel %vm3423_vm12, %v3424_v2, %v3415_v21  ;;  %v8964_v59 = vshrl.u32 %v3861_v60, 30  ;;  %v3976_v39 = vand.u32 65535, %v8934_v42  ;;  %v8967_v3 = vmul.u32 %v3977_v41, %v3974_v18 }
 0x2eb   :  { %v3426_v52 = vsel %vm3419_vm3, %v3422_v49, %v3425_v22  ;;  %v3563_v38 = vsel %vm8841_vm9, 0, %v3561_v29  ;;  %v3566_v9 = vadd.f32 0.041655596, %v3565_v55  ;;  %v3573_v63 = vadd.f32 0.008332121, %v3572_v51 }
 0x2ec   :  { %12710 = vst [vmem:[#allocation27_spill] sm:$0xff] %v8964_v59  ;;  %v3693_v46 = vadd.s32 %v8621_v58, %v8616_v43  ;;  %v3709_v36 = vsub.s32 32, %v8914_v11  ;;  %v3715_v21 = vshll.u32 %v3714_v19, 23  ;;  %v4259_v8 = vand.u32 2139095040, %v8956_v48 }
 0x2ed   :  { %v4000_v47 = vmul.u32 %v3998_v13, %v3974_v18  ;;  %v8977_v42 = vmul.u32 %v3998_v13, %v3975_v45  ;;  %v4004_v2 = vshll.u32 %v8960_v50, 16  ;;  %vm4105_vm13 = vcmp.gt.s32.totalorder %v4104_v34, 0 }
 0x2ee   :  { %v3863_v35 = vshll.u32 %v8964_v59, 30  ;;  %v3978_v25 = vmul.u32 %v3976_v39, %v3974_v18  ;;  %v8981_v60 = vmul.u32 %v3976_v39, %v3975_v45  ;;  %v3982_v55 = vshll.u32 %v8967_v3, 16 }
 0x2ef   :  { %v3427_v43 = vsel %vm3416_vm10, nan, %v3426_v52  ;;  %v3567_v58 = vmul.f32 %v3566_v9, %v8930_v1  ;;  %v3574_v51 = vmul.f32 %v3573_v63, %v8930_v1  ;;  %v3580_v49 = vadd.s32 3, %v3563_v38 }
 0x2f0   :  { %v3710_v29 = vshll.u32 %v8773_v17, %v8914_v11  ;;  %v3711_v19 = vshrl.u32 %v3693_v46, %v3709_v36  ;;  %v4106_v13 = vsel %vm4105_vm13, %v4104_v34, 0  ;;  %v4260_v22 = vshrl.u32 %v4259_v8, 23 }
 0x2f1   :  { %vm3601_vm2 = vcmp.lt.s32.totalorder %v12711_v14, 0  ;;  %v3716_v18 = vor.u32 4788187, %v3715_v21  ;;  %v4006_v39 = vshll.u32 %v8977_v42, 16  ;;  %vm4008_vm5 = vc.u32 %v4000_v47, %v4004_v2 }
 0x2f2   :  { %v8992_v56 = vadd.s32 %v4004_v2, %v4000_v47  ;;  %v8995_v0 = vsub.s32 %v8919_v37, %v3863_v35  ;;  %v3984_v52 = vshll.u32 %v8981_v60, 16  ;;  %vm3986_vm1 = vc.u32 %v3978_v25, %v3982_v55 }
 0x2f3   :  { %v3988_v38 = vadd.s32 %v3982_v55, %v3978_v25  ;;  %v3429_v9 = vmul.f32 %v3428_v15, %v3427_v43  ;;  %v8998_v17 = vand.u32 3, %v3580_v49  ;;  %v4003_v11 = vmul.u32 %v3999_v4, %v3975_v45 }
 0x2f4   :  { %v4108_v34 = vand.u32 31, %v4106_v13  ;;  %v3712_v63 = vor.u32 %v3711_v19, %v3710_v29  ;;  %v3981_v46 = vmul.u32 %v3977_v41, %v3975_v45  ;;  %v4009_v36 = vsel %vm4008_vm5, 1, %v12603_v61 }
 0x2f5   :  { %v5652_v21 = vadd.s32 4294967169, %v4260_v22  ;;  %v3568_v8 = vadd.f32 -0.4999988, %v3567_v58  ;;  %v3575_v47 = vadd.f32 -0.16666654, %v3574_v51  ;;  %v3987_v2 = vsel %vm3986_vm1, 1, %v12603_v61 }
 0x2f6   :  { %vm4012_vm11 = vc.u32 %v8992_v56, %v4006_v39  ;;  %v3717_v37 = vand.u32 2147483647, %v3716_v18  ;;  %v3723_v15 = vsub.s32 4, %v8745_v31  ;;  %v3866_v35 = vsub.s32 0, %v8995_v0 }
 0x2f7   :  { %vm3990_vm9 = vc.u32 %v3988_v38, %v3984_v52  ;;  %v9008_v4 = vadd.f32 %v3429_v9, %v8946_v7  ;;  %vm3865_vm8 = vcmp.lt.s32.totalorder %v8995_v0, 0  ;;  %v4011_v41 = vadd.s32 %v4009_v36, %v4003_v11 }
 0x2f8   :  { %v9011_v45 = vsub.s32 32, %v4108_v34  ;;  %v3719_v25 = vcvt.s32.f32 %v3712_v63  ;;  %v3989_v55 = vadd.s32 %v3987_v2, %v3981_v46  ;;  %v4013_v43 = vsel %vm4012_vm11, 1, %v12603_v61 }
 0x2f9   :  { %12712 = vst [vmem:[#allocation33_spill] sm:$0xff] %v9008_v4  ;;  %v4266_v58 = vadd.s32 1, %v5652_v21  ;;  %v3569_v51 = vmul.f32 %v3568_v8, %v8930_v1  ;;  %v3576_v49 = vmul.f32 %v3575_v47, %v8930_v1  ;;  %v3941_v29 = vshrl.u32 %v12610_v33, %v8807_v16 }
 0x2fa   :  { %v3991_v7 = vsel %vm3990_vm9, 1, %v12603_v61  ;;  %v9019_v19 = vmul.f32 %v3719_v25, %v3717_v37  ;;  %v9024_v22 = vsel %vm3601_vm2, %v3723_v15, %v8745_v31  ;;  %v3867_v18 = vsel %vm3865_vm8, %v3866_v35, %v8995_v0 }
 0x2fb   :  { %v3983_v52 = vshrl.u32 %v8967_v3, 16  ;;  %v4005_v38 = vshrl.u32 %v8960_v50, 16  ;;  %v4015_v9 = vadd.s32 %v4013_v43, %v4011_v41  ;;  %v4123_v1 = vshll.u32 %v12629_v32, %v4108_v34 }
 0x2fc   :  { %v4124_v16 = vshrl.u32 %v12630_v57, %v9011_v45  ;;  %v3993_v11 = vadd.s32 %v3991_v7, %v3989_v55  ;;  %v12490_v63 = vand.u32 2147483647, %v8863_v26  ;;  %v9033_v46 = vshrl.u32 %v4106_v13, 5 }
 0x2fd   :  { %vm4267_vm7 = vcmp.gt.s32.totalorder %v4266_v58, 0  ;;  %v3868_v31 = vclz %v3867_v18  ;;  %v3961_v36 = vsel %vm3957_vm15, %v3941_v29, %v8867_v40  ;;  %v4114_v3 = vshll.u32 %v12633_v24, %v4108_v34 }
 0x2fe   :  { %v4117_v50 = vshll.u32 %v12634_v44, %v4108_v34  ;;  %v4115_v21 = vshrl.u32 %v12634_v44, %v9011_v45  ;;  %v4118_v8 = vshrl.u32 %v12632_v12, %v9011_v45  ;;  %v4120_v47 = vshll.u32 %v12632_v12, %v4108_v34 }
 0x2ff   :  { %v4121_v13 = vshrl.u32 %v12629_v32, %v9011_v45  ;;  %v4007_v2 = vshrl.u32 %v8977_v42, 16  ;;  %v4016_v37 = vadd.s32 %v4015_v9, %v4005_v38  ;;  %v4125_v15 = vor.u32 %v4124_v16, %v4123_v1 }
 0x300   :  { %v4268_v40 = vsel %vm4267_vm7, %v4266_v58, 0  ;;  %v3985_v35 = vshrl.u32 %v8981_v60, 16  ;;  %v3994_v41 = vadd.s32 %v3993_v11, %v3983_v52  ;;  %v4101_v25 = vand.u32 8388607, %v12490_v63 }
 0x301   :  { %vm4129_vm15 = vcmp.lt.s32.totalorder %v9033_v46, 4  ;;  %v5638_v55 = vadd.s32 4294967294, %v3868_v31  ;;  %v3962_v43 = vsel %vm3960_vm0, %v8871_v62, 2102212464  ;;  %v4111_v29 = vshll.u32 %v12610_v33, %v4108_v34 }
 0x302   :  { %v4112_v7 = vshrl.u32 %v12633_v24, %v9011_v45  ;;  %v9060_v58 = vor.u32 %v4115_v21, %v4114_v3  ;;  %v9062_v60 = vor.u32 %v4118_v8, %v4117_v50  ;;  %v4122_v18 = vor.u32 %v4121_v13, %v4120_v47 }
 0x303   :  { %v4270_v52 = vand.u32 31, %v4268_v40  ;;  %v4017_v38 = vadd.s32 %v4016_v37, %v4007_v2  ;;  %vm4126_vm3 = vcmp.lt.s32.totalorder %v9033_v46, 1  ;;  %vm4128_vm14 = vcmp.lt.s32.totalorder %v9033_v46, 3 }
 0x304   :  { %v4139_v62 = vsel %vm4129_vm15, %v4125_v15, 1326507024  ;;  %v3963_v34 = vsel %vm3959_vm4, %v8869_v10, %v3962_v43  ;;  %v9071_v9 = vadd.s32 %v3994_v41, %v3985_v35  ;;  %v9076_v1 = vadd.s32 %v8992_v56, %v4006_v39 }
 0x305   :  { %v4102_v16 = vor.u32 8388608, %v4101_v25  ;;  %v9078_v11 = vadd.f32 1.0, %v3569_v51  ;;  %vm5639_vm0 = vcmp.lt.s32.totalorder %v5638_v55, 0  ;;  %v9080_v31 = vor.u32 %v4112_v7, %v4111_v29 }
 0x306   :  { %12713 = vst [vmem:[#allocation36_spill] sm:$0xff] %v9071_v9  ;;  %vm4127_vm10 = vcmp.lt.s32.totalorder %v9033_v46, 2  ;;  %v4135_v3 = vsel %vm4129_vm15, %v4122_v18, 920167782  ;;  %v4138_v10 = vsel %vm4126_vm3, %v9060_v58, %v9062_v60  ;;  %v4140_v56 = vsel %vm4128_vm14, %v4122_v18, %v4139_v62 }
 0x307   :  { %12714 = vst [vmem:[#allocation37_spill] sm:$0xff] %v9076_v1  ;;  %v9091_v42 = vsub.s32 32, %v4270_v52  ;;  %v9093_v39 = vadd.f32 1.0, %v3576_v49  ;;  %v3721_v51 = vxor.u32 2147483648, %v9019_v19  ;;  %v3964_v50 = vsel %vm3958_vm6, %v3961_v36, %v3963_v34 }
 0x308   :  { %v4021_v21 = vadd.s32 1, %v4017_v38  ;;  %v9098_v8 = vsel %vm5639_vm0, 0, %v5638_v55  ;;  %vm4020_vm4 = vc.u32 %v9071_v9, %v9076_v1  ;;  %v9102_v47 = vshll.u32 %v4102_v16, 8 }
 0x309   :  { %v4415_v13 = vmul.f32 0.17782794, %v8834_v5  ;;  %v4134_v49 = vsel %vm4126_vm3, %v9080_v31, %v9060_v58  ;;  %v4136_v53 = vsel %vm4128_vm14, %v9062_v60, %v4135_v3  ;;  %v9114_v36 = vsel %vm4127_vm10, %v4138_v10, %v4140_v56 }
 0x30a   :  { %v4417_v2 = vstv %s9058_s3  ;;  %v4018_v37 = vmul.u32 %v8916_v6, %v3964_v50  ;;  %v12495_v15 = vand.u32 2147483647, %v8956_v48  ;;  %v4285_v35 = vshll.u32 %v12629_v32, %v4270_v52  ;;  %s10290_s3 = sld [smem:[#allocation9 + $0x19]] }
 0x30b   :  { %v4286_v41 = vshrl.u32 %v12630_v57, %v9091_v42  ;;  %v4022_v25 = vsel %vm4020_vm4, %v4021_v21, %v4017_v38  ;;  %v9122_v55 = vshrl.u32 %v4268_v40, 5  ;;  %v4282_v43 = vshll.u32 %v12632_v12, %v4270_v52 }
 0x30c   :  { %v4283_v29 = vshrl.u32 %v12629_v32, %v9091_v42  ;;  %v9129_v7 = vsel %vm4127_vm10, %v4134_v49, %v4136_v53  ;;  %v4143_v6 = vand.u32 65535, %v9102_v47  ;;  %v12496_v18 = vshrl.u32 %v9114_v36, 16 }
 0x30d   :  { %v9133_v62 = vadd.f32 %v4417_v2, %v4415_v13  ;;  %v4276_v34 = vshll.u32 %v12633_v24, %v4270_v52  ;;  %v4277_v40 = vshrl.u32 %v12634_v44, %v9091_v42  ;;  %v4279_v38 = vshll.u32 %v12634_v44, %v4270_v52 }
 0x30e   :  { %v4280_v16 = vshrl.u32 %v12632_v12, %v9091_v42  ;;  %v3876_v3 = vsub.s32 4294967266, %v9098_v8  ;;  %v4273_v10 = vshll.u32 %v12610_v33, %v4270_v52  ;;  %v4274_v56 = vshrl.u32 %v12633_v24, %v9091_v42 }
 0x30f   :  { %12715 = vst [vmem:[#allocation38_spill] sm:$0xff] %v9133_v62  ;;  %v4287_v50 = vor.u32 %v4286_v41, %v4285_v35  ;;  %v12716_v21 = vand.u32 2147483647, %v12711_v14  ;;  %v4168_v49 = vshrl.u32 %v9129_v7, 16  ;;  %v4263_v53 = vand.u32 8388607, %v12495_v15 }
 0x310   :  { %v4284_v2 = vor.u32 %v4283_v29, %v4282_v43  ;;  %vm4291_vm12 = vcmp.lt.s32.totalorder %v9122_v55, 4  ;;  %v9155_v63 = vadd.s32 %v4022_v25, %v4018_v37  ;;  %v4144_v52 = vshrl.u32 %v9102_v47, 16 }
 0x311   :  { %vm9147_vm6 = vcmp.le.f32.partialorder %v12716_v21, 0.7853982  ;;  %v4145_v35 = vand.u32 65535, %v9114_v36  ;;  %v4422_v41 = vand.u32 2139095040, %v9133_v62  ;;  %v9162_v21 = vmul.u32 %v12496_v18, %v4143_v6 }
 0x312   :  { %v4167_v26 = vand.u32 65535, %v9129_v7  ;;  %v9165_v23 = vor.u32 %v4277_v40, %v4276_v34  ;;  %v9167_v15 = vor.u32 %v4280_v16, %v4279_v38  ;;  %v9169_v43 = vor.u32 %v4274_v56, %v4273_v10 }
 0x313   :  { %vm4288_vm13 = vcmp.lt.s32.totalorder %v9122_v55, 1  ;;  %vm4290_vm5 = vcmp.lt.s32.totalorder %v9122_v55, 3  ;;  %v4301_v37 = vsel %vm4291_vm12, %v4287_v50, 1326507024  ;;  %v3722_v25 = vsel %vm3601_vm2, %v3721_v51, %v9019_v19 }
 0x314   :  { %v9178_v29 = vmul.u32 %v4168_v49, %v4143_v6  ;;  %v4264_v7 = vor.u32 8388608, %v4263_v53  ;;  %v4297_v34 = vsel %vm4291_vm12, %v4284_v2, 920167782  ;;  %v3877_v40 = vadd.s32 127, %v3876_v3 }
 0x315   :  { %v4024_v38 = vadd.s32 536870912, %v9155_v63  ;;  %v4147_v16 = vmul.u32 %v4145_v35, %v4143_v6  ;;  %v4423_v10 = vshrl.u32 %v4422_v41, 23  ;;  %v9183_v56 = vmul.u32 %v4145_v35, %v4144_v52 }
 0x316   :  { %vm4289_vm1 = vcmp.lt.s32.totalorder %v9122_v55, 2  ;;  %v4300_v19 = vsel %vm4288_vm13, %v9165_v23, %v9167_v15  ;;  %v4302_v51 = vsel %vm4290_vm5, %v4284_v2, %v4301_v37  ;;  %v4151_v50 = vshll.u32 %v9162_v21, 16 }
 0x317   :  { %v9193_v53 = vmul.u32 %v4167_v26, %v4144_v52  ;;  %v4296_v3 = vsel %vm4288_vm13, %v9169_v43, %v9165_v23  ;;  %v4298_v35 = vsel %vm4290_vm5, %v9167_v15, %v4297_v34  ;;  %v9204_v41 = vmul.f32 %v9093_v39, %v8904_v28 }
 0x318   :  { %v4169_v18 = vmul.u32 %v4167_v26, %v4143_v6  ;;  %v4173_v2 = vshll.u32 %v9178_v29, 16  ;;  %v9207_v37 = vshll.u32 %v4264_v7, 8  ;;  %v9212_v48 = vsel %vm9147_vm6, %v12711_v14, %v3722_v25 }
 0x319   :  { %12720 = vst [vmem:[#allocation40_spill] sm:$0xff] %v9212_v48  ;;  %v3872_v4 = vsub.s32 32, %v9098_v8  ;;  %v9217_v1 = vsel %vm4289_vm1, %v4300_v19, %v4302_v51  ;;  %v5657_v34 = vadd.s32 4294967169, %v4423_v10  ;;  %v3856_v28 = vadd.s32 %v8857_v27, %v8852_v54 }
 0x31a   :  { %12719 = vst [vmem:[#allocation39_spill] sm:$0xff] %v9207_v37  ;;  %v3878_v26 = vshll.u32 %v3877_v40, 23  ;;  %v9221_v39 = vshrl.u32 %v4024_v38, 30  ;;  %v9225_v6 = vsel %vm4289_vm1, %v4296_v3, %v4298_v35  ;;  %v4153_v25 = vshll.u32 %v9183_v56, 16 }
 0x31b   :  { %vm9228_vm2 = vc.u32 %v4147_v16, %v4151_v50  ;;  %v4157_v14 = vadd.s32 %v4151_v50, %v4147_v16  ;;  %vm4177_vm11 = vc.u32 %v4169_v18, %v4173_v2  ;;  %v9233_v10 = vadd.s32 %v4173_v2, %v4169_v18 }
 0x31c   :  { %12721 = vst [vmem:[#allocation41_spill] sm:$0xff] %v9221_v39  ;;  %v4305_v54 = vand.u32 65535, %v9207_v37  ;;  %v4308_v27 = vshrl.u32 %v9217_v1, 16  ;;  %v9239_v40 = vmul.f32 %v9212_v48, %v9212_v48  ;;  %v3874_v38 = vshrl.u32 %v3856_v28, %v3872_v4 }
 0x31d   :  { %v4330_v51 = vshrl.u32 %v9225_v6, 16  ;;  %v4429_v3 = vadd.s32 1, %v5657_v34  ;;  %v3873_v16 = vshll.u32 %v8995_v0, %v9098_v8  ;;  %v3879_v50 = vor.u32 4788187, %v3878_v26 }
 0x31e   :  { %v12724_v35 = vshrl.u32 %v9114_v36, 16  ;;  %v4172_v2 = vmul.u32 %v4168_v49, %v4144_v52  ;;  %v4026_v19 = vshll.u32 %v9221_v39, 30  ;;  %v4156_v9 = vsel %vm9228_vm2, 1, %v12603_v61 }
 0x31f   :  { %vm9250_vm9 = vc.u32 %v4157_v14, %v4153_v25  ;;  %v4178_v4 = vsel %vm4177_vm11, 1, %v12603_v61  ;;  %v12727_v34 = vshll.u32 %v9193_v53, 16  ;;  %v4306_v0 = vshrl.u32 %v9207_v37, 16 }
 0x320   :  { %v4150_v18 = vmul.u32 %v12724_v35, %v4144_v52  ;;  %v4307_v8 = vand.u32 65535, %v9217_v1  ;;  %v9260_v36 = vmul.u32 %v4308_v27, %v4305_v54  ;;  %v3875_v49 = vor.u32 %v3874_v38, %v3873_v16 }
 0x321   :  { %vm4181_vm8 = vc.u32 %v9233_v10, %v12727_v34  ;;  %v4329_v52 = vand.u32 65535, %v9225_v6  ;;  %v9263_v28 = vmul.u32 %v4330_v51, %v4305_v54  ;;  %vm4430_vm7 = vcmp.gt.s32.totalorder %v4429_v3, 0 }
 0x322   :  { %v3735_v14 = vmul.f32 -0.00019511016, %v9239_v40  ;;  %v3880_v26 = vand.u32 2147483647, %v3879_v50  ;;  %v4158_v25 = vadd.s32 %v4156_v9, %v4150_v18  ;;  %v4180_v7 = vadd.s32 %v4178_v4, %v4172_v2 }
 0x323   :  { %v9267_v35 = vsub.s32 %v9155_v63, %v4026_v19  ;;  %v4110_v34 = vshrl.u32 %v12610_v33, %v9011_v45  ;;  %v4160_v1 = vsel %vm9250_vm9, 1, %v12603_v61  ;;  %v4182_v6 = vsel %vm4181_vm8, 1, %v12603_v61 }
 0x324   :  { %v4309_v38 = vmul.u32 %v4307_v8, %v4305_v54  ;;  %v9275_v16 = vmul.u32 %v4307_v8, %v4306_v0  ;;  %v4313_v39 = vshll.u32 %v9260_v36, 16  ;;  %v4431_v50 = vsel %vm4430_vm7, %v4429_v3, 0 }
 0x325   :  { %v3882_v9 = vcvt.s32.f32 %v3875_v49  ;;  %v4331_v18 = vmul.u32 %v4329_v52, %v4305_v54  ;;  %v9278_v2 = vmul.u32 %v4329_v52, %v4306_v0  ;;  %v4335_v63 = vshll.u32 %v9263_v28, 16 }
 0x326   :  { %v4152_v45 = vshrl.u32 %v9162_v21, 16  ;;  %v4162_v19 = vadd.s32 %v4160_v1, %v4158_v25  ;;  %v4174_v48 = vshrl.u32 %v9178_v29, 16  ;;  %v4184_v4 = vadd.s32 %v4182_v6, %v4180_v7 }
 0x327   :  { %v9283_v59 = vmul.f32 %v3882_v9, %v3880_v26  ;;  %vm4028_vm0 = vcmp.lt.s32.totalorder %v9267_v35, 0  ;;  %v4029_v8 = vsub.s32 0, %v9267_v35  ;;  %v4433_v37 = vand.u32 31, %v4431_v50 }
 0x328   :  { %v4130_v54 = vsel %vm4126_vm3, %v4110_v34, %v9080_v31  ;;  %v4131_v3 = vsel %vm4129_vm15, %v9062_v60, 2102212464  ;;  %v4315_v21 = vshll.u32 %v9275_v16, 16  ;;  %vm4317_vm4 = vc.u32 %v4309_v38, %v4313_v39 }
 0x329   :  { %v4319_v29 = vadd.s32 %v4313_v39, %v4309_v38  ;;  %v4337_v49 = vshll.u32 %v9278_v2, 16  ;;  %vm4339_vm2 = vc.u32 %v4331_v18, %v4335_v63  ;;  %v9295_v52 = vadd.s32 %v4335_v63, %v4331_v18 }
 0x32a   :  { %v4154_v26 = vshrl.u32 %v9183_v56, 16  ;;  %v4163_v25 = vadd.s32 %v4162_v19, %v4152_v45  ;;  %v4176_v7 = vshrl.u32 %v9193_v53, 16  ;;  %v4185_v1 = vadd.s32 %v4184_v4, %v4174_v48 }
 0x32b   :  { %v4132_v31 = vsel %vm4128_vm14, %v9060_v58, %v4131_v3  ;;  %v4312_v60 = vmul.u32 %v4308_v27, %v4306_v0  ;;  %v4334_v34 = vmul.u32 %v4330_v51, %v4306_v0  ;;  %v9302_v6 = vsub.s32 32, %v4433_v37 }
 0x32c   :  { %v9305_v38 = vadd.f32 0.008332121, %v3735_v14  ;;  %v4318_v9 = vsel %vm4317_vm4, 1, %v12603_v61  ;;  %v4340_v56 = vsel %vm4339_vm2, 1, %v12603_v61  ;;  %v9313_v63 = vsel %vm4028_vm0, %v4029_v8, %v9267_v35 }
 0x32d   :  { %vm4321_vm15 = vc.u32 %v4319_v29, %v4315_v21  ;;  %vm4343_vm3 = vc.u32 %v9295_v52, %v4337_v49  ;;  %v9322_v58 = vsel %vm4127_vm10, %v4130_v54, %v4132_v31  ;;  %v9324_v27 = vadd.s32 %v4163_v25, %v4154_v26 }
 0x32e   :  { %v12728_v51 = vshll.u32 %v9193_v53, 16  ;;  %v4186_v14 = vadd.s32 %v4185_v1, %v4176_v7  ;;  %v4320_v45 = vadd.s32 %v4318_v9, %v4312_v60  ;;  %v4342_v19 = vadd.s32 %v4340_v56, %v4334_v34 }
 0x32f   :  { %v4445_v48 = vshll.u32 %v12632_v12, %v4433_v37  ;;  %v4446_v4 = vshrl.u32 %v12629_v32, %v9302_v6  ;;  %v4322_v8 = vsel %vm4321_vm15, 1, %v12603_v61  ;;  %v4344_v46 = vsel %vm4343_vm3, 1, %v12603_v61 }
 0x330   :  { %v9329_v0 = vadd.s32 %v9233_v10, %v12728_v51  ;;  %v12508_v54 = vand.u32 2147483647, %v9133_v62  ;;  %v9337_v3 = vshrl.u32 %v4431_v50, 5  ;;  %v4436_v53 = vshll.u32 %v12610_v33, %v4433_v37 }
 0x331   :  { %v4437_v10 = vshrl.u32 %v12633_v24, %v9302_v6  ;;  %v4439_v21 = vshll.u32 %v12633_v24, %v4433_v37  ;;  %v4442_v29 = vshll.u32 %v12634_v44, %v4433_v37  ;;  %v4440_v26 = vshrl.u32 %v12634_v44, %v9302_v6 }
 0x332   :  { %v4443_v25 = vshrl.u32 %v12632_v12, %v9302_v6  ;;  %v4448_v7 = vshll.u32 %v12629_v32, %v4433_v37  ;;  %v4449_v50 = vshrl.u32 %v12630_v57, %v9302_v6  ;;  %v4190_v1 = vadd.s32 1, %v4186_v14 }
 0x333   :  { %v4336_v31 = vshrl.u32 %v9263_v28, 16  ;;  %v4346_v60 = vadd.s32 %v4344_v46, %v4342_v19  ;;  %v4447_v34 = vor.u32 %v4446_v4, %v4445_v48  ;;  %v4314_v9 = vshrl.u32 %v9260_v36, 16 }
 0x334   :  { %v4324_v56 = vadd.s32 %v4322_v8, %v4320_v45  ;;  %v4426_v51 = vand.u32 8388607, %v12508_v54  ;;  %vm4454_vm14 = vcmp.lt.s32.totalorder %v9337_v3, 4  ;;  %vm3764_vm10 = vcmp.lt.s32.totalorder %v8410_v30, 0 }
 0x335   :  { %v4272_v37 = vshrl.u32 %v12610_v33, %v9091_v42  ;;  %v4338_v39 = vshrl.u32 %v9278_v2, 16  ;;  %v4578_v18 = vmul.f32 0.07498942, %v8834_v5  ;;  %v4580_v28 = vstv %s9318_s5  ;;  %s10349_s5 = sld [smem:[#allocation9 + $0x1a]] }
 0x336   :  { %v9362_v19 = vor.u32 %v4437_v10, %v4436_v53  ;;  %v9364_v48 = vor.u32 %v4440_v26, %v4439_v21  ;;  %v9366_v36 = vor.u32 %v4443_v25, %v4442_v29  ;;  %v4450_v45 = vor.u32 %v4449_v50, %v4448_v7 }
 0x337   :  { %v4347_v4 = vadd.s32 %v4346_v60, %v4336_v31  ;;  %vm4451_vm11 = vcmp.lt.s32.totalorder %v9337_v3, 1  ;;  %vm4453_vm9 = vcmp.lt.s32.totalorder %v9337_v3, 3  ;;  %v4460_v42 = vsel %vm4454_vm14, %v4447_v34, 920167782 }
 0x338   :  { %vm3583_vm8 = vcmp.eq.s32.totalorder %v8998_v17, 0  ;;  %v12729_v8 = vand.u32 2147483647, %v8410_v30  ;;  %vm4189_vm0 = vc.u32 %v9324_v27, %v9329_v0  ;;  %v4316_v53 = vshrl.u32 %v9275_v16, 16 }
 0x339   :  { %v4325_v10 = vadd.s32 %v4324_v56, %v4314_v9  ;;  %v4427_v21 = vor.u32 8388608, %v4426_v51  ;;  %v4031_v29 = vclz %v9313_v63  ;;  %v4187_v26 = vmul.u32 %v9102_v47, %v9322_v58 }
 0x33a   :  { %vm9375_vm7 = vcmp.le.f32.partialorder %v12729_v8, 0.7853982  ;;  %v4293_v25 = vsel %vm4291_vm12, %v9167_v15, 2102212464  ;;  %v9388_v7 = vadd.f32 %v4580_v28, %v4578_v18  ;;  %vm3586_vm4 = vcmp.eq.s32.totalorder %v8998_v17, 2 }
 0x33b   :  { %vm4452_vm2 = vcmp.lt.s32.totalorder %v9337_v3, 2  ;;  %v4459_v16 = vsel %vm4451_vm11, %v9362_v19, %v9364_v48  ;;  %v4461_v63 = vsel %vm4453_vm9, %v9366_v36, %v4460_v42  ;;  %v4464_v47 = vsel %vm4454_vm14, %v4450_v45, 1326507024 }
 0x33c   :  { %12732 = vst [vmem:[#allocation42_spill] sm:$0xff] %v9388_v7  ;;  %vm3582_vm12 = vcmp.lt.s32.totalorder %v8998_v17, 2  ;;  %v3728_v15 = vmul.f32 -0.001358992, %v9239_v40  ;;  %v4191_v18 = vsel %vm4189_vm0, %v4190_v1, %v4186_v14  ;;  %v4292_v58 = vsel %vm4288_vm13, %v4272_v37, %v9169_v43 }
 0x33d   :  { %v4348_v50 = vadd.s32 %v4347_v4, %v4338_v39  ;;  %v4294_v31 = vsel %vm4290_vm5, %v9165_v23, %v4293_v25  ;;  %v9409_v60 = vadd.s32 %v4325_v10, %v4316_v53  ;;  %v9414_v9 = vadd.s32 %v9295_v52, %v4337_v49  ;;  %v12735_v10 = vld [vmem:[#allocation39_spill] sm:$0xff] }
 0x33e   :  { %v9416_v56 = vshll.u32 %v4427_v21, 8  ;;  %v3737_v14 = vmul.f32 %v9305_v38, %v9239_v40  ;;  %v9422_v43 = vsel %vm4452_vm2, %v4459_v16, %v4461_v63  ;;  %v4463_v23 = vsel %vm4451_vm11, %v9364_v48, %v9366_v36 }
 0x33f   :  { %v4465_v2 = vsel %vm4453_vm9, %v4447_v34, %v4464_v47  ;;  %vm3579_vm13 = vweird.f32 %v12703_v20  ;;  %v12733_v49 = vxor.u32 2147483648, %v9283_v59  ;;  %v5643_v39 = vadd.s32 4294967294, %v4031_v29 }
 0x340   :  { %v4192_v38 = vadd.s32 %v4191_v18, %v4187_v26  ;;  %v4585_v1 = vand.u32 2139095040, %v9388_v7  ;;  %v3587_v51 = vxor.u32 2147483648, %v9078_v11  ;;  %v3726_v34 = vsel %vm9147_vm6, 0, %v9024_v22 }
 0x341   :  { %v3885_v52 = vsel %vm3764_vm10, %v12733_v49, %v9283_v59  ;;  %v4295_v37 = vsel %vm4289_vm1, %v4292_v58, %v4294_v31  ;;  %v4352_v28 = vadd.s32 1, %v4348_v50  ;;  %vm4351_vm5 = vc.u32 %v9409_v60, %v9414_v9 }
 0x342   :  { %v9449_v59 = vsel %vm4452_vm2, %v4463_v23, %v4465_v2  ;;  %v4468_v45 = vand.u32 65535, %v9416_v56  ;;  %v4493_v4 = vshrl.u32 %v9422_v43, 16  ;;  %v12734_v42 = vxor.u32 2147483648, %v9204_v41 }
 0x343   :  { %v3729_v55 = vadd.f32 0.041655596, %v3728_v15  ;;  %v3738_v13 = vadd.f32 -0.16666654, %v3737_v14  ;;  %v9461_v8 = vsel %vm9375_vm7, %v8410_v30, %v3885_v52  ;;  %vm5644_vm6 = vcmp.lt.s32.totalorder %v5643_v39, 0 }
 0x344   :  { %v3585_v22 = vsel %vm3583_vm8, %v9078_v11, %v12734_v42  ;;  %v4193_v53 = vadd.s32 536870912, %v4192_v38  ;;  %v4349_v21 = vmul.u32 %v12735_v10, %v4295_v37  ;;  %v4586_v29 = vshrl.u32 %v4585_v1, 23 }
 0x345   :  { %v3588_v26 = vsel %vm3586_vm4, %v3587_v51, %v9204_v41  ;;  %v3743_v25 = vadd.s32 3, %v3726_v34  ;;  %v4353_v16 = vsel %vm4351_vm5, %v4352_v28, %v4348_v50  ;;  %v4471_v11 = vshrl.u32 %v9449_v59, 16 }
 0x346   :  { %v3589_v63 = vsel %vm3582_vm12, %v3585_v22, %v3588_v26  ;;  %v4469_v47 = vshrl.u32 %v9416_v56, 16  ;;  %v4492_v15 = vand.u32 65535, %v9422_v43  ;;  %v9472_v18 = vmul.u32 %v4493_v4, %v4468_v45  ;;  %v12736_v22 = vld [vmem:[#allocation27_spill] sm:$0xff] }
 0x347   :  { %v3730_v58 = vmul.f32 %v3729_v55, %v9239_v40  ;;  %v3739_v31 = vmul.f32 %v3738_v13, %v9239_v40  ;;  %v9478_v41 = vmul.f32 %v9461_v8, %v9461_v8  ;;  %v9480_v50 = vsel %vm5644_vm6, 0, %v5643_v39 }
 0x348   :  { %v3591_v14 = vstv %s9430_s30  ;;  %v9483_v23 = vshrl.u32 %v4193_v53, 30  ;;  %v9485_v17 = vadd.s32 %v4353_v16, %v4349_v21  ;;  %v5662_v2 = vadd.s32 4294967169, %v4586_v29  ;;  %s10537_s30 = sld [smem:[#allocation9 + $0x1b]] }
 0x349   :  { %v3590_v43 = vsel %vm3579_vm13, nan, %v3589_v63  ;;  %v9489_v49 = vand.u32 3, %v3743_v25  ;;  %v4470_v52 = vand.u32 65535, %v9449_v59  ;;  %v9492_v1 = vmul.u32 %v4471_v11, %v4468_v45 }
 0x34a   :  { %v4039_v51 = vsub.s32 4294967266, %v9480_v50  ;;  %v4494_v34 = vmul.u32 %v4492_v15, %v4468_v45  ;;  %v9495_v39 = vmul.u32 %v4492_v15, %v4469_v47  ;;  %v4498_v37 = vshll.u32 %v9472_v18, 16 }
 0x34b   :  { %v3731_v28 = vadd.f32 -0.4999988, %v3730_v58  ;;  %v3740_v42 = vadd.f32 1.0, %v3739_v31  ;;  %v3886_v55 = vsub.s32 4, %v12736_v22  ;;  %v3891_v20 = vmul.f32 -0.001358992, %v9478_v41 }
 0x34c   :  { %v3592_v13 = vmul.f32 %v3591_v14, %v3590_v43  ;;  %v4195_v53 = vshll.u32 %v9483_v23, 30  ;;  %v4355_v59 = vadd.s32 536870912, %v9485_v17  ;;  %v4592_v10 = vadd.s32 1, %v5662_v2  ;;  %v12737_v31 = vld [vmem:[#allocation40_spill] sm:$0xff] }
 0x34d   :  { %v3898_v21 = vmul.f32 -0.00019511016, %v9478_v41  ;;  %v4472_v29 = vmul.u32 %v4470_v52, %v4468_v45  ;;  %v9503_v26 = vmul.u32 %v4470_v52, %v4469_v47  ;;  %v4476_v25 = vshll.u32 %v9492_v1, 16 }
 0x34e   :  { %v4040_v16 = vadd.s32 127, %v4039_v51  ;;  %v12509_v63 = vshll.u32 %v9495_v39, 16  ;;  %vm4502_vm1 = vc.u32 %v4494_v34, %v4498_v37  ;;  %v9507_v15 = vadd.s32 %v4498_v37, %v4494_v34 }
 0x34f   :  { %v3732_v58 = vmul.f32 %v3731_v28, %v9239_v40  ;;  %v9511_v14 = vmul.f32 %v3740_v42, %v12737_v31  ;;  %v3887_v2 = vsel %vm3764_vm10, %v3886_v55, %v12736_v22  ;;  %v3892_v45 = vadd.f32 0.041655596, %v3891_v20  ;;  %v12739_v22 = vld [vmem:[#allocation36_spill] sm:$0xff] }
 0x350   :  { %v9516_v43 = vsub.s32 %v4192_v38, %v4195_v53  ;;  %v9518_v52 = vshrl.u32 %v4355_v59, 30  ;;  %v4497_v51 = vmul.u32 %v4493_v4, %v4469_v47  ;;  %vm4593_vm15 = vcmp.gt.s32.totalorder %v4592_v10, 0  ;;  %v12740_v4 = vld [vmem:[#allocation37_spill] sm:$0xff] }
 0x351   :  { %v4478_v54 = vshll.u32 %v9503_v26, 16  ;;  %vm4480_vm3 = vc.u32 %v4472_v29, %v4476_v25  ;;  %v4482_v34 = vadd.s32 %v4476_v25, %v4472_v29  ;;  %v4503_v40 = vsel %vm4502_vm1, 1, %v12603_v61 }
 0x352   :  { %12738 = vst [vmem:[#allocation39_spill] sm:$0xff] %v9518_v52  ;;  %v3899_v37 = vadd.f32 0.008332121, %v3898_v21  ;;  %v4035_v28 = vsub.s32 32, %v9480_v50  ;;  %v4041_v42 = vshll.u32 %v4040_v16, 23  ;;  %vm4506_vm10 = vc.u32 %v9507_v15, %v12509_v63 }
 0x353   :  { %v3889_v38 = vsel %vm9375_vm7, 0, %v3887_v2  ;;  %v4019_v55 = vadd.s32 %v12740_v4, %v12739_v22  ;;  %v4475_v20 = vmul.u32 %v4471_v11, %v4469_v47  ;;  %v4594_v53 = vsel %vm4593_vm15, %v4592_v10, 0  ;;  %v12741_v2 = vld [vmem:[#allocation33_spill] sm:$0xff] }
 0x354   :  { %v3893_v59 = vmul.f32 %v3892_v45, %v9478_v41  ;;  %v4198_v29 = vsub.s32 0, %v9516_v43  ;;  %v4481_v21 = vsel %vm4480_vm3, 1, %v12603_v61  ;;  %v4505_v25 = vadd.s32 %v4503_v40, %v4497_v51 }
 0x355   :  { %vm4197_vm8 = vcmp.lt.s32.totalorder %v9516_v43, 0  ;;  %v4357_v16 = vshll.u32 %v9518_v52, 30  ;;  %vm4484_vm0 = vc.u32 %v4482_v34, %v4478_v54  ;;  %v4507_v46 = vsel %vm4506_vm10, 1, %v12603_v61 }
 0x356   :  { %v3900_v31 = vmul.f32 %v3899_v37, %v9478_v41  ;;  %v4037_v11 = vshrl.u32 %v4019_v55, %v4035_v28  ;;  %v4042_v47 = vor.u32 4788187, %v4041_v42  ;;  %v4596_v10 = vand.u32 31, %v4594_v53 }
 0x357   :  { %v9540_v45 = vadd.f32 %v3592_v13, %v12741_v2  ;;  %v9542_v22 = vadd.f32 1.0, %v3732_v58  ;;  %v4036_v51 = vshll.u32 %v9267_v35, %v9480_v50  ;;  %v4483_v40 = vadd.s32 %v4481_v21, %v4475_v20 }
 0x358   :  { %v4199_v54 = vsel %vm4197_vm8, %v4198_v29, %v9516_v43  ;;  %v4485_v34 = vsel %vm4484_vm0, 1, %v12603_v61  ;;  %v4499_v4 = vshrl.u32 %v9472_v18, 16  ;;  %v4509_v63 = vadd.s32 %v4507_v46, %v4505_v25 }
 0x359   :  { %v9550_v28 = vadd.f32 -0.4999988, %v3893_v59  ;;  %v9552_v42 = vadd.s32 3, %v3889_v38  ;;  %v9555_v13 = vsub.s32 %v9485_v17, %v4357_v16  ;;  %v3901_v58 = vadd.f32 -0.16666654, %v3900_v31 }
 0x35a   :  { %v4038_v35 = vor.u32 %v4037_v11, %v4036_v51  ;;  %v4043_v50 = vand.u32 2147483647, %v4042_v47  ;;  %v9557_v55 = vsub.s32 32, %v4596_v10  ;;  %v4200_v20 = vclz %v4199_v54 }
 0x35b   :  { %v4435_v18 = vshrl.u32 %v12610_v33, %v9302_v6  ;;  %v4477_v29 = vshrl.u32 %v9492_v1, 16  ;;  %v4487_v21 = vadd.s32 %v4485_v34, %v4483_v40  ;;  %v4501_v59 = vshrl.u32 %v9495_v39, 16 }
 0x35c   :  { %v4510_v38 = vadd.s32 %v4509_v63, %v4499_v4  ;;  %v12512_v25 = vand.u32 2147483647, %v9388_v7  ;;  %v4741_v17 = vmul.f32 0.031622775, %v8834_v5  ;;  %vm4359_vm7 = vcmp.lt.s32.totalorder %v9555_v13, 0 }
 0x35d   :  { %v4360_v16 = vsub.s32 0, %v9555_v13  ;;  %v4456_v46 = vsel %vm4454_vm14, %v9366_v36, 2102212464  ;;  %v4743_v31 = vstv %s9536_s11  ;;  %v4608_v6 = vshll.u32 %v12632_v12, %v4596_v10 }
 0x35e   :  { %v4609_v1 = vshrl.u32 %v12629_v32, %v9557_v55  ;;  %v4611_v63 = vshll.u32 %v12629_v32, %v4596_v10  ;;  %v4612_v11 = vshrl.u32 %v12630_v57, %v9557_v55  ;;  %v4455_v47 = vsel %vm4451_vm11, %v4435_v18, %v9362_v19 }
 0x35f   :  { %v4479_v2 = vshrl.u32 %v9503_v26, 16  ;;  %v4488_v51 = vadd.s32 %v4487_v21, %v4477_v29  ;;  %v9581_v40 = vshrl.u32 %v4594_v53, 5  ;;  %v4457_v36 = vsel %vm4453_vm9, %v9364_v48, %v4456_v46 }
 0x360   :  { %v4511_v54 = vadd.s32 %v4510_v38, %v4501_v59  ;;  %v4599_v34 = vshll.u32 %v12610_v33, %v4596_v10  ;;  %v4602_v4 = vshll.u32 %v12633_v24, %v4596_v10  ;;  %v4600_v37 = vshrl.u32 %v12633_v24, %v9557_v55 }
 0x361   :  { %v4603_v19 = vshrl.u32 %v12634_v44, %v9557_v55  ;;  %v4605_v26 = vshll.u32 %v12634_v44, %v4596_v10  ;;  %v4606_v53 = vshrl.u32 %v12632_v12, %v9557_v55  ;;  %vm3746_vm14 = vcmp.eq.s32.totalorder %v9489_v49, 0 }
 0x362   :  { %v4045_v18 = vcvt.s32.f32 %v4038_v35  ;;  %v5648_v48 = vadd.s32 4294967294, %v4200_v20  ;;  %v4610_v29 = vor.u32 %v4609_v1, %v4608_v6  ;;  %v4613_v21 = vor.u32 %v4612_v11, %v4611_v63 }
 0x363   :  { %v9596_v59 = vadd.s32 %v4488_v51, %v4479_v2  ;;  %v12742_v38 = vshll.u32 %v9495_v39, 16  ;;  %v4589_v62 = vand.u32 8388607, %v12512_v25  ;;  %vm4617_vm11 = vcmp.lt.s32.totalorder %v9581_v40, 4 }
 0x364   :  { %v4046_v10 = vmul.f32 %v4045_v18, %v4043_v50  ;;  %v4361_v35 = vsel %vm4359_vm7, %v4360_v16, %v9555_v13  ;;  %v4458_v20 = vsel %vm4452_vm2, %v4455_v47, %v4457_v36  ;;  %v9611_v6 = vadd.f32 %v4743_v31, %v4741_v17 }
 0x365   :  { %v9601_v46 = vadd.s32 %v9507_v15, %v12742_v38  ;;  %vm3749_vm9 = vcmp.eq.s32.totalorder %v9489_v49, 2  ;;  %v4515_v39 = vadd.s32 1, %v4511_v54  ;;  %v9616_v15 = vor.u32 %v4600_v37, %v4599_v34 }
 0x366   :  { %12744 = vst [vmem:[#allocation40_spill] sm:$0xff] %v9611_v6  ;;  %v9618_v1 = vor.u32 %v4603_v19, %v4602_v4  ;;  %v9620_v63 = vor.u32 %v4606_v53, %v4605_v26  ;;  %vm3745_vm4 = vcmp.lt.s32.totalorder %v9489_v49, 2  ;;  %vm4614_vm12 = vcmp.lt.s32.totalorder %v9581_v40, 1  ;;  %v12746_v53 = vld [vmem:[#allocation25_spill] sm:$0xff] }
 0x367   :  { %12743 = vst [vmem:[#allocation27_spill] sm:$0xff] %v9601_v46  ;;  %vm4616_vm13 = vcmp.lt.s32.totalorder %v9581_v40, 3  ;;  %v4623_v3 = vsel %vm4617_vm11, %v4610_v29, 920167782  ;;  %v4627_v50 = vsel %vm4617_vm11, %v4613_v21, 1326507024  ;;  %v3902_v17 = vmul.f32 %v3901_v58, %v9478_v41 }
 0x368   :  { %vm5649_vm2 = vcmp.lt.s32.totalorder %v5648_v48, 0  ;;  %vm4514_vm5 = vc.u32 %v9596_v59, %v9601_v46  ;;  %v4590_v37 = vor.u32 8388608, %v4589_v62  ;;  %v4047_v16 = vxor.u32 2147483648, %v4046_v10 }
 0x369   :  { %v4362_v31 = vclz %v4361_v35  ;;  %v4512_v11 = vmul.u32 %v9416_v56, %v4458_v20  ;;  %vm4615_vm6 = vcmp.lt.s32.totalorder %v9581_v40, 2  ;;  %v4622_v47 = vsel %vm4614_vm12, %v9616_v15, %v9618_v1 }
 0x36a   :  { %v4624_v58 = vsel %vm4616_vm13, %v9620_v63, %v4623_v3  ;;  %v4626_v62 = vsel %vm4614_vm12, %v9618_v1, %v9620_v63  ;;  %v4628_v2 = vsel %vm4616_vm13, %v4610_v29, %v4627_v50  ;;  %v3750_v56 = vxor.u32 2147483648, %v9542_v22 }
 0x36b   :  { %v9648_v51 = vsel %vm5649_vm2, 0, %v5648_v48  ;;  %v4516_v36 = vsel %vm4514_vm5, %v4515_v39, %v4511_v54  ;;  %v4748_v34 = vand.u32 2139095040, %v9611_v6  ;;  %v12745_v4 = vxor.u32 2147483648, %v9511_v14 }
 0x36c   :  { %v9657_v26 = vand.u32 3, %v9552_v42  ;;  %vm3927_vm1 = vcmp.lt.s32.totalorder %v12746_v53, 0  ;;  %v9660_v18 = vshll.u32 %v4590_v37, 8  ;;  %v3895_v48 = vmul.f32 %v9550_v28, %v9478_v41 }
 0x36d   :  { %v3748_v19 = vsel %vm3746_vm14, %v9542_v22, %v12745_v4  ;;  %v3903_v29 = vadd.f32 1.0, %v3902_v17  ;;  %v9666_v54 = vsel %vm4615_vm6, %v4622_v47, %v4624_v58  ;;  %v9670_v21 = vsel %vm4615_vm6, %v4626_v62, %v4628_v2 }
 0x36e   :  { %v4048_v22 = vsel %vm3927_vm1, %v4047_v16, %v4046_v10  ;;  %v4208_v42 = vsub.s32 4294967266, %v9648_v51  ;;  %v5653_v38 = vadd.s32 4294967294, %v4362_v31  ;;  %v9675_v35 = vadd.s32 %v4516_v36, %v4512_v11 }
 0x36f   :  { %v3751_v41 = vsel %vm3749_vm9, %v3750_v56, %v9511_v14  ;;  %v12747_v20 = vand.u32 2147483647, %v12746_v53  ;;  %v4749_v3 = vshrl.u32 %v4748_v34, 23  ;;  %v4631_v50 = vand.u32 65535, %v9660_v18  ;;  %v12750_v56 = vld [vmem:[#allocation30_spill] sm:$0xff] }
 0x370   :  { %v3752_v10 = vsel %vm3745_vm4, %v3748_v19, %v3751_v41  ;;  %v4634_v17 = vshrl.u32 %v9670_v21, 16  ;;  %v4656_v37 = vshrl.u32 %v9666_v54, 16  ;;  %v3896_v16 = vadd.f32 1.0, %v3895_v48 }
 0x371   :  { %vm9683_vm15 = vcmp.le.f32.partialorder %v12747_v20, 0.7853982  ;;  %v3904_v14 = vmul.f32 %v3903_v29, %v9461_v8  ;;  %vm3909_vm3 = vcmp.eq.s32.totalorder %v9657_v26, 0  ;;  %v4204_v11 = vsub.s32 32, %v9648_v51  ;;  %v12751_v29 = vld [vmem:[#allocation41_spill] sm:$0xff] }
 0x372   :  { %v9697_v31 = vsel %vm9683_vm15, %v12746_v53, %v4048_v22  ;;  %v4209_v49 = vadd.s32 127, %v4208_v42  ;;  %vm5654_vm10 = vcmp.lt.s32.totalorder %v5653_v38, 0  ;;  %v4518_v47 = vadd.s32 536870912, %v9675_v35 }
 0x373   :  { %v4632_v58 = vshrl.u32 %v9660_v18, 16  ;;  %v4633_v62 = vand.u32 65535, %v9670_v21  ;;  %v4655_v2 = vand.u32 65535, %v9666_v54  ;;  %v5667_v8 = vadd.s32 4294967169, %v4749_v3 }
 0x374   :  { %vm3742_vm8 = vweird.f32 %v12750_v56  ;;  %vm3908_vm0 = vcmp.lt.s32.totalorder %v9657_v26, 2  ;;  %vm3912_vm7 = vcmp.eq.s32.totalorder %v9657_v26, 2  ;;  %v4188_v36 = vadd.s32 %v9329_v0, %v9324_v27 }
 0x375   :  { %v9709_v34 = vmul.u32 %v4634_v17, %v4631_v50  ;;  %v9711_v4 = vmul.u32 %v4656_v37, %v4631_v50  ;;  %v3910_v19 = vxor.u32 2147483648, %v3904_v14  ;;  %v3913_v48 = vxor.u32 2147483648, %v3896_v16 }
 0x376   :  { %v4049_v21 = vsub.s32 4, %v12751_v29  ;;  %v9716_v54 = vmul.f32 %v9697_v31, %v9697_v31  ;;  %v4205_v22 = vshll.u32 %v9516_v43, %v9648_v51  ;;  %v4206_v42 = vshrl.u32 %v4188_v36, %v4204_v11 }
 0x377   :  { %v4210_v41 = vshll.u32 %v4209_v49, 23  ;;  %v9721_v20 = vsel %vm5654_vm10, 0, %v5653_v38  ;;  %v9723_v27 = vshrl.u32 %v4518_v47, 30  ;;  %v9725_v0 = vmul.u32 %v4633_v62, %v4632_v58 }
 0x378   :  { %v9727_v3 = vmul.u32 %v4655_v2, %v4632_v58  ;;  %v4755_v25 = vadd.s32 1, %v5667_v8  ;;  %v4635_v28 = vmul.u32 %v4633_v62, %v4631_v50  ;;  %v4639_v7 = vshll.u32 %v9709_v34, 16 }
 0x379   :  { %v4657_v52 = vmul.u32 %v4655_v2, %v4631_v50  ;;  %v4661_v46 = vshll.u32 %v9711_v4, 16  ;;  %vm3905_vm14 = vweird.f32 %v8410_v30  ;;  %v3911_v43 = vsel %vm3909_vm3, %v3896_v16, %v3910_v19 }
 0x37a   :  { %v3914_v51 = vsel %vm3912_vm7, %v3913_v48, %v3904_v14  ;;  %v4050_v38 = vsel %vm3927_vm1, %v4049_v21, %v12751_v29  ;;  %v4054_v11 = vmul.f32 -0.001358992, %v9716_v54  ;;  %v4061_v50 = vmul.f32 -0.00019511016, %v9716_v54 }
 0x37b   :  { %v4207_v49 = vor.u32 %v4206_v42, %v4205_v22  ;;  %v4211_v47 = vor.u32 4788187, %v4210_v41  ;;  %v4370_v62 = vsub.s32 4294967266, %v9721_v20  ;;  %v4520_v2 = vshll.u32 %v9723_v27, 30 }
 0x37c   :  { %v4641_v8 = vshll.u32 %v9725_v0, 16  ;;  %vm4756_vm9 = vcmp.gt.s32.totalorder %v4755_v25, 0  ;;  %vm4643_vm4 = vc.u32 %v4635_v28, %v4639_v7  ;;  %v4645_v14 = vadd.s32 %v4639_v7, %v4635_v28 }
 0x37d   :  { %vm4665_vm2 = vc.u32 %v4657_v52, %v4661_v46  ;;  %v9747_v36 = vadd.s32 %v4661_v46, %v4657_v52  ;;  %v3753_v19 = vsel %vm3742_vm8, nan, %v3752_v10  ;;  %v3915_v48 = vsel %vm3908_vm0, %v3911_v43, %v3914_v51 }
 0x37e   :  { %v4052_v29 = vsel %vm9683_vm15, 0, %v4050_v38  ;;  %v4055_v21 = vadd.f32 0.041655596, %v4054_v11  ;;  %v4212_v22 = vand.u32 2147483647, %v4211_v47  ;;  %v4638_v42 = vmul.u32 %v4634_v17, %v4632_v58 }
 0x37f   :  { %v4660_v41 = vmul.u32 %v4656_v37, %v4632_v58  ;;  %v4757_v16 = vsel %vm4756_vm9, %v4755_v25, 0  ;;  %v4062_v7 = vadd.f32 0.008332121, %v4061_v50  ;;  %v4371_v52 = vadd.s32 127, %v4370_v62 }
 0x380   :  { %v4644_v46 = vsel %vm4643_vm4, 1, %v12603_v61  ;;  %v4666_v28 = vsel %vm4665_vm2, 1, %v12603_v61  ;;  %v4214_v26 = vcvt.s32.f32 %v4207_v49  ;;  %v9760_v10 = vsub.s32 %v9675_v35, %v4520_v2 }
 0x381   :  { %vm4647_vm5 = vc.u32 %v4645_v14, %v4641_v8  ;;  %v12752_v39 = vshll.u32 %v9727_v3, 16  ;;  %v12753_v17 = vstv %s9613_s12  ;;  %v9770_v58 = vadd.s32 3, %v4052_v29 }
 0x382   :  { %v9767_v37 = vmul.f32 %v12753_v17, %v3753_v19  ;;  %v4759_v56 = vand.u32 31, %v4757_v16  ;;  %v9774_v43 = vsel %vm3905_vm14, nan, %v3915_v48  ;;  %v9776_v51 = vmul.f32 %v4214_v26, %v4212_v22 }
 0x383   :  { %vm4669_vm1 = vc.u32 %v9747_v36, %v12752_v39  ;;  %v4646_v35 = vadd.s32 %v4644_v46, %v4638_v42  ;;  %v4668_v38 = vadd.s32 %v4666_v28, %v4660_v41  ;;  %v4366_v11 = vsub.s32 32, %v9721_v20  ;;  %v12754_v28 = vld [vmem:[#allocation29_spill] sm:$0xff] }
 0x384   :  { %v4372_v50 = vshll.u32 %v4371_v52, 23  ;;  %v4648_v49 = vsel %vm4647_vm5, 1, %v12603_v61  ;;  %v4670_v47 = vsel %vm4669_vm1, 1, %v12603_v61  ;;  %v9782_v62 = vmul.f32 %v4055_v21, %v9716_v54 }
 0x385   :  { %v4063_v2 = vmul.f32 %v4062_v7, %v9716_v54  ;;  %v4350_v30 = vadd.s32 %v9414_v9, %v9409_v60  ;;  %v4523_v8 = vsub.s32 0, %v9760_v10  ;;  %vm4522_vm15 = vcmp.lt.s32.totalorder %v9760_v10, 0 }
 0x386   :  { %v4662_v14 = vshrl.u32 %v9711_v4, 16  ;;  %v9790_v19 = vsub.s32 32, %v4759_v56  ;;  %v4904_v48 = vmul.f32 0.013335214, %v8834_v5  ;;  %v4640_v29 = vshrl.u32 %v9709_v34, 16 }
 0x387   :  { %v4650_v22 = vadd.s32 %v4648_v49, %v4646_v35  ;;  %v4672_v21 = vadd.s32 %v4670_v47, %v4668_v38  ;;  %v4906_v42 = vstv %s9755_s14  ;;  %v4216_v41 = vxor.u32 2147483648, %v9776_v51 }
 0x388   :  { %v4367_v60 = vshll.u32 %v9555_v13, %v9721_v20  ;;  %v4368_v9 = vshrl.u32 %v4350_v30, %v4366_v11  ;;  %v4373_v7 = vor.u32 4788187, %v4372_v50  ;;  %v4524_v52 = vsel %vm4522_vm15, %v4523_v8, %v9760_v10 }
 0x389   :  { %v4598_v4 = vshrl.u32 %v12610_v33, %v9557_v55  ;;  %v4619_v46 = vsel %vm4617_vm11, %v9620_v63, 2102212464  ;;  %v4642_v34 = vshrl.u32 %v9725_v0, 16  ;;  %vm4096_vm3 = vcmp.lt.s32.totalorder %v12754_v28, 0 }
 0x38a   :  { %v4664_v26 = vshrl.u32 %v9727_v3, 16  ;;  %v4771_v39 = vshll.u32 %v12632_v12, %v4759_v56  ;;  %v4772_v13 = vshrl.u32 %v12629_v32, %v9790_v19  ;;  %v9810_v20 = vadd.f32 %v4906_v42, %v4904_v48 }
 0x38b   :  { %v4651_v17 = vadd.s32 %v4650_v22, %v4640_v29  ;;  %v4673_v35 = vadd.s32 %v4672_v21, %v4662_v14  ;;  %v12518_v55 = vand.u32 2147483647, %v9611_v6  ;;  %v9813_v38 = vshrl.u32 %v4757_v16, 5 }
 0x38c   :  { %12755 = vst [vmem:[#allocation36_spill] sm:$0xff] %v9810_v20  ;;  %v4762_v63 = vshll.u32 %v12610_v33, %v4759_v56  ;;  %v4765_v0 = vshll.u32 %v12633_v24, %v4759_v56  ;;  %v4774_v11 = vshll.u32 %v12629_v32, %v4759_v56  ;;  %v4775_v50 = vshrl.u32 %v12630_v57, %v9790_v19 }
 0x38d   :  { %v12756_v49 = vand.u32 2147483647, %v12754_v28  ;;  %v4763_v30 = vshrl.u32 %v12633_v24, %v9790_v19  ;;  %v4766_v16 = vshrl.u32 %v12634_v44, %v9790_v19  ;;  %v4768_v8 = vshll.u32 %v12634_v44, %v4759_v56  ;;  %v12759_v56 = vld [vmem:[#allocation34_spill] sm:$0xff] }
 0x38e   :  { %v4769_v14 = vshrl.u32 %v12632_v12, %v9790_v19  ;;  %v4369_v48 = vor.u32 %v4368_v9, %v4367_v60  ;;  %v4374_v29 = vand.u32 2147483647, %v4373_v7  ;;  %v4773_v22 = vor.u32 %v4772_v13, %v4771_v39 }
 0x38f   :  { %vm9822_vm11 = vcmp.le.f32.partialorder %v12756_v49, 0.7853982  ;;  %v4911_v21 = vand.u32 2139095040, %v9810_v20  ;;  %v4618_v42 = vsel %vm4614_vm12, %v4598_v4, %v9616_v15  ;;  %v4620_v49 = vsel %vm4616_vm13, %v9618_v1, %v4619_v46 }
 0x390   :  { %v4752_v25 = vand.u32 8388607, %v12518_v55  ;;  %vm4780_vm10 = vcmp.lt.s32.totalorder %v9813_v38, 4  ;;  %vm1444_vm8 = vcmp.lt.s32.totalorder %v12759_v56, 2  ;;  %v4525_v60 = vclz %v4524_v52 }
 0x391   :  { %v12760_v9 = vshll.u32 %v9727_v3, 16  ;;  %v4674_v39 = vadd.s32 %v4673_v35, %v4664_v26  ;;  %v4776_v13 = vor.u32 %v4775_v50, %v4774_v11  ;;  %v9849_v15 = vadd.s32 %v4651_v17, %v4642_v34 }
 0x392   :  { %v9851_v4 = vor.u32 %v4763_v30, %v4762_v63  ;;  %v9853_v1 = vor.u32 %v4766_v16, %v4765_v0  ;;  %v9855_v46 = vor.u32 %v4769_v14, %v4768_v8  ;;  %vm4777_vm12 = vcmp.lt.s32.totalorder %v9813_v38, 1 }
 0x393   :  { %v9847_v7 = vadd.s32 %v9747_v36, %v12760_v9  ;;  %vm4779_vm13 = vcmp.lt.s32.totalorder %v9813_v38, 3  ;;  %v4786_v3 = vsel %vm4780_vm10, %v4773_v22, 920167782  ;;  %v4912_v52 = vshrl.u32 %v4911_v21, 23  ;;  %v12761_v36 = vld [vmem:[#allocation35_spill] sm:$0xff] }
 0x394   :  { %vm1441_vm0 = vweird.f32 %v12761_v36  ;;  %v4064_v26 = vadd.f32 -0.16666654, %v4063_v2  ;;  %v4217_v34 = vsel %vm4096_vm3, %v4216_v41, %v9776_v51  ;;  %v4218_v17 = vsub.s32 4, %v9483_v23 }
 0x395   :  { %v4753_v35 = vor.u32 8388608, %v4752_v25  ;;  %v4376_v63 = vcvt.s32.f32 %v4369_v48  ;;  %v4621_v0 = vsel %vm4615_vm6, %v4618_v42, %v4620_v49  ;;  %v4678_v11 = vadd.s32 1, %v4674_v39 }
 0x396   :  { %v4790_v50 = vsel %vm4780_vm10, %v4776_v13, 1326507024  ;;  %vm4677_vm7 = vc.u32 %v9849_v15, %v9847_v7  ;;  %vm4778_vm14 = vcmp.lt.s32.totalorder %v9813_v38, 2  ;;  %v4785_v51 = vsel %vm4777_vm12, %v9851_v4, %v9853_v1 }
 0x397   :  { %v4787_v40 = vsel %vm4779_vm13, %v9855_v46, %v4786_v3  ;;  %v9883_v25 = vsel %vm9822_vm11, %v12754_v28, %v4217_v34  ;;  %v4377_v2 = vmul.f32 %v4376_v63, %v4374_v29  ;;  %v5658_v41 = vadd.s32 4294967294, %v4525_v60  ;;  %v12763_v60 = vld [vmem:[#allocation32_spill] sm:$0xff] }
 0x398   :  { %v5672_v30 = vadd.s32 4294967169, %v4912_v52  ;;  %v4675_v16 = vmul.u32 %v9660_v18, %v4621_v0  ;;  %v4789_v8 = vsel %vm4777_vm12, %v9853_v1, %v9855_v46  ;;  %v4791_v14 = vsel %vm4779_vm13, %v4773_v22, %v4790_v50  ;;  %v12762_v18 = vld [vmem:[#allocation31_spill] sm:$0xff] }
 0x399   :  { %v9892_v48 = vshll.u32 %v4753_v35, 8  ;;  %v4057_v21 = vadd.f32 -0.4999988, %v9782_v62  ;;  %v4065_v42 = vmul.f32 %v4064_v26, %v9716_v54  ;;  %v4679_v49 = vsel %vm4677_vm7, %v4678_v11, %v4674_v39  ;;  %v12768_v11 = vld [vmem:[#allocation28_spill] sm:$0xff] }
 0x39a   :  { %v9898_v29 = vsel %vm4778_vm14, %v4785_v51, %v4787_v40  ;;  %v1451_v9 = vsel %vm1444_vm8, %v12763_v60, %v12762_v18  ;;  %v3756_v13 = vadd.f32 %v9767_v37, %v9540_v45  ;;  %v12764_v22 = vstv %s9731_s13 }
 0x39b   :  { %v3918_v3 = vmul.f32 %v12764_v22, %v9774_v43  ;;  %v9911_v62 = vmul.f32 %v9883_v25, %v9883_v25  ;;  %v4219_v39 = vsel %vm4096_vm3, %v4218_v17, %v9483_v23  ;;  %v4378_v52 = vxor.u32 2147483648, %v4377_v2 }
 0x39c   :  { %v9918_v26 = vsel %vm4778_vm14, %v4789_v8, %v4791_v14  ;;  %v4918_v56 = vadd.s32 1, %v5672_v30  ;;  %vm5659_vm6 = vcmp.lt.s32.totalorder %v5658_v41, 0  ;;  %v9920_v34 = vadd.s32 %v4679_v49, %v4675_v16 }
 0x39d   :  { %v4794_v45 = vand.u32 65535, %v9892_v48  ;;  %v4819_v37 = vshrl.u32 %v9898_v29, 16  ;;  %v9926_v43 = vsel %vm1441_vm0, nan, %v1451_v9  ;;  %v4058_v35 = vmul.f32 %v4057_v21, %v9716_v54 }
 0x39e   :  { %12765 = vst [vmem:[#allocation37_spill] sm:$0xff] %v9926_v43  ;;  %v4066_v23 = vadd.f32 1.0, %v4065_v42  ;;  %v9930_v17 = vand.u32 3, %v9770_v58  ;;  %v9932_v63 = vadd.f32 %v3918_v3, %v3756_v13  ;;  %v4230_v0 = vmul.f32 -0.00019511016, %v9911_v62 }
 0x39f   :  { %vm4258_vm9 = vcmp.lt.s32.totalorder %v12768_v11, 0  ;;  %v4797_v50 = vshrl.u32 %v9918_v26, 16  ;;  %v4221_v51 = vsel %vm9822_vm11, 0, %v4219_v39  ;;  %v4528_v40 = vsel %vm5659_vm6, 0, %v5658_v41 }
 0x3a0   :  { %12766 = vst [vmem:[#allocation33_spill] sm:$0xff] %v9930_v17  ;;  %v4379_v36 = vsel %vm4258_vm9, %v4378_v52, %v4377_v2  ;;  %vm4919_vm4 = vcmp.gt.s32.totalorder %v4918_v56, 0  ;;  %v4681_v54 = vadd.s32 536870912, %v9920_v34  ;;  %v4795_v58 = vshrl.u32 %v9892_v48, 16  ;;  %v12776_v52 = vld [vmem:[#allocation39_spill] sm:$0xff] }
 0x3a1   :  { %12767 = vst [vmem:[#allocation30_spill] sm:$0xff] %v9932_v63  ;;  %v4818_v30 = vand.u32 65535, %v9898_v29  ;;  %v9944_v16 = vmul.u32 %v4819_v37, %v4794_v45  ;;  %v9946_v8 = vadd.f32 1.0, %v4058_v35  ;;  %v9949_v14 = vmul.f32 %v4066_v23, %v9697_v31 }
 0x3a2   :  { %v4223_v47 = vmul.f32 -0.001358992, %v9911_v62  ;;  %v12771_v21 = vand.u32 2147483647, %v12768_v11  ;;  %v4231_v41 = vadd.f32 0.008332121, %v4230_v0  ;;  %v9959_v49 = vmul.u32 %v4797_v50, %v4794_v45 }
 0x3a3   :  { %12769 = vst [vmem:[#allocation41_spill] sm:$0xff] %v9946_v8  ;;  %v4796_v42 = vand.u32 65535, %v9918_v26  ;;  %v4920_v29 = vsel %vm4919_vm4, %v4918_v56, 0  ;;  %v4238_v18 = vadd.s32 3, %v4221_v51  ;;  %v4529_v60 = vsub.s32 32, %v4528_v40  ;;  %v12775_v56 = vld [vmem:[#allocation27_spill] sm:$0xff] }
 0x3a4   :  { %12770 = vst [vmem:[#allocation29_spill] sm:$0xff] %v9949_v14  ;;  %vm9954_vm2 = vcmp.le.f32.partialorder %v12771_v21, 0.7853982  ;;  %v4533_v9 = vsub.s32 4294967266, %v4528_v40  ;;  %v9966_v13 = vshrl.u32 %v4681_v54, 30  ;;  %v4820_v22 = vmul.u32 %v4818_v30, %v4794_v45 }
 0x3a5   :  { %v9964_v31 = vsel %vm9954_vm2, %v12768_v11, %v4379_v36  ;;  %v9968_v3 = vmul.u32 %v4818_v30, %v4795_v58  ;;  %v4824_v39 = vshll.u32 %v9944_v16, 16  ;;  %v4224_v26 = vadd.f32 0.041655596, %v4223_v47 }
 0x3a6   :  { %12774 = vst [vmem:[#allocation34_spill] sm:$0xff] %v9966_v13  ;;  %v4513_v35 = vadd.s32 %v12775_v56, %v9596_v59  ;;  %v4922_v23 = vand.u32 31, %v4920_v29  ;;  %v4232_v0 = vmul.f32 %v4231_v41, %v9911_v62  ;;  %v9977_v51 = vmul.f32 %v9964_v31, %v9964_v31 }
 0x3a7   :  { %v4798_v36 = vmul.u32 %v4796_v42, %v4794_v45  ;;  %v4802_v54 = vshll.u32 %v9959_v49, 16  ;;  %v9980_v30 = vand.u32 3, %v4238_v18  ;;  %v4534_v55 = vadd.s32 127, %v4533_v9 }
 0x3a8   :  { %v4531_v21 = vshrl.u32 %v4513_v35, %v4529_v60  ;;  %v9982_v63 = vmul.u32 %v4796_v42, %v4795_v58  ;;  %v4683_v47 = vshll.u32 %v9966_v13, 30  ;;  %vm4828_vm5 = vc.u32 %v4820_v22, %v4824_v39 }
 0x3a9   :  { %v9986_v56 = vadd.s32 %v4824_v39, %v4820_v22  ;;  %v9989_v41 = vmul.f32 %v4224_v26, %v9911_v62  ;;  %v4530_v43 = vshll.u32 %v9760_v10, %v4528_v40  ;;  %v9993_v18 = vsub.s32 32, %v4922_v23 }
 0x3aa   :  { %v9995_v60 = vadd.f32 -0.16666654, %v4232_v0  ;;  %v9998_v42 = vmul.f32 -0.00019511016, %v9977_v51  ;;  %vm4806_vm1 = vc.u32 %v4798_v36, %v4802_v54  ;;  %v4823_v9 = vmul.u32 %v4819_v37, %v4795_v58 }
 0x3ab   :  { %v10000_v35 = vor.u32 %v4531_v21, %v4530_v43  ;;  %v4804_v22 = vshll.u32 %v9982_v63, 16  ;;  %v4808_v39 = vadd.s32 %v4802_v54, %v4798_v36  ;;  %v4829_v26 = vsel %vm4828_vm5, 1, %v12603_v61 }
 0x3ac   :  { %v4535_v59 = vshll.u32 %v4534_v55, 23  ;;  %v10005_v45 = vsub.s32 %v9920_v34, %v4683_v47  ;;  %v12777_v10 = vshll.u32 %v9968_v3, 16  ;;  %v4801_v0 = vmul.u32 %v4797_v50, %v4795_v58 }
 0x3ad   :  { %v4807_v37 = vsel %vm4806_vm1, 1, %v12603_v61  ;;  %v4934_v43 = vshll.u32 %v12632_v12, %v4922_v23  ;;  %v4935_v36 = vshrl.u32 %v12629_v32, %v9993_v18  ;;  %v4831_v54 = vadd.s32 %v4829_v26, %v4823_v9 }
 0x3ae   :  { %vm4832_vm15 = vc.u32 %v9986_v56, %v12777_v10  ;;  %v10015_v21 = vshrl.u32 %v4920_v29, 5  ;;  %v4937_v55 = vshll.u32 %v12629_v32, %v4922_v23  ;;  %v4938_v34 = vshrl.u32 %v12630_v57, %v9993_v18 }
 0x3af   :  { %vm4810_vm3 = vc.u32 %v4808_v39, %v4804_v22  ;;  %v4833_v47 = vsel %vm4832_vm15, 1, %v12603_v61  ;;  %v4925_v50 = vshll.u32 %v12610_v33, %v4922_v23  ;;  %v4928_v58 = vshll.u32 %v12633_v24, %v4922_v23 }
 0x3b0   :  { %v4926_v10 = vshrl.u32 %v12633_v24, %v9993_v18  ;;  %v4929_v9 = vshrl.u32 %v12634_v44, %v9993_v18  ;;  %v4931_v29 = vshll.u32 %v12634_v44, %v4922_v23  ;;  %v4932_v26 = vshrl.u32 %v12632_v12, %v9993_v18 }
 0x3b1   :  { %v4536_v40 = vor.u32 4788187, %v4535_v59  ;;  %v4539_v22 = vcvt.s32.f32 %v10000_v35  ;;  %v4809_v39 = vadd.s32 %v4807_v37, %v4801_v0  ;;  %v4936_v53 = vor.u32 %v4935_v36, %v4934_v43 }
 0x3b2   :  { %v4811_v6 = vsel %vm4810_vm3, 1, %v12603_v61  ;;  %v12778_v13 = vand.u32 2147483647, %v9810_v20  ;;  %v4939_v14 = vor.u32 %v4938_v34, %v4937_v55  ;;  %vm4943_vm11 = vcmp.lt.s32.totalorder %v10015_v21, 4 }
 0x3b3   :  { %vm4685_vm8 = vcmp.lt.s32.totalorder %v10005_v45, 0  ;;  %v4686_v23 = vsub.s32 0, %v10005_v45  ;;  %v4825_v59 = vshrl.u32 %v9944_v16, 16  ;;  %v4835_v17 = vadd.s32 %v4833_v47, %v4831_v54 }
 0x3b4   :  { %v4915_v8 = vand.u32 8388607, %v12778_v13  ;;  %v4803_v35 = vshrl.u32 %v9959_v49, 16  ;;  %v10041_v0 = vor.u32 %v4926_v10, %v4925_v50  ;;  %v10043_v37 = vor.u32 %v4929_v9, %v4928_v58 }
 0x3b5   :  { %v10045_v43 = vor.u32 %v4932_v26, %v4931_v29  ;;  %v4813_v36 = vadd.s32 %v4811_v6, %v4809_v39  ;;  %vm4940_vm0 = vcmp.lt.s32.totalorder %v10015_v21, 1  ;;  %vm4942_vm7 = vcmp.lt.s32.totalorder %v10015_v21, 3 }
 0x3b6   :  { %v4949_v13 = vsel %vm4943_vm11, %v4936_v53, 920167782  ;;  %v4537_v55 = vand.u32 2147483647, %v4536_v40  ;;  %v4761_v16 = vshrl.u32 %v12610_v33, %v9790_v19  ;;  %v4916_v49 = vor.u32 8388608, %v4915_v8  ;;  %v12779_v40 = vld [vmem:[#allocation38_spill] sm:$0xff] }
 0x3b7   :  { %v4953_v54 = vsel %vm4943_vm11, %v4939_v14, 1326507024  ;;  %v4687_v6 = vsel %vm4685_vm8, %v4686_v23, %v10005_v45  ;;  %v4805_v34 = vshrl.u32 %v9982_v63, 16  ;;  %v4827_v47 = vshrl.u32 %v9968_v3, 16 }
 0x3b8   :  { %v4836_v50 = vadd.s32 %v4835_v17, %v4825_v59  ;;  %vm4941_vm6 = vcmp.lt.s32.totalorder %v10015_v21, 2  ;;  %v4948_v19 = vsel %vm4940_vm0, %v10041_v0, %v10043_v37  ;;  %v4950_v8 = vsel %vm4942_vm7, %v10045_v43, %v4949_v13 }
 0x3b9   :  { %v5067_v14 = vmul.f32 0.0056234132, %v8834_v5  ;;  %vm4421_vm4 = vcmp.lt.s32.totalorder %v12779_v40, 0  ;;  %v4814_v58 = vadd.s32 %v4813_v36, %v4803_v35  ;;  %v4952_v17 = vsel %vm4940_vm0, %v10043_v37, %v10045_v43 }
 0x3ba   :  { %v4954_v63 = vsel %vm4942_vm7, %v4936_v53, %v4953_v54  ;;  %v5069_v10 = vstv %s10031_s19  ;;  %v4226_v9 = vadd.f32 -0.4999988, %v9989_v41  ;;  %v4540_v29 = vmul.f32 %v4539_v22, %v4537_v55 }
 0x3bb   :  { %v4782_v26 = vsel %vm4780_vm10, %v9855_v46, 2102212464  ;;  %v10081_v39 = vshll.u32 %v4916_v49, 8  ;;  %v4234_v23 = vmul.f32 %v9995_v60, %v9911_v62  ;;  %v4385_v59 = vmul.f32 -0.001358992, %v9977_v51 }
 0x3bc   :  { %v4688_v35 = vclz %v4687_v6  ;;  %v10088_v36 = vsel %vm4941_vm6, %v4948_v19, %v4950_v8  ;;  %v4393_v53 = vadd.f32 0.008332121, %v9998_v42  ;;  %v4837_v41 = vadd.s32 %v4836_v50, %v4827_v47 }
 0x3bd   :  { %v10093_v22 = vsel %vm4941_vm6, %v4952_v17, %v4954_v63  ;;  %v10095_v46 = vadd.f32 %v5069_v10, %v5067_v14  ;;  %v4781_v60 = vsel %vm4777_vm12, %v4761_v16, %v9851_v4  ;;  %v4783_v13 = vsel %vm4779_vm13, %v9853_v1, %v4782_v26 }
 0x3be   :  { %v10103_v55 = vadd.s32 %v4814_v58, %v4805_v34  ;;  %v12781_v49 = vshll.u32 %v9968_v3, 16  ;;  %v12782_v54 = vsub.s32 4, %v12776_v52  ;;  %v4541_v47 = vxor.u32 2147483648, %v4540_v29 }
 0x3bf   :  { %12780 = vst [vmem:[#allocation35_spill] sm:$0xff] %v10095_v46  ;;  %v4957_v4 = vand.u32 65535, %v10081_v39  ;;  %v4982_v16 = vshrl.u32 %v10088_v36, 16  ;;  %v4227_v1 = vmul.f32 %v4226_v9, %v9911_v62  ;;  %v12783_v34 = vand.u32 2147483647, %v12779_v40 }
 0x3c0   :  { %v10108_v42 = vadd.s32 %v9986_v56, %v12781_v49  ;;  %v4381_v6 = vsel %vm4258_vm9, %v12782_v54, %v12776_v52  ;;  %v5663_v56 = vadd.s32 4294967294, %v4688_v35  ;;  %v4960_v50 = vshrl.u32 %v10093_v22, 16 }
 0x3c1   :  { %vm10120_vm10 = vcmp.le.f32.partialorder %v12783_v34, 0.7853982  ;;  %v4386_v19 = vadd.f32 0.041655596, %v4385_v59  ;;  %v4784_v52 = vsel %vm4778_vm14, %v4781_v60, %v4783_v13  ;;  %v4841_v8 = vadd.s32 1, %v4837_v41 }
 0x3c2   :  { %v5074_v14 = vand.u32 2139095040, %v10095_v46  ;;  %v4235_v58 = vadd.f32 1.0, %v4234_v23  ;;  %v4383_v62 = vsel %vm9954_vm2, 0, %v4381_v6  ;;  %v4394_v17 = vmul.f32 %v4393_v53, %v9977_v51 }
 0x3c3   :  { %vm4840_vm12 = vc.u32 %v10103_v55, %v10108_v42  ;;  %v4542_v63 = vsel %vm4421_vm4, %v4541_v47, %v4540_v29  ;;  %v4958_v10 = vshrl.u32 %v10081_v39, 16  ;;  %v4981_v38 = vand.u32 65535, %v10088_v36 }
 0x3c4   :  { %v10139_v9 = vmul.u32 %v4982_v16, %v4957_v4  ;;  %vm4244_vm13 = vcmp.eq.s32.totalorder %v9980_v30, 2  ;;  %vm5664_vm14 = vcmp.lt.s32.totalorder %v5663_v56, 0  ;;  %v4838_v2 = vmul.u32 %v9892_v48, %v4784_v52 }
 0x3c5   :  { %v4959_v26 = vand.u32 65535, %v10093_v22  ;;  %v10144_v23 = vmul.u32 %v4960_v50, %v4957_v4  ;;  %v4228_v59 = vadd.f32 1.0, %v4227_v1  ;;  %vm4241_vm9 = vcmp.eq.s32.totalorder %v9980_v30, 0 }
 0x3c6   :  { %v4387_v29 = vmul.f32 %v4386_v19, %v9977_v51  ;;  %v4842_v35 = vsel %vm4840_vm12, %v4841_v8, %v4837_v41  ;;  %v5075_v53 = vshrl.u32 %v5074_v14, 23  ;;  %v4236_v36 = vmul.f32 %v4235_v58, %v9883_v25 }
 0x3c7   :  { %v4395_v60 = vadd.f32 -0.16666654, %v4394_v17  ;;  %v4400_v13 = vadd.s32 3, %v4383_v62  ;;  %v10152_v48 = vsel %vm10120_vm10, %v12779_v40, %v4542_v63  ;;  %v10154_v22 = vsel %vm5664_vm14, 0, %v5663_v56 }
 0x3c8   :  { %v4983_v49 = vmul.u32 %v4981_v38, %v4957_v4  ;;  %v10156_v54 = vmul.u32 %v4981_v38, %v4958_v10  ;;  %v4987_v6 = vshll.u32 %v10139_v9, 16  ;;  %vm4240_vm2 = vcmp.lt.s32.totalorder %v9980_v30, 2 }
 0x3c9   :  { %v10160_v41 = vadd.s32 %v4842_v35, %v4838_v2  ;;  %v4961_v47 = vmul.u32 %v4959_v26, %v4957_v4  ;;  %v10162_v25 = vmul.u32 %v4959_v26, %v4958_v10  ;;  %v4965_v1 = vshll.u32 %v10144_v23, 16 }
 0x3ca   :  { %v4245_v34 = vxor.u32 2147483648, %v4228_v59  ;;  %v4388_v52 = vadd.f32 -0.4999988, %v4387_v29  ;;  %v5677_v8 = vadd.s32 4294967169, %v5075_v53  ;;  %v4242_v56 = vxor.u32 2147483648, %v4236_v36 }
 0x3cb   :  { %v4396_v14 = vmul.f32 %v4395_v60, %v9977_v51  ;;  %v10167_v58 = vand.u32 3, %v4400_v13  ;;  %v10171_v62 = vmul.f32 %v10152_v48, %v10152_v48  ;;  %v4696_v17 = vsub.s32 4294967266, %v10154_v22 }
 0x3cc   :  { %vm4991_vm5 = vc.u32 %v4983_v49, %v4987_v6  ;;  %v10175_v63 = vadd.s32 %v4987_v6, %v4983_v49  ;;  %vm4237_vm1 = vweird.f32 %v12754_v28  ;;  %v4844_v38 = vadd.s32 536870912, %v10160_v41 }
 0x3cd   :  { %v4967_v2 = vshll.u32 %v10162_v25, 16  ;;  %vm4969_vm15 = vc.u32 %v4961_v47, %v4965_v1  ;;  %v4971_v26 = vadd.s32 %v4965_v1, %v4961_v47  ;;  %v4246_v29 = vsel %vm4244_vm13, %v4245_v34, %v4236_v36 }
 0x3ce   :  { %v4389_v35 = vmul.f32 %v4388_v52, %v9977_v51  ;;  %v4986_v53 = vmul.u32 %v4982_v16, %v4958_v10  ;;  %v5081_v60 = vadd.s32 1, %v5677_v8  ;;  %v4243_v13 = vsel %vm4241_vm9, %v4228_v59, %v4242_v56 }
 0x3cf   :  { %v4397_v49 = vadd.f32 1.0, %v4396_v14  ;;  %v4964_v6 = vmul.u32 %v4960_v50, %v4958_v10  ;;  %v4992_v19 = vsel %vm4991_vm5, 1, %v12603_v61  ;;  %v4543_v4 = vsub.s32 4, %v9723_v27 }
 0x3d0   :  { %v4555_v20 = vmul.f32 -0.00019511016, %v10171_v62  ;;  %v4970_v47 = vsel %vm4969_vm15, 1, %v12603_v61  ;;  %v12786_v1 = vshll.u32 %v10156_v54, 16  ;;  %vm4406_vm8 = vcmp.eq.s32.totalorder %v10167_v58, 2 }
 0x3d1   :  { %v4692_v51 = vsub.s32 32, %v10154_v22  ;;  %v4697_v16 = vadd.s32 127, %v4696_v17  ;;  %v10194_v59 = vshrl.u32 %v4844_v38, 30  ;;  %vm4973_vm12 = vc.u32 %v4971_v26, %v4967_v2 }
 0x3d2   :  { %vm4995_vm3 = vc.u32 %v10175_v63, %v12786_v1  ;;  %v4247_v50 = vsel %vm4240_vm2, %v4243_v13, %v4246_v29  ;;  %v10198_v10 = vadd.f32 1.0, %v4389_v35  ;;  %v4994_v36 = vadd.s32 %v4992_v19, %v4986_v53 }
 0x3d3   :  { %vm5082_vm13 = vcmp.gt.s32.totalorder %v5081_v60, 0  ;;  %v10201_v34 = vmul.f32 %v4397_v49, %v9964_v31  ;;  %v4676_v52 = vadd.s32 %v9847_v7, %v9849_v15  ;;  %v4972_v8 = vadd.s32 %v4970_v47, %v4964_v6 }
 0x3d4   :  { %v4996_v56 = vsel %vm4995_vm3, 1, %v12603_v61  ;;  %v4544_v30 = vsel %vm4421_vm4, %v4543_v4, %v9723_v27  ;;  %v4548_v14 = vmul.f32 -0.001358992, %v10171_v62  ;;  %v4556_v17 = vadd.f32 0.008332121, %v4555_v20 }
 0x3d5   :  { %v4974_v19 = vsel %vm4973_vm12, 1, %v12603_v61  ;;  %v4694_v38 = vshrl.u32 %v4676_v52, %v4692_v51  ;;  %v4698_v31 = vshll.u32 %v4697_v16, 23  ;;  %v4846_v2 = vshll.u32 %v10194_v59, 30  ;;  %v5409_v51 = vld [vmem:[#allocation13 + $0x10] sm:$0xff]  ;;  %v5410_v16 = vld [vmem:[#allocation13 + $0x18] sm:$0xff] }
 0x3d6   :  { %v5083_v26 = vsel %vm5082_vm13, %v5081_v60, 0  ;;  %v10216_v7 = vsel %vm4237_vm1, nan, %v4247_v50  ;;  %v4407_v15 = vxor.u32 2147483648, %v10198_v10  ;;  %v4988_v29 = vshrl.u32 %v10139_v9, 16 }
 0x3d7   :  { %v4998_v35 = vadd.s32 %v4996_v56, %v4994_v36  ;;  %v4404_v27 = vxor.u32 2147483648, %v10201_v34  ;;  %v4693_v20 = vshll.u32 %v10005_v45, %v10154_v22  ;;  %v4966_v4 = vshrl.u32 %v10144_v23, 16 }
 0x3d8   :  { %v4976_v53 = vadd.s32 %v4974_v19, %v4972_v8  ;;  %v4546_v60 = vsel %vm10120_vm10, 0, %v4544_v30  ;;  %v4549_v13 = vadd.f32 0.041655596, %v4548_v14  ;;  %v4557_v28 = vmul.f32 %v4556_v17, %v10171_v62  ;;  %v5408_v14 = vld [vmem:[#allocation13 + $0x8] sm:$0xff] }
 0x3d9   :  { %v5085_v49 = vand.u32 31, %v5083_v26  ;;  %v4695_v6 = vor.u32 %v4694_v38, %v4693_v20  ;;  %v4699_v47 = vor.u32 4788187, %v4698_v31  ;;  %v10228_v9 = vsub.s32 %v10160_v41, %v4846_v2 }
 0x3da   :  { %v4924_v1 = vshrl.u32 %v12610_v33, %v9993_v18  ;;  %v10235_v45 = vsel %vm4406_vm8, %v4407_v15, %v10201_v34  ;;  %v4990_v3 = vshrl.u32 %v10156_v54, 16  ;;  %v4999_v23 = vadd.s32 %v4998_v35, %v4988_v29 }
 0x3db   :  { %v5230_v22 = vmul.f32 0.0023713738, %v8834_v5  ;;  %vm4403_vm4 = vcmp.eq.s32.totalorder %v10167_v58, 0  ;;  %v4945_v41 = vsel %vm4943_vm11, %v10045_v43, 2102212464  ;;  %v4968_v18 = vshrl.u32 %v10162_v25, 16 }
 0x3dc   :  { %v4977_v50 = vadd.s32 %v4976_v53, %v4966_v4  ;;  %v5232_v36 = vstv %s10206_s1  ;;  %v4550_v52 = vmul.f32 %v4549_v13, %v10171_v62  ;;  %v4558_v8 = vadd.f32 -0.16666654, %v4557_v28  ;;  %v5407_v5 = vld [vmem:[#allocation13] sm:$0xff] }
 0x3dd   :  { %v10246_v56 = vadd.s32 3, %v4546_v60  ;;  %v10248_v30 = vsub.s32 32, %v5085_v49  ;;  %v4702_v17 = vcvt.s32.f32 %v4695_v6  ;;  %v4849_v19 = vsub.s32 0, %v10228_v9 }
 0x3de   :  { %v4944_v43 = vsel %vm4940_vm0, %v4924_v1, %v10041_v0  ;;  %v5412_v38 = vpack.c.bf16 %v5410_v16, %v5409_v51  ;;  %vm4848_vm11 = vcmp.lt.s32.totalorder %v10228_v9, 0  ;;  %v4946_v25 = vsel %vm4942_vm7, %v10043_v37, %v4945_v41 }
 0x3df   :  { %v5000_v31 = vadd.s32 %v4999_v23, %v4990_v3  ;;  %v10258_v2 = vadd.f32 %v5232_v36, %v5230_v22  ;;  %v4700_v15 = vand.u32 2147483647, %v4699_v47  ;;  %v10260_v29 = vadd.s32 %v4977_v50, %v4968_v18  ;;  %v12789_v36 = vld [vmem:[#allocation33_spill] sm:$0xff] }
 0x3e0   :  { %v12788_v35 = vshll.u32 %v10156_v54, 16  ;;  %v5411_v4 = vpack.c.bf16 %v5408_v14, %v5407_v5  ;;  %5423 = vmatpush.bf16.msra.mxu0 %v5412_v38  ;;  %vm4402_vm0 = vcmp.lt.s32.totalorder %v10167_v58, 2  ;;  %v5097_v0 = vshll.u32 %v12632_v12, %v5085_v49 }
 0x3e1   :  { %12787 = vst [vmem:[#allocation31_spill] sm:$0xff] %v10258_v2  ;;  %v5098_v37 = vshrl.u32 %v12629_v32, %v10248_v30  ;;  %v5100_v53 = vshll.u32 %v12629_v32, %v5085_v49  ;;  %v5101_v60 = vshrl.u32 %v12630_v57, %v10248_v30  ;;  %v4850_v13 = vsel %vm4848_vm11, %v4849_v19, %v10228_v9 }
 0x3e2   :  { %v10265_v20 = vadd.s32 %v10175_v63, %v12788_v35  ;;  %v4947_v54 = vsel %vm4941_vm6, %v4944_v43, %v4946_v25  ;;  %v12530_v63 = vand.u32 2147483647, %v10095_v46  ;;  %v10278_v28 = vshrl.u32 %v5083_v26, 5 }
 0x3e3   :  { %v5004_v6 = vadd.s32 1, %v5000_v31  ;;  %v5088_v47 = vshll.u32 %v12610_v33, %v5085_v49  ;;  %v5091_v1 = vshll.u32 %v12633_v24, %v5085_v49  ;;  %v5237_v3 = vand.u32 2139095040, %v10258_v2 }
 0x3e4   :  { %v5089_v23 = vshrl.u32 %v12633_v24, %v10248_v30  ;;  %v5092_v22 = vshrl.u32 %v12634_v44, %v10248_v30  ;;  %v5094_v21 = vshll.u32 %v12634_v44, %v5085_v49  ;;  %v5095_v51 = vshrl.u32 %v12632_v12, %v10248_v30  ;;  %5424 = vmatpush.bf16.msra.mxu0 %v5411_v4 }
 0x3e5   :  { %vm4399_vm7 = vweird.f32 %v12768_v11  ;;  %v4405_v26 = vsel %vm4403_vm4, %v10198_v10, %v4404_v27  ;;  %vm5003_vm6 = vc.u32 %v10260_v29, %v10265_v20  ;;  %v5099_v16 = vor.u32 %v5098_v37, %v5097_v0  ;;  %v12791_v11 = vld [vmem:[#allocation29_spill] sm:$0xff] }
 0x3e6   :  { %v5102_v41 = vor.u32 %v5101_v60, %v5100_v53  ;;  %v4703_v49 = vmul.f32 %v4702_v17, %v4700_v15  ;;  %v4851_v18 = vclz %v4850_v13  ;;  %v5078_v50 = vand.u32 8388607, %v12530_v63  ;;  %v12790_v60 = vld [vmem:[#allocation42_spill] sm:$0xff] }
 0x3e7   :  { %vm5106_vm10 = vcmp.lt.s32.totalorder %v10278_v28, 4  ;;  %vm4072_vm14 = vcmp.eq.s32.totalorder %v12789_v36, 0  ;;  %v4551_v5 = vadd.f32 -0.4999988, %v4550_v52  ;;  %v4559_v34 = vmul.f32 %v4558_v8, %v10171_v62 }
 0x3e8   :  { %v5001_v14 = vmul.u32 %v10081_v39, %v4947_v54  ;;  %v5238_v10 = vshrl.u32 %v5237_v3, 23  ;;  %v5005_v27 = vsel %vm5003_vm6, %v5004_v6, %v5000_v31  ;;  %v10306_v19 = vor.u32 %v5089_v23, %v5088_v47 }
 0x3e9   :  { %v10308_v43 = vor.u32 %v5092_v22, %v5091_v1  ;;  %v10310_v17 = vor.u32 %v5095_v51, %v5094_v21  ;;  %vm5103_vm9 = vcmp.lt.s32.totalorder %v10278_v28, 1  ;;  %vm5105_vm2 = vcmp.lt.s32.totalorder %v10278_v28, 3  ;;  %v12793_v21 = vld [vmem:[#allocation41_spill] sm:$0xff] }
 0x3ea   :  { %v5112_v52 = vsel %vm5106_vm10, %v5099_v16, 920167782  ;;  %v5116_v8 = vsel %vm5106_vm10, %v5102_v41, 1326507024  ;;  %v4409_v39 = vsel %vm4402_vm0, %v4405_v26, %v10235_v45  ;;  %v4704_v38 = vxor.u32 2147483648, %v4703_v49 }
 0x3eb   :  { %v5668_v25 = vadd.s32 4294967294, %v4851_v18  ;;  %v5079_v31 = vor.u32 8388608, %v5078_v50  ;;  %v4552_v15 = vmul.f32 %v4551_v5, %v10171_v62  ;;  %v4560_v35 = vadd.f32 1.0, %v4559_v34 }
 0x3ec   :  { %v10322_v4 = vadd.s32 %v5005_v27, %v5001_v14  ;;  %vm5104_vm5 = vcmp.lt.s32.totalorder %v10278_v28, 2  ;;  %v5111_v0 = vsel %vm5103_vm9, %v10306_v19, %v10308_v43  ;;  %v5113_v58 = vsel %vm5105_vm2, %v10310_v17, %v5112_v52 }
 0x3ed   :  { %v5115_v45 = vsel %vm5103_vm9, %v10308_v43, %v10310_v17  ;;  %v5117_v62 = vsel %vm5105_vm2, %v5099_v16, %v5116_v8  ;;  %v4411_v37 = vstv %s10290_s3  ;;  %v10340_v53 = vand.u32 3, %v10246_v56 }
 0x3ee   :  { %vm4584_vm1 = vcmp.lt.s32.totalorder %v12790_v60, 0  ;;  %v5682_v13 = vadd.s32 4294967169, %v5238_v10  ;;  %v4410_v54 = vsel %vm4399_vm7, nan, %v4409_v39  ;;  %vm5669_vm15 = vcmp.lt.s32.totalorder %v5668_v25, 0 }
 0x3ef   :  { %v4705_v6 = vsel %vm4584_vm1, %v4704_v38, %v4703_v49  ;;  %v10347_v47 = vshll.u32 %v5079_v31, 8  ;;  %v4553_v1 = vadd.f32 1.0, %v4552_v15  ;;  %v5007_v3 = vadd.s32 536870912, %v10322_v4 }
 0x3f0   :  { %v10354_v56 = vsel %vm5104_vm5, %v5111_v0, %v5113_v58  ;;  %v10358_v23 = vsel %vm5104_vm5, %v5115_v45, %v5117_v62  ;;  %v12792_v22 = vxor.u32 2147483648, %v12791_v11  ;;  %v4561_v16 = vmul.f32 %v4560_v35, %v10152_v48 }
 0x3f1   :  { %v12795_v41 = vand.u32 2147483647, %v12790_v60  ;;  %v12798_v18 = vstv %s10125_s2  ;;  %v4854_v34 = vsel %vm5669_vm15, 0, %v5668_v25  ;;  %v5244_v14 = vadd.s32 1, %v5682_v13  ;;  %v12800_v13 = vld [vmem:[#allocation34_spill] sm:$0xff] }
 0x3f2   :  { %v10365_v51 = vsel %vm4072_vm14, %v12793_v21, %v12792_v22  ;;  %v4250_v50 = vmul.f32 %v12798_v18, %v10216_v7  ;;  %v4412_v10 = vmul.f32 %v4411_v37, %v4410_v54  ;;  %v5120_v27 = vand.u32 65535, %v10347_v47 }
 0x3f3   :  { %12794 = vst [vmem:[#allocation32_spill] sm:$0xff] %v10365_v51  ;;  %vm10371_vm3 = vcmp.le.f32.partialorder %v12795_v41, 0.7853982  ;;  %v5123_v48 = vshrl.u32 %v10358_v23, 16  ;;  %v5145_v52 = vshrl.u32 %v10354_v56, 16  ;;  %vm4565_vm8 = vcmp.lt.s32.totalorder %v10340_v53, 2 }
 0x3f4   :  { %v10381_v5 = vsel %vm10371_vm3, %v12790_v60, %v4705_v6  ;;  %vm4566_vm12 = vcmp.eq.s32.totalorder %v10340_v53, 0  ;;  %v4570_v7 = vxor.u32 2147483648, %v4553_v1  ;;  %v10388_v8 = vshrl.u32 %v5007_v3, 30 }
 0x3f5   :  { %v4567_v39 = vxor.u32 2147483648, %v4561_v16  ;;  %v10392_v38 = vmul.f32 %v10381_v5, %v10381_v5  ;;  %v4855_v25 = vsub.s32 32, %v4854_v34  ;;  %v4859_v31 = vsub.s32 4294967266, %v4854_v34 }
 0x3f6   :  { %12799 = vst [vmem:[#allocation28_spill] sm:$0xff] %v10388_v8  ;;  %v5121_v15 = vshrl.u32 %v10347_v47, 16  ;;  %v5122_v35 = vand.u32 65535, %v10358_v23  ;;  %v5144_v0 = vand.u32 65535, %v10354_v56  ;;  %vm5245_vm13 = vcmp.gt.s32.totalorder %v5244_v14, 0 }
 0x3f7   :  { %v10397_v58 = vadd.f32 %v4412_v10, %v4250_v50  ;;  %vm4569_vm4 = vcmp.eq.s32.totalorder %v10340_v53, 2  ;;  %v10400_v45 = vmul.u32 %v5123_v48, %v5120_v27  ;;  %v10402_v62 = vmul.u32 %v5145_v52, %v5120_v27 }
 0x3f8   :  { %v4706_v54 = vsub.s32 4, %v12800_v13  ;;  %v4839_v6 = vadd.s32 %v10108_v42, %v10103_v55  ;;  %v5009_v3 = vshll.u32 %v10388_v8, 30  ;;  %v4571_v23 = vsel %vm4569_vm4, %v4570_v7, %v4561_v16  ;;  %v5405_v42 = vld [vmem:[#allocation12] sm:$0xff] }
 0x3f9   :  { %v4711_v56 = vmul.f32 -0.001358992, %v10392_v38  ;;  %v4860_v22 = vadd.s32 127, %v4859_v31  ;;  %v5246_v41 = vsel %vm5245_vm13, %v5244_v14, 0  ;;  %v4568_v18 = vsel %vm4566_vm12, %v4553_v1, %v4567_v39 }
 0x3fa   :  { %v4857_v50 = vshrl.u32 %v4839_v6, %v4855_v25  ;;  %v10412_v10 = vmul.u32 %v5122_v35, %v5121_v15  ;;  %v5146_v26 = vmul.u32 %v5144_v0, %v5120_v27  ;;  %v5124_v63 = vmul.u32 %v5122_v35, %v5120_v27 }
 0x3fb   :  { %v5128_v37 = vshll.u32 %v10400_v45, 16  ;;  %v10415_v51 = vmul.u32 %v5144_v0, %v5121_v15  ;;  %v5150_v55 = vshll.u32 %v10402_v62, 16  ;;  %v4718_v16 = vmul.f32 -0.00019511016, %v10392_v38 }
 0x3fc   :  { %v4856_v7 = vshll.u32 %v10228_v9, %v4854_v34  ;;  %v10421_v14 = vsub.s32 %v10322_v4, %v5009_v3  ;;  %v5248_v1 = vand.u32 31, %v5246_v41  ;;  %v10425_v39 = vsel %vm4565_vm8, %v4568_v18, %v4571_v23  ;;  %v1458_v3 = vpop.permute.xlu0 %1457  ;;  %v1464_v18 = vpop.permute.xlu1 %1463 }
 0x3fd   :  { %v10430_v27 = vsel %vm4584_vm1, %v4706_v54, %v12800_v13  ;;  %v10432_v25 = vadd.f32 0.041655596, %v4711_v56  ;;  %v4861_v31 = vshll.u32 %v4860_v22, 23  ;;  %v5130_v9 = vshll.u32 %v10412_v10, 16 }
 0x3fe   :  { %v10434_v35 = vor.u32 %v4857_v50, %v4856_v7  ;;  %v5406_v34 = vpack.c.bf16 %v5405_v42, %v5405_v42  ;;  %v5134_v0 = vadd.s32 %v5128_v37, %v5124_v63  ;;  %v12531_v53 = vshll.u32 %v10415_v51, 16 }
 0x3ff   :  { %vm5154_vm11 = vc.u32 %v5146_v26, %v5150_v55  ;;  %v10439_v6 = vadd.s32 %v5150_v55, %v5146_v26  ;;  %v4719_v23 = vadd.f32 0.008332121, %v4718_v16  ;;  %v5012_v13 = vsub.s32 0, %v10421_v14  ;;  %v12801_v26 = vld [vmem:[#allocation24_spill] sm:$0xff] }
 0x400   :  { %vm5132_vm0 = vc.u32 %v5124_v63, %v5128_v37  ;;  %v10442_v54 = vsub.s32 32, %v5248_v1  ;;  %v4862_v56 = vor.u32 4788187, %v4861_v31  ;;  %vm5011_vm7 = vcmp.lt.s32.totalorder %v10421_v14, 0 }
 0x401   :  { %v5149_v22 = vmul.u32 %v5145_v52, %v5121_v15  ;;  %vm5413_vm6 = vcmask 261120   ;;  %v4865_v50 = vcvt.s32.f32 %v10434_v35  ;;  %v5127_v42 = vmul.u32 %v5123_v48, %v5121_v15 }
 0x402   :  { %v5155_v7 = vsel %vm5154_vm11, 1, %v12603_v61  ;;  %v12802_v55 = vperm.slane %v12801_v26, 1  ;;  %5685 = vmatmul.msk.bf16.vlgmr.msra.gmra.mxu0 %vm5413_vm6, %v5406_v34  ;;  %v5133_v63 = vsel %vm5132_vm0, 1, %v12603_v61  ;;  %vm5136_vm14 = vc.u32 %v5134_v0, %v5130_v9 }
 0x403   :  { %vm5158_vm1 = vc.u32 %v10439_v6, %v12531_v53  ;;  %v12803_v52 = vand.u32 2147483647, %v10258_v2  ;;  %v5013_v16 = vsel %vm5011_vm7, %v5012_v13, %v10421_v14  ;;  %v5263_v48 = vshll.u32 %v12629_v32, %v5248_v1 }
 0x404   :  { %v1461_v4 = vsub.f32 %v1458_v3, %v12802_v55  ;;  %v5264_v15 = vshrl.u32 %v12630_v57, %v10442_v54  ;;  %v5157_v35 = vadd.s32 %v5155_v7, %v5149_v22  ;;  %v10460_v34 = vshrl.u32 %v5246_v41, 5 }
 0x405   :  { %v5241_v37 = vand.u32 8388607, %v12803_v52  ;;  %v5260_v9 = vshll.u32 %v12632_v12, %v5248_v1  ;;  %v5261_v0 = vshrl.u32 %v12629_v32, %v10442_v54  ;;  %v5135_v3 = vadd.s32 %v5133_v63, %v5127_v42 }
 0x406   :  { %v1466_v31 = vmul.f32 %v1464_v18, %v1461_v4  ;;  %v5137_v26 = vsel %vm5136_vm14, 1, %v12603_v61  ;;  %v5159_v55 = vsel %vm5158_vm1, 1, %v12603_v61  ;;  %v5254_v52 = vshll.u32 %v12633_v24, %v5248_v1 }
 0x407   :  { %v5255_v53 = vshrl.u32 %v12634_v44, %v10442_v54  ;;  %v5257_v4 = vshll.u32 %v12634_v44, %v5248_v1  ;;  %v5258_v41 = vshrl.u32 %v12632_v12, %v10442_v54  ;;  %v5251_v22 = vshll.u32 %v12610_v33, %v5248_v1 }
 0x408   :  { %v1467_v13 = vand.u32 2147483647, %v1466_v31  ;;  %v5252_v18 = vshrl.u32 %v12633_v24, %v10442_v54  ;;  %v5265_v42 = vor.u32 %v5264_v15, %v5263_v48  ;;  %v5151_v63 = vshrl.u32 %v10402_v62, 16 }
 0x409   :  { %v5161_v31 = vadd.s32 %v5159_v55, %v5157_v35  ;;  %v5262_v21 = vor.u32 %v5261_v0, %v5260_v9  ;;  %vm5269_vm15 = vcmp.lt.s32.totalorder %v10460_v34, 4  ;;  %v4863_v11 = vand.u32 2147483647, %v4862_v56 }
 0x40a   :  { %v1468_v7 = vmax.f32 %v1467_v13, 0.001  ;;  %v5129_v36 = vshrl.u32 %v10400_v45, 16  ;;  %v5139_v2 = vadd.s32 %v5137_v26, %v5135_v3  ;;  %vm4562_vm8 = vweird.f32 %v12779_v40  ;;  %v12804_v3 = vld [vmem:[#allocation40_spill] sm:$0xff] }
 0x40b   :  { %v5014_v46 = vclz %v5013_v16  ;;  %v5087_v1 = vshrl.u32 %v12610_v33, %v10248_v30  ;;  %v10482_v8 = vor.u32 %v5255_v53, %v5254_v52  ;;  %v10484_v48 = vor.u32 %v5258_v41, %v5257_v4 }
 0x40c   :  { %5722 = vlog2.f32 %v1468_v7  ;;  %v10486_v62 = vor.u32 %v5252_v18, %v5251_v22  ;;  %vm5266_vm12 = vcmp.lt.s32.totalorder %v10460_v34, 1  ;;  %vm5268_vm13 = vcmp.lt.s32.totalorder %v10460_v34, 3 }
 0x40d   :  { %v5279_v45 = vsel %vm5269_vm15, %v5265_v42, 1326507024  ;;  %v5153_v56 = vshrl.u32 %v10415_v51, 16  ;;  %v5162_v15 = vadd.s32 %v5161_v31, %v5151_v63  ;;  %v5242_v16 = vor.u32 8388608, %v5241_v37 }
 0x40e   :  { %v5275_v30 = vsel %vm5269_vm15, %v5262_v21, 920167782  ;;  %v4720_v53 = vmul.f32 %v4719_v23, %v10392_v38  ;;  %v5108_v35 = vsel %vm5106_vm10, %v10310_v17, 2102212464  ;;  %v5131_v9 = vshrl.u32 %v10412_v10, 16 }
 0x40f   :  { %v5140_v0 = vadd.s32 %v5139_v2, %v5129_v36  ;;  %vm4747_vm4 = vcmp.lt.s32.totalorder %v12804_v3, 0  ;;  %v4866_v26 = vmul.f32 %v4865_v50, %v4863_v11  ;;  %vm5267_vm11 = vcmp.lt.s32.totalorder %v10460_v34, 2 }
 0x410   :  { %v5278_v37 = vsel %vm5266_vm12, %v10482_v8, %v10484_v48  ;;  %v5280_v23 = vsel %vm5268_vm13, %v5262_v21, %v5279_v45  ;;  %v5673_v13 = vadd.s32 4294967294, %v5014_v46  ;;  %v5107_v17 = vsel %vm5103_vm9, %v5087_v1, %v10306_v19 }
 0x411   :  { %v5274_v2 = vsel %vm5266_vm12, %v10486_v62, %v10482_v8  ;;  %v5276_v36 = vsel %vm5268_vm13, %v10484_v48, %v5275_v30  ;;  %v5109_v11 = vsel %vm5105_vm2, %v10308_v43, %v5108_v35  ;;  %v5163_v21 = vadd.s32 %v5162_v15, %v5153_v56 }
 0x412   :  { %v5723_v55 = vpop.eup %5722  ;;  %v10521_v10 = vshll.u32 %v5242_v16, 8  ;;  %v4709_v19 = vsel %vm10371_vm3, 0, %v10430_v27  ;;  %v10526_v50 = vadd.s32 %v5140_v0, %v5131_v9  ;;  %v12805_v52 = vshll.u32 %v10415_v51, 16 }
 0x413   :  { %v1470_v46 = vmul.f32 0.6931472, %v5723_v55  ;;  %v10535_v41 = vsel %vm5267_vm11, %v5278_v37, %v5280_v23  ;;  %v4713_v43 = vmul.f32 %v10432_v25, %v10392_v38  ;;  %v4721_v49 = vadd.f32 -0.16666654, %v4720_v53 }
 0x414   :  { %v10531_v4 = vadd.s32 %v10439_v6, %v12805_v52  ;;  %v10543_v27 = vsel %vm5267_vm11, %v5274_v2, %v5276_v36  ;;  %v4573_v51 = vsel %vm4562_vm8, nan, %v10425_v39  ;;  %v4867_v6 = vxor.u32 2147483648, %v4866_v26 }
 0x415   :  { %v10545_v22 = vmul.f32 100.0, %v1470_v46  ;;  %vm5674_vm10 = vcmp.lt.s32.totalorder %v5673_v13, 0  ;;  %v5110_v18 = vsel %vm5104_vm5, %v5107_v17, %v5109_v11  ;;  %v5167_v42 = vadd.s32 1, %v5163_v21 }
 0x416   :  { %v5283_v25 = vand.u32 65535, %v10521_v10  ;;  %v5286_v7 = vshrl.u32 %v10535_v41, 16  ;;  %v12806_v63 = vstv %s7397_s15  ;;  %v4726_v1 = vadd.s32 3, %v4709_v19  ;;  %s11003_s15 = sld [smem:[#allocation9 + $0x1c]] }
 0x417   :  { %v10557_v31 = vadd.f32 %v12806_v63, %v10545_v22  ;;  %v12808_v45 = vand.u32 2147483647, %v12804_v3  ;;  %vm5166_vm2 = vc.u32 %v10526_v50, %v10531_v4  ;;  %v5308_v28 = vshrl.u32 %v10543_v27, 16 }
 0x418   :  { %v12811_v39 = vstv %s10349_s5  ;;  %v4714_v15 = vadd.f32 -0.4999988, %v4713_v43  ;;  %v4722_v16 = vmul.f32 %v4721_v49, %v10392_v38  ;;  %v4868_v53 = vsel %vm4747_vm4, %v4867_v6, %v4866_v26 }
 0x419   :  { %12807 = vst [vmem:[#allocation27_spill] sm:$0xff] %v10557_v31  ;;  %vm10561_vm9 = vcmp.le.f32.partialorder %v12808_v45, 0.7853982  ;;  %v4575_v56 = vmul.f32 %v12811_v39, %v4573_v51  ;;  %v1479_v30 = vand.u32 2139095040, %v10557_v31  ;;  %v5017_v35 = vsel %vm5674_vm10, 0, %v5673_v13 }
 0x41a   :  { %v5164_v9 = vmul.u32 %v10347_v47, %v5110_v18  ;;  %v5284_v0 = vshrl.u32 %v10521_v10, 16  ;;  %v5168_v37 = vsel %vm5166_vm2, %v5167_v42, %v5163_v21  ;;  %v5285_v23 = vand.u32 65535, %v10535_v41 }
 0x41b   :  { %v10577_v55 = vmul.u32 %v5286_v7, %v5283_v25  ;;  %v1480_v17 = vshrl.u32 %v1479_v30, 23  ;;  %v10580_v2 = vadd.f32 %v4575_v56, %v10397_v58  ;;  %v10582_v36 = vand.u32 3, %v4726_v1 }
 0x41c   :  { %v5307_v11 = vand.u32 65535, %v10543_v27  ;;  %v10585_v46 = vmul.u32 %v5308_v28, %v5283_v25  ;;  %v4715_v26 = vmul.f32 %v4714_v15, %v10392_v38  ;;  %v4723_v47 = vadd.f32 1.0, %v4722_v16 }
 0x41d   :  { %12812 = vst [vmem:[#allocation39_spill] sm:$0xff] %v10580_v2  ;;  %v10592_v21 = vsel %vm10561_vm9, %v12804_v3, %v4868_v53  ;;  %v5018_v19 = vsub.s32 32, %v5017_v35  ;;  %v5022_v52 = vsub.s32 4294967266, %v5017_v35  ;;  %v10594_v41 = vadd.s32 %v5168_v37, %v5164_v9 }
 0x41e   :  { %12813 = vst [vmem:[#allocation38_spill] sm:$0xff] %v10592_v21  ;;  %v5567_v58 = vadd.s32 4294967169, %v1480_v17  ;;  %v5002_v43 = vadd.s32 %v10265_v20, %v10260_v29  ;;  %v5287_v49 = vmul.u32 %v5285_v23, %v5283_v25  ;;  %v10598_v27 = vmul.u32 %v5285_v23, %v5284_v0 }
 0x41f   :  { %v5291_v38 = vshll.u32 %v10577_v55, 16  ;;  %v5309_v51 = vmul.u32 %v5307_v11, %v5283_v25  ;;  %v10601_v6 = vmul.u32 %v5307_v11, %v5284_v0  ;;  %v5313_v18 = vshll.u32 %v10585_v46, 16 }
 0x420   :  { %v1486_v42 = vadd.s32 1, %v5567_v58  ;;  %v10604_v63 = vadd.f32 1.0, %v4715_v26  ;;  %v10607_v1 = vmul.f32 %v4723_v47, %v10381_v5  ;;  %v10612_v29 = vmul.f32 %v10592_v21, %v10592_v21 }
 0x421   :  { %v5020_v20 = vshrl.u32 %v5002_v43, %v5018_v19  ;;  %v5023_v39 = vadd.s32 127, %v5022_v52  ;;  %v5170_v25 = vadd.s32 536870912, %v10594_v41  ;;  %v5019_v56 = vshll.u32 %v10421_v14, %v5017_v35 }
 0x422   :  { %vm1487_vm5 = vcmp.gt.s32.totalorder %v1486_v42, 0  ;;  %v5293_v15 = vshll.u32 %v10598_v27, 16  ;;  %v5297_v16 = vadd.s32 %v5291_v38, %v5287_v49  ;;  %vm5295_vm3 = vc.u32 %v5287_v49, %v5291_v38 }
 0x423   :  { %v1488_v30 = vsel %vm1487_vm5, %v1486_v42, 0  ;;  %v12540_v5 = vshll.u32 %v10601_v6, 16  ;;  %v10618_v53 = vadd.s32 %v5313_v18, %v5309_v51  ;;  %v10622_v23 = vmul.f32 -0.001358992, %v10612_v29 }
 0x424   :  { %v1490_v9 = vand.u32 31, %v1488_v30  ;;  %v4881_v17 = vmul.f32 -0.00019511016, %v10612_v29  ;;  %vm5317_vm0 = vc.u32 %v5309_v51, %v5313_v18  ;;  %v10625_v11 = vor.u32 %v5020_v20, %v5019_v56 }
 0x425   :  { %v5024_v14 = vshll.u32 %v5023_v39, 23  ;;  %v10627_v35 = vshrl.u32 %v5170_v25, 30  ;;  %v5290_v47 = vmul.u32 %v5286_v7, %v5284_v0  ;;  %v5296_v19 = vsel %vm5295_vm3, 1, %v12603_v61 }
 0x426   :  { %v10629_v26 = vsub.s32 32, %v1490_v9  ;;  %vm10632_vm7 = vc.u32 %v5297_v16, %v5293_v15  ;;  %v5312_v58 = vmul.u32 %v5308_v28, %v5284_v0  ;;  %v5318_v43 = vsel %vm5317_vm0, 1, %v12603_v61 }
 0x427   :  { %vm10640_vm14 = vc.u32 %v10618_v53, %v12540_v5  ;;  %v1634_v7 = vmul.f32 0.4216965, %v10545_v22  ;;  %v1502_v51 = vshll.u32 %v12632_v12, %v1490_v9  ;;  %v1505_v28 = vshll.u32 %v12629_v32, %v1490_v9 }
 0x428   :  { %v1503_v18 = vshrl.u32 %v12629_v32, %v10629_v26  ;;  %v1506_v0 = vshrl.u32 %v12630_v57, %v10629_v26  ;;  %v10652_v42 = vshrl.u32 %v1488_v30, 5  ;;  %v1494_v20 = vshrl.u32 %v12633_v24, %v10629_v26 }
 0x429   :  { %v1497_v39 = vshrl.u32 %v12634_v44, %v10629_v26  ;;  %v1500_v25 = vshrl.u32 %v12632_v12, %v10629_v26  ;;  %v5172_v56 = vshll.u32 %v10627_v35, 30  ;;  %v5298_v15 = vadd.s32 %v5296_v19, %v5290_v47 }
 0x42a   :  { %v1504_v16 = vor.u32 %v1503_v18, %v1502_v51  ;;  %v1507_v13 = vor.u32 %v1506_v0, %v1505_v28  ;;  %v1493_v5 = vshll.u32 %v12610_v33, %v1490_v9  ;;  %v1496_v37 = vshll.u32 %v12633_v24, %v1490_v9 }
 0x42b   :  { %v1499_v30 = vshll.u32 %v12634_v44, %v1490_v9  ;;  %v12818_v45 = vstv %s7401_s16  ;;  %v5300_v2 = vsel %vm10632_vm7, 1, %v12603_v61  ;;  %v5320_v21 = vadd.s32 %v5318_v43, %v5312_v58  ;;  %s11153_s16 = sld [smem:[#allocation9 + $0x1d]] }
 0x42c   :  { %v10666_v38 = vadd.f32 %v12818_v45, %v1634_v7  ;;  %v5322_v47 = vsel %vm10640_vm14, 1, %v12603_v61  ;;  %v12819_v19 = vand.u32 2147483647, %v10557_v31  ;;  %v10676_v18 = vor.u32 %v1494_v20, %v1493_v5 }
 0x42d   :  { %v10678_v28 = vor.u32 %v1497_v39, %v1496_v37  ;;  %v10680_v9 = vor.u32 %v1500_v25, %v1499_v30  ;;  %vm1511_vm1 = vcmp.lt.s32.totalorder %v10652_v42, 4  ;;  %v5025_v45 = vor.u32 4788187, %v5024_v14 }
 0x42e   :  { %v1483_v51 = vand.u32 8388607, %v12819_v19  ;;  %v10684_v52 = vsub.s32 %v10594_v41, %v5172_v56  ;;  %v1517_v58 = vsel %vm1511_vm1, %v1504_v16, 920167782  ;;  %v1521_v43 = vsel %vm1511_vm1, %v1507_v13, 1326507024 }
 0x42f   :  { %vm4732_vm8 = vcmp.eq.s32.totalorder %v10582_v36, 2  ;;  %v5292_v5 = vshrl.u32 %v10577_v55, 16  ;;  %v5302_v37 = vadd.s32 %v5300_v2, %v5298_v15  ;;  %v5314_v49 = vshrl.u32 %v10585_v46, 16 }
 0x430   :  { %v1641_v7 = vand.u32 2139095040, %v10666_v38  ;;  %v5324_v0 = vadd.s32 %v5322_v47, %v5320_v21  ;;  %v1484_v14 = vor.u32 8388608, %v1483_v51  ;;  %vm1508_vm10 = vcmp.lt.s32.totalorder %v10652_v42, 1 }
 0x431   :  { %vm1510_vm2 = vcmp.lt.s32.totalorder %v10652_v42, 3  ;;  %v1516_v13 = vsel %vm1508_vm10, %v10676_v18, %v10678_v28  ;;  %v1520_v2 = vsel %vm1508_vm10, %v10678_v28, %v10680_v9  ;;  %vm4729_vm5 = vcmp.eq.s32.totalorder %v10582_v36, 0 }
 0x432   :  { %v1518_v55 = vsel %vm1510_vm2, %v10680_v9, %v1517_v58  ;;  %v1522_v46 = vsel %vm1510_vm2, %v1504_v16, %v1521_v43  ;;  %v12820_v21 = vsub.s32 4, %v10194_v59  ;;  %v4882_v20 = vadd.f32 0.008332121, %v4881_v17 }
 0x433   :  { %v5026_v39 = vand.u32 2147483647, %v5025_v45  ;;  %v5028_v25 = vcvt.s32.f32 %v10625_v11  ;;  %vm5174_vm3 = vcmp.lt.s32.totalorder %v10684_v52, 0  ;;  %v5175_v56 = vsub.s32 0, %v10684_v52  ;;  %v12821_v11 = vld [vmem:[#allocation36_spill] sm:$0xff] }
 0x434   :  { %v4870_v41 = vsel %vm4747_vm4, %v12820_v21, %v10194_v59  ;;  %vm1509_vm0 = vcmp.lt.s32.totalorder %v10652_v42, 2  ;;  %v1642_v15 = vshrl.u32 %v1641_v7, 23  ;;  %v5316_v16 = vshrl.u32 %v10601_v6, 16 }
 0x435   :  { %v5325_v30 = vadd.s32 %v5324_v0, %v5314_v49  ;;  %v10722_v47 = vsel %vm1509_vm0, %v1516_v13, %v1518_v55  ;;  %v10726_v59 = vsel %vm1509_vm0, %v1520_v2, %v1522_v46  ;;  %vm4728_vm4 = vcmp.lt.s32.totalorder %v10582_v36, 2 }
 0x436   :  { %v4875_v17 = vadd.f32 0.041655596, %v10622_v23  ;;  %vm4910_vm7 = vcmp.lt.s32.totalorder %v12821_v11, 0  ;;  %v5294_v19 = vshrl.u32 %v10598_v27, 16  ;;  %v5303_v51 = vadd.s32 %v5302_v37, %v5292_v5 }
 0x437   :  { %v10732_v45 = vshll.u32 %v1484_v14, 8  ;;  %v4730_v58 = vxor.u32 2147483648, %v10607_v1  ;;  %v5029_v43 = vmul.f32 %v5028_v25, %v5026_v39  ;;  %v5250_v49 = vshrl.u32 %v12610_v33, %v10442_v54 }
 0x438   :  { %v5271_v7 = vsel %vm5269_vm15, %v10484_v48, 2102212464  ;;  %v5176_v23 = vsel %vm5174_vm3, %v5175_v56, %v10684_v52  ;;  %v1528_v0 = vshrl.u32 %v10726_v59, 16  ;;  %v1550_v27 = vshrl.u32 %v10722_v47, 16 }
 0x439   :  { %v5572_v5 = vadd.s32 4294967169, %v1642_v15  ;;  %v12822_v37 = vxor.u32 2147483648, %v10604_v63  ;;  %v4872_v54 = vsel %vm10561_vm9, 0, %v4870_v41  ;;  %v4883_v48 = vmul.f32 %v4882_v20, %v10612_v29 }
 0x43a   :  { %v5326_v13 = vadd.s32 %v5325_v30, %v5316_v16  ;;  %vm4725_vm15 = vweird.f32 %v12790_v60  ;;  %v4876_v55 = vmul.f32 %v4875_v17, %v10612_v29  ;;  %v12823_v2 = vand.u32 2147483647, %v12821_v11 }
 0x43b   :  { %v4734_v14 = vsel %vm4732_vm8, %v12822_v37, %v10607_v1  ;;  %v10761_v21 = vadd.s32 %v5303_v51, %v5294_v19  ;;  %v12826_v1 = vshll.u32 %v10601_v6, 16  ;;  %v1525_v41 = vand.u32 65535, %v10732_v45 }
 0x43c   :  { %vm10757_vm14 = vcmp.le.f32.partialorder %v12823_v2, 0.7853982  ;;  %v5030_v20 = vxor.u32 2147483648, %v5029_v43  ;;  %v5177_v39 = vclz %v5176_v23  ;;  %v5270_v25 = vsel %vm5266_vm12, %v5250_v49, %v10486_v62 }
 0x43d   :  { %v10766_v40 = vadd.s32 %v10618_v53, %v12826_v1  ;;  %v5272_v56 = vsel %vm5268_vm13, %v10482_v8, %v5271_v7  ;;  %v4731_v15 = vsel %vm4729_vm5, %v10604_v63, %v4730_v58  ;;  %v10780_v6 = vmul.u32 %v1528_v0, %v1525_v41 }
 0x43e   :  { %v10784_v53 = vmul.u32 %v1550_v27, %v1525_v41  ;;  %v1648_v16 = vadd.s32 1, %v5572_v5  ;;  %v4884_v30 = vadd.f32 -0.16666654, %v4883_v48  ;;  %v4889_v17 = vadd.s32 3, %v4872_v54 }
 0x43f   :  { %v5330_v62 = vadd.s32 1, %v5326_v13  ;;  %v1549_v19 = vand.u32 65535, %v10722_v47  ;;  %v5273_v8 = vsel %vm5267_vm11, %v5270_v25, %v5272_v56  ;;  %vm5329_vm12 = vc.u32 %v10761_v21, %v10766_v40  ;;  %v12827_v56 = vld [vmem:[#allocation28_spill] sm:$0xff] }
 0x440   :  { %v1527_v63 = vand.u32 65535, %v10726_v59  ;;  %vm1649_vm13 = vcmp.gt.s32.totalorder %v1648_v16, 0  ;;  %v4735_v51 = vsel %vm4728_vm4, %v4731_v15, %v4734_v14  ;;  %v4877_v58 = vadd.f32 -0.4999988, %v4876_v55 }
 0x441   :  { %v5031_v49 = vsel %vm4910_vm7, %v5030_v20, %v5029_v43  ;;  %v5678_v7 = vadd.s32 4294967294, %v5177_v39  ;;  %v1526_v23 = vshrl.u32 %v10732_v45, 16  ;;  %v1533_v5 = vshll.u32 %v10780_v6, 16 }
 0x442   :  { %v1555_v34 = vshll.u32 %v10784_v53, 16  ;;  %v1650_v37 = vsel %vm1649_vm13, %v1648_v16, 0  ;;  %v4885_v54 = vmul.f32 %v4884_v30, %v10612_v29  ;;  %v5327_v48 = vmul.u32 %v10521_v10, %v5273_v8 }
 0x443   :  { %v5331_v2 = vsel %vm5329_vm12, %v5330_v62, %v5326_v13  ;;  %v1551_v1 = vmul.u32 %v1549_v19, %v1525_v41  ;;  %v1529_v36 = vmul.u32 %v1527_v63, %v1525_v41  ;;  %v10801_v14 = vmul.u32 %v1527_v63, %v1526_v23 }
 0x444   :  { %v10803_v55 = vmul.u32 %v1549_v19, %v1526_v23  ;;  %v1652_v43 = vand.u32 31, %v1650_v37  ;;  %v10807_v20 = vsel %vm4725_vm15, nan, %v4735_v51  ;;  %v10809_v39 = vand.u32 3, %v4889_v17 }
 0x445   :  { %v10814_v25 = vsel %vm10757_vm14, %v12821_v11, %v5031_v49  ;;  %vm5679_vm11 = vcmp.lt.s32.totalorder %v5678_v7, 0  ;;  %vm1537_vm9 = vc.u32 %v1529_v36, %v1533_v5  ;;  %v1539_v10 = vadd.s32 %v1533_v5, %v1529_v36 }
 0x446   :  { %vm1559_vm8 = vc.u32 %v1551_v1, %v1555_v34  ;;  %v10816_v13 = vadd.s32 %v1555_v34, %v1551_v1  ;;  %v10819_v41 = vmul.f32 %v4877_v58, %v10612_v29  ;;  %v10822_v15 = vadd.s32 %v5331_v2, %v5327_v48 }
 0x447   :  { %v10824_v16 = vsub.s32 32, %v1652_v43  ;;  %v10826_v30 = vadd.f32 1.0, %v4885_v54  ;;  %v10830_v17 = vmul.f32 %v10814_v25, %v10814_v25  ;;  %v1535_v62 = vshll.u32 %v10801_v14, 16 }
 0x448   :  { %v12542_v19 = vshll.u32 %v10803_v55, 16  ;;  %v5165_v29 = vadd.s32 %v10531_v4, %v10526_v50  ;;  %v10836_v8 = vsel %vm5679_vm11, 0, %v5678_v7  ;;  %v1538_v63 = vsel %vm1537_vm9, 1, %v12603_v61 }
 0x449   :  { %v1560_v51 = vsel %vm1559_vm8, 1, %v12603_v61  ;;  %v1532_v58 = vmul.u32 %v1528_v0, %v1526_v23  ;;  %vm1541_vm5 = vc.u32 %v1539_v10, %v1535_v62  ;;  %v1554_v49 = vmul.u32 %v1550_v27, %v1526_v23 }
 0x44a   :  { %vm1563_vm3 = vc.u32 %v10816_v13, %v12542_v19  ;;  %v5333_v5 = vadd.s32 536870912, %v10822_v15  ;;  %v12548_v50 = vand.u32 2147483647, %v10666_v38  ;;  %v1665_v4 = vshrl.u32 %v12629_v32, %v10824_v16 }
 0x44b   :  { %v1668_v7 = vshrl.u32 %v12630_v57, %v10824_v16  ;;  %v5044_v59 = vmul.f32 -0.00019511016, %v10830_v17  ;;  %v5185_v0 = vsub.s32 4294967266, %v10836_v8  ;;  %v1540_v47 = vadd.s32 %v1538_v63, %v1532_v58 }
 0x44c   :  { %v1562_v27 = vadd.s32 %v1560_v51, %v1554_v49  ;;  %v1542_v23 = vsel %vm1541_vm5, 1, %v12603_v61  ;;  %v1564_v34 = vsel %vm1563_vm3, 1, %v12603_v61  ;;  %v1664_v54 = vshll.u32 %v12632_v12, %v1652_v43 }
 0x44d   :  { %v1667_v48 = vshll.u32 %v12629_v32, %v1652_v43  ;;  %v10859_v2 = vshrl.u32 %v1650_v37, 5  ;;  %v1656_v1 = vshrl.u32 %v12633_v24, %v10824_v16  ;;  %v1659_v36 = vshrl.u32 %v12634_v44, %v10824_v16 }
 0x44e   :  { %v1662_v10 = vshrl.u32 %v12632_v12, %v10824_v16  ;;  %v10867_v62 = vshrl.u32 %v5333_v5, 30  ;;  %v1645_v63 = vand.u32 8388607, %v12548_v50  ;;  %v1666_v51 = vor.u32 %v1665_v4, %v1664_v54 }
 0x44f   :  { %v1669_v58 = vor.u32 %v1668_v7, %v1667_v48  ;;  %v1566_v49 = vadd.s32 %v1564_v34, %v1562_v27  ;;  %v1655_v37 = vshll.u32 %v12610_v33, %v1652_v43  ;;  %v1658_v19 = vshll.u32 %v12633_v24, %v1652_v43 }
 0x450   :  { %v1661_v60 = vshll.u32 %v12634_v44, %v1652_v43  ;;  %v5181_v31 = vsub.s32 32, %v10836_v8  ;;  %v1544_v57 = vadd.s32 %v1542_v23, %v1540_v47  ;;  %v1556_v32 = vshrl.u32 %v10784_v53, 16 }
 0x451   :  { %v1797_v5 = vmul.f32 0.17782794, %v10545_v22  ;;  %v10877_v12 = vor.u32 %v1656_v1, %v1655_v37  ;;  %v10879_v50 = vor.u32 %v1659_v36, %v1658_v19  ;;  %vm1673_vm4 = vcmp.lt.s32.totalorder %v10859_v2, 4 }
 0x452   :  { %v10881_v4 = vor.u32 %v1662_v10, %v1661_v60  ;;  %v5186_v7 = vadd.s32 127, %v5185_v0  ;;  %v1534_v27 = vshrl.u32 %v10780_v6, 16  ;;  %v1679_v43 = vsel %vm1673_vm4, %v1666_v51, 920167782 }
 0x453   :  { %v1683_v53 = vsel %vm1673_vm4, %v1669_v58, 1326507024  ;;  %v5335_v47 = vshll.u32 %v10867_v62, 30  ;;  %v1558_v23 = vshrl.u32 %v10803_v55, 16  ;;  %v1567_v34 = vadd.s32 %v1566_v49, %v1556_v32 }
 0x454   :  { %v1646_v19 = vor.u32 8388608, %v1645_v63  ;;  %v1545_v54 = vadd.s32 %v1544_v57, %v1534_v27  ;;  %vm1670_vm15 = vcmp.lt.s32.totalorder %v10859_v2, 1  ;;  %vm1672_vm12 = vcmp.lt.s32.totalorder %v10859_v2, 3 }
 0x455   :  { %v12828_v60 = vstv %s7408_s0  ;;  %v1678_v6 = vsel %vm1670_vm15, %v10877_v12, %v10879_v50  ;;  %v1680_v48 = vsel %vm1672_vm12, %v10881_v4, %v1679_v43  ;;  %v1682_v32 = vsel %vm1670_vm15, %v10879_v50, %v10881_v4  ;;  %s11206_s0 = sld [smem:[#allocation9 + $0x1e]] }
 0x456   :  { %v10895_v0 = vadd.f32 %v12828_v60, %v1797_v5  ;;  %v1684_v57 = vsel %vm1672_vm12, %v1666_v51, %v1683_v53  ;;  %v12830_v1 = vsub.s32 4, %v12827_v56  ;;  %v5045_v10 = vadd.f32 0.008332121, %v5044_v59  ;;  %v12832_v60 = vld [vmem:[#allocation38_spill] sm:$0xff] }
 0x457   :  { %v5187_v63 = vshll.u32 %v5186_v7, 23  ;;  %v1536_v58 = vshrl.u32 %v10801_v14, 16  ;;  %v5183_v49 = vshrl.u32 %v5165_v29, %v5181_v31  ;;  %v1513_v37 = vsel %vm1511_vm1, %v10680_v9, 2102212464 }
 0x458   :  { %12829 = vst [vmem:[#allocation42_spill] sm:$0xff] %v10895_v0  ;;  %v5033_v36 = vsel %vm4910_vm7, %v12830_v1, %v12827_v56  ;;  %v1568_v5 = vadd.s32 %v1567_v34, %v1558_v23  ;;  %vm1671_vm13 = vcmp.lt.s32.totalorder %v10859_v2, 2  ;;  %v1492_v51 = vshrl.u32 %v12610_v33, %v10629_v26 }
 0x459   :  { %v10922_v27 = vadd.s32 %v1545_v54, %v1536_v58  ;;  %v10926_v56 = vsel %vm1671_vm13, %v1678_v6, %v1680_v48  ;;  %v10930_v14 = vsel %vm1671_vm13, %v1682_v32, %v1684_v57  ;;  %v5182_v31 = vshll.u32 %v10684_v52, %v10836_v8 }
 0x45a   :  { %v10935_v9 = vsub.s32 %v10822_v15, %v5335_v47  ;;  %v10937_v29 = vshll.u32 %v1646_v19, 8  ;;  %v1804_v26 = vand.u32 2139095040, %v10895_v0  ;;  %v5188_v59 = vor.u32 4788187, %v5187_v63  ;;  %v12833_v63 = vld [vmem:[#allocation35_spill] sm:$0xff] }
 0x45b   :  { %v1512_v7 = vsel %vm1508_vm10, %v1492_v51, %v10676_v18  ;;  %v1514_v43 = vsel %vm1510_vm2, %v10678_v28, %v1513_v37  ;;  %v12831_v53 = vshll.u32 %v10803_v55, 16  ;;  %v5037_v15 = vmul.f32 -0.001358992, %v10830_v17 }
 0x45c   :  { %v1572_v8 = vadd.s32 1, %v1568_v5  ;;  %v1690_v47 = vshrl.u32 %v10930_v14, 16  ;;  %v1712_v23 = vshrl.u32 %v10926_v56, 16  ;;  %v4879_v34 = vadd.f32 1.0, %v10819_v41 }
 0x45d   :  { %v10949_v52 = vadd.s32 %v10816_v13, %v12831_v53  ;;  %v5046_v18 = vmul.f32 %v5045_v10, %v10830_v17  ;;  %v5184_v19 = vor.u32 %v5183_v49, %v5182_v31  ;;  %vm4895_vm10 = vcmp.eq.s32.totalorder %v10809_v39, 2 }
 0x45e   :  { %v5338_v28 = vsub.s32 0, %v10935_v9  ;;  %v1515_v55 = vsel %vm1509_vm0, %v1512_v7, %v1514_v43  ;;  %v1687_v13 = vand.u32 65535, %v10937_v29  ;;  %v1805_v54 = vshrl.u32 %v1804_v26, 23 }
 0x45f   :  { %vm1571_vm1 = vc.u32 %v10922_v27, %v10949_v52  ;;  %v4887_v6 = vmul.f32 %v10826_v30, %v12832_v60  ;;  %v5035_v41 = vsel %vm10757_vm14, 0, %v5033_v36  ;;  %v5189_v48 = vand.u32 2147483647, %v5188_v59 }
 0x460   :  { %vm5337_vm2 = vcmp.lt.s32.totalorder %v10935_v9, 0  ;;  %v5038_v32 = vadd.f32 0.041655596, %v5037_v15  ;;  %v1573_v57 = vsel %vm1571_vm1, %v1572_v8, %v1568_v5  ;;  %v10970_v1 = vmul.u32 %v1690_v47, %v1687_v13 }
 0x461   :  { %v10974_v42 = vmul.u32 %v1712_v23, %v1687_v13  ;;  %vm4892_vm0 = vcmp.eq.s32.totalorder %v10809_v39, 0  ;;  %v5047_v10 = vadd.f32 -0.16666654, %v5046_v18  ;;  %v5191_v30 = vcvt.s32.f32 %v5184_v19 }
 0x462   :  { %v1569_v46 = vmul.u32 %v10732_v45, %v1515_v55  ;;  %v1711_v36 = vand.u32 65535, %v10926_v56  ;;  %vm5073_vm7 = vcmp.lt.s32.totalorder %v12833_v63, 0  ;;  %v5339_v58 = vsel %vm5337_vm2, %v5338_v28, %v10935_v9 }
 0x463   :  { %v1689_v49 = vand.u32 65535, %v10930_v14  ;;  %v5577_v37 = vadd.s32 4294967169, %v1805_v54  ;;  %v4896_v5 = vxor.u32 2147483648, %v4879_v34  ;;  %v5052_v51 = vadd.s32 3, %v5035_v41 }
 0x464   :  { %v5192_v31 = vmul.f32 %v5191_v30, %v5189_v48  ;;  %v10982_v26 = vadd.s32 %v1573_v57, %v1569_v46  ;;  %v4893_v59 = vxor.u32 2147483648, %v4887_v6  ;;  %v1688_v7 = vshrl.u32 %v10937_v29, 16 }
 0x465   :  { %v1695_v43 = vshll.u32 %v10970_v1, 16  ;;  %v1717_v45 = vshll.u32 %v10974_v42, 16  ;;  %vm4891_vm14 = vcmp.lt.s32.totalorder %v10809_v39, 2  ;;  %v5039_v53 = vmul.f32 %v5038_v32, %v10830_v17 }
 0x466   :  { %v5048_v15 = vmul.f32 %v5047_v10, %v10830_v17  ;;  %v5340_v8 = vclz %v5339_v58  ;;  %v1713_v18 = vmul.u32 %v1711_v36, %v1687_v13  ;;  %v1691_v19 = vmul.u32 %v1689_v49, %v1687_v13 }
 0x467   :  { %v10990_v28 = vmul.u32 %v1689_v49, %v1688_v7  ;;  %v10992_v55 = vmul.u32 %v1711_v36, %v1688_v7  ;;  %v1811_v54 = vadd.s32 1, %v5577_v37  ;;  %v4897_v60 = vsel %vm4895_vm10, %v4896_v5, %v4887_v6 }
 0x468   :  { %v12834_v41 = vand.u32 2147483647, %v12833_v63  ;;  %v5193_v32 = vxor.u32 2147483648, %v5192_v31  ;;  %v1575_v57 = vadd.s32 536870912, %v10982_v26  ;;  %vm1699_vm9 = vc.u32 %v1691_v19, %v1695_v43 }
 0x469   :  { %v1701_v13 = vadd.s32 %v1695_v43, %v1691_v19  ;;  %vm1721_vm8 = vc.u32 %v1713_v18, %v1717_v45  ;;  %v11005_v10 = vadd.s32 %v1717_v45, %v1713_v18  ;;  %v5040_v30 = vadd.f32 -0.4999988, %v5039_v53 }
 0x46a   :  { %vm10998_vm11 = vcmp.le.f32.partialorder %v12834_v41, 0.7853982  ;;  %v5049_v46 = vadd.f32 1.0, %v5048_v15  ;;  %v11007_v36 = vand.u32 3, %v5052_v51  ;;  %v5683_v6 = vadd.s32 4294967294, %v5340_v8 }
 0x46b   :  { %v4894_v58 = vsel %vm4892_vm0, %v4879_v34, %v4893_v59  ;;  %v1697_v49 = vshll.u32 %v10990_v28, 16  ;;  %v1719_v37 = vshll.u32 %v10992_v55, 16  ;;  %vm1812_vm5 = vcmp.gt.s32.totalorder %v1811_v54, 0 }
 0x46c   :  { %v5194_v5 = vsel %vm5073_vm7, %v5193_v32, %v5192_v31  ;;  %v11015_v43 = vshrl.u32 %v1575_v57, 30  ;;  %v1700_v45 = vsel %vm1699_vm9, 1, %v12603_v61  ;;  %v1722_v53 = vsel %vm1721_vm8, 1, %v12603_v61 }
 0x46d   :  { %v1694_v51 = vmul.u32 %v1690_v47, %v1688_v7  ;;  %vm1703_vm3 = vc.u32 %v1701_v13, %v1697_v49  ;;  %v1716_v34 = vmul.u32 %v1712_v23, %v1688_v7  ;;  %vm1725_vm1 = vc.u32 %v11005_v10, %v1719_v37 }
 0x46e   :  { %v5041_v31 = vmul.f32 %v5040_v30, %v10830_v17  ;;  %v11028_v59 = vmul.f32 %v5049_v46, %v10814_v25  ;;  %vm5684_vm10 = vcmp.lt.s32.totalorder %v5683_v6, 0  ;;  %v1813_v15 = vsel %vm1812_vm5, %v1811_v54, 0  ;;  %v12838_v46 = vld [vmem:[#allocation39_spill] sm:$0xff] }
 0x46f   :  { %v4898_v14 = vsel %vm4891_vm14, %v4894_v58, %v4897_v60  ;;  %v5195_v47 = vsub.s32 4, %v10627_v35  ;;  %v1702_v8 = vadd.s32 %v1700_v45, %v1694_v51  ;;  %v1724_v56 = vadd.s32 %v1722_v53, %v1716_v34 }
 0x470   :  { %v11036_v23 = vsel %vm10998_vm11, %v12833_v63, %v5194_v5  ;;  %v1577_v17 = vshll.u32 %v11015_v43, 30  ;;  %v1704_v25 = vsel %vm1703_vm3, 1, %v12603_v61  ;;  %v1726_v7 = vsel %vm1725_vm1, 1, %v12603_v61 }
 0x471   :  { %v12837_v18 = vstv %s10537_s30  ;;  %vm4888_vm2 = vweird.f32 %v12804_v3  ;;  %v11045_v39 = vsel %vm5684_vm10, 0, %v5683_v6  ;;  %v1815_v54 = vand.u32 31, %v1813_v15 }
 0x472   :  { %v4738_v19 = vmul.f32 %v12837_v18, %v10807_v20  ;;  %v4899_v60 = vsel %vm4888_vm2, nan, %v4898_v14  ;;  %v4900_v41 = vstv %s11003_s15  ;;  %v11048_v32 = vadd.f32 1.0, %v5041_v31 }
 0x473   :  { %v5056_v57 = vxor.u32 2147483648, %v11028_v59  ;;  %v11054_v13 = vsel %vm5073_vm7, %v5195_v47, %v10627_v35  ;;  %v11058_v30 = vmul.f32 %v11036_v23, %v11036_v23  ;;  %v1706_v20 = vadd.s32 %v1704_v25, %v1702_v8 }
 0x474   :  { %v1728_v3 = vadd.s32 %v1726_v7, %v1724_v56  ;;  %v11061_v6 = vadd.f32 %v4738_v19, %v12838_v46  ;;  %vm5055_vm0 = vcmp.eq.s32.totalorder %v11007_v36, 0  ;;  %v5348_v58 = vsub.s32 4294967266, %v11045_v39 }
 0x475   :  { %v11066_v49 = vsub.s32 %v10982_v26, %v1577_v17  ;;  %v11068_v5 = vmul.f32 %v4900_v41, %v4899_v60  ;;  %v1696_v35 = vshrl.u32 %v10970_v1, 16  ;;  %v1718_v45 = vshrl.u32 %v10974_v42, 16 }
 0x476   :  { %v11072_v53 = vsub.s32 32, %v1815_v54  ;;  %v11075_v51 = vsel %vm5055_vm0, %v11048_v32, %v5056_v57  ;;  %v5328_v26 = vadd.s32 %v10766_v40, %v10761_v21  ;;  %v5200_v14 = vmul.f32 -0.001358992, %v11058_v30 }
 0x477   :  { %v5344_v1 = vsub.s32 32, %v11045_v39  ;;  %v1707_v47 = vadd.s32 %v1706_v20, %v1696_v35  ;;  %v1729_v42 = vadd.s32 %v1728_v3, %v1718_v45  ;;  %v5349_v8 = vadd.s32 127, %v5348_v58 }
 0x478   :  { %v1580_v56 = vsub.s32 0, %v11066_v49  ;;  %v1654_v17 = vshrl.u32 %v12610_v33, %v10824_v16  ;;  %v1698_v7 = vshrl.u32 %v10990_v28, 16  ;;  %v1720_v18 = vshrl.u32 %v10992_v55, 16 }
 0x479   :  { %v12839_v21 = vmov 920167782   ;;  %v12840_v19 = vmov 1326507024   ;;  %vm1579_vm7 = vcmp.lt.s32.totalorder %v11066_v49, 0  ;;  %v11107_v35 = vshrl.u32 %v1813_v15, 5 }
 0x47a   :  { %v1828_v40 = vshrl.u32 %v12839_v21, %v11072_v53  ;;  %v1831_v60 = vshrl.u32 %v12840_v19, %v11072_v53  ;;  %v1674_v41 = vsel %vm1670_vm15, %v1654_v17, %v10877_v12  ;;  %v1675_v16 = vsel %vm1673_vm4, %v10881_v4, 2102212464 }
 0x47b   :  { %v1960_v28 = vmul.f32 0.07498942, %v10545_v22  ;;  %v11103_v57 = vadd.s32 %v1707_v47, %v1698_v7  ;;  %v1730_v20 = vadd.s32 %v1729_v42, %v1720_v18  ;;  %v12841_v3 = vmov 2102212464  }
 0x47c   :  { %v1827_v46 = vshll.u32 %v12841_v3, %v1815_v54  ;;  %v1830_v58 = vshll.u32 %v12839_v21, %v1815_v54  ;;  %v1819_v45 = vshrl.u32 %v12633_v24, %v11072_v53  ;;  %v1822_v12 = vshrl.u32 %v12634_v44, %v11072_v53 }
 0x47d   :  { %v1825_v4 = vshrl.u32 %v12841_v3, %v11072_v53  ;;  %v1581_v47 = vsel %vm1579_vm7, %v1580_v56, %v11066_v49  ;;  %v11119_v42 = vadd.s32 %v11005_v10, %v1719_v37  ;;  %vm5058_vm4 = vcmp.eq.s32.totalorder %v11007_v36, 2 }
 0x47e   :  { %v1829_v17 = vor.u32 %v1828_v40, %v1827_v46  ;;  %v1832_v7 = vor.u32 %v1831_v60, %v1830_v58  ;;  %v1818_v15 = vshll.u32 %v12610_v33, %v1815_v54  ;;  %v1821_v18 = vshll.u32 %v12633_v24, %v1815_v54 }
 0x47f   :  { %v1824_v31 = vshll.u32 %v12634_v44, %v1815_v54  ;;  %v12842_v34 = vstv %s7421_s17  ;;  %vm5054_vm15 = vcmp.lt.s32.totalorder %v11007_v36, 2  ;;  %v1676_v55 = vsel %vm1672_vm12, %v10879_v50, %v1675_v16  ;;  %s12318_s17 = sld [smem:[#allocation9 + $0x17]] }
 0x480   :  { %v11127_v25 = vadd.f32 %v12842_v34, %v1960_v28  ;;  %vm1733_vm14 = vc.u32 %v11103_v57, %v11119_v42  ;;  %v1734_v10 = vadd.s32 1, %v1730_v20  ;;  %v12844_v37 = vand.u32 2147483647, %v10895_v0 }
 0x481   :  { %v11137_v40 = vor.u32 %v1819_v45, %v1818_v15  ;;  %v11139_v60 = vor.u32 %v1822_v12, %v1821_v18  ;;  %v11141_v54 = vor.u32 %v1825_v4, %v1824_v31  ;;  %vm1836_vm9 = vcmp.lt.s32.totalorder %v11107_v35, 4 }
 0x482   :  { %12843 = vst [vmem:[#allocation34_spill] sm:$0xff] %v11127_v25  ;;  %v1808_v56 = vand.u32 8388607, %v12844_v37  ;;  %v5207_v34 = vmul.f32 -0.00019511016, %v11058_v30  ;;  %v1582_v28 = vclz %v1581_v47  ;;  %vm5051_vm12 = vweird.f32 %v12821_v11 }
 0x483   :  { %v1842_v50 = vsel %vm1836_vm9, %v1829_v17, 920167782  ;;  %v1846_v16 = vsel %vm1836_vm9, %v1832_v7, 1326507024  ;;  %v5346_v46 = vshrl.u32 %v5328_v26, %v5344_v1  ;;  %v5350_v58 = vshll.u32 %v5349_v8, 23 }
 0x484   :  { %v1677_v45 = vsel %vm1671_vm13, %v1674_v41, %v1676_v55  ;;  %v1967_v31 = vand.u32 2139095040, %v11127_v25  ;;  %v1735_v12 = vsel %vm1733_vm14, %v1734_v10, %v1730_v20  ;;  %v1809_v4 = vor.u32 8388608, %v1808_v56 }
 0x485   :  { %vm1833_vm8 = vcmp.lt.s32.totalorder %v11107_v35, 1  ;;  %vm1835_vm5 = vcmp.lt.s32.totalorder %v11107_v35, 3  ;;  %v5201_v41 = vadd.f32 0.041655596, %v5200_v14  ;;  %v5208_v20 = vadd.f32 0.008332121, %v5207_v34 }
 0x486   :  { %v1841_v26 = vsel %vm1833_vm8, %v11137_v40, %v11139_v60  ;;  %v1843_v2 = vsel %vm1835_vm5, %v11141_v54, %v1842_v50  ;;  %v1845_v1 = vsel %vm1833_vm8, %v11139_v60, %v11141_v54  ;;  %v1847_v8 = vsel %vm1835_vm5, %v1829_v17, %v1846_v16 }
 0x487   :  { %v5568_v47 = vadd.s32 4294967294, %v1582_v28  ;;  %v1731_v7 = vmul.u32 %v10937_v29, %v1677_v45  ;;  %v5345_v15 = vshll.u32 %v10935_v9, %v11045_v39  ;;  %v5351_v18 = vor.u32 4788187, %v5350_v58 }
 0x488   :  { %vm1834_vm13 = vcmp.lt.s32.totalorder %v11107_v35, 2  ;;  %v1968_v55 = vshrl.u32 %v1967_v31, 23  ;;  %v12845_v10 = vxor.u32 2147483648, %v11048_v32  ;;  %v11195_v32 = vshll.u32 %v1809_v4, 8 }
 0x489   :  { %v11182_v56 = vadd.s32 %v1735_v12, %v1731_v7  ;;  %v11186_v14 = vsel %vm1834_vm13, %v1841_v26, %v1843_v2  ;;  %v11190_v9 = vsel %vm1834_vm13, %v1845_v1, %v1847_v8  ;;  %v5347_v39 = vor.u32 %v5346_v46, %v5345_v15  ;;  %v12847_v8 = vld [vmem:[#allocation31_spill] sm:$0xff] }
 0x48a   :  { %v5060_v37 = vsel %vm5058_vm4, %v12845_v10, %v11028_v59  ;;  %v5582_v17 = vadd.s32 4294967169, %v1968_v55  ;;  %v4902_v59 = vadd.f32 %v11068_v5, %v11061_v6  ;;  %v5202_v34 = vmul.f32 %v5201_v41, %v11058_v30 }
 0x48b   :  { %v5061_v29 = vsel %vm5054_vm15, %v11075_v51, %v5060_v37  ;;  %v5209_v28 = vmul.f32 %v5208_v20, %v11058_v30  ;;  %vm5569_vm3 = vcmp.lt.s32.totalorder %v5568_v47, 0  ;;  %v5352_v50 = vand.u32 2147483647, %v5351_v18 }
 0x48c   :  { %v1853_v16 = vshrl.u32 %v11190_v9, 16  ;;  %v12549_v58 = vshrl.u32 %v11186_v14, 16  ;;  %v1974_v45 = vadd.s32 1, %v5582_v17  ;;  %v5062_v36 = vsel %vm5051_vm12, nan, %v5061_v29 }
 0x48d   :  { %v5063_v51 = vstv %s11153_s16  ;;  %v12846_v6 = vsel %vm10998_vm11, 0, %v11054_v13  ;;  %v1737_v46 = vadd.s32 536870912, %v11182_v56  ;;  %v5354_v31 = vcvt.s32.f32 %v5347_v39 }
 0x48e   :  { %v5215_v5 = vadd.s32 3, %v12846_v6  ;;  %v11213_v12 = vsel %vm5569_vm3, 0, %v5568_v47  ;;  %v1850_v4 = vand.u32 65535, %v11195_v32  ;;  %vm1975_vm1 = vcmp.gt.s32.totalorder %v1974_v45, 0 }
 0x48f   :  { %v5203_v26 = vadd.f32 -0.4999988, %v5202_v34  ;;  %v5210_v2 = vadd.f32 -0.16666654, %v5209_v28  ;;  %v5358_v11 = vsub.s32 4, %v10867_v62  ;;  %v1976_v1 = vsel %vm1975_vm1, %v1974_v45, 0 }
 0x490   :  { %v12848_v41 = vand.u32 2147483647, %v12847_v8  ;;  %v5355_v13 = vmul.f32 %v5354_v31, %v5352_v50  ;;  %v11223_v20 = vmul.u32 %v1853_v16, %v1850_v4  ;;  %v11227_v47 = vmul.u32 %v12549_v58, %v1850_v4 }
 0x491   :  { %v5064_v7 = vmul.f32 %v5063_v51, %v5062_v36  ;;  %vm5236_vm11 = vcmp.lt.s32.totalorder %v12847_v8, 0  ;;  %v1590_v15 = vsub.s32 4294967266, %v11213_v12  ;;  %v11231_v18 = vshrl.u32 %v1737_v46, 30 }
 0x492   :  { %vm11219_vm10 = vcmp.le.f32.partialorder %v12848_v41, 0.7853982  ;;  %v11233_v55 = vand.u32 3, %v5215_v5  ;;  %v1852_v10 = vand.u32 65535, %v11190_v9  ;;  %v1874_v37 = vand.u32 65535, %v11186_v14 }
 0x493   :  { %v1978_v29 = vand.u32 31, %v1976_v1  ;;  %v11237_v39 = vadd.f32 %v5064_v7, %v4902_v59  ;;  %v5204_v17 = vmul.f32 %v5203_v26, %v11058_v30  ;;  %v5211_v34 = vmul.f32 %v5210_v2, %v11058_v30 }
 0x494   :  { %12851 = vst [vmem:[#allocation24_spill] sm:$0xff] %v11233_v55  ;;  %v5359_v28 = vsel %vm5236_vm11, %v5358_v11, %v10867_v62  ;;  %v5356_v50 = vxor.u32 2147483648, %v5355_v13  ;;  %v1851_v45 = vshrl.u32 %v11195_v32, 16  ;;  %v1858_v36 = vshll.u32 %v11223_v20, 16 }
 0x495   :  { %12852 = vst [vmem:[#allocation40_spill] sm:$0xff] %v11237_v39  ;;  %v1880_v9 = vshll.u32 %v11227_v47, 16  ;;  %v1586_v6 = vsub.s32 32, %v11213_v12  ;;  %v1591_v59 = vadd.s32 127, %v1590_v15  ;;  %v1739_v5 = vshll.u32 %v11231_v18, 30 }
 0x496   :  { %v1854_v46 = vmul.u32 %v1852_v10, %v1850_v4  ;;  %v1876_v31 = vmul.u32 %v1874_v37, %v1850_v4  ;;  %v11250_v30 = vmul.u32 %v1874_v37, %v1851_v45  ;;  %v11252_v26 = vsub.s32 32, %v1978_v29 }
 0x497   :  { %v11254_v62 = vadd.f32 1.0, %v5204_v17  ;;  %v5361_v2 = vsel %vm11219_vm10, 0, %v5359_v28  ;;  %v1570_v11 = vadd.s32 %v10949_v52, %v10922_v27  ;;  %v11260_v41 = vmul.u32 %v1852_v10, %v1851_v45 }
 0x498   :  { %v11262_v7 = vadd.f32 1.0, %v5211_v34  ;;  %v5357_v15 = vsel %vm5236_vm11, %v5356_v50, %v5355_v13  ;;  %vm1862_vm2 = vc.u32 %v1854_v46, %v1858_v36  ;;  %v11266_v4 = vadd.s32 %v1880_v9, %v1876_v31 }
 0x499   :  { %v1587_v37 = vshll.u32 %v11066_v49, %v11213_v12  ;;  %v1588_v17 = vshrl.u32 %v1570_v11, %v1586_v6  ;;  %v1592_v51 = vshll.u32 %v1591_v59, 23  ;;  %vm1884_vm0 = vc.u32 %v1876_v31, %v1880_v9 }
 0x49a   :  { %v11271_v28 = vsub.s32 %v11182_v56, %v1739_v5  ;;  %v12550_v27 = vshll.u32 %v11250_v30, 16  ;;  %v1991_v10 = vshrl.u32 %v12839_v21, %v11252_v26  ;;  %v1857_v13 = vmul.u32 %v1853_v16, %v1851_v45 }
 0x49b   :  { %v1860_v34 = vshll.u32 %v11260_v41, 16  ;;  %v1863_v50 = vsel %vm1862_vm2, 1, %v12603_v61  ;;  %v1864_v58 = vadd.s32 %v1858_v36, %v1854_v46  ;;  %v1885_v49 = vsel %vm1884_vm0, 1, %v12603_v61 }
 0x49c   :  { %vm11283_vm7 = vc.u32 %v11266_v4, %v12550_v27  ;;  %v1990_v12 = vshll.u32 %v12841_v3, %v1978_v29  ;;  %v1994_v9 = vshrl.u32 %v12840_v19, %v11252_v26  ;;  %v11290_v16 = vshrl.u32 %v1976_v1, 5 }
 0x49d   :  { %v1982_v6 = vshrl.u32 %v12633_v24, %v11252_v26  ;;  %v1985_v36 = vshrl.u32 %v12634_v44, %v11252_v26  ;;  %v1988_v59 = vshrl.u32 %v12841_v3, %v11252_v26  ;;  %v1865_v5 = vadd.s32 %v1863_v50, %v1857_v13 }
 0x49e   :  { %v12855_v46 = vshrl.u32 %v11186_v14, 16  ;;  %v1992_v11 = vor.u32 %v1991_v10, %v1990_v12  ;;  %v1993_v27 = vshll.u32 %v12839_v21, %v1978_v29  ;;  %vm1866_vm4 = vc.u32 %v1864_v58, %v1860_v34 }
 0x49f   :  { %v1981_v1 = vshll.u32 %v12610_v33, %v1978_v29  ;;  %v1984_v52 = vshll.u32 %v12633_v24, %v1978_v29  ;;  %v1987_v39 = vshll.u32 %v12634_v44, %v1978_v29  ;;  %v1889_v0 = vsel %vm11283_vm7, 1, %v12603_v61 }
 0x4a0   :  { %v1879_v31 = vmul.u32 %v12855_v46, %v1851_v45  ;;  %v12856_v13 = vand.u32 2147483647, %v11127_v25  ;;  %v1995_v14 = vor.u32 %v1994_v9, %v1993_v27  ;;  %vm1999_vm15 = vcmp.lt.s32.totalorder %v11290_v16, 4 }
 0x4a1   :  { %v11309_v45 = vor.u32 %v1982_v6, %v1981_v1  ;;  %v11311_v10 = vor.u32 %v1985_v36, %v1984_v52  ;;  %v11313_v58 = vor.u32 %v1988_v59, %v1987_v39  ;;  %v5378_v34 = vadd.s32 3, %v5361_v2  ;;  %v12857_v1 = vld [vmem:[#allocation27_spill] sm:$0xff] }
 0x4a2   :  { %v1887_v63 = vadd.s32 %v1885_v49, %v1879_v31  ;;  %v1971_v50 = vand.u32 8388607, %v12856_v13  ;;  %v1593_v12 = vor.u32 4788187, %v1592_v51  ;;  %v1867_v29 = vsel %vm1866_vm4, 1, %v12603_v61 }
 0x4a3   :  { %v2005_v49 = vsel %vm1999_vm15, %v1992_v11, 920167782  ;;  %v11322_v56 = vsel %vm11219_vm10, %v12847_v8, %v5357_v15  ;;  %v1589_v27 = vor.u32 %v1588_v17, %v1587_v37  ;;  %vm1741_vm14 = vcmp.lt.s32.totalorder %v11271_v28, 0 }
 0x4a4   :  { %v1742_v39 = vsub.s32 0, %v11271_v28  ;;  %v1891_v52 = vadd.s32 %v1889_v0, %v1887_v63  ;;  %vm1996_vm12 = vcmp.lt.s32.totalorder %v11290_v16, 1  ;;  %vm1998_vm3 = vcmp.lt.s32.totalorder %v11290_v16, 3 }
 0x4a5   :  { %v2009_v51 = vsel %vm1999_vm15, %v1995_v14, 1326507024  ;;  %v1869_v2 = vadd.s32 %v1867_v29, %v1865_v5  ;;  %v1972_v9 = vor.u32 8388608, %v1971_v50  ;;  %v2004_v48 = vsel %vm1996_vm12, %v11309_v45, %v11311_v10 }
 0x4a6   :  { %v2006_v15 = vsel %vm1998_vm3, %v11313_v58, %v2005_v49  ;;  %v11339_v0 = vmul.f32 %v11322_v56, %v11322_v56  ;;  %v1594_v63 = vand.u32 2147483647, %v1593_v12  ;;  %v1859_v37 = vshrl.u32 %v11223_v20, 16 }
 0x4a7   :  { %v1881_v17 = vshrl.u32 %v11227_v47, 16  ;;  %vm1997_vm1 = vcmp.lt.s32.totalorder %v11290_v16, 2  ;;  %v2008_v6 = vsel %vm1996_vm12, %v11311_v10, %v11313_v58  ;;  %v2010_v36 = vsel %vm1998_vm3, %v1992_v11, %v2009_v51 }
 0x4a8   :  { %v2123_v59 = vmul.f32 0.031622775, %v10545_v22  ;;  %v1596_v5 = vcvt.s32.f32 %v1589_v27  ;;  %v1743_v46 = vsel %vm1741_vm14, %v1742_v39, %v11271_v28  ;;  %v11356_v47 = vsel %vm1997_vm1, %v2004_v48, %v2006_v15 }
 0x4a9   :  { %v1892_v20 = vadd.s32 %v1891_v52, %v1881_v17  ;;  %v5213_v31 = vmul.f32 %v11262_v7, %v11036_v23  ;;  %vm5221_vm10 = vcmp.eq.s32.totalorder %v11233_v55, 2  ;;  %v5222_v11 = vxor.u32 2147483648, %v11254_v62 }
 0x4aa   :  { %vm1478_vm11 = vcmp.lt.s32.totalorder %v12857_v1, 0  ;;  %v1870_v13 = vadd.s32 %v1869_v2, %v1859_v37  ;;  %v11363_v50 = vshll.u32 %v1972_v9, 8  ;;  %v1597_v14 = vmul.f32 %v1596_v5, %v1594_v63 }
 0x4ab   :  { %v1838_v12 = vsel %vm1836_vm9, %v11141_v54, 2102212464  ;;  %v1883_v29 = vshrl.u32 %v11250_v30, 16  ;;  %v11371_v49 = vsel %vm1997_vm1, %v2008_v6, %v2010_v36  ;;  %vm5218_vm2 = vcmp.eq.s32.totalorder %v11233_v55, 0 }
 0x4ac   :  { %v1744_v23 = vclz %v1743_v46  ;;  %v1861_v7 = vshrl.u32 %v11260_v41, 16  ;;  %v2038_v27 = vshrl.u32 %v11356_v47, 16  ;;  %v12858_v39 = vstv %s7430_s18  ;;  %s12327_s18 = sld [smem:[#allocation9 + $0x1f]] }
 0x4ad   :  { %v11378_v52 = vadd.f32 %v12858_v39, %v2123_v59  ;;  %v5363_v51 = vmul.f32 -0.001358992, %v11339_v0  ;;  %v5370_v54 = vmul.f32 -0.00019511016, %v11339_v0  ;;  %v1817_v2 = vshrl.u32 %v12610_v33, %v11072_v53 }
 0x4ae   :  { %v1893_v9 = vadd.s32 %v1892_v20, %v1883_v29  ;;  %v11384_v48 = vand.u32 3, %v5378_v34  ;;  %v11386_v15 = vadd.s32 %v1870_v13, %v1861_v7  ;;  %v2013_v63 = vand.u32 65535, %v11363_v50 }
 0x4af   :  { %12859 = vst [vmem:[#allocation36_spill] sm:$0xff] %v11378_v52  ;;  %v2016_v41 = vshrl.u32 %v11371_v49, 16  ;;  %v12861_v37 = vand.u32 2147483647, %v12857_v1  ;;  %v1598_v6 = vxor.u32 2147483648, %v1597_v14  ;;  %v1837_v53 = vsel %vm1833_vm8, %v1817_v2, %v11137_v40 }
 0x4b0   :  { %12860 = vst [vmem:[#allocation28_spill] sm:$0xff] %v11384_v48  ;;  %v1839_v34 = vsel %vm1835_vm5, %v11139_v60, %v1838_v12  ;;  %v5573_v36 = vadd.s32 4294967294, %v1744_v23  ;;  %v12864_v59 = vshll.u32 %v11250_v30, 16  ;;  %v11409_v46 = vmul.u32 %v2038_v27, %v2013_v63 }
 0x4b1   :  { %vm11392_vm9 = vcmp.le.f32.partialorder %v12861_v37, 0.7853982  ;;  %v2130_v20 = vand.u32 2139095040, %v11378_v52  ;;  %v5219_v13 = vxor.u32 2147483648, %v5213_v31  ;;  %v5364_v29 = vadd.f32 0.041655596, %v5363_v51 }
 0x4b2   :  { %v11405_v5 = vadd.s32 %v11266_v4, %v12864_v59  ;;  %v5371_v7 = vadd.f32 0.008332121, %v5370_v54  ;;  %v1897_v40 = vadd.s32 1, %v1893_v9  ;;  %v11414_v60 = vmul.u32 %v2016_v41, %v2013_v63 }
 0x4b3   :  { %v2037_v30 = vand.u32 65535, %v11356_v47  ;;  %v2131_v12 = vshrl.u32 %v2130_v20, 23  ;;  %v11419_v4 = vsel %vm5221_vm10, %v5222_v11, %v5213_v31  ;;  %v1599_v23 = vsel %vm1478_vm11, %v1598_v6, %v1597_v14 }
 0x4b4   :  { %vm1896_vm8 = vc.u32 %v11386_v15, %v11405_v5  ;;  %12865 = vst [vmem:[#allocation38_spill] sm:$0xff] %v11419_v4  ;;  %v1840_v39 = vsel %vm1834_vm13, %v1837_v53, %v1839_v34  ;;  %v2015_v51 = vand.u32 65535, %v11371_v49  ;;  %vm5574_vm5 = vcmp.lt.s32.totalorder %v5573_v36, 0 }
 0x4b5   :  { %v2014_v54 = vshrl.u32 %v11363_v50, 16  ;;  %v2043_v2 = vshll.u32 %v11409_v46, 16  ;;  %v5587_v37 = vadd.s32 4294967169, %v2131_v12  ;;  %v11431_v59 = vsel %vm5218_vm2, %v11254_v62, %v5219_v13 }
 0x4b6   :  { %12866 = vst [vmem:[#allocation39_spill] sm:$0xff] %v11431_v59  ;;  %v5365_v31 = vmul.f32 %v5364_v29, %v11339_v0  ;;  %v5372_v11 = vmul.f32 %v5371_v7, %v11339_v0  ;;  %v1898_v14 = vsel %vm1896_vm8, %v1897_v40, %v1893_v9  ;;  %v2021_v35 = vshll.u32 %v11414_v60, 16 }
 0x4b7   :  { %v2039_v6 = vmul.u32 %v2037_v30, %v2013_v63  ;;  %v11436_v49 = vmul.u32 %v2037_v30, %v2014_v54  ;;  %v2137_v53 = vadd.s32 1, %v5587_v37  ;;  %v11441_v34 = vsel %vm11392_vm9, %v12857_v1, %v1599_v23 }
 0x4b8   :  { %12867 = vst [vmem:[#allocation43_spill] sm:$0xff] %v11441_v34  ;;  %v11443_v20 = vsel %vm5574_vm5, 0, %v5573_v36  ;;  %v1894_v62 = vmul.u32 %v11195_v32, %v1840_v39  ;;  %v2017_v13 = vmul.u32 %v2015_v51, %v2013_v63  ;;  %v11446_v29 = vmul.u32 %v2015_v51, %v2014_v54 }
 0x4b9   :  { %vm2047_vm13 = vc.u32 %v2039_v6, %v2043_v2  ;;  %v11448_v9 = vadd.s32 %v2043_v2, %v2039_v6  ;;  %vm2138_vm0 = vcmp.gt.s32.totalorder %v2137_v53, 0  ;;  %v5366_v7 = vadd.f32 -0.4999988, %v5365_v31 }
 0x4ba   :  { %v5373_v40 = vadd.f32 -0.16666654, %v5372_v11  ;;  %v11450_v30 = vadd.s32 %v1898_v14, %v1894_v62  ;;  %v2139_v12 = vsel %vm2138_vm0, %v2137_v53, 0  ;;  %v1600_v37 = vsub.s32 4, %v11015_v43 }
 0x4bb   :  { %vm2025_vm7 = vc.u32 %v2017_v13, %v2021_v35  ;;  %v2027_v23 = vadd.s32 %v2021_v35, %v2017_v13  ;;  %v12554_v36 = vshll.u32 %v11436_v49, 16  ;;  %v11456_v32 = vmul.f32 %v11441_v34, %v11441_v34 }
 0x4bc   :  { %v1752_v63 = vsub.s32 4294967266, %v11443_v20  ;;  %v2048_v39 = vsel %vm2047_vm13, 1, %v12603_v61  ;;  %v2141_v51 = vand.u32 31, %v2139_v12  ;;  %v2023_v2 = vshll.u32 %v11446_v29, 16 }
 0x4bd   :  { %v2042_v31 = vmul.u32 %v2038_v27, %v2014_v54  ;;  %vm2051_vm4 = vc.u32 %v11448_v9, %v12554_v36  ;;  %v11468_v14 = vmul.f32 %v5366_v7, %v11339_v0  ;;  %v1900_v35 = vadd.s32 536870912, %v11450_v30 }
 0x4be   :  { %v2026_v6 = vsel %vm2025_vm7, 1, %v12603_v61  ;;  %v11472_v53 = vsub.s32 32, %v2141_v51  ;;  %v11475_v62 = vmul.f32 %v5373_v40, %v11339_v0  ;;  %v2020_v47 = vmul.u32 %v2016_v41, %v2014_v54 }
 0x4bf   :  { %vm2029_vm14 = vc.u32 %v2027_v23, %v2023_v2  ;;  %v2050_v27 = vadd.s32 %v2048_v39, %v2042_v31  ;;  %v11480_v13 = vsel %vm1478_vm11, %v1600_v37, %v11015_v43  ;;  %v11483_v7 = vmul.f32 -0.001358992, %v11456_v32 }
 0x4c0   :  { %v11487_v36 = vadd.s32 %v11119_v42, %v11103_v57  ;;  %v2052_v11 = vsel %vm2051_vm4, 1, %v12603_v61  ;;  %v11491_v40 = vadd.s32 127, %v1752_v63  ;;  %v2028_v41 = vadd.s32 %v2026_v6, %v2020_v47 }
 0x4c1   :  { %v12868_v54 = vand.u32 2147483647, %v11378_v52  ;;  %v11495_v39 = vshrl.u32 %v1900_v35, 30  ;;  %v2030_v43 = vsel %vm2029_vm14, 1, %v12603_v61  ;;  %v2145_v37 = vshrl.u32 %v12633_v24, %v11472_v53 }
 0x4c2   :  { %v2148_v57 = vshrl.u32 %v12634_v44, %v11472_v53  ;;  %v2044_v42 = vshrl.u32 %v11409_v46, 16  ;;  %v2054_v2 = vadd.s32 %v2052_v11, %v2050_v27  ;;  %v2154_v63 = vshrl.u32 %v12839_v21, %v11472_v53 }
 0x4c3   :  { %v2134_v23 = vand.u32 8388607, %v12868_v54  ;;  %v2286_v31 = vmul.f32 0.013335214, %v10545_v22  ;;  %v2144_v35 = vshll.u32 %v12610_v33, %v2141_v51  ;;  %v2147_v6 = vshll.u32 %v12633_v24, %v2141_v51 }
 0x4c4   :  { %v2151_v47 = vshrl.u32 %v12841_v3, %v11472_v53  ;;  %v2157_v54 = vshrl.u32 %v12840_v19, %v11472_v53  ;;  %v2032_v0 = vadd.s32 %v2030_v43, %v2028_v41  ;;  %v11512_v46 = vshrl.u32 %v2139_v12, 5 }
 0x4c5   :  { %v2135_v8 = vor.u32 8388608, %v2134_v23  ;;  %v2153_v11 = vshll.u32 %v12841_v3, %v2141_v51  ;;  %v11515_v27 = vor.u32 %v2145_v37, %v2144_v35  ;;  %v11517_v59 = vor.u32 %v2148_v57, %v2147_v6 }
 0x4c6   :  { %v2150_v4 = vshll.u32 %v12634_v44, %v2141_v51  ;;  %v2156_v48 = vshll.u32 %v12839_v21, %v2141_v51  ;;  %v2022_v55 = vshrl.u32 %v11414_v60, 16  ;;  %v2055_v1 = vadd.s32 %v2054_v2, %v2044_v42 }
 0x4c7   :  { %v2155_v52 = vor.u32 %v2154_v63, %v2153_v11  ;;  %v12869_v25 = vstv %s7573_s20  ;;  %v1902_v12 = vshll.u32 %v11495_v39, 30  ;;  %v1980_v41 = vshrl.u32 %v12610_v33, %v11252_v26 }
 0x4c8   :  { %v11524_v34 = vadd.f32 %v12869_v25, %v2286_v31  ;;  %v11529_v23 = vor.u32 %v2151_v47, %v2150_v4  ;;  %v2158_v43 = vor.u32 %v2157_v54, %v2156_v48  ;;  %v2001_v37 = vsel %vm1999_vm15, %v11313_v58, 2102212464 }
 0x4c9   :  { %v2033_v51 = vadd.s32 %v2032_v0, %v2022_v55  ;;  %v2046_v60 = vshrl.u32 %v11436_v49, 16  ;;  %vm2159_vm10 = vcmp.lt.s32.totalorder %v11512_v46, 1  ;;  %v2024_v25 = vshrl.u32 %v11446_v29, 16 }
 0x4ca   :  { %vm2162_vm11 = vcmp.lt.s32.totalorder %v11512_v46, 4  ;;  %v2167_v26 = vsel %vm2159_vm10, %v11515_v27, %v11517_v59  ;;  %v11542_v4 = vshll.u32 %v2135_v8, 8  ;;  %vm2161_vm2 = vcmp.lt.s32.totalorder %v11512_v46, 3 }
 0x4cb   :  { %v2056_v48 = vadd.s32 %v2055_v1, %v2046_v60  ;;  %v2168_v55 = vsel %vm2162_vm11, %v2155_v52, 920167782  ;;  %v2293_v58 = vand.u32 2139095040, %v11524_v34  ;;  %vm2160_vm15 = vcmp.lt.s32.totalorder %v11512_v46, 2 }
 0x4cc   :  { %v2169_v29 = vsel %vm2161_vm2, %v11529_v23, %v2168_v55  ;;  %v2171_v8 = vsel %vm2159_vm10, %v11517_v59, %v11529_v23  ;;  %v2172_v1 = vsel %vm2162_vm11, %v2158_v43, 1326507024  ;;  %v1754_v0 = vshll.u32 %v11491_v40, 23 }
 0x4cd   :  { %v11559_v57 = vadd.s32 %v2033_v51, %v2024_v25  ;;  %v2170_v42 = vsel %vm2160_vm15, %v2167_v26, %v2169_v29  ;;  %v2173_v2 = vsel %vm2161_vm2, %v2155_v52, %v2172_v1  ;;  %v2000_v63 = vsel %vm1996_vm12, %v1980_v41, %v11309_v45 }
 0x4ce   :  { %v2002_v31 = vsel %vm1998_vm3, %v11311_v10, %v2001_v37  ;;  %v12870_v35 = vshll.u32 %v11436_v49, 16  ;;  %v2176_v6 = vand.u32 65535, %v11542_v4  ;;  %v2174_v47 = vsel %vm2160_vm15, %v2171_v8, %v2173_v2 }
 0x4cf   :  { %v2200_v54 = vand.u32 65535, %v2170_v42  ;;  %v2201_v52 = vshrl.u32 %v2170_v42, 16  ;;  %v2294_v11 = vshrl.u32 %v2293_v58, 23  ;;  %v11580_v43 = vsub.s32 %v11450_v30, %v1902_v12 }
 0x4d0   :  { %v11574_v40 = vadd.s32 %v11448_v9, %v12870_v35  ;;  %v2060_v45 = vadd.s32 1, %v2056_v48  ;;  %v2177_v41 = vshrl.u32 %v11542_v4, 16  ;;  %v2178_v10 = vand.u32 65535, %v2174_v47 }
 0x4d1   :  { %v2003_v49 = vsel %vm1997_vm1, %v2000_v63, %v2002_v31  ;;  %v2179_v9 = vshrl.u32 %v2174_v47, 16  ;;  %v2203_v37 = vmul.u32 %v2201_v52, %v2176_v6  ;;  %v1749_v51 = vshll.u32 %v11271_v28, %v11443_v20 }
 0x4d2   :  { %vm2059_vm12 = vc.u32 %v11559_v57, %v11574_v40  ;;  %v12871_v60 = vsub.s32 32, %v11443_v20  ;;  %v2182_v12 = vmul.u32 %v2178_v10, %v2177_v41  ;;  %v11592_v25 = vmul.u32 %v2200_v54, %v2177_v41 }
 0x4d3   :  { %v1755_v26 = vor.u32 4788187, %v1754_v0  ;;  %v2181_v55 = vmul.u32 %v2179_v9, %v2176_v6  ;;  %v2206_v58 = vshll.u32 %v2203_v37, 16  ;;  %v5592_v16 = vadd.s32 4294967169, %v2294_v11 }
 0x4d4   :  { %v1750_v30 = vshrl.u32 %v11487_v36, %v12871_v60  ;;  %vm1904_vm3 = vcmp.lt.s32.totalorder %v11580_v43, 0  ;;  %v2057_v29 = vmul.u32 %v11363_v50, %v2003_v49  ;;  %v2061_v8 = vsel %vm2059_vm12, %v2060_v45, %v2056_v48 }
 0x4d5   :  { %v2202_v1 = vmul.u32 %v2200_v54, %v2176_v6  ;;  %v2180_v42 = vmul.u32 %v2178_v10, %v2176_v6  ;;  %v2183_v2 = vmul.u32 %v2179_v9, %v2177_v41  ;;  %v2184_v28 = vshll.u32 %v2181_v55, 16 }
 0x4d6   :  { %v2205_v63 = vmul.u32 %v2201_v52, %v2177_v41  ;;  %v2186_v20 = vshll.u32 %v2182_v12, 16  ;;  %v2208_v36 = vshll.u32 %v11592_v25, 16  ;;  %v2300_v47 = vadd.s32 1, %v5592_v16 }
 0x4d7   :  { %vm2210_vm1 = vc.u32 %v2202_v1, %v2206_v58  ;;  %v2212_v31 = vadd.s32 %v2206_v58, %v2202_v1  ;;  %vm2188_vm8 = vc.u32 %v2180_v42, %v2184_v28  ;;  %v2190_v0 = vadd.s32 %v2184_v28, %v2180_v42 }
 0x4d8   :  { %v2211_v35 = vsel %vm2210_vm1, 1, %v12603_v61  ;;  %v1905_v11 = vsub.s32 0, %v11580_v43  ;;  %v2189_v50 = vsel %vm2188_vm8, 1, %v12603_v61  ;;  %v11600_v6 = vadd.s32 %v2061_v8, %v2057_v29 }
 0x4d9   :  { %v2213_v48 = vadd.s32 %v2211_v35, %v2205_v63  ;;  %vm2214_vm5 = vc.u32 %v2212_v31, %v2208_v36  ;;  %v2191_v54 = vadd.s32 %v2189_v50, %v2183_v2  ;;  %vm2192_vm13 = vc.u32 %v2190_v0, %v2186_v20 }
 0x4da   :  { %v2215_v52 = vsel %vm2214_vm5, 1, %v12603_v61  ;;  %v1751_v45 = vor.u32 %v1750_v30, %v1749_v51  ;;  %v2193_v41 = vsel %vm2192_vm13, 1, %v12603_v61  ;;  %vm2301_vm0 = vcmp.gt.s32.totalorder %v2300_v47, 0 }
 0x4db   :  { %v2217_v10 = vadd.s32 %v2215_v52, %v2213_v48  ;;  %v2185_v49 = vshrl.u32 %v2181_v55, 16  ;;  %v2195_v9 = vadd.s32 %v2193_v41, %v2191_v54  ;;  %v2207_v60 = vshrl.u32 %v2203_v37, 16 }
 0x4dc   :  { %v2302_v58 = vsel %vm2301_vm0, %v2300_v47, 0  ;;  %v11605_v16 = vadd.f32 1.0, %v11468_v14  ;;  %v1756_v1 = vand.u32 2147483647, %v1755_v26  ;;  %v1906_v29 = vsel %vm1904_vm3, %v1905_v11, %v11580_v43 }
 0x4dd   :  { %v2304_v8 = vand.u32 31, %v2302_v58  ;;  %v2063_v42 = vadd.s32 536870912, %v11600_v6  ;;  %v2196_v51 = vadd.s32 %v2195_v9, %v2185_v49  ;;  %v2218_v30 = vadd.s32 %v2217_v10, %v2207_v60 }
 0x4de   :  { %12872 = vst [vmem:[#allocation44_spill] sm:$0xff] %v11605_v16  ;;  %v12565_v2 = vand.u32 2147483647, %v11524_v34  ;;  %v5375_v55 = vadd.f32 1.0, %v11475_v62  ;;  %v1603_v37 = vsel %vm11392_vm9, 0, %v11480_v13  ;;  %v1758_v14 = vcvt.s32.f32 %v1751_v45 }
 0x4df   :  { %v11616_v28 = vsub.s32 32, %v2304_v8  ;;  %v1606_v26 = vadd.f32 0.041655596, %v11483_v7  ;;  %v1612_v63 = vmul.f32 -0.00019511016, %v11456_v32  ;;  %v2187_v20 = vshrl.u32 %v2182_v12, 16 }
 0x4e0   :  { %v2209_v0 = vshrl.u32 %v11592_v25, 16  ;;  %v1759_v35 = vmul.f32 %v1758_v14, %v1756_v1  ;;  %v1907_v47 = vclz %v1906_v29  ;;  %v2143_v11 = vshrl.u32 %v12610_v33, %v11472_v53 }
 0x4e1   :  { %v2164_v62 = vsel %vm2162_vm11, %v11529_v23, 2102212464  ;;  %v11626_v50 = vshrl.u32 %v2063_v42, 30  ;;  %v11628_v48 = vadd.s32 %v2196_v51, %v2187_v20  ;;  %v2297_v7 = vand.u32 8388607, %v12565_v2 }
 0x4e2   :  { %v2219_v54 = vadd.s32 %v2218_v30, %v2209_v0  ;;  %vm1640_vm7 = vcmp.lt.s32.totalorder %v10666_v38, 0  ;;  %v2163_v12 = vsel %vm2159_vm10, %v2143_v11, %v11515_v27  ;;  %v2308_v53 = vshrl.u32 %v12633_v24, %v11616_v28 }
 0x4e3   :  { %12873 = vst [vmem:[#allocation45_spill] sm:$0xff] %v11626_v50  ;;  %v2311_v23 = vshrl.u32 %v12634_v44, %v11616_v28  ;;  %v2314_v25 = vshrl.u32 %v12841_v3, %v11616_v28  ;;  %v2165_v52 = vsel %vm2161_vm2, %v11517_v59, %v2164_v62  ;;  %v11645_v45 = vadd.s32 %v2212_v31, %v2208_v36 }
 0x4e4   :  { %v2316_v41 = vshll.u32 %v12841_v3, %v2304_v8  ;;  %v2317_v27 = vshrl.u32 %v12839_v21, %v11616_v28  ;;  %v11650_v10 = vshrl.u32 %v2302_v58, 5  ;;  %v2307_v49 = vshll.u32 %v12610_v33, %v2304_v8 }
 0x4e5   :  { %v2310_v9 = vshll.u32 %v12633_v24, %v2304_v8  ;;  %v2313_v60 = vshll.u32 %v12634_v44, %v2304_v8  ;;  %v12874_v1 = vand.u32 2147483647, %v10666_v38  ;;  %vm2222_vm14 = vc.u32 %v11628_v48, %v11645_v45 }
 0x4e6   :  { %v2223_v59 = vadd.s32 1, %v2219_v54  ;;  %v2318_v36 = vor.u32 %v2317_v27, %v2316_v41  ;;  %v2320_v31 = vshrl.u32 %v12840_v19, %v11616_v28  ;;  %v11665_v58 = vor.u32 %v2308_v53, %v2307_v49 }
 0x4e7   :  { %vm11657_vm4 = vcmp.le.f32.partialorder %v12874_v1, 0.7853982  ;;  %v11667_v42 = vor.u32 %v2311_v23, %v2310_v9  ;;  %v11669_v51 = vor.u32 %v2314_v25, %v2313_v60  ;;  %v2319_v30 = vshll.u32 %v12839_v21, %v2304_v8 }
 0x4e8   :  { %v1613_v14 = vadd.f32 0.008332121, %v1612_v63  ;;  %v1760_v20 = vxor.u32 2147483648, %v1759_v35  ;;  %v5578_v0 = vadd.s32 4294967294, %v1907_v47  ;;  %v2166_v11 = vsel %vm2160_vm15, %v2163_v12, %v2165_v52 }
 0x4e9   :  { %v2065_v62 = vshll.u32 %v11626_v50, 30  ;;  %v2298_v41 = vor.u32 8388608, %v2297_v7  ;;  %v2321_v27 = vor.u32 %v2320_v31, %v2319_v30  ;;  %vm2325_vm10 = vcmp.lt.s32.totalorder %v11650_v10, 4 }
 0x4ea   :  { %v2224_v53 = vsel %vm2222_vm14, %v2223_v59, %v2219_v54  ;;  %vm2322_vm11 = vcmp.lt.s32.totalorder %v11650_v10, 1  ;;  %vm2324_vm2 = vcmp.lt.s32.totalorder %v11650_v10, 3  ;;  %v2331_v8 = vsel %vm2325_vm10, %v2318_v36, 920167782 }
 0x4eb   :  { %v1607_v46 = vmul.f32 %v1606_v26, %v11456_v32  ;;  %v2220_v63 = vmul.u32 %v11542_v4, %v2166_v11  ;;  %v2330_v47 = vsel %vm2322_vm11, %v11665_v58, %v11667_v42  ;;  %v2332_v54 = vsel %vm2324_vm2, %v11669_v51, %v2331_v8 }
 0x4ec   :  { %v1614_v7 = vmul.f32 %v1613_v14, %v11456_v32  ;;  %v1761_v12 = vsel %vm1640_vm7, %v1760_v20, %v1759_v35  ;;  %vm5579_vm15 = vcmp.lt.s32.totalorder %v5578_v0, 0  ;;  %v2334_v4 = vsel %vm2322_vm11, %v11667_v42, %v11669_v51 }
 0x4ed   :  { %v11699_v26 = vadd.s32 %v2224_v53, %v2220_v63  ;;  %vm2323_vm12 = vcmp.lt.s32.totalorder %v11650_v10, 2  ;;  %v2335_v23 = vsel %vm2325_vm10, %v2321_v27, 1326507024  ;;  %v11704_v25 = vshll.u32 %v2298_v41, 8 }
 0x4ee   :  { %v11707_v52 = vmul.f32 %v5375_v55, %v11322_v56  ;;  %v11710_v35 = vsub.s32 %v11600_v6, %v2065_v62  ;;  %v2333_v49 = vsel %vm2323_vm12, %v2330_v47, %v2332_v54  ;;  %v2336_v9 = vsel %vm2324_vm2, %v2318_v36, %v2335_v23 }
 0x4ef   :  { %v1620_v60 = vadd.s32 3, %v1603_v37  ;;  %v11723_v1 = vsel %vm11657_vm4, %v10666_v38, %v1761_v12  ;;  %v11725_v56 = vsel %vm5579_vm15, 0, %v5578_v0  ;;  %v2337_v6 = vsel %vm2323_vm12, %v2334_v4, %v2336_v9 }
 0x4f0   :  { %12877 = vst [vmem:[#allocation46_spill] sm:$0xff] %v11707_v52  ;;  %v1608_v55 = vadd.f32 -0.4999988, %v1607_v46  ;;  %v1762_v59 = vsub.s32 4, %v11231_v18  ;;  %v2341_v31 = vand.u32 65535, %v2337_v6  ;;  %v2342_v36 = vshrl.u32 %v2337_v6, 16 }
 0x4f1   :  { %v1615_v30 = vadd.f32 -0.16666654, %v1614_v7  ;;  %v2226_v17 = vadd.s32 536870912, %v11699_v26  ;;  %v2339_v13 = vand.u32 65535, %v11704_v25  ;;  %v2364_v37 = vshrl.u32 %v2333_v49, 16 }
 0x4f2   :  { %v11734_v14 = vmul.f32 %v11723_v1, %v11723_v1  ;;  %v1915_v20 = vsub.s32 4294967266, %v11725_v56  ;;  %v2068_v0 = vsub.s32 0, %v11710_v35  ;;  %v2340_v11 = vshrl.u32 %v11704_v25, 16 }
 0x4f3   :  { %v11739_v62 = vand.u32 3, %v1620_v60  ;;  %vm2067_vm9 = vcmp.lt.s32.totalorder %v11710_v35, 0  ;;  %v2344_v41 = vmul.u32 %v2342_v36, %v2339_v13  ;;  %v2363_v27 = vand.u32 65535, %v2333_v49 }
 0x4f4   :  { %v11743_v53 = vmul.f32 %v1608_v55, %v11456_v32  ;;  %v11748_v8 = vsel %vm1640_vm7, %v1762_v59, %v11231_v18  ;;  %v2345_v46 = vmul.u32 %v2341_v31, %v2340_v11  ;;  %v2366_v63 = vmul.u32 %v2364_v37, %v2339_v13 }
 0x4f5   :  { %v1616_v47 = vmul.f32 %v1615_v30, %v11456_v32  ;;  %v11751_v54 = vshrl.u32 %v2226_v17, 30  ;;  %v2343_v7 = vmul.u32 %v2341_v31, %v2339_v13  ;;  %v2347_v12 = vshll.u32 %v2344_v41, 16 }
 0x4f6   :  { %v1767_v4 = vmul.f32 -0.001358992, %v11734_v14  ;;  %v1895_v23 = vadd.s32 %v11405_v5, %v11386_v15  ;;  %v1916_v49 = vadd.s32 127, %v1915_v20  ;;  %v2069_v9 = vsel %vm2067_vm9, %v2068_v0, %v11710_v35 }
 0x4f7   :  { %12878 = vst [vmem:[#allocation47_spill] sm:$0xff] %v11751_v54  ;;  %v2346_v60 = vmul.u32 %v2342_v36, %v2340_v11  ;;  %vm2351_vm3 = vc.u32 %v2343_v7, %v2347_v12  ;;  %v2365_v18 = vmul.u32 %v2363_v27, %v2339_v13  ;;  %v2367_v6 = vmul.u32 %v2363_v27, %v2340_v11 }
 0x4f8   :  { %v2349_v55 = vshll.u32 %v2345_v46, 16  ;;  %v2352_v59 = vsel %vm2351_vm3, 1, %v12603_v61  ;;  %v2353_v32 = vadd.s32 %v2347_v12, %v2343_v7  ;;  %v2369_v30 = vshll.u32 %v2366_v63, 16 }
 0x4f9   :  { %v1774_v31 = vmul.f32 -0.00019511016, %v11734_v14  ;;  %v1911_v17 = vsub.s32 32, %v11725_v56  ;;  %v2228_v2 = vshll.u32 %v11751_v54, 30  ;;  %v2354_v16 = vadd.s32 %v2352_v59, %v2346_v60 }
 0x4fa   :  { %v1917_v15 = vshll.u32 %v1916_v49, 23  ;;  %vm2355_vm1 = vc.u32 %v2353_v32, %v2349_v55  ;;  %v2368_v5 = vmul.u32 %v2364_v37, %v2340_v11  ;;  %vm2373_vm8 = vc.u32 %v2365_v18, %v2369_v30 }
 0x4fb   :  { %v2070_v36 = vclz %v2069_v9  ;;  %v2348_v20 = vshrl.u32 %v2344_v41, 16  ;;  %v2356_v13 = vsel %vm2355_vm1, 1, %v12603_v61  ;;  %v2374_v0 = vsel %vm2373_vm8, 1, %v12603_v61 }
 0x4fc   :  { %v2358_v27 = vadd.s32 %v2356_v13, %v2354_v16  ;;  %v2371_v7 = vshll.u32 %v2367_v6, 16  ;;  %v2375_v12 = vadd.s32 %v2369_v30, %v2365_v18  ;;  %v2376_v52 = vadd.s32 %v2374_v0, %v2368_v5 }
 0x4fd   :  { %v1912_v50 = vshll.u32 %v11580_v43, %v11725_v56  ;;  %v1913_v54 = vshrl.u32 %v1895_v23, %v1911_v17  ;;  %v11766_v49 = vsub.s32 %v11699_v26, %v2228_v2  ;;  %v2449_v37 = vmul.f32 0.0056234132, %v10545_v22 }
 0x4fe   :  { %v2306_v11 = vshrl.u32 %v12610_v33, %v11616_v28  ;;  %v2327_v41 = vsel %vm2325_vm10, %v11669_v51, 2102212464  ;;  %v2359_v16 = vadd.s32 %v2358_v27, %v2348_v20  ;;  %vm2377_vm5 = vc.u32 %v2375_v12, %v2371_v7 }
 0x4ff   :  { %v1918_v9 = vor.u32 4788187, %v1917_v15  ;;  %v2350_v60 = vshrl.u32 %v2345_v46, 16  ;;  %v2378_v18 = vsel %vm2377_vm5, 1, %v12603_v61  ;;  %v12879_v43 = vstv %s7741_s21 }
 0x500   :  { %v11777_v56 = vadd.f32 %v12879_v43, %v2449_v37  ;;  %v5583_v2 = vadd.s32 4294967294, %v2070_v36  ;;  %v2326_v26 = vsel %vm2322_vm11, %v2306_v11, %v11665_v58  ;;  %v2370_v23 = vshrl.u32 %v2366_v63, 16  ;;  %v12881_v11 = vld [vmem:[#allocation42_spill] sm:$0xff] }
 0x501   :  { %v2380_v28 = vadd.s32 %v2378_v18, %v2376_v52  ;;  %v2231_v55 = vsub.s32 0, %v11766_v49  ;;  %v2328_v51 = vsel %vm2324_vm2, %v11667_v42, %v2327_v41  ;;  %v11786_v59 = vadd.s32 %v2359_v16, %v2350_v60 }
 0x502   :  { %v2456_v46 = vand.u32 2139095040, %v11777_v56  ;;  %v1617_v32 = vadd.f32 1.0, %v1616_v47  ;;  %vm2230_vm13 = vcmp.lt.s32.totalorder %v11766_v49, 0  ;;  %v2372_v30 = vshrl.u32 %v2367_v6, 16 }
 0x503   :  { %v2381_v17 = vadd.s32 %v2380_v28, %v2370_v23  ;;  %v1768_v15 = vadd.f32 0.041655596, %v1767_v4  ;;  %v1914_v5 = vor.u32 %v1913_v54, %v1912_v50  ;;  %v11790_v58 = vadd.s32 %v2375_v12, %v2371_v7  ;;  %v12880_v4 = vld [vmem:[#allocation43_spill] sm:$0xff] }
 0x504   :  { %v2457_v52 = vshrl.u32 %v2456_v46, 23  ;;  %v1775_v63 = vadd.f32 0.008332121, %v1774_v31  ;;  %vm5584_vm0 = vcmp.lt.s32.totalorder %v5583_v2, 0  ;;  %v2329_v36 = vsel %vm2323_vm12, %v2326_v26, %v2328_v51 }
 0x505   :  { %v2382_v42 = vadd.s32 %v2381_v17, %v2372_v30  ;;  %v1919_v20 = vand.u32 2147483647, %v1918_v9  ;;  %v2232_v13 = vsel %vm2230_vm13, %v2231_v55, %v11766_v49  ;;  %vm2385_vm7 = vc.u32 %v11786_v59, %v11790_v58 }
 0x506   :  { %v5597_v47 = vadd.s32 4294967169, %v2457_v52  ;;  %v1610_v6 = vadd.f32 1.0, %v11743_v53  ;;  %v1618_v50 = vmul.f32 %v1617_v32, %v12880_v4  ;;  %v1765_v54 = vsel %vm11657_vm4, 0, %v11748_v8 }
 0x507   :  { %v2386_v31 = vadd.s32 1, %v2382_v42  ;;  %v1921_v0 = vcvt.s32.f32 %v1914_v5  ;;  %v11802_v10 = vsel %vm5584_vm0, 0, %v5583_v2  ;;  %v2383_v27 = vmul.u32 %v11704_v25, %v2329_v36 }
 0x508   :  { %v2463_v7 = vadd.s32 1, %v5597_v47  ;;  %v1769_v12 = vmul.f32 %v1768_v15, %v11734_v14  ;;  %v1776_v37 = vmul.f32 %v1775_v63, %v11734_v14  ;;  %vm1803_vm14 = vcmp.lt.s32.totalorder %v12881_v11, 0 }
 0x509   :  { %v2233_v53 = vclz %v2232_v13  ;;  %v2387_v41 = vsel %vm2385_vm7, %v2386_v31, %v2382_v42  ;;  %v1782_v16 = vadd.s32 3, %v1765_v54  ;;  %v1922_v9 = vmul.f32 %v1921_v0, %v1919_v20 }
 0x50a   :  { %v2388_v60 = vadd.s32 %v2387_v41, %v2383_v27  ;;  %vm2464_vm10 = vcmp.gt.s32.totalorder %v2463_v7, 0  ;;  %vm1623_vm4 = vcmp.eq.s32.totalorder %v11739_v62, 0  ;;  %v1627_v29 = vxor.u32 2147483648, %v1610_v6 }
 0x50b   :  { %v2078_v8 = vsub.s32 4294967266, %v11802_v10  ;;  %v2465_v18 = vsel %vm2464_vm10, %v2463_v7, 0  ;;  %v1624_v25 = vxor.u32 2147483648, %v1618_v50  ;;  %v12572_v2 = vand.u32 2147483647, %v11777_v56 }
 0x50c   :  { %v2389_v43 = vadd.s32 536870912, %v2388_v60  ;;  %v2612_v26 = vmul.f32 0.0023713738, %v10545_v22  ;;  %v1770_v23 = vadd.f32 -0.4999988, %v1769_v12  ;;  %v5588_v55 = vadd.s32 4294967294, %v2233_v53 }
 0x50d   :  { %v1777_v28 = vadd.f32 -0.16666654, %v1776_v37  ;;  %v2467_v51 = vand.u32 31, %v2465_v18  ;;  %vm1626_vm11 = vcmp.eq.s32.totalorder %v11739_v62, 2  ;;  %v11813_v46 = vand.u32 3, %v1782_v16 }
 0x50e   :  { %v1923_v32 = vxor.u32 2147483648, %v1922_v9  ;;  %v11815_v30 = vshrl.u32 %v2389_v43, 30  ;;  %v11817_v17 = vsel %vm1626_vm11, %v1627_v29, %v1618_v50  ;;  %v12883_v15 = vand.u32 2147483647, %v12881_v11 }
 0x50f   :  { %v2074_v22 = vsub.s32 32, %v11802_v10  ;;  %v2079_v52 = vadd.s32 127, %v2078_v8  ;;  %v11826_v63 = vsub.s32 32, %v2467_v51  ;;  %v11830_v36 = vsel %vm1623_vm4, %v1610_v6, %v1624_v25 }
 0x510   :  { %12882 = vst [vmem:[#allocation43_spill] sm:$0xff] %v11815_v30  ;;  %vm11821_vm2 = vcmp.le.f32.partialorder %v12883_v15, 0.7853982  ;;  %v2391_v42 = vshll.u32 %v11815_v30, 30  ;;  %v2460_v20 = vand.u32 8388607, %v12572_v2  ;;  %v12886_v13 = vstv %s7752_s22 }
 0x511   :  { %v11837_v47 = vadd.f32 %v12886_v13, %v2612_v26  ;;  %v1771_v4 = vmul.f32 %v1770_v23, %v11734_v14  ;;  %v1778_v50 = vmul.f32 %v1777_v28, %v11734_v14  ;;  %v2058_v54 = vadd.s32 %v11574_v40, %v11559_v57 }
 0x512   :  { %vm5589_vm15 = vcmp.lt.s32.totalorder %v5588_v55, 0  ;;  %v1924_v6 = vsel %vm1803_vm14, %v1923_v32, %v1922_v9  ;;  %v1925_v31 = vsub.s32 4, %v11495_v39  ;;  %v2075_v0 = vshll.u32 %v11710_v35, %v11802_v10 }
 0x513   :  { %v11848_v27 = vsub.s32 %v2388_v60, %v2391_v42  ;;  %v2076_v7 = vshrl.u32 %v2058_v54, %v2074_v22  ;;  %v2080_v12 = vshll.u32 %v2079_v52, 23  ;;  %v2471_v37 = vshrl.u32 %v12633_v24, %v11826_v63 }
 0x514   :  { %v2474_v14 = vshrl.u32 %v12634_v44, %v11826_v63  ;;  %v11854_v57 = vsel %vm5589_vm15, 0, %v5588_v55  ;;  %v2461_v40 = vor.u32 8388608, %v2460_v20  ;;  %v2477_v53 = vshrl.u32 %v12841_v3, %v11826_v63 }
 0x515   :  { %v2619_v41 = vand.u32 2139095040, %v11837_v47  ;;  %v2470_v35 = vshll.u32 %v12610_v33, %v2467_v51  ;;  %v2473_v10 = vshll.u32 %v12633_v24, %v2467_v51  ;;  %v2479_v16 = vshll.u32 %v12841_v3, %v2467_v51 }
 0x516   :  { %v2480_v9 = vshrl.u32 %v12839_v21, %v11826_v63  ;;  %v2394_v60 = vsub.s32 0, %v11848_v27  ;;  %v11865_v29 = vshrl.u32 %v2465_v18, 5  ;;  %v2476_v8 = vshll.u32 %v12634_v44, %v2467_v51 }
 0x517   :  { %v2483_v25 = vshrl.u32 %v12840_v19, %v11826_v63  ;;  %vm2393_vm12 = vcmp.lt.s32.totalorder %v11848_v27, 0  ;;  %v11871_v43 = vor.u32 %v2471_v37, %v2470_v35  ;;  %v11873_v26 = vor.u32 %v2474_v14, %v2473_v10 }
 0x518   :  { %v2481_v23 = vor.u32 %v2480_v9, %v2479_v16  ;;  %v11875_v28 = vadd.f32 1.0, %v1771_v4  ;;  %v11880_v55 = vsel %vm11821_vm2, %v12881_v11, %v1924_v6  ;;  %v11882_v18 = vor.u32 %v2477_v53, %v2476_v8 }
 0x519   :  { %v2482_v32 = vshll.u32 %v12839_v21, %v2467_v51  ;;  %v2077_v15 = vor.u32 %v2076_v7, %v2075_v0  ;;  %v2081_v22 = vor.u32 4788187, %v2080_v12  ;;  %v2241_v52 = vsub.s32 4294967266, %v11854_v57 }
 0x51a   :  { %v2620_v42 = vshrl.u32 %v2619_v41, 23  ;;  %v2395_v20 = vsel %vm2393_vm12, %v2394_v60, %v11848_v27  ;;  %vm2485_vm9 = vcmp.lt.s32.totalorder %v11865_v29, 1  ;;  %vm2488_vm3 = vcmp.lt.s32.totalorder %v11865_v29, 4 }
 0x51b   :  { %v2484_v13 = vor.u32 %v2483_v25, %v2482_v32  ;;  %vm2487_vm1 = vcmp.lt.s32.totalorder %v11865_v29, 3  ;;  %v2493_v4 = vsel %vm2485_vm9, %v11871_v43, %v11873_v26  ;;  %v2494_v51 = vsel %vm2488_vm3, %v2481_v23, 920167782 }
 0x51c   :  { %v11896_v54 = vshll.u32 %v2461_v40, 8  ;;  %v11898_v6 = vadd.f32 1.0, %v1778_v50  ;;  %v11903_v0 = vsel %vm1803_vm14, %v1925_v31, %v11495_v39  ;;  %v11907_v7 = vmul.f32 %v11880_v55, %v11880_v55 }
 0x51d   :  { %v2495_v12 = vsel %vm2487_vm1, %v11882_v18, %v2494_v51  ;;  %v2082_v37 = vand.u32 2147483647, %v2081_v22  ;;  %v2084_v14 = vcvt.s32.f32 %v2077_v15  ;;  %v2396_v53 = vclz %v2395_v20 }
 0x51e   :  { %vm2486_vm8 = vcmp.lt.s32.totalorder %v11865_v29, 2  ;;  %v2237_v50 = vsub.s32 32, %v11854_v57  ;;  %v2497_v39 = vsel %vm2485_vm9, %v11873_v26, %v11882_v18  ;;  %v2498_v31 = vsel %vm2488_vm3, %v2484_v13, 1326507024 }
 0x51f   :  { %v2496_v40 = vsel %vm2486_vm8, %v2493_v4, %v2495_v12  ;;  %v11922_v41 = vadd.s32 127, %v2241_v52  ;;  %v2499_v35 = vsel %vm2487_vm1, %v2481_v23, %v2498_v31  ;;  %v2502_v10 = vand.u32 65535, %v11896_v54 }
 0x520   :  { %v5602_v16 = vadd.s32 4294967169, %v2620_v42  ;;  %v2500_v9 = vsel %vm2486_vm8, %v2497_v39, %v2499_v35  ;;  %v2503_v60 = vshrl.u32 %v11896_v54, 16  ;;  %v2526_v8 = vand.u32 65535, %v2496_v40 }
 0x521   :  { %v2527_v25 = vshrl.u32 %v2496_v40, 16  ;;  %v2221_v32 = vadd.s32 %v11645_v45, %v11628_v48  ;;  %v5593_v15 = vadd.s32 4294967294, %v2396_v53  ;;  %v2504_v22 = vand.u32 65535, %v2500_v9 }
 0x522   :  { %v2505_v52 = vshrl.u32 %v2500_v9, 16  ;;  %v11933_v20 = vmul.f32 -0.001358992, %v11907_v7  ;;  %v11935_v23 = vmul.f32 %v2084_v14, %v2082_v37  ;;  %v2530_v42 = vmul.u32 %v2526_v8, %v2503_v60 }
 0x523   :  { %v2529_v13 = vmul.u32 %v2527_v25, %v2502_v10  ;;  %v2238_v4 = vshll.u32 %v11766_v49, %v11854_v57  ;;  %v2239_v51 = vshrl.u32 %v2221_v32, %v2237_v50  ;;  %v2243_v12 = vshll.u32 %v11922_v41, 23 }
 0x524   :  { %v2507_v40 = vmul.u32 %v2505_v52, %v2502_v10  ;;  %v2508_v39 = vmul.u32 %v2504_v22, %v2503_v60  ;;  %v2528_v31 = vmul.u32 %v2526_v8, %v2502_v10  ;;  %v2626_v45 = vadd.s32 1, %v5602_v16 }
 0x525   :  { %v2532_v48 = vshll.u32 %v2529_v13, 16  ;;  %vm5594_vm5 = vcmp.lt.s32.totalorder %v5593_v15, 0  ;;  %v2506_v53 = vmul.u32 %v2504_v22, %v2502_v10  ;;  %v12575_v9 = vand.u32 2147483647, %v11837_v47 }
 0x526   :  { %v2510_v35 = vshll.u32 %v2507_v40, 16  ;;  %v2509_v37 = vmul.u32 %v2505_v52, %v2503_v60  ;;  %v2531_v14 = vmul.u32 %v2527_v25, %v2503_v60  ;;  %v2534_v2 = vshll.u32 %v2530_v42, 16 }
 0x527   :  { %vm2536_vm13 = vc.u32 %v2528_v31, %v2532_v48  ;;  %v2512_v30 = vshll.u32 %v2508_v39, 16  ;;  %v2538_v41 = vadd.s32 %v2532_v48, %v2528_v31  ;;  %vm2627_vm7 = vcmp.gt.s32.totalorder %v2626_v45, 0 }
 0x528   :  { %vm2514_vm0 = vc.u32 %v2506_v53, %v2510_v35  ;;  %v2516_v49 = vadd.s32 %v2510_v35, %v2506_v53  ;;  %v2537_v57 = vsel %vm2536_vm13, 1, %v12603_v61  ;;  %v2490_v10 = vsel %vm2488_vm3, %v11882_v18, 2102212464 }
 0x529   :  { %v2515_v50 = vsel %vm2514_vm0, 1, %v12603_v61  ;;  %v2539_v8 = vadd.s32 %v2537_v57, %v2531_v14  ;;  %v2628_v32 = vsel %vm2627_vm7, %v2626_v45, 0  ;;  %v11947_v60 = vsel %vm5594_vm5, 0, %v5593_v15 }
 0x52a   :  { %v2517_v16 = vadd.s32 %v2515_v50, %v2509_v37  ;;  %vm2518_vm14 = vc.u32 %v2516_v49, %v2512_v30  ;;  %v2469_v25 = vshrl.u32 %v12610_v33, %v11826_v63  ;;  %vm2540_vm10 = vc.u32 %v2538_v41, %v2534_v2 }
 0x52b   :  { %v2519_v22 = vsel %vm2518_vm14, 1, %v12603_v61  ;;  %v2511_v52 = vshrl.u32 %v2507_v40, 16  ;;  %v2541_v48 = vsel %vm2540_vm10, 1, %v12603_v61  ;;  %v2630_v53 = vand.u32 31, %v2628_v32 }
 0x52c   :  { %v2521_v31 = vadd.s32 %v2519_v22, %v2517_v16  ;;  %v2489_v18 = vsel %vm2485_vm9, %v2469_v25, %v11871_v43  ;;  %v2491_v30 = vsel %vm2487_vm1, %v11873_v26, %v2490_v10  ;;  %v2533_v15 = vshrl.u32 %v2529_v13, 16 }
 0x52d   :  { %v2543_v45 = vadd.s32 %v2541_v48, %v2539_v8  ;;  %v2404_v63 = vsub.s32 4294967266, %v11947_v60  ;;  %v2513_v35 = vshrl.u32 %v2508_v39, 16  ;;  %v11960_v14 = vsub.s32 32, %v2630_v53 }
 0x52e   :  { %v2522_v37 = vadd.s32 %v2521_v31, %v2511_v52  ;;  %v1937_v40 = vmul.f32 -0.00019511016, %v11907_v7  ;;  %v2086_v49 = vxor.u32 2147483648, %v11935_v23  ;;  %v2535_v57 = vshrl.u32 %v2530_v42, 16 }
 0x52f   :  { %v2544_v50 = vadd.s32 %v2543_v45, %v2533_v15  ;;  %v2240_v16 = vor.u32 %v2239_v51, %v2238_v4  ;;  %v2492_v43 = vsel %vm2486_vm8, %v2489_v18, %v2491_v30  ;;  %v11968_v26 = vadd.s32 %v2538_v41, %v2534_v2  ;;  %v12887_v18 = vld [vmem:[#allocation34_spill] sm:$0xff] }
 0x530   :  { %v11966_v25 = vadd.s32 %v2522_v37, %v2513_v35  ;;  %v2244_v13 = vor.u32 4788187, %v2243_v12  ;;  %v2400_v39 = vsub.s32 32, %v11947_v60  ;;  %v2623_v10 = vand.u32 8388607, %v12575_v9 }
 0x531   :  { %v2545_v8 = vadd.s32 %v2544_v50, %v2535_v57  ;;  %v2405_v22 = vadd.s32 127, %v2404_v63  ;;  %v2637_v42 = vshrl.u32 %v12634_v44, %v11960_v14  ;;  %v2640_v29 = vshrl.u32 %v12841_v3, %v11960_v14 }
 0x532   :  { %vm2548_vm4 = vc.u32 %v11966_v25, %v11968_v26  ;;  %v2546_v2 = vmul.u32 %v11896_v54, %v2492_v43  ;;  %v11980_v51 = vshrl.u32 %v2628_v32, 5  ;;  %v2636_v12 = vshll.u32 %v12633_v24, %v2630_v53 }
 0x533   :  { %v2549_v4 = vadd.s32 1, %v2545_v8  ;;  %v2634_v41 = vshrl.u32 %v12633_v24, %v11960_v14  ;;  %v2639_v52 = vshll.u32 %v12634_v44, %v2630_v53  ;;  %v2642_v31 = vshll.u32 %v12841_v3, %v2630_v53 }
 0x534   :  { %v2643_v48 = vshrl.u32 %v12839_v21, %v11960_v14  ;;  %vm1966_vm11 = vcmp.lt.s32.totalorder %v12887_v18, 0  ;;  %v2633_v54 = vshll.u32 %v12610_v33, %v2630_v53  ;;  %v2645_v32 = vshll.u32 %v12839_v21, %v2630_v53 }
 0x535   :  { %v2550_v30 = vsel %vm2548_vm4, %v2549_v4, %v2545_v8  ;;  %v2646_v15 = vshrl.u32 %v12840_v19, %v11960_v14  ;;  %v11994_v63 = vor.u32 %v2637_v42, %v2636_v12  ;;  %v11996_v24 = vor.u32 %v2640_v29, %v2639_v52 }
 0x536   :  { %v2551_v45 = vadd.s32 %v2550_v30, %v2546_v2  ;;  %v2644_v44 = vor.u32 %v2643_v48, %v2642_v31  ;;  %v2245_v3 = vand.u32 2147483647, %v2244_v13  ;;  %v2406_v35 = vshll.u32 %v2405_v22, 23 }
 0x537   :  { %v2624_v37 = vor.u32 8388608, %v2623_v10  ;;  %v2647_v57 = vor.u32 %v2646_v15, %v2645_v32  ;;  %v12888_v50 = vand.u32 2147483647, %v12887_v18  ;;  %v2384_v21 = vadd.s32 %v11790_v58, %v11786_v59 }
 0x538   :  { %v2552_v19 = vadd.s32 536870912, %v2551_v45  ;;  %v12006_v53 = vor.u32 %v2634_v41, %v2633_v54  ;;  %vm2651_vm12 = vcmp.lt.s32.totalorder %v11980_v51, 4  ;;  %v2247_v8 = vcvt.s32.f32 %v2240_v16 }
 0x539   :  { %vm12000_vm15 = vcmp.le.f32.partialorder %v12888_v50, 0.7853982  ;;  %vm2648_vm9 = vcmp.lt.s32.totalorder %v11980_v51, 1  ;;  %v2657_v13 = vsel %vm2651_vm12, %v2644_v44, 920167782  ;;  %v2402_v22 = vshrl.u32 %v2384_v21, %v2400_v39  ;;  %v12891_v21 = vld [vmem:[#allocation36_spill] sm:$0xff] }
 0x53a   :  { %v2661_v10 = vsel %vm2651_vm12, %v2647_v57, 1326507024  ;;  %v12014_v42 = vshrl.u32 %v2552_v19, 30  ;;  %vm2650_vm3 = vcmp.lt.s32.totalorder %v11980_v51, 3  ;;  %v2660_v59 = vsel %vm2648_vm9, %v11994_v63, %v11996_v24 }
 0x53b   :  { %v2401_v58 = vshll.u32 %v11848_v27, %v11947_v60  ;;  %v2407_v16 = vor.u32 4788187, %v2406_v35  ;;  %v2662_v29 = vsel %vm2650_vm3, %v2644_v44, %v2661_v10  ;;  %v12025_v2 = vshll.u32 %v2624_v37, 8 }
 0x53c   :  { %v2554_v39 = vshll.u32 %v12014_v42, 30  ;;  %vm2649_vm1 = vcmp.lt.s32.totalorder %v11980_v51, 2  ;;  %v2656_v4 = vsel %vm2648_vm9, %v12006_v53, %v11994_v63  ;;  %v2658_v12 = vsel %vm2650_vm3, %v11996_v24, %v2657_v13 }
 0x53d   :  { %v12038_v27 = vmul.f32 %v11898_v6, %v11723_v1  ;;  %v1931_v60 = vadd.f32 0.041655596, %v11933_v20  ;;  %v1938_v41 = vadd.f32 0.008332121, %v1937_v40  ;;  %v2663_v52 = vsel %vm2649_vm1, %v2660_v59, %v2662_v29 }
 0x53e   :  { %v2087_v31 = vsel %vm1966_vm11, %v2086_v49, %v11935_v23  ;;  %v2248_v48 = vmul.f32 %v2247_v8, %v2245_v3  ;;  %v2403_v30 = vor.u32 %v2402_v22, %v2401_v58  ;;  %v12046_v54 = vsub.s32 %v2551_v45, %v2554_v39 }
 0x53f   :  { %v2659_v32 = vsel %vm2649_vm1, %v2656_v4, %v2658_v12  ;;  %v2665_v1 = vand.u32 65535, %v12025_v2  ;;  %v2667_v6 = vand.u32 65535, %v2663_v52  ;;  %v2668_v15 = vshrl.u32 %v2663_v52, 16 }
 0x540   :  { %v2408_v20 = vand.u32 2147483647, %v2407_v16  ;;  %vm2556_vm8 = vcmp.lt.s32.totalorder %v12046_v54, 0  ;;  %v2557_v40 = vsub.s32 0, %v12046_v54  ;;  %v2666_v44 = vshrl.u32 %v12025_v2, 16 }
 0x541   :  { %v1789_v23 = vxor.u32 2147483648, %v11875_v28  ;;  %v12056_v49 = vmul.f32 %v1931_v60, %v11907_v7  ;;  %v12061_v45 = vsel %vm12000_vm15, %v12887_v18, %v2087_v31  ;;  %v2670_v3 = vmul.u32 %v2668_v15, %v2665_v1 }
 0x542   :  { %v2410_v35 = vcvt.s32.f32 %v2403_v30  ;;  %v2558_v37 = vsel %vm2556_vm8, %v2557_v40, %v12046_v54  ;;  %v12064_v57 = vmul.u32 %v2667_v6, %v2666_v44  ;;  %v2690_v50 = vshrl.u32 %v2659_v32, 16 }
 0x543   :  { %vm2129_vm5 = vcmp.lt.s32.totalorder %v12891_v21, 0  ;;  %v2559_v19 = vclz %v2558_v37  ;;  %v2669_v8 = vmul.u32 %v2667_v6, %v2665_v1  ;;  %v2673_v13 = vshll.u32 %v2670_v3, 16 }
 0x544   :  { %v2689_v10 = vand.u32 65535, %v2659_v32  ;;  %v1939_v22 = vmul.f32 %v1938_v41, %v11907_v7  ;;  %v12070_v59 = vmul.f32 %v12061_v45, %v12061_v45  ;;  %v2249_v58 = vxor.u32 2147483648, %v2248_v48 }
 0x545   :  { %v12072_v16 = vmul.f32 %v2410_v35, %v2408_v20  ;;  %v2547_v29 = vadd.s32 %v11968_v26, %v11966_v25  ;;  %v5598_v39 = vadd.s32 4294967294, %v2559_v19  ;;  %v2672_v4 = vmul.u32 %v2668_v15, %v2666_v44 }
 0x546   :  { %vm2677_vm13 = vc.u32 %v2669_v8, %v2673_v13  ;;  %v2675_v12 = vshll.u32 %v12064_v57, 16  ;;  %v2679_v52 = vadd.s32 %v2673_v13, %v2669_v8  ;;  %v2692_v31 = vmul.u32 %v2690_v50, %v2665_v1 }
 0x547   :  { %v2678_v60 = vsel %vm2677_vm13, 1, %v12603_v61  ;;  %v12892_v41 = vand.u32 2147483647, %v12891_v21  ;;  %vm5599_vm7 = vcmp.lt.s32.totalorder %v5598_v39, 0  ;;  %v2674_v32 = vshrl.u32 %v2670_v3, 16 }
 0x548   :  { %v2680_v6 = vadd.s32 %v2678_v60, %v2672_v4  ;;  %v2693_v20 = vmul.u32 %v2689_v10, %v2666_v44  ;;  %v2562_v25 = vsel %vm5599_vm7, 0, %v5598_v39  ;;  %vm2681_vm14 = vc.u32 %v2679_v52, %v2675_v12 }
 0x549   :  { %vm12080_vm0 = vcmp.le.f32.partialorder %v12892_v41, 0.7853982  ;;  %v2691_v26 = vmul.u32 %v2689_v10, %v2665_v1  ;;  %v2695_v15 = vshll.u32 %v2692_v31, 16  ;;  %vm2292_vm10 = vcmp.lt.s32.totalorder %v11524_v34, 0 }
 0x54a   :  { %v2563_v40 = vsub.s32 32, %v2562_v25  ;;  %v2567_v35 = vsub.s32 4294967266, %v2562_v25  ;;  %v2682_v37 = vsel %vm2681_vm14, 1, %v12603_v61  ;;  %v2694_v19 = vmul.u32 %v2690_v50, %v2666_v44 }
 0x54b   :  { %v2564_v8 = vshll.u32 %v12046_v54, %v2562_v25  ;;  %v2684_v13 = vadd.s32 %v2682_v37, %v2680_v6  ;;  %v2697_v41 = vshll.u32 %v2693_v20, 16  ;;  %vm2699_vm4 = vc.u32 %v2691_v26, %v2695_v15 }
 0x54c   :  { %v2565_v9 = vshrl.u32 %v2547_v29, %v2563_v40  ;;  %v2568_v3 = vadd.s32 127, %v2567_v35  ;;  %v2700_v4 = vsel %vm2699_vm4, 1, %v12603_v61  ;;  %v2701_v39 = vadd.s32 %v2695_v15, %v2691_v26 }
 0x54d   :  { %v1940_v12 = vadd.f32 -0.16666654, %v1939_v22  ;;  %v2250_v1 = vsel %vm2129_vm5, %v2249_v58, %v2248_v48  ;;  %v2685_v10 = vadd.s32 %v2684_v13, %v2674_v32  ;;  %v2702_v60 = vadd.s32 %v2700_v4, %v2694_v19 }
 0x54e   :  { %vm1622_vm8 = vcmp.lt.s32.totalorder %v11739_v62, 2  ;;  %vm1785_vm13 = vcmp.eq.s32.totalorder %v11813_v46, 0  ;;  %v2566_v44 = vor.u32 %v2565_v9, %v2564_v8  ;;  %v2569_v54 = vshll.u32 %v2568_v3, 23 }
 0x54f   :  { %v2653_v50 = vsel %vm2651_vm12, %v11996_v24, 2102212464  ;;  %vm2703_vm7 = vc.u32 %v2701_v39, %v2697_v41  ;;  %v2412_v29 = vxor.u32 2147483648, %v12072_v16  ;;  %v2632_v22 = vshrl.u32 %v12610_v33, %v11960_v14 }
 0x550   :  { %v2676_v48 = vshrl.u32 %v12064_v57, 16  ;;  %v2704_v58 = vsel %vm2703_vm7, 1, %v12603_v61  ;;  %v2100_v52 = vmul.f32 -0.00019511016, %v12070_v59  ;;  %v2570_v32 = vor.u32 4788187, %v2569_v54 }
 0x551   :  { %v2696_v6 = vshrl.u32 %v2692_v31, 16  ;;  %v2706_v9 = vadd.s32 %v2704_v58, %v2702_v60  ;;  %vm1788_vm14 = vcmp.eq.s32.totalorder %v11813_v46, 2  ;;  %v12105_v24 = vsel %vm12080_vm0, %v12891_v21, %v2250_v1  ;;  %v12895_v57 = vld [vmem:[#allocation27_spill] sm:$0xff]  ;;  %v12899_v60 = vld [vmem:[#allocation45_spill] sm:$0xff] }
 0x552   :  { %v2652_v33 = vsel %vm2648_vm9, %v2632_v22, %v12006_v53  ;;  %v2654_v61 = vsel %vm2650_vm3, %v11994_v63, %v2653_v50  ;;  %v12113_v14 = vadd.s32 %v2685_v10, %v2676_v48  ;;  %vm1619_vm12 = vweird.f32 %v12895_v57  ;;  %v12903_v57 = vld [vmem:[#allocation46_spill] sm:$0xff] }
 0x553   :  { %vm1784_vm4 = vcmp.lt.s32.totalorder %v11813_v46, 2  ;;  %v2571_v31 = vand.u32 2147483647, %v2570_v32  ;;  %v2573_v25 = vcvt.s32.f32 %v2566_v44  ;;  %v2698_v26 = vshrl.u32 %v2693_v20, 16 }
 0x554   :  { %v2707_v15 = vadd.s32 %v2706_v9, %v2696_v6  ;;  %v1786_v40 = vxor.u32 2147483648, %v12038_v27  ;;  %v1928_v53 = vsel %vm11821_vm2, 0, %v11903_v0  ;;  %v2413_v63 = vsel %vm2292_vm10, %v2412_v29, %v12072_v16 }
 0x555   :  { %v12124_v35 = vadd.s32 %v2701_v39, %v2697_v41  ;;  %v1941_v37 = vmul.f32 %v1940_v12, %v11907_v7  ;;  %v2574_v19 = vmul.f32 %v2573_v25, %v2571_v31  ;;  %v2655_v8 = vsel %vm2649_vm1, %v2652_v33, %v2654_v61 }
 0x556   :  { %v2708_v20 = vadd.s32 %v2707_v15, %v2698_v26  ;;  %v1933_v13 = vadd.f32 -0.4999988, %v12056_v49  ;;  %v12132_v3 = vmul.f32 %v12105_v24, %v12105_v24  ;;  %v12896_v5 = vand.u32 2147483647, %v11524_v34 }
 0x557   :  { %vm2711_vm9 = vc.u32 %v12113_v14, %v12124_v35  ;;  %v2101_v16 = vadd.f32 0.008332121, %v2100_v52  ;;  %v2575_v49 = vxor.u32 2147483648, %v2574_v19  ;;  %v1629_v4 = vsel %vm1622_vm8, %v11830_v36, %v11817_v17 }
 0x558   :  { %vm12136_vm2 = vcmp.le.f32.partialorder %v12896_v5, 0.7853982  ;;  %v2712_v41 = vadd.s32 1, %v2708_v20  ;;  %vm1781_vm3 = vweird.f32 %v10666_v38  ;;  %v1787_v39 = vsel %vm1785_vm13, %v11875_v28, %v1786_v40 }
 0x559   :  { %v12145_v51 = vsel %vm12136_vm2, %v11524_v34, %v2413_v63  ;;  %v1945_v12 = vadd.s32 3, %v1928_v53  ;;  %v2709_v1 = vmul.u32 %v12025_v2, %v2655_v8  ;;  %v1942_v10 = vadd.f32 1.0, %v1941_v37 }
 0x55a   :  { %v2088_v44 = vsub.s32 4, %v12899_v60  ;;  %v2093_v54 = vmul.f32 -0.001358992, %v12070_v59  ;;  %v2713_v50 = vsel %vm2711_vm9, %v2712_v41, %v2708_v20  ;;  %v2263_v29 = vmul.f32 -0.00019511016, %v12132_v3 }
 0x55b   :  { %v12161_v62 = vmul.f32 %v12145_v51, %v12145_v51  ;;  %vm2455_vm1 = vcmp.lt.s32.totalorder %v11777_v56, 0  ;;  %v2714_v17 = vadd.s32 %v2713_v50, %v2709_v1  ;;  %v1790_v36 = vsel %vm1788_vm14, %v1789_v23, %v12038_v27 }
 0x55c   :  { %v1934_v2 = vmul.f32 %v1933_v13, %v11907_v7  ;;  %v2102_v22 = vmul.f32 %v2101_v16, %v12070_v59  ;;  %v2576_v48 = vsel %vm2455_vm1, %v2575_v49, %v2574_v19  ;;  %v1630_v58 = vsel %vm1619_vm12, nan, %v1629_v4 }
 0x55d   :  { %v1791_v52 = vsel %vm1784_vm4, %v1787_v39, %v1790_v36  ;;  %v1946_v32 = vand.u32 3, %v1945_v12  ;;  %v2715_v6 = vadd.s32 536870912, %v2714_v17  ;;  %v1943_v28 = vmul.f32 %v1942_v10, %v11880_v55 }
 0x55e   :  { %v2089_v7 = vsel %vm1966_vm11, %v2088_v44, %v12899_v60  ;;  %v2094_v27 = vadd.f32 0.041655596, %v2093_v54  ;;  %v12900_v23 = vand.u32 2147483647, %v11777_v56  ;;  %v2264_v33 = vadd.f32 0.008332121, %v2263_v29 }
 0x55f   :  { %v2426_v61 = vmul.f32 -0.00019511016, %v12161_v62  ;;  %v12193_v55 = vshrl.u32 %v2715_v6, 30  ;;  %v5382_v31 = vxor.u32 2147483648, %v12903_v57  ;;  %v12904_v25 = vstv %s8164_s23  ;;  %v12906_v44 = vld [vmem:[#allocation47_spill] sm:$0xff] }
 0x560   :  { %vm12183_vm8 = vcmp.le.f32.partialorder %v12900_v23, 0.7853982  ;;  %v1632_v26 = vmul.f32 %v12904_v25, %v1630_v58  ;;  %v1935_v15 = vadd.f32 1.0, %v1934_v2  ;;  %v2103_v40 = vadd.f32 -0.16666654, %v2102_v22 }
 0x561   :  { %v12191_v46 = vsel %vm12183_vm8, %v11777_v56, %v2576_v48  ;;  %vm1947_vm11 = vcmp.lt.s32.totalorder %v1946_v32, 2  ;;  %v2091_v53 = vsel %vm12000_vm15, 0, %v2089_v7  ;;  %v2256_v63 = vmul.f32 -0.001358992, %v12132_v3 }
 0x562   :  { %v2717_v37 = vshll.u32 %v12193_v55, 30  ;;  %v1792_v19 = vsel %vm1781_vm3, nan, %v1791_v52  ;;  %vm1948_vm13 = vcmp.eq.s32.totalorder %v1946_v32, 0  ;;  %v1949_v8 = vxor.u32 2147483648, %v1943_v28 }
 0x563   :  { %v12206_v20 = vmul.f32 %v12191_v46, %v12191_v46  ;;  %v2095_v13 = vmul.f32 %v2094_v27, %v12070_v59  ;;  %v2265_v5 = vmul.f32 %v2264_v33, %v12132_v3  ;;  %v2427_v43 = vadd.f32 0.008332121, %v2426_v61 }
 0x564   :  { %v12210_v16 = vsub.s32 %v2714_v17, %v2717_v37  ;;  %vm1951_vm15 = vcmp.eq.s32.totalorder %v1946_v32, 2  ;;  %v1952_v49 = vxor.u32 2147483648, %v1935_v15  ;;  %v2104_v41 = vmul.f32 %v2103_v40, %v12070_v59  ;;  %v12907_v40 = vld [vmem:[#allocation43_spill] sm:$0xff] }
 0x565   :  { %v2108_v38 = vadd.s32 3, %v2091_v53  ;;  %v2257_v4 = vadd.f32 0.041655596, %v2256_v63  ;;  %v2419_v39 = vmul.f32 -0.001358992, %v12161_v62  ;;  %v12905_v1 = vstv %s8179_s24 }
 0x566   :  { %vm2719_vm7 = vcmp.lt.s32.totalorder %v12210_v16, 0  ;;  %v2720_v12 = vsub.s32 0, %v12210_v16  ;;  %v1794_v10 = vmul.f32 %v12905_v1, %v1792_v19  ;;  %v1950_v60 = vsel %vm1948_vm13, %v1935_v15, %v1949_v8 }
 0x567   :  { %v2251_v54 = vsub.s32 4, %v12906_v44  ;;  %v2589_v50 = vmul.f32 -0.00019511016, %v12206_v20  ;;  %v2096_v29 = vadd.f32 -0.4999988, %v2095_v13  ;;  %v2428_v36 = vmul.f32 %v2427_v43, %v12161_v62 }
 0x568   :  { %v2266_v17 = vadd.f32 -0.16666654, %v2265_v5  ;;  %v2721_v2 = vsel %vm2719_vm7, %v2720_v12, %v12210_v16  ;;  %v1953_v22 = vsel %vm1951_vm15, %v1952_v49, %v1943_v28  ;;  %v2105_v48 = vadd.f32 1.0, %v2104_v41 }
 0x569   :  { %v12224_v58 = vand.u32 3, %v2108_v38  ;;  %v2722_v52 = vclz %v2721_v2  ;;  %vm1944_vm14 = vweird.f32 %v12881_v11  ;;  %v1954_v6 = vsel %vm1947_vm11, %v1950_v60, %v1953_v22 }
 0x56a   :  { %v2258_v7 = vmul.f32 %v2257_v4, %v12132_v3  ;;  %v2420_v27 = vadd.f32 0.041655596, %v2419_v39  ;;  %v1795_v23 = vadd.f32 %v1794_v10, %v1632_v26  ;;  %v2252_v33 = vsel %vm2129_vm5, %v2251_v54, %v12906_v44 }
 0x56b   :  { %v2590_v61 = vadd.f32 0.008332121, %v2589_v50  ;;  %v5603_v25 = vadd.s32 4294967294, %v2722_v52  ;;  %v2097_v28 = vmul.f32 %v2096_v29, %v12070_v59  ;;  %v2267_v15 = vmul.f32 %v2266_v17, %v12132_v3 }
 0x56c   :  { %v2414_v53 = vsub.s32 4, %v12907_v40  ;;  %v2429_v63 = vadd.f32 -0.16666654, %v2428_v36  ;;  %v1955_v11 = vsel %vm1944_vm14, nan, %v1954_v6  ;;  %v2106_v32 = vmul.f32 %v2105_v48, %v12061_v45 }
 0x56d   :  { %vm2111_vm12 = vcmp.eq.s32.totalorder %v12224_v58, 0  ;;  %v2582_v26 = vmul.f32 -0.001358992, %v12206_v20  ;;  %vm5604_vm4 = vcmp.lt.s32.totalorder %v5603_v25, 0  ;;  %v2254_v37 = vsel %vm12080_vm0, 0, %v2252_v33 }
 0x56e   :  { %v2259_v19 = vadd.f32 -0.4999988, %v2258_v7  ;;  %v2421_v8 = vmul.f32 %v2420_v27, %v12161_v62  ;;  %v2725_v59 = vsel %vm5604_vm4, 0, %v5603_v25  ;;  %v2591_v13 = vmul.f32 %v2590_v61, %v12206_v20 }
 0x56f   :  { %v2710_v5 = vadd.s32 %v12124_v35, %v12113_v14  ;;  %v2726_v43 = vsub.s32 32, %v2725_v59  ;;  %v2730_v49 = vsub.s32 4294967266, %v2725_v59  ;;  %v2098_v45 = vadd.f32 1.0, %v2097_v28 }
 0x570   :  { %vm2110_vm5 = vcmp.lt.s32.totalorder %v12224_v58, 2  ;;  %v2268_v41 = vadd.f32 1.0, %v2267_v15  ;;  %v2415_v30 = vsel %vm2292_vm10, %v2414_v53, %v12907_v40  ;;  %v2430_v38 = vmul.f32 %v2429_v63, %v12161_v62 }
 0x571   :  { %v2583_v4 = vadd.f32 0.041655596, %v2582_v26  ;;  %v2727_v39 = vshll.u32 %v12210_v16, %v2725_v59  ;;  %v2728_v12 = vshrl.u32 %v2710_v5, %v2726_v43  ;;  %v2731_v1 = vadd.s32 127, %v2730_v49 }
 0x572   :  { %v2112_v10 = vxor.u32 2147483648, %v2106_v32  ;;  %v2260_v14 = vmul.f32 %v2259_v19, %v12132_v3  ;;  %v2271_v35 = vadd.s32 3, %v2254_v37  ;;  %v2422_v60 = vadd.f32 -0.4999988, %v2421_v8  ;;  %v12909_v19 = vld [vmem:[#allocation24_spill] sm:$0xff] }
 0x573   :  { %vm2107_vm0 = vweird.f32 %v12887_v18  ;;  %vm2114_vm9 = vcmp.eq.s32.totalorder %v12224_v58, 2  ;;  %v2592_v44 = vadd.f32 -0.16666654, %v2591_v13  ;;  %v2729_v54 = vor.u32 %v2728_v12, %v2727_v39  ;;  %v12910_v13 = vld [vmem:[#allocation28_spill] sm:$0xff] }
 0x574   :  { %v2732_v50 = vshll.u32 %v2731_v1, 23  ;;  %v2115_v29 = vxor.u32 2147483648, %v2098_v45  ;;  %v2417_v17 = vsel %vm12136_vm2, 0, %v2415_v30  ;;  %v2431_v16 = vadd.f32 1.0, %v2430_v38 }
 0x575   :  { %v2577_v36 = vsub.s32 4, %v12014_v42  ;;  %v12908_v2 = vstv %s8197_s25  ;;  %v2269_v3 = vmul.f32 %v2268_v41, %v12105_v24  ;;  %v2584_v48 = vmul.f32 %v2583_v4, %v12206_v20 }
 0x576   :  { %v1957_v22 = vmul.f32 %v12908_v2, %v1955_v11  ;;  %v2733_v52 = vor.u32 4788187, %v2732_v50  ;;  %v2113_v6 = vsel %vm2111_vm12, %v2098_v45, %v2112_v10  ;;  %v2261_v7 = vadd.f32 1.0, %v2260_v14  ;;  %v5426_v10 = vpop.f32.mrf.mxu0 }
 0x577   :  { %v2272_v27 = vand.u32 3, %v2271_v35  ;;  %v2423_v33 = vmul.f32 %v2422_v60, %v12161_v62  ;;  %v2434_v61 = vadd.s32 3, %v2417_v17  ;;  %v2593_v0 = vmul.f32 %v2592_v44, %v12206_v20 }
 0x578   :  { %v2734_v25 = vand.u32 2147483647, %v2733_v52  ;;  %v2736_v28 = vcvt.s32.f32 %v2729_v54  ;;  %v12264_v15 = vadd.f32 %v1957_v22, %v1795_v23  ;;  %v2116_v24 = vsel %vm2114_vm9, %v2115_v29, %v2106_v32  ;;  %v12914_v54 = vld [vmem:[#allocation35_spill] sm:$0xff]  ;;  %v12915_v22 = vld [vmem:[#allocation33_spill] sm:$0xff] }
 0x579   :  { %v2432_v40 = vmul.f32 %v2431_v16, %v12145_v51  ;;  %v2578_v53 = vsel %vm2455_vm1, %v2577_v36, %v12014_v42  ;;  %v2117_v63 = vsel %vm2110_vm5, %v2113_v6, %v2116_v24  ;;  %v2275_v62 = vxor.u32 2147483648, %v2269_v3 }
 0x57a   :  { %v2585_v11 = vadd.f32 -0.4999988, %v2584_v48  ;;  %v2737_v26 = vmul.f32 %v2736_v28, %v2734_v25  ;;  %vm2273_vm10 = vcmp.lt.s32.totalorder %v2272_v27, 2  ;;  %vm2274_vm2 = vcmp.eq.s32.totalorder %v2272_v27, 0  ;;  %v12917_v48 = vld [vmem:[#allocation39_spill] sm:$0xff]  ;;  %v12919_v28 = vld [vmem:[#allocation44_spill] sm:$0xff] }
 0x57b   :  { %v2278_v37 = vxor.u32 2147483648, %v2261_v7  ;;  %v2424_v23 = vadd.f32 1.0, %v2423_v33  ;;  %vm5217_vm3 = vcmp.lt.s32.totalorder %v12909_v19, 2  ;;  %vm2270_vm11 = vweird.f32 %v12891_v21 }
 0x57c   :  { %v2435_v32 = vand.u32 3, %v2434_v61  ;;  %v2580_v51 = vsel %vm12183_vm8, 0, %v2578_v53  ;;  %v2594_v8 = vadd.f32 1.0, %v2593_v0  ;;  %v2738_v42 = vxor.u32 2147483648, %v2737_v26 }
 0x57d   :  { %v2118_v58 = vsel %vm2107_vm0, nan, %v2117_v63  ;;  %vm2277_vm1 = vcmp.eq.s32.totalorder %v2272_v27, 2  ;;  %v2438_v59 = vxor.u32 2147483648, %v2432_v40  ;;  %vm2618_vm13 = vcmp.lt.s32.totalorder %v11837_v47, 0 }
 0x57e   :  { %vm5381_vm15 = vcmp.eq.s32.totalorder %v12910_v13, 0  ;;  %v2276_v5 = vsel %vm2274_vm2, %v2261_v7, %v2275_v62  ;;  %v2586_v43 = vmul.f32 %v2585_v11, %v12206_v20  ;;  %v12911_v49 = vand.u32 2147483647, %v11837_v47  ;;  %v12920_v11 = vld [vmem:[#allocation25_spill] sm:$0xff]  ;;  %v5428_v19 = vpop.f32.mrf.mxu0 }
 0x57f   :  { %v2739_v9 = vsel %vm2618_vm13, %v2738_v42, %v2737_v26  ;;  %v2441_v18 = vxor.u32 2147483648, %v2424_v23  ;;  %v2597_v41 = vadd.s32 3, %v2580_v51  ;;  %v2740_v30 = vsub.s32 4, %v12193_v55  ;;  %v5460_v19 = vld [vmem:[#allocation15 + $0x8] sm:$0xff] }
 0x580   :  { %vm12285_vm7 = vcmp.le.f32.partialorder %v12911_v49, 0.7853982  ;;  %v2279_v4 = vsel %vm2277_vm1, %v2278_v37, %v2269_v3  ;;  %vm2437_vm8 = vcmp.eq.s32.totalorder %v2435_v32, 0  ;;  %v2595_v20 = vmul.f32 %v2594_v8, %v12191_v46  ;;  %v12916_v3 = vld [vmem:[#allocation38_spill] sm:$0xff] }
 0x581   :  { %v12295_v38 = vsel %vm12285_vm7, %v11837_v47, %v2739_v9  ;;  %v2280_v12 = vsel %vm2273_vm10, %v2276_v5, %v2279_v4  ;;  %v2439_v1 = vsel %vm2437_vm8, %v2424_v23, %v2438_v59  ;;  %vm2440_vm14 = vcmp.eq.s32.totalorder %v2435_v32, 2 }
 0x582   :  { %v2744_v39 = vmul.f32 %v12295_v38, %v12295_v38  ;;  %vm5434_vm12 = vcmask 1043456   ;;  %v2587_v14 = vadd.f32 1.0, %v2586_v43  ;;  %v5430_v44 = vpack.c.bf16 %v5426_v10, %v5426_v10 }
 0x583   :  { %vm5214_vm4 = vweird.f32 %v12914_v54  ;;  %vm2436_vm5 = vcmp.lt.s32.totalorder %v2435_v32, 2  ;;  %v2442_v50 = vsel %vm2440_vm14, %v2441_v18, %v2432_v40  ;;  %v2598_v29 = vand.u32 3, %v2597_v41  ;;  %v12924_v18 = vld [vmem:[#allocation41_spill] sm:$0xff] }
 0x584   :  { %v2745_v35 = vmul.f32 -0.001358992, %v2744_v39  ;;  %v2752_v60 = vmul.f32 -0.00019511016, %v2744_v39  ;;  %v2741_v46 = vsel %vm2618_vm13, %v2740_v30, %v12193_v55  ;;  %v2601_v17 = vxor.u32 2147483648, %v2595_v20 }
 0x585   :  { %v5436_v2 = vsel %vm5434_vm12, %v5430_v44, 0  ;;  %vm4075_vm0 = vcmp.eq.s32.totalorder %v12915_v22, 2  ;;  %v5224_v52 = vsel %vm5217_vm3, %v12917_v48, %v12916_v3  ;;  %v12918_v6 = vstv %s8205_s26 }
 0x586   :  { %v2746_v16 = vadd.f32 0.041655596, %v2745_v35  ;;  %v2753_v36 = vadd.f32 0.008332121, %v2752_v60  ;;  %v2120_v7 = vmul.f32 %v12918_v6, %v2118_v58  ;;  %v2281_v27 = vsel %vm2270_vm11, nan, %v2280_v12  ;;  %5445 = vmatpush.bf16.msra.mxu1 %v5436_v2 }
 0x587   :  { %v2443_v33 = vsel %vm2436_vm5, %v2439_v1, %v2442_v50  ;;  %vm4071_vm9 = vcmp.lt.s32.totalorder %v12915_v22, 2  ;;  %v2604_v55 = vxor.u32 2147483648, %v2587_v14  ;;  %v2743_v61 = vsel %vm12285_vm7, 0, %v2741_v46  ;;  %v12929_v50 = vld [vmem:[#allocation40_spill] sm:$0xff] }
 0x588   :  { %v2747_v0 = vmul.f32 %v2746_v16, %v2744_v39  ;;  %v2754_v25 = vmul.f32 %v2753_v36, %v2744_v39  ;;  %v5383_v21 = vsel %vm5381_vm15, %v12919_v28, %v5382_v31  ;;  %v5385_v24 = vxor.u32 2147483648, %v12919_v28  ;;  %v12935_v28 = vld [vmem:[#allocation30_spill] sm:$0xff] }
 0x589   :  { %v2121_v40 = vadd.f32 %v2120_v7, %v12264_v15  ;;  %vm2600_vm10 = vcmp.eq.s32.totalorder %v2598_v29, 0  ;;  %vm2433_vm2 = vweird.f32 %v11524_v34  ;;  %vm4068_vm3 = vweird.f32 %v12920_v11 }
 0x58a   :  { %v2602_v53 = vsel %vm2600_vm10, %v2587_v14, %v2601_v17  ;;  %v2748_v63 = vadd.f32 -0.4999988, %v2747_v0  ;;  %v2755_v62 = vadd.f32 -0.16666654, %v2754_v25  ;;  %v12921_v26 = vstv %s8215_s27  ;;  %v12928_v14 = vld [vmem:[#allocation31_spill] sm:$0xff]  ;;  %v12934_v0 = vld [vmem:[#allocation26_spill] sm:$0xff] }
 0x58b   :  { %v2283_v37 = vmul.f32 %v12921_v26, %v2281_v27  ;;  %v2444_v23 = vsel %vm2433_vm2, nan, %v2443_v33  ;;  %vm2603_vm11 = vcmp.eq.s32.totalorder %v2598_v29, 2  ;;  %v2760_v31 = vadd.s32 3, %v2743_v61  ;;  %s5513_s27 = sshll.u32 %s12396_s10, 4  ;;  %s5514_s27 = int_to_ptr.hbm [resolvable:$true] %s5513_s27 }
 0x58c   :  { %vm2599_vm1 = vcmp.lt.s32.totalorder %v2598_v29, 2  ;;  %v2605_v32 = vsel %vm2603_vm11, %v2604_v55, %v2595_v20  ;;  %v2749_v15 = vmul.f32 %v2748_v63, %v2744_v39  ;;  %v2756_v51 = vmul.f32 %v2755_v62, %v2744_v39  ;;  %v12926_v39 = vld [vmem:[#allocation32_spill] sm:$0xff] }
 0x58d   :  { %vm5380_vm13 = vcmp.lt.s32.totalorder %v12910_v13, 2  ;;  %vm5384_vm15 = vcmp.eq.s32.totalorder %v12910_v13, 2  ;;  %v2284_v34 = vadd.f32 %v2283_v37, %v2121_v40  ;;  %v2606_v8 = vsel %vm2599_vm1, %v2602_v53, %v2605_v32  ;;  %v12923_v13 = vld [vmem:[#allocation29_spill] sm:$0xff]  ;;  %v5462_v32 = vld [vmem:[#allocation15 + $0x18] sm:$0xff] }
 0x58e   :  { %v5225_v42 = vsel %vm5214_vm4, nan, %v5224_v52  ;;  %v5386_v58 = vsel %vm5384_vm15, %v5385_v24, %v12903_v57  ;;  %v2750_v59 = vadd.f32 1.0, %v2749_v15  ;;  %v2757_v5 = vadd.f32 1.0, %v2756_v51  ;;  %v12931_v52 = vld [vmem:[#allocation37_spill] sm:$0xff] }
 0x58f   :  { %v5387_v43 = vsel %vm5380_vm13, %v5383_v21, %v5386_v58  ;;  %v12922_v49 = vstv %s8233_s28  ;;  %vm2596_vm7 = vweird.f32 %v11777_v56  ;;  %v2761_v9 = vand.u32 3, %v2760_v31  ;;  %v5459_v31 = vld [vmem:[#allocation15] sm:$0xff] }
 0x590   :  { %v2446_v45 = vmul.f32 %v12922_v49, %v2444_v23  ;;  %v12925_v41 = vxor.u32 2147483648, %v12924_v18  ;;  %v2607_v4 = vsel %vm2596_vm7, nan, %v2606_v8  ;;  %v2758_v20 = vmul.f32 %v2757_v5, %v12295_v38  ;;  %v5461_v23 = vld [vmem:[#allocation15 + $0x10] sm:$0xff]  ;;  %v5718_v8 = vld [vmem:[%s12393_s7] ss:$0 sm:$0xff]  ;;  %s5931_s7 = smov [#allocation16]  }
 0x591   :  { %v2767_v57 = vxor.u32 2147483648, %v2750_v59  ;;  %v12927_v1 = vstv %s11206_s0  ;;  %vm5377_vm8 = vweird.f32 %v12928_v14  ;;  %v4080_v35 = vstv %s12318_s17  ;;  %s5511_s24 = sshll.u32 %s5931_s7, 4  ;;  %s5512_s24 = int_to_ptr.vmem [resolvable:$true] %s5511_s24 }
 0x592   :  { %v4077_v30 = vsel %vm4075_vm0, %v12925_v41, %v12923_v13  ;;  %v5227_v10 = vmul.f32 %v12927_v1, %v5225_v42  ;;  %v2447_v56 = vadd.f32 %v2446_v45, %v2284_v34  ;;  %v5388_v60 = vsel %vm5377_vm8, nan, %v5387_v43 }
 0x593   :  { %v4078_v12 = vsel %vm4071_vm9, %v12926_v39, %v4077_v30  ;;  %v5389_v44 = vstv %s12327_s18  ;;  %v2764_v54 = vxor.u32 2147483648, %v2758_v20  ;;  %v12930_v46 = vstv %s8239_s6  ;;  %v5719_v30 = vld [vmem:[%s12395_s9] ss:$0 sm:$0xff] }
 0x594   :  { %v5228_v29 = vadd.f32 %v5227_v10, %v12929_v50  ;;  %v2609_v38 = vmul.f32 %v12930_v46, %v2607_v4  ;;  %vm2763_vm14 = vcmp.eq.s32.totalorder %v2761_v9, 0  ;;  %vm2766_vm4 = vcmp.eq.s32.totalorder %v2761_v9, 2 }
 0x595   :  { %v4079_v17 = vsel %vm4068_vm3, nan, %v4078_v12  ;;  %vm2762_vm5 = vcmp.lt.s32.totalorder %v2761_v9, 2  ;;  %v2765_v16 = vsel %vm2763_vm14, %v2750_v59, %v2764_v54  ;;  %v2768_v36 = vsel %vm2766_vm4, %v2767_v57, %v2758_v20 }
 0x596   :  { %v5390_v2 = vmul.f32 %v5389_v44, %v5388_v60  ;;  %v2610_v22 = vadd.f32 %v2609_v38, %v2447_v56  ;;  %vm2759_vm0 = vweird.f32 %v11837_v47  ;;  %v2769_v3 = vsel %vm2762_vm5, %v2765_v16, %v2768_v36 }
 0x597   :  { %v2770_v48 = vsel %vm2759_vm0, nan, %v2769_v3  ;;  %v12932_v6 = vstv %s8153_s8  ;;  %v4081_v27 = vmul.f32 %v4080_v35, %v4079_v17  ;;  %v12933_v55 = vstv %s8261_s29 }
 0x598   :  { %v1454_v7 = vmul.f32 %v12932_v6, %v12931_v52  ;;  %v5391_v33 = vadd.f32 %v5390_v2, %v5228_v29  ;;  %v2772_v61 = vmul.f32 %v12933_v55, %v2770_v48  ;;  %v5396_v47 = vstv %s12390_s4 }
 0x599   :  { %v4082_v21 = vadd.f32 %v4081_v27, %v12935_v28  ;;  %vm5399_vm9 = vcmask 64512   ;;  %v5464_v15 = vpack.c.bf16 %v5462_v32, %v5461_v23  ;;  %v5463_v51 = vpack.c.bf16 %v5460_v19, %v5459_v31 }
 0x59a   :  { %v1455_v25 = vadd.f32 %v1454_v7, %v12934_v0  ;;  %v2773_v24 = vadd.f32 %v2772_v61, %v2610_v22 }
 0x59b   :  { %v5393_v40 = vadd.f32 %v5391_v33, %v4082_v21  ;;  %5474 = vmatpush.bf16.msra.mxu2 %v5464_v15 }
 0x59c   :  { %v5392_v53 = vadd.f32 %v2773_v24, %v1455_v25 }
 0x59e   :  { %v5394_v63 = vadd.f32 %v5393_v40, %v5392_v53 }
 0x59f   :  { %5475 = vmatpush.bf16.msra.mxu2 %v5463_v51 }
 0x5a0   :  { %v5397_v62 = vadd.f32 %v5396_v47, %v5394_v63 }
 0x5a2   :  { %v5398_v11 = vmax.f32 %v5397_v62, 1e-06 }
 0x5a4   :  { %v5400_v26 = vsel %vm5399_vm9, %v5398_v11, 0.0  ;;  %v5404_v37 = vpack.c.bf16 %v5398_v11, %v5398_v11 }
 0x5a5   :  { %5401 = vadd.xlane.f32.xlu1 %v5400_v26 }
 0x5a6   :  { %5686 = vmatmul.msk.bf16.vlgmr.msra.gmra.mxu1 %vm5399_vm9, %v5404_v37 }
 0x618   :  { %v5402_v34 = vpop.xlane.xlu1 %5401 }
 0x619   :  { %5724 = vrcp.f32 %v5402_v34 }
 0x61f   :  { %v5725_v42 = vpop.eup %5724 }
 0x623   :  { %v5447_v58 = vpop.f32.mrf.mxu1 }
 0x624   :  { %v5451_v59 = vmul.f32 %v5725_v42, %v5447_v58 }
 0x626   :  { %v5456_v5 = vadd.f32 %v5718_v8, %v5451_v59 }
 0x628   :  { %v5457_v43 = vmax.f32 %v5456_v5, 0.0 }
 0x62a   :  { %v5458_v49 = vpack.c.bf16 %v5457_v43, %v5457_v43 }
 0x62b   :  { %v5449_v45 = vpop.f32.mrf.mxu1 }
 0x62c   :  { %5687 = vmatmul.msk.bf16.vlgmr.msra.gmra.mxu2 %vm5413_vm6, %v5458_v49 }
 0x6af   :  { %v5477_v9 = vpop.f32.mrf.mxu2 }
 0x6b0   :  { %v5481_v13 = vpack.c.bf16 %v5477_v9, %v5477_v9 }
 0x6b2   :  { %v5483_v18 = vsel %vm5434_vm12, %v5481_v13, 0 }
 0x6b3   :  { %5492 = vmatpush.bf16.msra.mxu3 %v5483_v18 }
 0x6b6   :  { %5688 = vmatmul.msk.bf16.vlgmr.msra.gmra.mxu3 %vm5399_vm9, %v5404_v37 }
 0x6b7   :  { %v5479_v41 = vpop.f32.mrf.mxu2 }
 0x739   :  { %v5494_v4 = vpop.f32.mrf.mxu3 }
 0x73a   :  { %v5498_v20 = vmul.f32 %v5725_v42, %v5494_v4 }
 0x73c   :  { %v5503_v57 = vadd.f32 %v5719_v30, %v5498_v20 }
 0x73e   :  { %v5504_v39 = vmax.f32 %v5503_v57, 0.0 }
 0x740   :  { %5505 = vst.msk [vmem:[#allocation16] sm:$0xff] %vm5413_vm6, %v5504_v39 }
 0x741   :  { %v5496_v12 = vpop.f32.mrf.mxu3  ;;  %5516 = dma.vmem_to_hbm [thread:$0]  %s5512_s24, 128, %s5514_s27, [#allocation5]  }
 0x742   :  { %5908 = dma.done.wait [#allocation5], 128  }
 0x743   :  { %5909 = vsyncadd [#allocation5], 4294967168 }
 0x744   :  { %5521 = vsyncpa [#allocation4], 1 }
 0x745   :  { %5522 = vsyncpa [#allocation8], 1 }
 0x746   :  { %5523 = vsyncpa [#allocation14], 1 }
 0x747   :  { %5524 = vsyncpa [#allocation5], 1 }
 0x748   :  { %5525 = vsyncpa [#allocation6], 1 }
 0x749   :  { %5526 = vsyncpa [#allocation11], 1 }

</bundles_post_ra>
